<compile_context>
chip_gen: v5e
topology: v5e:2x2
jax: 0.10.0
libtpu: 0.0.40
codegen_flags: <defaults>
</compile_context>

<pallas_src>
import jax
import jax.numpy as jnp
import numpy as np
from jax.experimental import pallas as pl
from jax.experimental.pallas import tpu as pltpu

# ----------------------------- configuration --------------------------------
EMBED_DIM = 32
NUM_HEADS = 4
HEAD_DIM = EMBED_DIM // NUM_HEADS
WINDOW = (16, 16)          # window_size
PATCH = (2, 2)             # patch_size
MLP_RATIO = 4
QKV_BIAS = True

B = 2
H, W = WINDOW
R0, R1 = H // PATCH[0], W // PATCH[1]
N = R0 * R1                             # tokens after patchify (= 64)
PPX = PATCH[0] * PATCH[1]               # pixels per patch token (= 4)
HIGH = EMBED_DIM * PPX                  # high_dim (= 128)
MLP_HIDDEN = int(EMBED_DIM * MLP_RATIO) # 128
MLP_WIDE = PPX * MLP_HIDDEN             # 512 (per-token block-diag MLP width)
EPS = 1e-5
NEG_INF = -1e9                          # cross-window mask value baked into rpe


# ------------------------------- fused kernel --------------------------------
def vit_block_kernel(xp_ref, avg_ref, wqkv_ref, wpu_ref, w1_ref, w2_ref,
                     bp_ref, rpe_ref, hmask_ref, o_ref):
    f32, bf16 = jnp.float32, jnp.bfloat16
    D = EMBED_DIM
    GN = xp_ref.shape[1]                      # tokens in this grid step (wps * 64)

    x = xp_ref[0]                             # (GN, HIGH) f32, patchified tokens
    avg = avg_ref[...]                        # (HIGH, HIGH) f32 block-diag averaging

    def pixel_layernorm(v):
        # Per-pixel (per 32-channel chunk) LN stats via a block-diagonal
        # averaging matmul on the otherwise-idle MXU; stats stay in f32.
        mu = jnp.dot(v, avg, preferred_element_type=f32)
        vc = v - mu
        var = jnp.dot(vc * vc, avg, preferred_element_type=f32)
        return vc * jax.lax.rsqrt(var + EPS)  # affine folded into next linear

    # ---- norm1 + fc_down + QKV: one (GN,128)@(128,96) bf16 matmul ---------------
    xh = pixel_layernorm(x).astype(bf16)
    qkv = jnp.dot(xh, wqkv_ref[...], preferred_element_type=f32)
    qkv = qkv + bp_ref[0:1, 0:3 * D]                               # (GN, 96) f32
    q = qkv[:, 0:D].astype(bf16)
    k = qkv[:, D:2 * D].astype(bf16)
    v = qkv[:, 2 * D:3 * D].astype(bf16)

    # ---- head-batched window MHSA (heads stacked along sublanes) ----------------
    hmask = hmask_ref[...]                    # (nH*GN, D) bf16 0/1 per-head channel mask
    q_st = jnp.concatenate([q] * NUM_HEADS, axis=0) * hmask        # (nH*GN, D)
    s = jax.lax.dot_general(q_st, k, (((1,), (1,)), ((), ())),
                            preferred_element_type=f32)            # (nH*GN, GN)
    s = s + rpe_ref[...]                      # rpe (+ -1e9 on cross-window blocks)
    s = s - jnp.max(s, axis=-1, keepdims=True)
    p = jnp.exp(s)
    p = p * pl.reciprocal(jnp.sum(p, axis=-1, keepdims=True), approx=True)
    pv = jnp.dot(p.astype(bf16), v, preferred_element_type=f32)    # (nH*GN, D)
    pv = pv.astype(bf16) * hmask              # keep head-h channels per row block
    attn = pv[0:GN]
    for h in range(1, NUM_HEADS):             # disjoint channel blocks -> exact sum
        attn = attn + pv[h * GN:(h + 1) * GN]                      # (GN, D) bf16

    # ---- proj folded into fc_up: (GN,32)@(32,128), residual 1 -------------------
    up = jnp.dot(attn, wpu_ref[...], preferred_element_type=f32) + bp_ref[1:2, 0:HIGH]
    r = x + up                                                      # (GN, HIGH) f32

    # ---- norm2 + per-pixel SiLU MLP (block-diag), 2 x 256-lane chunks, residual 2
    rh = pixel_layernorm(r).astype(bf16)
    CH = MLP_WIDE // 2                         # 256 lanes per chunk
    y = bp_ref[3:4, 0:HIGH]                    # start from MLP output bias
    for c in range(2):
        h1 = (jnp.dot(rh, w1_ref[:, c * CH:(c + 1) * CH], preferred_element_type=f32)
              + bp_ref[2:3, c * CH:(c + 1) * CH])
        h1 = h1 * jax.nn.sigmoid(h1)           # SiLU in f32
        y = y + jnp.dot(h1.astype(bf16), w2_ref[c * CH:(c + 1) * CH, :],
                        preferred_element_type=f32)
    o_ref[0] = r + y


# ------------------------------ host wrapper ----------------------------------
def _pick_windows_per_step(batch):
    """v7x has 2 TensorCores: keep >= 2 parallel grid steps so both cores work.
    Single-TC chips (v5e/v6e): fold windows into sublanes (M = wps*64) to fill
    MXU rows and avoid per-grid-step overhead."""
    try:
        kind = jax.devices()[0].device_kind.lower()
    except Exception:
        kind = ""
    wps = max(1, batch // 2) if "v7" in kind else batch
    wps = min(wps, 2)                       # cap the sublane fold (keeps S/P tiles modest)
    while batch % wps:
        wps -= 1
    return wps


def vit_block_forward(x, kp, windows_per_step):
    """x: (B, H, W, C) float32 -> (B, H, W, C)."""
    B_, H_, W_, C_ = x.shape
    wps = windows_per_step
    assert B_ % wps == 0
    steps = B_ // wps
    GN = wps * N

    # patchify: equivalent to NCHW unfold + 'B (C P0 P1) (R0 R1) -> B (R0 R1) (P0 P1 C)'
    # TODO(synk): for large production B, fuse this permutation into the BlockSpec
    #             index_map instead of a separate XLA transpose pass.
    xp = x.reshape(B_, R0, PATCH[0], R1, PATCH[1], C_).transpose(0, 1, 3, 2, 4, 5)
    xp = xp.reshape(steps, GN, HIGH)

    c2 = lambda s: (0, 0)
    out_p = pl.pallas_call(
        vit_block_kernel,
        out_shape=jax.ShapeDtypeStruct((steps, GN, HIGH), x.dtype),
        grid=(steps,),
        in_specs=[
            pl.BlockSpec((1, GN, HIGH), lambda s: (s, 0, 0)),        # tokens
            pl.BlockSpec((HIGH, HIGH), c2),                          # LN averaging matrix (f32)
            pl.BlockSpec((HIGH, 3 * EMBED_DIM), c2),                 # folded norm1+fc_down+QKV (bf16)
            pl.BlockSpec((EMBED_DIM, HIGH), c2),                     # folded proj+fc_up (bf16)
            pl.BlockSpec((HIGH, MLP_WIDE), c2),                      # block-diag MLP W1 (bf16)
            pl.BlockSpec((MLP_WIDE, HIGH), c2),                      # block-diag MLP W2 (bf16)
            pl.BlockSpec((8, MLP_WIDE), c2),                         # packed biases (f32)
            pl.BlockSpec((NUM_HEADS * GN, GN), c2),                  # stacked rpe (f32)
            pl.BlockSpec((NUM_HEADS * GN, EMBED_DIM), c2),           # stacked head masks (bf16)
        ],
        out_specs=pl.BlockSpec((1, GN, HIGH), lambda s: (s, 0, 0)),
        compiler_params=pltpu.CompilerParams(dimension_semantics=("parallel",)),
    )(xp, kp['avg'], kp['wqkv'], kp['wpu'], kp['w1_bd'], kp['w2_bd'],
      kp['b_pack'], kp['rpe_big'], kp['hmask'])

    # unpatchify (inverse permutation; equivalent to F.fold with stride == kernel)
    out = out_p.reshape(B_, R0, R1, PATCH[0], PATCH[1], C_).transpose(0, 1, 3, 2, 4, 5)
    return out.reshape(B_, H_, W_, C_)


# --------------------------- parameter init -----------------------------------
def _linear(key, fan_in, fan_out, bias=True):
    kw, kb = jax.random.split(key)
    w = jax.random.normal(kw, (fan_in, fan_out), jnp.float32) * 0.02
    b = (jax.random.normal(kb, (1, fan_out), jnp.float32) * 0.02
         if bias else jnp.zeros((1, fan_out), jnp.float32))
    return w, b


def _build_rpe_bias(table, window):
    """Standard Swin-style 2D relative position bias: (num_heads, N, N)."""
    Wh, Ww = window
    coords = np.stack(np.meshgrid(np.arange(Wh), np.arange(Ww), indexing='ij'))
    coords_flat = coords.reshape(2, -1)
    rel = coords_flat[:, :, None] - coords_flat[:, None, :]
    rel = rel.transpose(1, 2, 0).astype(np.int64)
    rel[:, :, 0] += Wh - 1
    rel[:, :, 1] += Ww - 1
    rel[:, :, 0] *= 2 * Ww - 1
    idx = rel.sum(-1)                                            # (N, N)
    bias = jnp.take(table, jnp.asarray(idx.reshape(-1)), axis=0)
    bias = bias.reshape(Wh * Ww, Wh * Ww, -1)
    return jnp.transpose(bias, (2, 0, 1))                        # (nH, N, N)


def init_raw_params(key):
    ks = jax.random.split(key, 12)
    p = {}
    # Non-trivial LN affine params so the weight-folding is actually exercised.
    p['g1'] = 1.0 + 0.1 * jax.random.normal(ks[7], (EMBED_DIM,), jnp.float32)
    p['b1'] = 0.05 * jax.random.normal(ks[8], (EMBED_DIM,), jnp.float32)
    p['g2'] = 1.0 + 0.1 * jax.random.normal(ks[9], (EMBED_DIM,), jnp.float32)
    p['b2'] = 0.05 * jax.random.normal(ks[10], (EMBED_DIM,), jnp.float32)
    p['wd'], p['bd'] = _linear(ks[0], HIGH, EMBED_DIM)
    p['wqkv'], p['bqkv'] = _linear(ks[1], EMBED_DIM, 3 * EMBED_DIM, bias=QKV_BIAS)
    p['wproj'], p['bproj'] = _linear(ks[2], EMBED_DIM, EMBED_DIM)
    p['wu'], p['bu'] = _linear(ks[3], EMBED_DIM, HIGH)
    p['w1m'], p['b1m'] = _linear(ks[4], EMBED_DIM, MLP_HIDDEN)
    p['w2m'], p['b2m'] = _linear(ks[5], MLP_HIDDEN, EMBED_DIM)
    rpe_table = jax.random.normal(ks[6], ((2 * R0 - 1) * (2 * R1 - 1), NUM_HEADS),
                                  jnp.float32) * 0.02
    p['rpe'] = _build_rpe_bias(rpe_table, (R0, R1))              # (nH, N, N)
    return p


def pack_kernel_params(p, windows_per_step):
    """Host-side weight folding + packing:
       * norm1 affine -> fc_down -> QKV collapsed into one (HIGH, 3D) bf16 weight,
         attention scale folded into the Q third.
       * proj -> fc_up collapsed into one (D, HIGH) bf16 weight.
       * norm2 affine folded into the per-pixel block-diagonal MLP W1.
       * LN averaging matrix, stacked rpe (with cross-window -1e9) and stacked
         per-head channel masks precomputed."""
    wps = windows_per_step
    GN = wps * N
    D = EMBED_DIM

    # norm1 affine folded into fc_down, then fc_down folded into QKV
    g1t = jnp.tile(p['g1'], PPX)                                  # (HIGH,)
    b1t = jnp.tile(p['b1'], PPX)
    wd_f = g1t[:, None] * p['wd']                                 # (HIGH, D)
    bd_f = b1t @ p['wd'] + p['bd'][0]                             # (D,)
    wqkv_f = wd_f @ p['wqkv']                                     # (HIGH, 3D)
    bqkv_f = bd_f @ p['wqkv'] + p['bqkv'][0]                      # (3D,)
    scale = HEAD_DIM ** -0.5
    wqkv_f = wqkv_f.at[:, :D].multiply(scale)                     # scale folded into Q
    bqkv_f = bqkv_f.at[:D].multiply(scale)

    # proj folded into fc_up
    wpu = p['wproj'] @ p['wu']                                    # (D, HIGH)
    bpu = p['bproj'][0] @ p['wu'] + p['bu'][0]                    # (HIGH,)

    # norm2 affine folded into MLP layer 1; block-diagonal per-pixel MLP weights
    w1_f = p['g2'][:, None] * p['w1m']                            # (D, MLP_HIDDEN)
    b1_f = p['b2'] @ p['w1m'] + p['b1m'][0]                       # (MLP_HIDDEN,)
    w1_bd = jax.scipy.linalg.block_diag(*([w1_f] * PPX))          # (HIGH, 512)
    w2_bd = jax.scipy.linalg.block_diag(*([p['w2m']] * PPX))      # (512, HIGH)
    b1_bd = jnp.tile(b1_f, PPX)                                   # (512,)
    b2_bd = jnp.tile(p['b2m'][0], PPX)                            # (HIGH,)

    # packed biases (f32, added to f32 matmul outputs)
    bpack = jnp.zeros((8, MLP_WIDE), jnp.float32)
    bpack = bpack.at[0, 0:3 * D].set(bqkv_f)
    bpack = bpack.at[1, 0:HIGH].set(bpu)
    bpack = bpack.at[2, 0:MLP_WIDE].set(b1_bd)
    bpack = bpack.at[3, 0:HIGH].set(b2_bd)

    # per-pixel LayerNorm averaging matrix (block-diag mean over each 32-ch pixel)
    rr = np.arange(HIGH)[:, None] // D
    cc = np.arange(HIGH)[None, :] // D
    avg = jnp.asarray((rr == cc).astype(np.float32) / D)          # (HIGH, HIGH) f32

    # head-stacked rpe, block-diagonal across the windows folded into sublanes
    rpe_np = np.asarray(p['rpe'], np.float32)                     # (nH, N, N)
    rpe_big = np.full((NUM_HEADS * GN, GN), NEG_INF, np.float32)
    for h in range(NUM_HEADS):
        for w in range(wps):
            rpe_big[h * GN + w * N:h * GN + (w + 1) * N, w * N:(w + 1) * N] = rpe_np[h]

    # stacked per-head 0/1 channel masks (used for Q stacking and head output scatter)
    hm = np.zeros((NUM_HEADS * GN, D), np.float32)
    for h in range(NUM_HEADS):
        hm[h * GN:(h + 1) * GN, h * HEAD_DIM:(h + 1) * HEAD_DIM] = 1.0

    return {
        'avg': avg,
        'wqkv': wqkv_f.astype(jnp.bfloat16),
        'wpu': wpu.astype(jnp.bfloat16),
        'w1_bd': w1_bd.astype(jnp.bfloat16),
        'w2_bd': w2_bd.astype(jnp.bfloat16),
        'b_pack': bpack,
        'rpe_big': jnp.asarray(rpe_big),
        'hmask': jnp.asarray(hm, jnp.bfloat16),
    }


# ------------------------- pure-JAX reference ---------------------------------
def reference_forward(x, p):
    def ln(v, g, b):
        mu = jnp.mean(v, axis=-1, keepdims=True)
        var = jnp.mean((v - mu) ** 2, axis=-1, keepdims=True)
        return (v - mu) / jnp.sqrt(var + EPS) * g + b

    B_, H_, W_, C_ = x.shape
    shortcut = x
    xn = ln(x, p['g1'], p['b1'])
    xp = xn.reshape(B_, R0, PATCH[0], R1, PATCH[1], C_).transpose(0, 1, 3, 2, 4, 5)
    xp = xp.reshape(B_, N, HIGH)
    xd = xp @ p['wd'] + p['bd'][0]
    qkv = xd @ p['wqkv'] + p['bqkv'][0]
    q, k, v = jnp.split(qkv, 3, axis=-1)
    sh = lambda t: t.reshape(B_, N, NUM_HEADS, HEAD_DIM).transpose(0, 2, 1, 3)
    q, k, v = sh(q) * HEAD_DIM ** -0.5, sh(k), sh(v)
    s = jnp.einsum('bhnd,bhmd->bhnm', q, k) + p['rpe'][None]
    a = jax.nn.softmax(s, axis=-1)
    o = jnp.einsum('bhnm,bhmd->bhnd', a, v).transpose(0, 2, 1, 3).reshape(B_, N, EMBED_DIM)
    o = o @ p['wproj'] + p['bproj'][0]
    o = o @ p['wu'] + p['bu'][0]
    o = o.reshape(B_, R0, R1, PATCH[0], PATCH[1], C_).transpose(0, 1, 3, 2, 4, 5)
    o = o.reshape(B_, H_, W_, C_)
    xr = shortcut + o
    xm = ln(xr, p['g2'], p['b2'])
    h1 = xm @ p['w1m'] + p['b1m'][0]
    h1 = h1 * jax.nn.sigmoid(h1)
    return xr + h1 @ p['w2m'] + p['b2m'][0]


# ----------------------------------- main --------------------------------------
if __name__ == "__main__":
    key = jax.random.PRNGKey(0)
    kx, kparam = jax.random.split(key)
    x = jax.random.normal(kx, (B, H, W, EMBED_DIM), jnp.float32)
    raw = init_raw_params(kparam)

    wps = _pick_windows_per_step(B)
    kparams = pack_kernel_params(raw, wps)

    out = vit_block_forward(x, kparams, wps)
    out = jax.block_until_ready(out)
    assert out.shape == (B, H, W, EMBED_DIM)

    ref = reference_forward(x, raw)
    err = float(jnp.max(jnp.abs(out - ref)))
    if not np.isfinite(err) or err > 5e-2:
        raise AssertionError(f"Pallas output mismatch vs JAX reference, max abs err = {err}")

    print("KERNEL_OK")
</pallas_src>

<mosaic_0001>
module attributes {stable_mosaic.version = 11 : i64} {
  func.func @vit_block_kernel(%arg0: i32, %arg1: memref<1x128x128xf32, #tpu.memory_space<vmem>>, %arg2: memref<128x128xf32, #tpu.memory_space<vmem>>, %arg3: memref<128x96xbf16, #tpu.memory_space<vmem>>, %arg4: memref<32x128xbf16, #tpu.memory_space<vmem>>, %arg5: memref<128x512xbf16, #tpu.memory_space<vmem>>, %arg6: memref<512x128xbf16, #tpu.memory_space<vmem>>, %arg7: memref<8x512xf32, #tpu.memory_space<vmem>>, %arg8: memref<512x128xf32, #tpu.memory_space<vmem>>, %arg9: memref<512x32xbf16, #tpu.memory_space<vmem>>, %arg10: memref<1x128x128xf32, #tpu.memory_space<vmem>>) attributes {dimension_semantics = [#tpu.dimension_semantics<parallel>], iteration_bounds = array<i64: 1>, scalar_prefetch = 0 : i64, scratch_operands = 0 : i64, tpu.core_type = #tpu.core_type<tc>, window_params = [{transform_indices = @transform_0, window_bounds = array<i64: 1, 128, 128>}, {pipeline_mode = #tpu.pipeline_mode<synchronous>, transform_indices = @transform_1, window_bounds = array<i64: 128, 128>}, {pipeline_mode = #tpu.pipeline_mode<synchronous>, transform_indices = @transform_2, window_bounds = array<i64: 128, 96>}, {pipeline_mode = #tpu.pipeline_mode<synchronous>, transform_indices = @transform_3, window_bounds = array<i64: 32, 128>}, {pipeline_mode = #tpu.pipeline_mode<synchronous>, transform_indices = @transform_4, window_bounds = array<i64: 128, 512>}, {pipeline_mode = #tpu.pipeline_mode<synchronous>, transform_indices = @transform_5, window_bounds = array<i64: 512, 128>}, {pipeline_mode = #tpu.pipeline_mode<synchronous>, transform_indices = @transform_6, window_bounds = array<i64: 8, 512>}, {pipeline_mode = #tpu.pipeline_mode<synchronous>, transform_indices = @transform_7, window_bounds = array<i64: 512, 128>}, {pipeline_mode = #tpu.pipeline_mode<synchronous>, transform_indices = @transform_8, window_bounds = array<i64: 512, 32>}, {transform_indices = @transform_9, window_bounds = array<i64: 1, 128, 128>}]} {
    %c0 = arith.constant 0 : index
    %c0_0 = arith.constant 0 : index
    %c0_1 = arith.constant 0 : index
    %0 = vector.load %arg1[%c0, %c0_0, %c0_1] : memref<1x128x128xf32, #tpu.memory_space<vmem>>, vector<1x128x128xf32>
    %1 = vector.shape_cast %0 : vector<1x128x128xf32> to vector<128x128xf32>
    %c0_2 = arith.constant 0 : index
    %c0_3 = arith.constant 0 : index
    %2 = vector.load %arg2[%c0_2, %c0_3] : memref<128x128xf32, #tpu.memory_space<vmem>>, vector<128x128xf32>
    %cst = arith.constant dense<0.000000e+00> : vector<128x128xf32>
    %3 = tpu.matmul %1, %2, %cst {dimension_numbers = #tpu.dot_dimension_numbers<[1], [0], [0], [1], [0, 0, 1, 1], [], []>} : vector<128x128xf32>, vector<128x128xf32>, vector<128x128xf32> -> vector<128x128xf32>
    %4 = arith.subf %1, %3 : vector<128x128xf32>
    %5 = arith.mulf %4, %4 : vector<128x128xf32>
    %cst_4 = arith.constant dense<0.000000e+00> : vector<128x128xf32>
    %6 = tpu.matmul %5, %2, %cst_4 {dimension_numbers = #tpu.dot_dimension_numbers<[1], [0], [0], [1], [0, 0, 1, 1], [], []>} : vector<128x128xf32>, vector<128x128xf32>, vector<128x128xf32> -> vector<128x128xf32>
    %cst_5 = arith.constant 9.99999974E-6 : f32
    %7 = vector.broadcast %cst_5 : f32 to vector<128x128xf32>
    %8 = arith.addf %6, %7 : vector<128x128xf32>
    %9 = math.rsqrt %8 : vector<128x128xf32>
    %10 = arith.mulf %4, %9 : vector<128x128xf32>
    %11 = arith.truncf %10 : vector<128x128xf32> to vector<128x128xbf16>
    %c0_6 = arith.constant 0 : index
    %c0_7 = arith.constant 0 : index
    %12 = vector.load %arg3[%c0_6, %c0_7] : memref<128x96xbf16, #tpu.memory_space<vmem>>, vector<128x96xbf16>
    %cst_8 = arith.constant dense<0.000000e+00> : vector<128x96xf32>
    %13 = tpu.matmul %11, %12, %cst_8 {dimension_numbers = #tpu.dot_dimension_numbers<[1], [0], [0], [1], [0, 0, 1, 1], [], []>} : vector<128x128xbf16>, vector<128x96xbf16>, vector<128x96xf32> -> vector<128x96xf32>
    %c0_9 = arith.constant 0 : index
    %c0_10 = arith.constant 0 : index
    %14 = vector.load %arg7[%c0_9, %c0_10] : memref<8x512xf32, #tpu.memory_space<vmem>>, vector<1x96xf32>
    %15 = vector.broadcast %14 : vector<1x96xf32> to vector<128x96xf32>
    %16 = arith.addf %13, %15 : vector<128x96xf32>
    %17 = vector.extract_strided_slice %16 {offsets = [0, 0], sizes = [128, 32], strides = [1, 1]} : vector<128x96xf32> to vector<128x32xf32>
    %18 = arith.truncf %17 : vector<128x32xf32> to vector<128x32xbf16>
    %19 = vector.extract_strided_slice %16 {offsets = [0, 32], sizes = [128, 32], strides = [1, 1]} : vector<128x96xf32> to vector<128x32xf32>
    %20 = arith.truncf %19 : vector<128x32xf32> to vector<128x32xbf16>
    %21 = vector.extract_strided_slice %16 {offsets = [0, 64], sizes = [128, 32], strides = [1, 1]} : vector<128x96xf32> to vector<128x32xf32>
    %22 = arith.truncf %21 : vector<128x32xf32> to vector<128x32xbf16>
    %c0_11 = arith.constant 0 : index
    %c0_12 = arith.constant 0 : index
    %23 = vector.load %arg9[%c0_11, %c0_12] : memref<512x32xbf16, #tpu.memory_space<vmem>>, vector<512x32xbf16>
    %24 = tpu.concatenate %18, %18, %18, %18 in 0 : vector<128x32xbf16>, vector<128x32xbf16>, vector<128x32xbf16>, vector<128x32xbf16> -> vector<512x32xbf16>
    %25 = arith.mulf %24, %23 : vector<512x32xbf16>
    %cst_13 = arith.constant dense<0.000000e+00> : vector<512x128xf32>
    %26 = tpu.matmul %25, %20, %cst_13 {dimension_numbers = #tpu.dot_dimension_numbers<[1], [1], [0], [0], [0, 0, 1, 0], [], []>} : vector<512x32xbf16>, vector<128x32xbf16>, vector<512x128xf32> -> vector<512x128xf32>
    %c0_14 = arith.constant 0 : index
    %c0_15 = arith.constant 0 : index
    %27 = vector.load %arg8[%c0_14, %c0_15] : memref<512x128xf32, #tpu.memory_space<vmem>>, vector<512x128xf32>
    %28 = arith.addf %26, %27 : vector<512x128xf32>
    %cst_16 = arith.constant dense<0xFF800000> : vector<512xf32>
    %29 = vector.multi_reduction <maximumf>, %28, %cst_16 [1] : vector<512x128xf32> to vector<512xf32>
    %30 = vector.shape_cast %29 : vector<512xf32> to vector<512x1xf32>
    %31 = vector.broadcast %30 : vector<512x1xf32> to vector<512x128xf32>
    %32 = arith.subf %28, %31 : vector<512x128xf32>
    %33 = math.exp %32 : vector<512x128xf32>
    %cst_17 = arith.constant dense<0.000000e+00> : vector<512xf32>
    %34 = vector.multi_reduction <add>, %33, %cst_17 [1] : vector<512x128xf32> to vector<512xf32>
    %35 = vector.shape_cast %34 : vector<512xf32> to vector<512x1xf32>
    %36 = tpu.reciprocal %35 {approx = true} : vector<512x1xf32> -> vector<512x1xf32>
    %37 = vector.broadcast %36 : vector<512x1xf32> to vector<512x128xf32>
    %38 = arith.mulf %33, %37 : vector<512x128xf32>
    %39 = arith.truncf %38 : vector<512x128xf32> to vector<512x128xbf16>
    %cst_18 = arith.constant dense<0.000000e+00> : vector<512x32xf32>
    %40 = tpu.matmul %39, %22, %cst_18 {dimension_numbers = #tpu.dot_dimension_numbers<[1], [0], [0], [1], [0, 0, 1, 1], [], []>} : vector<512x128xbf16>, vector<128x32xbf16>, vector<512x32xf32> -> vector<512x32xf32>
    %41 = arith.truncf %40 : vector<512x32xf32> to vector<512x32xbf16>
    %42 = arith.mulf %41, %23 : vector<512x32xbf16>
    %43 = vector.extract_strided_slice %42 {offsets = [0, 0], sizes = [128, 32], strides = [1, 1]} : vector<512x32xbf16> to vector<128x32xbf16>
    %44 = vector.extract_strided_slice %42 {offsets = [128, 0], sizes = [128, 32], strides = [1, 1]} : vector<512x32xbf16> to vector<128x32xbf16>
    %45 = arith.addf %43, %44 : vector<128x32xbf16>
    %46 = vector.extract_strided_slice %42 {offsets = [256, 0], sizes = [128, 32], strides = [1, 1]} : vector<512x32xbf16> to vector<128x32xbf16>
    %47 = arith.addf %45, %46 : vector<128x32xbf16>
    %48 = vector.extract_strided_slice %42 {offsets = [384, 0], sizes = [128, 32], strides = [1, 1]} : vector<512x32xbf16> to vector<128x32xbf16>
    %49 = arith.addf %47, %48 : vector<128x32xbf16>
    %c0_19 = arith.constant 0 : index
    %c0_20 = arith.constant 0 : index
    %50 = vector.load %arg4[%c0_19, %c0_20] : memref<32x128xbf16, #tpu.memory_space<vmem>>, vector<32x128xbf16>
    %cst_21 = arith.constant dense<0.000000e+00> : vector<128x128xf32>
    %51 = tpu.matmul %49, %50, %cst_21 {dimension_numbers = #tpu.dot_dimension_numbers<[1], [0], [0], [1], [0, 0, 1, 1], [], []>} : vector<128x32xbf16>, vector<32x128xbf16>, vector<128x128xf32> -> vector<128x128xf32>
    %c1 = arith.constant 1 : index
    %c0_22 = arith.constant 0 : index
    %52 = vector.load %arg7[%c1, %c0_22] : memref<8x512xf32, #tpu.memory_space<vmem>>, vector<1x128xf32>
    %53 = vector.broadcast %52 : vector<1x128xf32> to vector<128x128xf32>
    %54 = arith.addf %51, %53 : vector<128x128xf32>
    %55 = arith.addf %1, %54 : vector<128x128xf32>
    %cst_23 = arith.constant dense<0.000000e+00> : vector<128x128xf32>
    %56 = tpu.matmul %55, %2, %cst_23 {dimension_numbers = #tpu.dot_dimension_numbers<[1], [0], [0], [1], [0, 0, 1, 1], [], []>} : vector<128x128xf32>, vector<128x128xf32>, vector<128x128xf32> -> vector<128x128xf32>
    %57 = arith.subf %55, %56 : vector<128x128xf32>
    %58 = arith.mulf %57, %57 : vector<128x128xf32>
    %cst_24 = arith.constant dense<0.000000e+00> : vector<128x128xf32>
    %59 = tpu.matmul %58, %2, %cst_24 {dimension_numbers = #tpu.dot_dimension_numbers<[1], [0], [0], [1], [0, 0, 1, 1], [], []>} : vector<128x128xf32>, vector<128x128xf32>, vector<128x128xf32> -> vector<128x128xf32>
    %cst_25 = arith.constant 9.99999974E-6 : f32
    %60 = vector.broadcast %cst_25 : f32 to vector<128x128xf32>
    %61 = arith.addf %59, %60 : vector<128x128xf32>
    %62 = math.rsqrt %61 : vector<128x128xf32>
    %63 = arith.mulf %57, %62 : vector<128x128xf32>
    %64 = arith.truncf %63 : vector<128x128xf32> to vector<128x128xbf16>
    %c3 = arith.constant 3 : index
    %c0_26 = arith.constant 0 : index
    %65 = vector.load %arg7[%c3, %c0_26] : memref<8x512xf32, #tpu.memory_space<vmem>>, vector<1x128xf32>
    %c0_27 = arith.constant 0 : index
    %c0_28 = arith.constant 0 : index
    %66 = vector.load %arg5[%c0_27, %c0_28] : memref<128x512xbf16, #tpu.memory_space<vmem>>, vector<128x256xbf16>
    %cst_29 = arith.constant dense<0.000000e+00> : vector<128x256xf32>
    %67 = tpu.matmul %64, %66, %cst_29 {dimension_numbers = #tpu.dot_dimension_numbers<[1], [0], [0], [1], [0, 0, 1, 1], [], []>} : vector<128x128xbf16>, vector<128x256xbf16>, vector<128x256xf32> -> vector<128x256xf32>
    %c2 = arith.constant 2 : index
    %c0_30 = arith.constant 0 : index
    %68 = vector.load %arg7[%c2, %c0_30] : memref<8x512xf32, #tpu.memory_space<vmem>>, vector<1x256xf32>
    %69 = vector.broadcast %68 : vector<1x256xf32> to vector<128x256xf32>
    %70 = arith.addf %67, %69 : vector<128x256xf32>
    %71 = arith.negf %70 : vector<128x256xf32>
    %72 = math.exp %71 : vector<128x256xf32>
    %cst_31 = arith.constant 1.000000e+00 : f32
    %73 = vector.broadcast %cst_31 : f32 to vector<128x256xf32>
    %74 = arith.addf %73, %72 : vector<128x256xf32>
    %75 = arith.divf %73, %74 : vector<128x256xf32>
    %76 = arith.mulf %70, %75 : vector<128x256xf32>
    %77 = arith.truncf %76 : vector<128x256xf32> to vector<128x256xbf16>
    %c0_32 = arith.constant 0 : index
    %c0_33 = arith.constant 0 : index
    %78 = vector.load %arg6[%c0_32, %c0_33] : memref<512x128xbf16, #tpu.memory_space<vmem>>, vector<256x128xbf16>
    %cst_34 = arith.constant dense<0.000000e+00> : vector<128x128xf32>
    %79 = tpu.matmul %77, %78, %cst_34 {dimension_numbers = #tpu.dot_dimension_numbers<[1], [0], [0], [1], [0, 0, 1, 1], [], []>} : vector<128x256xbf16>, vector<256x128xbf16>, vector<128x128xf32> -> vector<128x128xf32>
    %80 = vector.broadcast %65 : vector<1x128xf32> to vector<128x128xf32>
    %81 = arith.addf %80, %79 : vector<128x128xf32>
    %c0_35 = arith.constant 0 : index
    %c256 = arith.constant 256 : index
    %82 = vector.load %arg5[%c0_35, %c256] : memref<128x512xbf16, #tpu.memory_space<vmem>>, vector<128x256xbf16>
    %cst_36 = arith.constant dense<0.000000e+00> : vector<128x256xf32>
    %83 = tpu.matmul %64, %82, %cst_36 {dimension_numbers = #tpu.dot_dimension_numbers<[1], [0], [0], [1], [0, 0, 1, 1], [], []>} : vector<128x128xbf16>, vector<128x256xbf16>, vector<128x256xf32> -> vector<128x256xf32>
    %c2_37 = arith.constant 2 : index
    %c256_38 = arith.constant 256 : index
    %84 = vector.load %arg7[%c2_37, %c256_38] : memref<8x512xf32, #tpu.memory_space<vmem>>, vector<1x256xf32>
    %85 = vector.broadcast %84 : vector<1x256xf32> to vector<128x256xf32>
    %86 = arith.addf %83, %85 : vector<128x256xf32>
    %87 = arith.negf %86 : vector<128x256xf32>
    %88 = math.exp %87 : vector<128x256xf32>
    %cst_39 = arith.constant 1.000000e+00 : f32
    %89 = vector.broadcast %cst_39 : f32 to vector<128x256xf32>
    %90 = arith.addf %89, %88 : vector<128x256xf32>
    %91 = arith.divf %89, %90 : vector<128x256xf32>
    %92 = arith.mulf %86, %91 : vector<128x256xf32>
    %93 = arith.truncf %92 : vector<128x256xf32> to vector<128x256xbf16>
    %c256_40 = arith.constant 256 : index
    %c0_41 = arith.constant 0 : index
    %94 = vector.load %arg6[%c256_40, %c0_41] : memref<512x128xbf16, #tpu.memory_space<vmem>>, vector<256x128xbf16>
    %cst_42 = arith.constant dense<0.000000e+00> : vector<128x128xf32>
    %95 = tpu.matmul %93, %94, %cst_42 {dimension_numbers = #tpu.dot_dimension_numbers<[1], [0], [0], [1], [0, 0, 1, 1], [], []>} : vector<128x256xbf16>, vector<256x128xbf16>, vector<128x128xf32> -> vector<128x128xf32>
    %96 = arith.addf %81, %95 : vector<128x128xf32>
    %97 = arith.addf %55, %96 : vector<128x128xf32>
    %c0_43 = arith.constant 0 : index
    %c0_44 = arith.constant 0 : index
    %c0_45 = arith.constant 0 : index
    %98 = vector.load %arg10[%c0_43, %c0_44, %c0_45] : memref<1x128x128xf32, #tpu.memory_space<vmem>>, vector<1x128x128xf32>
    %99 = vector.shape_cast %98 : vector<1x128x128xf32> to vector<128x128xf32>
    %100 = vector.shape_cast %97 : vector<128x128xf32> to vector<1x128x128xf32>
    tpu.vector_store %arg10[%c0_43, %c0_44, %c0_45], %100 {strides = array<i32>} : memref<1x128x128xf32, #tpu.memory_space<vmem>>, vector<1x128x128xf32>,
    return
  }
  func.func @transform_0(%arg0: i32) -> (i32, i32, i32) {
    %c0_i32 = arith.constant 0 : i32
    %c0_i32_0 = arith.constant 0 : i32
    %c0_i32_1 = arith.constant 0 : i32
    return %arg0, %c0_i32, %c0_i32_0 : i32, i32, i32
  }
  func.func @transform_1(%arg0: i32) -> (i32, i32) {
    %c0_i32 = arith.constant 0 : i32
    %c0_i32_0 = arith.constant 0 : i32
    %c0_i32_1 = arith.constant 0 : i32
    return %c0_i32, %c0_i32_0 : i32, i32
  }
  func.func @transform_2(%arg0: i32) -> (i32, i32) {
    %c0_i32 = arith.constant 0 : i32
    %c0_i32_0 = arith.constant 0 : i32
    %c0_i32_1 = arith.constant 0 : i32
    return %c0_i32, %c0_i32_0 : i32, i32
  }
  func.func @transform_3(%arg0: i32) -> (i32, i32) {
    %c0_i32 = arith.constant 0 : i32
    %c0_i32_0 = arith.constant 0 : i32
    %c0_i32_1 = arith.constant 0 : i32
    return %c0_i32, %c0_i32_0 : i32, i32
  }
  func.func @transform_4(%arg0: i32) -> (i32, i32) {
    %c0_i32 = arith.constant 0 : i32
    %c0_i32_0 = arith.constant 0 : i32
    %c0_i32_1 = arith.constant 0 : i32
    return %c0_i32, %c0_i32_0 : i32, i32
  }
  func.func @transform_5(%arg0: i32) -> (i32, i32) {
    %c0_i32 = arith.constant 0 : i32
    %c0_i32_0 = arith.constant 0 : i32
    %c0_i32_1 = arith.constant 0 : i32
    return %c0_i32, %c0_i32_0 : i32, i32
  }
  func.func @transform_6(%arg0: i32) -> (i32, i32) {
    %c0_i32 = arith.constant 0 : i32
    %c0_i32_0 = arith.constant 0 : i32
    %c0_i32_1 = arith.constant 0 : i32
    return %c0_i32, %c0_i32_0 : i32, i32
  }
  func.func @transform_7(%arg0: i32) -> (i32, i32) {
    %c0_i32 = arith.constant 0 : i32
    %c0_i32_0 = arith.constant 0 : i32
    %c0_i32_1 = arith.constant 0 : i32
    return %c0_i32, %c0_i32_0 : i32, i32
  }
  func.func @transform_8(%arg0: i32) -> (i32, i32) {
    %c0_i32 = arith.constant 0 : i32
    %c0_i32_0 = arith.constant 0 : i32
    %c0_i32_1 = arith.constant 0 : i32
    return %c0_i32, %c0_i32_0 : i32, i32
  }
  func.func @transform_9(%arg0: i32) -> (i32, i32, i32) {
    %c0_i32 = arith.constant 0 : i32
    %c0_i32_0 = arith.constant 0 : i32
    %c0_i32_1 = arith.constant 0 : i32
    return %arg0, %c0_i32, %c0_i32_0 : i32, i32, i32
  }
}

</mosaic_0001>

<bundles_post_ra>
// kernel: tpu_custom_call.1
= control target key start
LH: loop header
LB: loop body
LE: loop exit
PB: predicated region body
PF: predicated region fallthrough
CT: control target
= control target key end

     0   :  { %14 = vsyncpa [#allocation3], 0  ;;  %s10574_s0 = inlined_call_operand.hbm [shape: f32[1,128,128], index: 0, kind: input, shape index: {}]   ;;  %s10575_s1 = inlined_call_operand.hbm [shape: f32[128,128], index: 1, kind: input, shape index: {}]   ;;  %s10576_s2 = inlined_call_operand.vmem [shape: bf16[128,96], index: 2, kind: input, shape index: {}]   ;;  %s10577_s3 = inlined_call_operand.vmem [shape: bf16[32,128], index: 3, kind: input, shape index: {}]   ;;  %s10578_s4 = inlined_call_operand.vmem [shape: bf16[128,512], index: 4, kind: input, shape index: {}]   ;;  %s10579_s5 = inlined_call_operand.hbm [shape: bf16[512,128], index: 5, kind: input, shape index: {}]   ;;  %s10580_s6 = inlined_call_operand.vmem [shape: f32[8,512], index: 6, kind: input, shape index: {}]   ;;  %s10581_s7 = inlined_call_operand.hbm [shape: f32[512,128], index: 7, kind: input, shape index: {}]   ;;  %s10582_s8 = inlined_call_operand.vmem [shape: bf16[512,32], index: 8, kind: input, shape index: {}]   ;;  %s10583_s9 = inlined_call_operand.hbm [shape: f32[1,128,128], index: 9, kind: output, shape index: {}]  }
   0x1   :  { %15 = vsyncpa [#allocation6], 0 }
   0x2   :  { %16 = vsyncpa [#allocation9], 0 }
   0x3   :  { %17 = vsyncpa [#allocation4], 0  ;;  %s35_s11 = sshll.u32 %s10575_s1, 4  ;;  %s6638_s12 = smov [#allocation5]   ;;  %s36_s11 = int_to_ptr.hbm [resolvable:$true] %s35_s11 }
   0x4   :  { %s37_s13 = sshll.u32 %s6638_s12, 4  ;;  %s22_s16 = sshll.u32 %s10574_s0, 4  ;;  %s38_s13 = int_to_ptr.vmem [resolvable:$true] %s37_s13  ;;  %s23_s16 = int_to_ptr.hbm [resolvable:$true] %s22_s16 }
   0x5   :  { %s6639_s17 = smov 128   ;;  %s6640_s18 = smov 8  }
   0x6   :  { %43 = dma.hbm_to_vmem [thread:$0]  %s36_s11, 2048, %s38_s13, [#allocation6], %s6639_s17, %s6639_s17, %s6640_s18  }
   0x7   :  { %s6641_s19 = smov [#allocation2]   ;;  %s54_s1 = sshll.u32 %s10579_s5, 4  ;;  %s55_s1 = int_to_ptr.hbm [resolvable:$true] %s54_s1 }
   0x8   :  { %s24_s20 = sshll.u32 %s6641_s19, 4  ;;  %s6642_s0 = smov [#allocation7]   ;;  %s25_s20 = int_to_ptr.vmem [resolvable:$true] %s24_s20 }
   0x9   :  { %30 = dma.hbm_to_vmem [thread:$0]  %s23_s16, 2048, %s25_s20, [#allocation3], %s6639_s17, %s6639_s17, %s6640_s18  }
   0xa   :  { %s56_s23 = sshll.u32 %s6642_s0, 4  ;;  %s69_s26 = sshll.u32 %s10581_s7, 4  ;;  %s57_s23 = int_to_ptr.vmem [resolvable:$true] %s56_s23  ;;  %s70_s26 = int_to_ptr.hbm [resolvable:$true] %s69_s26 }
   0xb   :  { %s6643_s27 = smov 64   ;;  %s6644_s28 = smov 4  }
   0xc   :  { %62 = dma.hbm_to_vmem [thread:$0]  %s55_s1, 4096, %s57_s23, [#allocation6], %s6643_s27, %s6643_s27, %s6644_s28  }
   0xd   :  { %s6645_s5 = smov [#allocation8]  }
   0xe   :  { %s71_s29 = sshll.u32 %s6645_s5, 4  ;;  %s72_s29 = int_to_ptr.vmem [resolvable:$true] %s71_s29 }
   0xf   :  { %77 = dma.hbm_to_vmem [thread:$0]  %s70_s26, 8192, %s72_s29, [#allocation9], %s6639_s17, %s6639_s17, %s6640_s18  }
  0x10   :  { %6630 = dma.done.wait [#allocation3], 2048  }
  0x11   :  { %6631 = vsyncadd [#allocation3], 4294965248 }
  0x12   :  { %6632 = dma.done.wait [#allocation6], 6144  }
  0x13   :  { %6633 = vsyncadd [#allocation6], 4294961152 }
  0x14   :  { %6634 = dma.done.wait [#allocation9], 8192  }
  0x15   :  { %6635 = vsyncadd [#allocation9], 4294959104  ;;  %v6721_v0 = vld [vmem:[#allocation5 + $0x78] sm:$0xff]  ;;  %v6723_v1 = vld [vmem:[#allocation5 + $0x70] sm:$0xff]  ;;  %s6646_s23 = smov 96   ;;  %s5209_s10 = sshll.u32 %s10583_s9, 4  ;;  %s5210_s10 = int_to_ptr.hbm [resolvable:$true] %s5209_s10 }
  0x16   :  { %129 = vmatpush.msra.mxu0 %v6721_v0  ;;  %5859 = vmatpush.msra.mxu2 %v6721_v0  ;;  %v6727_v2 = vld [vmem:[#allocation5 + $0x68] sm:$0xff]  ;;  %v6733_v3 = vld [vmem:[#allocation5 + $0x60] sm:$0xff]  ;;  %v6739_v4 = vld [vmem:[#allocation5 + $0x58] sm:$0xff] }
  0x17   :  { %226 = vmatpush.msra.mxu1 %v6721_v0  ;;  %5875 = vmatpush.msra.mxu3 %v6721_v0  ;;  %v6745_v5 = vld [vmem:[#allocation5 + $0x50] sm:$0xff]  ;;  %v6751_v6 = vld [vmem:[#allocation5 + $0x48] sm:$0xff]  ;;  %v6757_v7 = vld [vmem:[#allocation5 + $0x40] sm:$0xff] }
  0x18   :  { %130 = vmatpush.msra.mxu0 %v6723_v1  ;;  %5860 = vmatpush.msra.mxu2 %v6723_v1  ;;  %v6763_v8 = vld [vmem:[#allocation5 + $0x38] sm:$0xff]  ;;  %v6769_v9 = vld [vmem:[#allocation5 + $0x30] sm:$0xff]  ;;  %v6775_v10 = vld [vmem:[#allocation5 + $0x28] sm:$0xff] }
  0x19   :  { %227 = vmatpush.msra.mxu1 %v6723_v1  ;;  %5876 = vmatpush.msra.mxu3 %v6723_v1  ;;  %v6781_v11 = vld [vmem:[#allocation5 + $0x20] sm:$0xff]  ;;  %v6787_v12 = vld [vmem:[#allocation5 + $0x18] sm:$0xff]  ;;  %v6793_v13 = vld [vmem:[#allocation5 + $0x10] sm:$0xff] }
  0x1a   :  { %131 = vmatpush.msra.mxu0 %v6727_v2  ;;  %5861 = vmatpush.msra.mxu2 %v6727_v2  ;;  %v6799_v14 = vld [vmem:[#allocation5 + $0x8] sm:$0xff]  ;;  %v6805_v15 = vld [vmem:[#allocation5] sm:$0xff]  ;;  %v99_v18 = vld [vmem:[#allocation2 + $0x10] sm:$0xff] }
  0x1b   :  { %228 = vmatpush.msra.mxu1 %v6727_v2  ;;  %5877 = vmatpush.msra.mxu3 %v6727_v2  ;;  %v97_v16 = vld [vmem:[#allocation2] sm:$0xff]  ;;  %v98_v17 = vld [vmem:[#allocation2 + $0x8] sm:$0xff]  ;;  %v100_v19 = vld [vmem:[#allocation2 + $0x18] sm:$0xff] }
  0x1c   :  { %132 = vmatpush.msra.mxu0 %v6733_v3  ;;  %5862 = vmatpush.msra.mxu2 %v6733_v3  ;;  %v101_v20 = vld [vmem:[#allocation2 + $0x20] sm:$0xff]  ;;  %v106_v21 = vld [vmem:[#allocation2 + $0x48] sm:$0xff]  ;;  %v107_v23 = vld [vmem:[#allocation2 + $0x50] sm:$0xff] }
  0x1d   :  { %229 = vmatpush.msra.mxu1 %v6733_v3  ;;  %5878 = vmatpush.msra.mxu3 %v6733_v3  ;;  %v102_v22 = vld [vmem:[#allocation2 + $0x28] sm:$0xff]  ;;  %v103_v24 = vld [vmem:[#allocation2 + $0x30] sm:$0xff]  ;;  %v6817_v25 = vld [vmem:[#allocation2 + $0x58] sm:$0xff] }
  0x1e   :  { %133 = vmatpush.msra.mxu0 %v6739_v4  ;;  %5863 = vmatpush.msra.mxu2 %v6739_v4  ;;  %v104_v26 = vld [vmem:[#allocation2 + $0x38] sm:$0xff]  ;;  %v6820_v27 = vld [vmem:[#allocation2 + $0x60] sm:$0xff]  ;;  %v6823_v29 = vld [vmem:[#allocation2 + $0x68] sm:$0xff] }
  0x1f   :  { %230 = vmatpush.msra.mxu1 %v6739_v4  ;;  %5879 = vmatpush.msra.mxu3 %v6739_v4  ;;  %v105_v28 = vld [vmem:[#allocation2 + $0x40] sm:$0xff]  ;;  %v6826_v30 = vld [vmem:[#allocation2 + $0x70] sm:$0xff]  ;;  %v6829_v31 = vld [vmem:[#allocation2 + $0x78] sm:$0xff] }
  0x20   :  { %134 = vmatpush.msra.mxu0 %v6745_v5  ;;  %5864 = vmatpush.msra.mxu2 %v6745_v5 }
  0x21   :  { %231 = vmatpush.msra.mxu1 %v6745_v5  ;;  %5880 = vmatpush.msra.mxu3 %v6745_v5 }
  0x22   :  { %135 = vmatpush.msra.mxu0 %v6751_v6  ;;  %5865 = vmatpush.msra.mxu2 %v6751_v6 }
  0x23   :  { %232 = vmatpush.msra.mxu1 %v6751_v6  ;;  %5881 = vmatpush.msra.mxu3 %v6751_v6 }
  0x24   :  { %136 = vmatpush.msra.mxu0 %v6757_v7  ;;  %5866 = vmatpush.msra.mxu2 %v6757_v7 }
  0x25   :  { %233 = vmatpush.msra.mxu1 %v6757_v7  ;;  %5882 = vmatpush.msra.mxu3 %v6757_v7 }
  0x26   :  { %137 = vmatpush.msra.mxu0 %v6763_v8  ;;  %5867 = vmatpush.msra.mxu2 %v6763_v8 }
  0x27   :  { %234 = vmatpush.msra.mxu1 %v6763_v8  ;;  %5883 = vmatpush.msra.mxu3 %v6763_v8 }
  0x28   :  { %138 = vmatpush.msra.mxu0 %v6769_v9  ;;  %5868 = vmatpush.msra.mxu2 %v6769_v9 }
  0x29   :  { %235 = vmatpush.msra.mxu1 %v6769_v9  ;;  %5884 = vmatpush.msra.mxu3 %v6769_v9 }
  0x2a   :  { %139 = vmatpush.msra.mxu0 %v6775_v10  ;;  %5869 = vmatpush.msra.mxu2 %v6775_v10 }
  0x2b   :  { %236 = vmatpush.msra.mxu1 %v6775_v10  ;;  %5885 = vmatpush.msra.mxu3 %v6775_v10 }
  0x2c   :  { %140 = vmatpush.msra.mxu0 %v6781_v11  ;;  %5870 = vmatpush.msra.mxu2 %v6781_v11 }
  0x2d   :  { %237 = vmatpush.msra.mxu1 %v6781_v11  ;;  %5886 = vmatpush.msra.mxu3 %v6781_v11 }
  0x2e   :  { %141 = vmatpush.msra.mxu0 %v6787_v12  ;;  %5871 = vmatpush.msra.mxu2 %v6787_v12 }
  0x2f   :  { %238 = vmatpush.msra.mxu1 %v6787_v12  ;;  %5887 = vmatpush.msra.mxu3 %v6787_v12 }
  0x30   :  { %142 = vmatpush.msra.mxu0 %v6793_v13  ;;  %5872 = vmatpush.msra.mxu2 %v6793_v13 }
  0x31   :  { %239 = vmatpush.msra.mxu1 %v6793_v13  ;;  %5888 = vmatpush.msra.mxu3 %v6793_v13 }
  0x32   :  { %143 = vmatpush.msra.mxu0 %v6799_v14  ;;  %5873 = vmatpush.msra.mxu2 %v6799_v14 }
  0x33   :  { %240 = vmatpush.msra.mxu1 %v6799_v14  ;;  %5889 = vmatpush.msra.mxu3 %v6799_v14 }
  0x34   :  { %144 = vmatpush.msra.mxu0 %v6805_v15  ;;  %5874 = vmatpush.msra.mxu2 %v6805_v15 }
  0x35   :  { %145 = vmatmul.f32.vlgmr.msra.gmra.mxu0 %v97_v16  ;;  %241 = vmatpush.msra.mxu1 %v6805_v15 }
  0x36   :  { %5890 = vmatpush.msra.mxu3 %v6805_v15  ;;  %172 = vmatmul.f32.vlgmr.msra.gmra.mxu2 %v106_v21 }
  0x3d   :  { %148 = vmatmul.f32.gmra.mxu0 %v98_v17 }
  0x3e   :  { %175 = vmatmul.f32.gmra.mxu2 %v107_v23 }
  0x45   :  { %151 = vmatmul.f32.gmra.mxu0 %v99_v18 }
  0x46   :  { %178 = vmatmul.f32.gmra.mxu2 %v6817_v25 }
  0x4d   :  { %154 = vmatmul.f32.gmra.mxu0 %v100_v19 }
  0x4e   :  { %181 = vmatmul.f32.gmra.mxu2 %v6820_v27 }
  0x55   :  { %157 = vmatmul.f32.gmra.mxu0 %v101_v20 }
  0x56   :  { %184 = vmatmul.f32.gmra.mxu2 %v6823_v29 }
  0x5d   :  { %160 = vmatmul.f32.gmra.mxu0 %v102_v22 }
  0x5e   :  { %187 = vmatmul.f32.gmra.mxu2 %v6826_v30 }
  0x65   :  { %163 = vmatmul.f32.gmra.mxu0 %v103_v24 }
  0x66   :  { %190 = vmatmul.f32.gmra.mxu2 %v6829_v31 }
  0x6d   :  { %166 = vmatmul.f32.gmra.mxu0 %v104_v26 }
  0x75   :  { %169 = vmatmul.f32.gmra.mxu0 %v105_v28 }
  0xb2   :  { %v146_v32 = vpop.f32.mrf.mxu0 }
  0xb3   :  { %v6832_v33 = vsub.f32 %v97_v16, %v146_v32 }
  0xb5   :  { %v210_v34 = vmul.f32 %v6832_v33, %v6832_v33 }
  0xb7   :  { %242 = vmatmul.f32.vlgmr.msra.gmra.mxu1 %v210_v34 }
  0xb9   :  { %v173_v53 = vpop.f32.mrf.mxu2 }
  0xba   :  { %v149_v35 = vpop.f32.mrf.mxu0  ;;  %v6868_v61 = vsub.f32 %v106_v21, %v173_v53  ;;  %v5632_v21 = vld [vmem:[%s10576_s2 + $0x30] sm:$0xff] }
  0xbb   :  { %v6836_v36 = vsub.f32 %v98_v17, %v149_v35  ;;  %v5633_v17 = vld [vmem:[%s10576_s2 + $0x38] sm:$0xff]  ;;  %v5630_v35 = vld [vmem:[%s10576_s2 + $0x20] sm:$0xff] }
  0xbc   :  { %v219_v62 = vmul.f32 %v6868_v61, %v6868_v61  ;;  %540 = vmatpush.bf16.msrb.mxu2 %v5633_v17 }
  0xbd   :  { %v211_v37 = vmul.f32 %v6836_v36, %v6836_v36 }
  0xbf   :  { %245 = vmatmul.f32.gmra.mxu1 %v211_v37 }
  0xc0   :  { %541 = vmatpush.bf16.msrb.mxu2 %v5632_v21 }
  0xc1   :  { %v176_v58 = vpop.f32.mrf.mxu2 }
  0xc2   :  { %v152_v38 = vpop.f32.mrf.mxu0  ;;  %v6872_v16 = vsub.f32 %v107_v23, %v176_v58 }
  0xc3   :  { %v6840_v39 = vsub.f32 %v99_v18, %v152_v38 }
  0xc4   :  { %v220_v18 = vmul.f32 %v6872_v16, %v6872_v16 }
  0xc5   :  { %v212_v40 = vmul.f32 %v6840_v39, %v6840_v39 }
  0xc7   :  { %248 = vmatmul.f32.gmra.mxu1 %v212_v40 }
  0xc9   :  { %v179_v63 = vpop.f32.mrf.mxu2 }
  0xca   :  { %v155_v41 = vpop.f32.mrf.mxu0 }
  0xcb   :  { %v6844_v42 = vsub.f32 %v100_v19, %v155_v41 }
  0xcd   :  { %v213_v43 = vmul.f32 %v6844_v42, %v6844_v42 }
  0xcf   :  { %251 = vmatmul.f32.gmra.mxu1 %v213_v43  ;;  %v5627_v43 = vld [vmem:[%s10576_s2 + $0x8] sm:$0xff] }
  0xd1   :  { %v182_v19 = vpop.f32.mrf.mxu2 }
  0xd2   :  { %v158_v44 = vpop.f32.mrf.mxu0  ;;  %v6888_v23 = vsub.f32 %v6820_v27, %v182_v19 }
  0xd3   :  { %v6848_v45 = vsub.f32 %v101_v20, %v158_v44  ;;  %v6880_v20 = vsub.f32 %v6817_v25, %v179_v63  ;;  %v5626_v44 = vld [vmem:[%s10576_s2] sm:$0xff] }
  0xd4   :  { %v222_v25 = vmul.f32 %v6888_v23, %v6888_v23 }
  0xd5   :  { %v214_v46 = vmul.f32 %v6848_v45, %v6848_v45 }
  0xd7   :  { %254 = vmatmul.f32.gmra.mxu1 %v214_v46 }
  0xda   :  { %v161_v47 = vpop.f32.mrf.mxu0 }
  0xdb   :  { %v6852_v48 = vsub.f32 %v102_v22, %v161_v47  ;;  %v221_v22 = vmul.f32 %v6880_v20, %v6880_v20 }
  0xdd   :  { %v215_v49 = vmul.f32 %v6852_v48, %v6852_v48 }
  0xdf   :  { %257 = vmatmul.f32.gmra.mxu1 %v215_v49 }
  0xe2   :  { %v164_v50 = vpop.f32.mrf.mxu0 }
  0xe3   :  { %v6856_v51 = vsub.f32 %v103_v24, %v164_v50  ;;  %v5631_v24 = vld [vmem:[%s10576_s2 + $0x28] sm:$0xff] }
  0xe4   :  { %542 = vmatpush.bf16.msrb.mxu2 %v5631_v24 }
  0xe5   :  { %v216_v52 = vmul.f32 %v6856_v51, %v6856_v51 }
  0xe7   :  { %260 = vmatmul.f32.gmra.mxu1 %v216_v52 }
  0xe8   :  { %543 = vmatpush.bf16.msrb.mxu2 %v5630_v35 }
  0xea   :  { %v167_v54 = vpop.f32.mrf.mxu0 }
  0xeb   :  { %v6860_v55 = vsub.f32 %v104_v26, %v167_v54  ;;  %v185_v26 = vpop.f32.mrf.mxu2 }
  0xed   :  { %v217_v56 = vmul.f32 %v6860_v55, %v6860_v55 }
  0xef   :  { %263 = vmatmul.f32.gmra.mxu1 %v217_v56 }
  0xf2   :  { %v170_v57 = vpop.f32.mrf.mxu0 }
  0xf3   :  { %v6864_v59 = vsub.f32 %v105_v28, %v170_v57  ;;  %v6896_v28 = vsub.f32 %v6823_v29, %v185_v26  ;;  %v188_v32 = vpop.f32.mrf.mxu2  ;;  %v5629_v29 = vld [vmem:[%s10576_s2 + $0x18] sm:$0xff] }
  0xf4   :  { %v6901_v27 = vsub.f32 %v6826_v30, %v188_v32  ;;  %544 = vmatpush.bf16.msrb.mxu2 %v5629_v29  ;;  %v5628_v30 = vld [vmem:[%s10576_s2 + $0x10] sm:$0xff] }
  0xf5   :  { %v218_v60 = vmul.f32 %v6864_v59, %v6864_v59  ;;  %v223_v34 = vmul.f32 %v6896_v28, %v6896_v28 }
  0xf6   :  { %v224_v37 = vmul.f32 %v6901_v27, %v6901_v27 }
  0xf7   :  { %266 = vmatmul.f32.vlgmr.msra.gmra.mxu3 %v218_v60 }
  0xf8   :  { %545 = vmatpush.bf16.msrb.mxu2 %v5628_v30 }
  0xfb   :  { %v191_v38 = vpop.f32.mrf.mxu2 }
  0xfc   :  { %v6912_v40 = vsub.f32 %v6829_v31, %v191_v38  ;;  %546 = vmatpush.bf16.msrb.mxu2 %v5627_v43 }
  0xfe   :  { %v225_v41 = vmul.f32 %v6912_v40, %v6912_v40 }
  0xff   :  { %269 = vmatmul.f32.gmra.mxu3 %v219_v62 }
 0x100   :  { %547 = vmatpush.bf16.msrb.mxu2 %v5626_v44 }
 0x104   :  { %2626 = vmatpush.msra.mxu2 %v6721_v0 }
 0x106   :  { %2627 = vmatpush.msra.mxu2 %v6723_v1 }
 0x107   :  { %272 = vmatmul.f32.gmra.mxu3 %v220_v18 }
 0x108   :  { %2628 = vmatpush.msra.mxu2 %v6727_v2 }
 0x10a   :  { %2629 = vmatpush.msra.mxu2 %v6733_v3 }
 0x10c   :  { %2630 = vmatpush.msra.mxu2 %v6739_v4 }
 0x10e   :  { %2631 = vmatpush.msra.mxu2 %v6745_v5 }
 0x10f   :  { %275 = vmatmul.f32.gmra.mxu3 %v221_v22 }
 0x110   :  { %2632 = vmatpush.msra.mxu2 %v6751_v6 }
 0x112   :  { %2633 = vmatpush.msra.mxu2 %v6757_v7 }
 0x114   :  { %2634 = vmatpush.msra.mxu2 %v6763_v8 }
 0x116   :  { %2635 = vmatpush.msra.mxu2 %v6769_v9 }
 0x117   :  { %278 = vmatmul.f32.gmra.mxu3 %v222_v25 }
 0x118   :  { %2636 = vmatpush.msra.mxu2 %v6775_v10 }
 0x11a   :  { %2637 = vmatpush.msra.mxu2 %v6781_v11 }
 0x11c   :  { %2638 = vmatpush.msra.mxu2 %v6787_v12 }
 0x11e   :  { %2639 = vmatpush.msra.mxu2 %v6793_v13 }
 0x11f   :  { %281 = vmatmul.f32.gmra.mxu3 %v223_v34 }
 0x120   :  { %2640 = vmatpush.msra.mxu2 %v6799_v14 }
 0x122   :  { %2641 = vmatpush.msra.mxu2 %v6805_v15 }
 0x127   :  { %284 = vmatmul.f32.gmra.mxu3 %v224_v37 }
 0x12f   :  { %287 = vmatmul.f32.gmra.mxu3 %v225_v41 }
 0x134   :  { %v243_v31 = vpop.f32.mrf.mxu1 }
 0x135   :  { %v244_v46 = vadd.f32 1e-05, %v243_v31 }
 0x137   :  { %5901 = vrsqrt.f32 %v244_v46  ;;  %vm297_vm1 = vweird.f32 %v244_v46 }
 0x13c   :  { %v246_v47 = vpop.f32.mrf.mxu1 }
 0x13d   :  { %v5902_v49 = vpop.eup %5901  ;;  %v247_v50 = vadd.f32 1e-05, %v246_v47 }
 0x13e   :  { %v292_v52 = vmul.f32 %v5902_v49, %v244_v46  ;;  %vm298_vm0 = vweird.f32 %v5902_v49 }
 0x13f   :  { %5903 = vrsqrt.f32 %v247_v50  ;;  %vm299_vm3 = vmor %vm297_vm1, %vm298_vm0  ;;  %vm307_vm4 = vweird.f32 %v247_v50 }
 0x140   :  { %v293_v0 = vmul.f32 %v5902_v49, %v292_v52 }
 0x142   :  { %v294_v1 = vmul.f32 0.5, %v293_v0 }
 0x144   :  { %v249_v2 = vpop.f32.mrf.mxu1  ;;  %v295_v4 = vsub.f32 1.5, %v294_v1 }
 0x145   :  { %v5904_v53 = vpop.eup %5903  ;;  %v250_v3 = vadd.f32 1e-05, %v249_v2 }
 0x146   :  { %v302_v54 = vmul.f32 %v5904_v53, %v247_v50  ;;  %v296_v6 = vmul.f32 %v5902_v49, %v295_v4  ;;  %vm308_vm2 = vweird.f32 %v5904_v53 }
 0x147   :  { %5905 = vrsqrt.f32 %v250_v3  ;;  %vm309_vm5 = vmor %vm307_vm4, %vm308_vm2  ;;  %vm317_vm7 = vweird.f32 %v250_v3 }
 0x148   :  { %v303_v5 = vmul.f32 %v5904_v53, %v302_v54  ;;  %v300_v60 = vsel %vm299_vm3, %v5902_v49, %v296_v6 }
 0x149   :  { %v451_v12 = vmul.f32 %v300_v60, %v6832_v33 }
 0x14a   :  { %v304_v56 = vmul.f32 0.5, %v303_v5 }
 0x14c   :  { %v305_v7 = vsub.f32 1.5, %v304_v56  ;;  %v252_v8 = vpop.f32.mrf.mxu1 }
 0x14d   :  { %v5906_v57 = vpop.eup %5905  ;;  %v253_v9 = vadd.f32 1e-05, %v252_v8 }
 0x14e   :  { %v306_v58 = vmul.f32 %v5904_v53, %v305_v7  ;;  %v312_v10 = vmul.f32 %v5906_v57, %v250_v3  ;;  %vm318_vm6 = vweird.f32 %v5906_v57 }
 0x14f   :  { %5907 = vrsqrt.f32 %v253_v9  ;;  %vm319_vm9 = vmor %vm317_vm7, %vm318_vm6  ;;  %vm327_vm10 = vweird.f32 %v253_v9 }
 0x150   :  { %v313_v11 = vmul.f32 %v5906_v57, %v312_v10  ;;  %v310_v62 = vsel %vm309_vm5, %v5904_v53, %v306_v58 }
 0x151   :  { %v452_v63 = vmul.f32 %v310_v62, %v6836_v36 }
 0x152   :  { %v314_v17 = vmul.f32 0.5, %v313_v11 }
 0x153   :  { %v467_v18 = vpack.c.bf16 %v452_v63, %v451_v12 }
 0x154   :  { %v255_v19 = vpop.f32.mrf.mxu1  ;;  %v315_v22 = vsub.f32 1.5, %v314_v17 }
 0x155   :  { %v5908_v13 = vpop.eup %5907  ;;  %v256_v21 = vadd.f32 1e-05, %v255_v19  ;;  %548 = vmatmul.bf16.vlgmr.msrb.gmra.mxu2 %v467_v18 }
 0x156   :  { %v322_v24 = vmul.f32 %v5908_v13, %v253_v9  ;;  %v316_v14 = vmul.f32 %v5906_v57, %v315_v22  ;;  %vm328_vm8 = vweird.f32 %v5908_v13 }
 0x157   :  { %5909 = vrsqrt.f32 %v256_v21  ;;  %vm329_vm11 = vmor %vm327_vm10, %vm328_vm8  ;;  %vm337_vm13 = vweird.f32 %v256_v21 }
 0x158   :  { %v323_v26 = vmul.f32 %v5908_v13, %v322_v24  ;;  %v320_v35 = vsel %vm319_vm9, %v5906_v57, %v316_v14 }
 0x159   :  { %v453_v30 = vmul.f32 %v320_v35, %v6840_v39 }
 0x15a   :  { %v324_v25 = vmul.f32 0.5, %v323_v26 }
 0x15c   :  { %v325_v32 = vsub.f32 1.5, %v324_v25  ;;  %v258_v33 = vpop.f32.mrf.mxu1 }
 0x15d   :  { %v5910_v36 = vpop.eup %5909  ;;  %v259_v34 = vadd.f32 1e-05, %v258_v33 }
 0x15e   :  { %v332_v15 = vmul.f32 %v5910_v36, %v256_v21  ;;  %v326_v37 = vmul.f32 %v5908_v13, %v325_v32  ;;  %vm338_vm12 = vweird.f32 %v5910_v36 }
 0x15f   :  { %5911 = vrsqrt.f32 %v259_v34  ;;  %vm339_vm15 = vmor %vm337_vm13, %vm338_vm12  ;;  %vm347_vm0 = vweird.f32 %v259_v34 }
 0x160   :  { %v333_v38 = vmul.f32 %v5910_v36, %v332_v15  ;;  %v330_v29 = vsel %vm329_vm11, %v5908_v13, %v326_v37 }
 0x161   :  { %v454_v41 = vmul.f32 %v330_v29, %v6844_v42 }
 0x162   :  { %v334_v43 = vmul.f32 0.5, %v333_v38 }
 0x163   :  { %v468_v44 = vpack.c.bf16 %v454_v41, %v453_v30 }
 0x164   :  { %v261_v31 = vpop.f32.mrf.mxu1  ;;  %v335_v49 = vsub.f32 1.5, %v334_v43 }
 0x165   :  { %v5912_v46 = vpop.eup %5911  ;;  %v262_v47 = vadd.f32 1e-05, %v261_v31  ;;  %553 = vmatmul.bf16.gmra.mxu2 %v468_v44 }
 0x166   :  { %v342_v50 = vmul.f32 %v5912_v46, %v259_v34  ;;  %v336_v1 = vmul.f32 %v5910_v36, %v335_v49  ;;  %vm348_vm14 = vweird.f32 %v5912_v46 }
 0x167   :  { %5913 = vrsqrt.f32 %v262_v47  ;;  %vm349_vm1 = vmor %vm347_vm0, %vm348_vm14  ;;  %vm357_vm3 = vweird.f32 %v262_v47 }
 0x168   :  { %v343_v52 = vmul.f32 %v5912_v46, %v342_v50  ;;  %v340_v4 = vsel %vm339_vm15, %v5910_v36, %v336_v1 }
 0x169   :  { %v455_v56 = vmul.f32 %v340_v4, %v6848_v45 }
 0x16a   :  { %v344_v0 = vmul.f32 0.5, %v343_v52 }
 0x16c   :  { %v345_v2 = vsub.f32 1.5, %v344_v0  ;;  %v264_v53 = vpop.f32.mrf.mxu1 }
 0x16d   :  { %v5914_v39 = vpop.eup %5913  ;;  %v265_v3 = vadd.f32 1e-05, %v264_v53 }
 0x16e   :  { %v352_v42 = vmul.f32 %v5914_v39, %v262_v47  ;;  %v346_v54 = vmul.f32 %v5912_v46, %v345_v2  ;;  %vm358_vm2 = vweird.f32 %v5914_v39 }
 0x16f   :  { %5915 = vrsqrt.f32 %v265_v3  ;;  %vm359_vm5 = vmor %vm357_vm3, %vm358_vm2  ;;  %vm367_vm6 = vweird.f32 %v265_v3 }
 0x170   :  { %v353_v5 = vmul.f32 %v5914_v39, %v352_v42  ;;  %v350_v6 = vsel %vm349_vm1, %v5912_v46, %v346_v54 }
 0x171   :  { %v456_v7 = vmul.f32 %v350_v6, %v6852_v48 }
 0x172   :  { %v354_v8 = vmul.f32 0.5, %v353_v5 }
 0x173   :  { %v469_v57 = vpack.c.bf16 %v456_v7, %v455_v56 }
 0x174   :  { %v355_v58 = vsub.f32 1.5, %v354_v8 }
 0x175   :  { %v5916_v9 = vpop.eup %5915  ;;  %558 = vmatmul.bf16.gmra.mxu2 %v469_v57 }
 0x176   :  { %v362_v10 = vmul.f32 %v5916_v9, %v265_v3  ;;  %v356_v12 = vmul.f32 %v5914_v39, %v355_v58  ;;  %vm368_vm4 = vweird.f32 %v5916_v9 }
 0x177   :  { %vm369_vm7 = vmor %vm367_vm6, %vm368_vm4 }
 0x178   :  { %v363_v60 = vmul.f32 %v5916_v9, %v362_v10  ;;  %v360_v45 = vsel %vm359_vm5, %v5914_v39, %v356_v12 }
 0x179   :  { %v457_v19 = vmul.f32 %v360_v45, %v6856_v51 }
 0x17a   :  { %v364_v11 = vmul.f32 0.5, %v363_v60  ;;  %v267_v62 = vpop.f32.mrf.mxu3 }
 0x17b   :  { %v268_v63 = vadd.f32 1e-05, %v267_v62 }
 0x17c   :  { %v365_v17 = vsub.f32 1.5, %v364_v11 }
 0x17d   :  { %5917 = vrsqrt.f32 %v268_v63  ;;  %vm377_vm9 = vweird.f32 %v268_v63 }
 0x17e   :  { %v366_v48 = vmul.f32 %v5916_v9, %v365_v17 }
 0x180   :  { %v370_v18 = vsel %vm369_vm7, %v5916_v9, %v366_v48 }
 0x181   :  { %v458_v13 = vmul.f32 %v370_v18, %v6860_v55 }
 0x182   :  { %v270_v21 = vpop.f32.mrf.mxu3 }
 0x183   :  { %v5918_v22 = vpop.eup %5917  ;;  %v271_v24 = vadd.f32 1e-05, %v270_v21  ;;  %v470_v26 = vpack.c.bf16 %v458_v13, %v457_v19 }
 0x184   :  { %v372_v25 = vmul.f32 %v5918_v22, %v268_v63  ;;  %vm378_vm8 = vweird.f32 %v5918_v22 }
 0x185   :  { %5919 = vrsqrt.f32 %v271_v24  ;;  %563 = vmatmul.bf16.gmra.mxu2 %v470_v26  ;;  %vm379_vm11 = vmor %vm377_vm9, %vm378_vm8  ;;  %vm387_vm12 = vweird.f32 %v271_v24 }
 0x186   :  { %v373_v14 = vmul.f32 %v5918_v22, %v372_v25 }
 0x188   :  { %v374_v32 = vmul.f32 0.5, %v373_v14 }
 0x18a   :  { %v273_v33 = vpop.f32.mrf.mxu3  ;;  %v375_v15 = vsub.f32 1.5, %v374_v32 }
 0x18b   :  { %v5920_v36 = vpop.eup %5919  ;;  %v274_v34 = vadd.f32 1e-05, %v273_v33 }
 0x18c   :  { %v382_v35 = vmul.f32 %v5920_v36, %v271_v24  ;;  %v376_v38 = vmul.f32 %v5918_v22, %v375_v15  ;;  %vm388_vm10 = vweird.f32 %v5920_v36 }
 0x18d   :  { %5921 = vrsqrt.f32 %v274_v34  ;;  %vm389_vm13 = vmor %vm387_vm12, %vm388_vm10  ;;  %vm397_vm15 = vweird.f32 %v274_v34 }
 0x18e   :  { %v383_v37 = vmul.f32 %v5920_v36, %v382_v35  ;;  %v380_v44 = vsel %vm379_vm11, %v5918_v22, %v376_v38 }
 0x18f   :  { %v459_v49 = vmul.f32 %v380_v44, %v6864_v59 }
 0x190   :  { %v384_v51 = vmul.f32 0.5, %v383_v37 }
 0x192   :  { %v385_v55 = vsub.f32 1.5, %v384_v51  ;;  %v276_v29 = vpop.f32.mrf.mxu3 }
 0x193   :  { %v5922_v30 = vpop.eup %5921  ;;  %v277_v41 = vadd.f32 1e-05, %v276_v29 }
 0x194   :  { %v392_v43 = vmul.f32 %v5922_v30, %v274_v34  ;;  %v386_v31 = vmul.f32 %v5920_v36, %v385_v55  ;;  %vm398_vm14 = vweird.f32 %v5922_v30 }
 0x195   :  { %5923 = vrsqrt.f32 %v277_v41  ;;  %vm399_vm1 = vmor %vm397_vm15, %vm398_vm14  ;;  %vm407_vm2 = vweird.f32 %v277_v41 }
 0x196   :  { %v393_v46 = vmul.f32 %v5922_v30, %v392_v43  ;;  %v390_v47 = vsel %vm389_vm13, %v5920_v36, %v386_v31 }
 0x197   :  { %v460_v50 = vmul.f32 %v390_v47, %v6868_v61 }
 0x198   :  { %v394_v52 = vmul.f32 0.5, %v393_v46  ;;  %v6960_v46 = vld [vmem:[%s10580_s6] ss:$0 sm:$0xff] }
 0x199   :  { %v471_v0 = vpack.c.bf16 %v460_v50, %v459_v49 }
 0x19a   :  { %v279_v1 = vpop.f32.mrf.mxu3  ;;  %v395_v39 = vsub.f32 1.5, %v394_v52 }
 0x19b   :  { %v5924_v2 = vpop.eup %5923  ;;  %v280_v53 = vadd.f32 1e-05, %v279_v1  ;;  %568 = vmatmul.bf16.gmra.mxu2 %v471_v0 }
 0x19c   :  { %v402_v3 = vmul.f32 %v5924_v2, %v277_v41  ;;  %v396_v54 = vmul.f32 %v5922_v30, %v395_v39  ;;  %vm408_vm0 = vweird.f32 %v5924_v2 }
 0x19d   :  { %5925 = vrsqrt.f32 %v280_v53  ;;  %vm409_vm3 = vmor %vm407_vm2, %vm408_vm0  ;;  %vm417_vm5 = vweird.f32 %v280_v53  ;;  %vm989_vm0 = vcmask 261120  }
 0x19e   :  { %v403_v42 = vmul.f32 %v5924_v2, %v402_v3  ;;  %v400_v7 = vsel %vm399_vm1, %v5922_v30, %v396_v54 }
 0x19f   :  { %v461_v58 = vmul.f32 %v400_v7, %v6872_v16 }
 0x1a0   :  { %v404_v4 = vmul.f32 0.5, %v403_v42 }
 0x1a2   :  { %v405_v5 = vsub.f32 1.5, %v404_v4  ;;  %v282_v6 = vpop.f32.mrf.mxu3 }
 0x1a3   :  { %v5926_v59 = vpop.eup %5925  ;;  %v283_v61 = vadd.f32 1e-05, %v282_v6 }
 0x1a4   :  { %v412_v56 = vmul.f32 %v5926_v59, %v280_v53  ;;  %v406_v8 = vmul.f32 %v5924_v2, %v405_v5  ;;  %vm418_vm4 = vweird.f32 %v5926_v59  ;;  %v6985_v53 = vld [vmem:[%s10582_s8 + $0xc0] sm:$0xff]  }
 0x1a5   :  { %5927 = vrsqrt.f32 %v283_v61  ;;  %vm419_vm7 = vmor %vm417_vm5, %vm418_vm4  ;;  %vm427_vm8 = vweird.f32 %v283_v61  ;;  %10726 = vst [vmem:[#allocation17_spill] sm:$0xff] %v6985_v53 }
 0x1a6   :  { %v413_v57 = vmul.f32 %v5926_v59, %v412_v56  ;;  %v410_v9 = vsel %vm409_vm3, %v5924_v2, %v406_v8  ;;  %v6980_v2 = vld [vmem:[%s10582_s8 + $0x80] sm:$0xff]   ;;  %v10587_v56 = vunpack.c.h.bf16 %v6985_v53 }
 0x1a7   :  { %v462_v10 = vmul.f32 %v410_v9, %v6880_v20  ;;  %10725 = vst [vmem:[#allocation16_spill] sm:$0xff] %v6980_v2  ;;  %v10598_v54 = vunpack.c.l.bf16 %v6980_v2  ;;  %v10594_v5 = vunpack.c.h.bf16 %v6980_v2 }
 0x1a8   :  { %v414_v60 = vmul.f32 0.5, %v413_v57 }
 0x1a9   :  { %v472_v11 = vpack.c.bf16 %v462_v10, %v461_v58 }
 0x1aa   :  { %v285_v62 = vpop.f32.mrf.mxu3  ;;  %v415_v17 = vsub.f32 1.5, %v414_v60 }
 0x1ab   :  { %v5928_v12 = vpop.eup %5927  ;;  %v286_v63 = vadd.f32 1e-05, %v285_v62  ;;  %573 = vmatmul.bf16.gmra.mxu2 %v472_v11  ;;  %v7243_v62 = vld [vmem:[%s10582_s8 + $0x60] sm:$0xff]  }
 0x1ac   :  { %v422_v45 = vmul.f32 %v5928_v12, %v283_v61  ;;  %v416_v19 = vmul.f32 %v5926_v59, %v415_v17  ;;  %vm428_vm6 = vweird.f32 %v5928_v12  ;;  %v10590_v61 = vunpack.c.l.bf16 %v6985_v53  ;;  %10744 = vst [vmem:[#allocation35_spill] sm:$0xff] %v7243_v62 }
 0x1ad   :  { %5929 = vrsqrt.f32 %v286_v63  ;;  %vm429_vm9 = vmor %vm427_vm8, %vm428_vm6  ;;  %vm437_vm11 = vweird.f32 %v286_v63  ;;  %v10619_v11 = vunpack.c.h.bf16 %v7243_v62 }
 0x1ae   :  { %v423_v48 = vmul.f32 %v5928_v12, %v422_v45  ;;  %v420_v24 = vsel %vm419_vm7, %v5926_v59, %v416_v19 }
 0x1af   :  { %v463_v32 = vmul.f32 %v420_v24, %v6888_v23 }
 0x1b0   :  { %v424_v18 = vmul.f32 0.5, %v423_v48 }
 0x1b2   :  { %v425_v13 = vsub.f32 1.5, %v424_v18  ;;  %v288_v21 = vpop.f32.mrf.mxu3  ;;  %v7046_v18 = vld [vmem:[%s10582_s8 + $0x48] sm:$0xff]  }
 0x1b3   :  { %v5930_v16 = vpop.eup %5929  ;;  %v289_v20 = vadd.f32 1e-05, %v288_v21  ;;  %10729 = vst [vmem:[#allocation20_spill] sm:$0xff] %v7046_v18  ;;  %v7051_v21 = vld [vmem:[%s10582_s8 + $0x88] sm:$0xff]  }
 0x1b4   :  { %v432_v22 = vmul.f32 %v5930_v16, %v286_v63  ;;  %v426_v26 = vmul.f32 %v5928_v12, %v425_v13  ;;  %vm438_vm10 = vweird.f32 %v5930_v16  ;;  %10730 = vst [vmem:[#allocation21_spill] sm:$0xff] %v7051_v21 }
 0x1b5   :  { %5931 = vrsqrt.f32 %v289_v20  ;;  %vm439_vm13 = vmor %vm437_vm11, %vm438_vm10  ;;  %vm447_vm14 = vweird.f32 %v289_v20 }
 0x1b6   :  { %v433_v25 = vmul.f32 %v5930_v16, %v432_v22  ;;  %v430_v14 = vsel %vm429_vm9, %v5928_v12, %v426_v26  ;;  %v10600_v22 = vunpack.c.l.bf16 %v7046_v18  ;;  %v10592_v26 = vunpack.c.h.bf16 %v7046_v18 }
 0x1b7   :  { %v464_v33 = vmul.f32 %v430_v14, %v6896_v28  ;;  %v10589_v14 = vunpack.c.h.bf16 %v7051_v21 }
 0x1b8   :  { %v434_v36 = vmul.f32 0.5, %v433_v25  ;;  %v10597_v25 = vunpack.c.l.bf16 %v7051_v21 }
 0x1b9   :  { %v473_v34 = vpack.c.bf16 %v464_v33, %v463_v32 }
 0x1ba   :  { %v435_v35 = vsub.f32 1.5, %v434_v36 }
 0x1bb   :  { %v5932_v15 = vpop.eup %5931  ;;  %578 = vmatmul.bf16.gmra.mxu2 %v473_v34 }
 0x1bc   :  { %v442_v37 = vmul.f32 %v5932_v15, %v289_v20  ;;  %v436_v55 = vmul.f32 %v5930_v16, %v435_v35  ;;  %vm448_vm12 = vweird.f32 %v5932_v15 }
 0x1bd   :  { %vm449_vm15 = vmor %vm447_vm14, %vm448_vm12 }
 0x1be   :  { %v443_v51 = vmul.f32 %v5932_v15, %v442_v37  ;;  %v440_v30 = vsel %vm439_vm13, %v5930_v16, %v436_v55  ;;  %v7056_v16 = vld [vmem:[%s10582_s8 + $0xc8] sm:$0xff]  }
 0x1bf   :  { %v465_v28 = vmul.f32 %v440_v30, %v6901_v27  ;;  %10731 = vst [vmem:[#allocation22_spill] sm:$0xff] %v7056_v16  ;;  %v10585_v36 = vunpack.c.l.bf16 %v7056_v16  ;;  %v10584_v34 = vunpack.c.h.bf16 %v7056_v16 }
 0x1c0   :  { %v444_v38 = vmul.f32 0.5, %v443_v51 }
 0x1c2   :  { %v445_v29 = vsub.f32 1.5, %v444_v38 }
 0x1c4   :  { %v446_v41 = vmul.f32 %v5932_v15, %v445_v29 }
 0x1c6   :  { %v450_v23 = vsel %vm449_vm15, %v5932_v15, %v446_v41 }
 0x1c7   :  { %v466_v43 = vmul.f32 %v450_v23, %v6912_v40  ;;  %v6975_v40 = vld [vmem:[%s10582_s8 + $0x40] sm:$0xff]  }
 0x1c8   :  { %10724 = vst [vmem:[#allocation15_spill] sm:$0xff] %v6975_v40  ;;  %v10601_v3 = vunpack.c.l.bf16 %v6975_v40  ;;  %v10595_v4 = vunpack.c.h.bf16 %v6975_v40 }
 0x1c9   :  { %v474_v44 = vpack.c.bf16 %v466_v43, %v465_v28 }
 0x1cb   :  { %583 = vmatmul.bf16.gmra.mxu2 %v474_v44 }
 0x1d8   :  { %v549_v31 = vpop.f32.mrf.mxu2 }
 0x1d9   :  { %v6963_v47 = vadd.f32 %v549_v31, %v6960_v46 }
 0x1db   :  { %v589_v50 = vpack.c.bf16 %v6963_v47, %v6963_v47 }
 0x1dd   :  { %v693_v0 = vunpack.c.l.b16 %v589_v50 }
 0x1e0   :  { %v551_v49 = vpop.f32.mrf.mxu2 }
 0x1e1   :  { %v6968_v52 = vadd.f32 %v551_v49, %v6960_v46  ;;  %v7109_v49 = vld [vmem:[%s10582_s8 + $0x50] sm:$0xff]  }
 0x1e2   :  { %10734 = vst [vmem:[#allocation25_spill] sm:$0xff] %v7109_v49 }
 0x1e3   :  { %v590_v27 = vpack.c.bf16 %v6968_v52, %v6968_v52 }
 0x1e5   :  { %v694_v1 = vunpack.c.l.b16 %v590_v27 }
 0x1e7   :  { %v709_v39 = vpack.c.b16 %v694_v1, %v693_v0  ;;  %v7114_v0 = vld [vmem:[%s10582_s8 + $0x90] sm:$0xff]  }
 0x1e8   :  { %v554_v42 = vpop.f32.mrf.mxu2  ;;  %10735 = vst [vmem:[#allocation26_spill] sm:$0xff] %v7114_v0  ;;  %v7119_v1 = vld [vmem:[%s10582_s8 + $0xd0] sm:$0xff]  }
 0x1e9   :  { %v6991_v6 = vunpack.c.l.bf16 %v709_v39  ;;  %v6993_v59 = vunpack.c.h.bf16 %v709_v39  ;;  %v7018_v58 = vadd.f32 %v554_v42, %v6960_v46  ;;  %10736 = vst [vmem:[#allocation27_spill] sm:$0xff] %v7119_v1  ;;  %v10599_v42 = vunpack.c.l.bf16 %v7109_v49 }
 0x1eb   :  { %v7000_v7 = vmul.f32 %v10601_v3, %v6991_v6  ;;  %v7005_v8 = vmul.f32 %v10595_v4, %v6993_v59  ;;  %v7010_v57 = vmul.f32 %v10598_v54, %v6991_v6  ;;  %v7015_v9 = vmul.f32 %v10594_v5, %v6993_v59 }
 0x1ec   :  { %v7023_v10 = vmul.f32 %v10590_v61, %v6991_v6  ;;  %v7028_v60 = vmul.f32 %v10587_v56, %v6993_v59  ;;  %v591_v17 = vpack.c.bf16 %v7018_v58, %v7018_v58 }
 0x1ee   :  { %10727 = vst [vmem:[#allocation18_spill] sm:$0xff] %v7023_v10  ;;  %v695_v19 = vunpack.c.l.b16 %v591_v17  ;;  %v10586_v17 = vunpack.c.h.bf16 %v7109_v49 }
 0x1ef   :  { %10728 = vst [vmem:[#allocation19_spill] sm:$0xff] %v7028_v60 }
 0x1f0   :  { %v556_v63 = vpop.f32.mrf.mxu2 }
 0x1f1   :  { %v7039_v45 = vadd.f32 %v556_v63, %v6960_v46 }
 0x1f3   :  { %v592_v48 = vpack.c.bf16 %v7039_v45, %v7039_v45 }
 0x1f5   :  { %v696_v13 = vunpack.c.l.b16 %v592_v48  ;;  %v10596_v48 = vunpack.c.l.bf16 %v7114_v0 }
 0x1f7   :  { %v710_v20 = vpack.c.b16 %v696_v13, %v695_v19  ;;  %v10588_v19 = vunpack.c.h.bf16 %v7114_v0  ;;  %v10591_v13 = vunpack.c.l.bf16 %v7119_v1 }
 0x1f8   :  { %v559_v24 = vpop.f32.mrf.mxu2 }
 0x1f9   :  { %v7062_v32 = vunpack.c.l.bf16 %v710_v20  ;;  %v7064_v33 = vunpack.c.h.bf16 %v710_v20  ;;  %v560_v38 = vadd.f32 %v559_v24, %v6960_v46 }
 0x1fb   :  { %v7071_v15 = vmul.f32 %v10600_v22, %v7062_v32  ;;  %v7076_v35 = vmul.f32 %v10592_v26, %v7064_v33  ;;  %v7081_v37 = vmul.f32 %v10597_v25, %v7062_v32  ;;  %v7086_v51 = vmul.f32 %v10589_v14, %v7064_v33 }
 0x1fc   :  { %v7092_v55 = vmul.f32 %v10585_v36, %v7062_v32  ;;  %v7097_v29 = vmul.f32 %v10584_v34, %v7064_v33  ;;  %v593_v43 = vpack.c.bf16 %v560_v38, %v560_v38 }
 0x1fe   :  { %10732 = vst [vmem:[#allocation23_spill] sm:$0xff] %v7092_v55  ;;  %v697_v50 = vunpack.c.l.b16 %v593_v43 }
 0x1ff   :  { %10733 = vst [vmem:[#allocation24_spill] sm:$0xff] %v7097_v29 }
 0x200   :  { %v561_v28 = vpop.f32.mrf.mxu2 }
 0x201   :  { %v562_v44 = vadd.f32 %v561_v28, %v6960_v46  ;;  %v10593_v28 = vunpack.c.h.bf16 %v7119_v1 }
 0x203   :  { %v594_v31 = vpack.c.bf16 %v562_v44, %v562_v44 }
 0x205   :  { %v698_v27 = vunpack.c.l.b16 %v594_v31 }
 0x207   :  { %v711_v39 = vpack.c.b16 %v698_v27, %v697_v50 }
 0x208   :  { %v564_v63 = vpop.f32.mrf.mxu2 }
 0x209   :  { %v7126_v20 = vunpack.c.l.bf16 %v711_v39  ;;  %v7128_v24 = vunpack.c.h.bf16 %v711_v39  ;;  %v565_v34 = vadd.f32 %v564_v63, %v6960_v46 }
 0x20b   :  { %v7134_v43 = vmul.f32 %v10599_v42, %v7126_v20  ;;  %v7139_v31 = vmul.f32 %v10586_v17, %v7128_v24  ;;  %v7144_v50 = vmul.f32 %v10596_v48, %v7126_v20  ;;  %v7149_v27 = vmul.f32 %v10588_v19, %v7128_v24  ;;  %v7181_v48 = vld [vmem:[%s10582_s8 + $0x98] sm:$0xff]  }
 0x20c   :  { %v7154_v39 = vmul.f32 %v10591_v13, %v7126_v20  ;;  %v7160_v36 = vmul.f32 %v10593_v28, %v7128_v24  ;;  %v595_v61 = vpack.c.bf16 %v565_v34, %v565_v34  ;;  %v7174_v28 = vld [vmem:[%s10582_s8 + $0x58] sm:$0xff]   ;;  %10740 = vst [vmem:[#allocation31_spill] sm:$0xff] %v7181_v48  ;;  %v10604_v25 = vunpack.c.h.bf16 %v7181_v48 }
 0x20d   :  { %10739 = vst [vmem:[#allocation30_spill] sm:$0xff] %v7174_v28  ;;  %v7198_v19 = vpack.c.bf16 %v562_v44, %v560_v38 }
 0x20e   :  { %10737 = vst [vmem:[#allocation28_spill] sm:$0xff] %v7154_v39  ;;  %v699_v5 = vunpack.c.l.b16 %v595_v61  ;;  %v10602_v61 = vunpack.c.h.bf16 %v7174_v28 }
 0x20f   :  { %10738 = vst [vmem:[#allocation29_spill] sm:$0xff] %v7160_v36 }
 0x210   :  { %v566_v14 = vpop.f32.mrf.mxu2 }
 0x211   :  { %v567_v13 = vadd.f32 %v566_v14, %v6960_v46  ;;  %v7186_v14 = vld [vmem:[%s10582_s8 + $0xd8] sm:$0xff]  }
 0x212   :  { %10741 = vst [vmem:[#allocation32_spill] sm:$0xff] %v7186_v14  ;;  %v10606_v54 = vunpack.c.l.bf16 %v7186_v14  ;;  %v10607_v42 = vunpack.c.h.bf16 %v7186_v14 }
 0x213   :  { %v596_v26 = vpack.c.bf16 %v567_v13, %v567_v13  ;;  %v7169_v63 = vpack.c.bf16 %v567_v13, %v565_v34  ;;  %v10605_v13 = vunpack.c.l.bf16 %v7174_v28 }
 0x215   :  { %v700_v4 = vunpack.c.l.b16 %v596_v26  ;;  %979 = vrot.lane.b32.xlu2 %v7169_v63, %s6646_s23  ;;  %v10603_v26 = vunpack.c.l.bf16 %v7181_v48 }
 0x217   :  { %v712_v34 = vpack.c.b16 %v700_v4, %v699_v5 }
 0x219   :  { %v7194_v22 = vunpack.c.l.bf16 %v712_v34  ;;  %v7196_v3 = vunpack.c.h.bf16 %v712_v34 }
 0x21b   :  { %v7203_v4 = vmul.f32 %v10605_v13, %v7194_v22  ;;  %v7208_v5 = vmul.f32 %v10602_v61, %v7196_v3  ;;  %v7213_v23 = vmul.f32 %v10603_v26, %v7194_v22  ;;  %v7218_v38 = vmul.f32 %v10604_v25, %v7196_v3  ;;  %v7248_v25 = vld [vmem:[%s10582_s8 + $0xa0] sm:$0xff]  }
 0x21c   :  { %v7223_v44 = vmul.f32 %v10606_v54, %v7194_v22  ;;  %v7228_v34 = vmul.f32 %v10607_v42, %v7196_v3  ;;  %10745 = vst [vmem:[#allocation36_spill] sm:$0xff] %v7248_v25  ;;  %v10622_v14 = vunpack.c.l.bf16 %v7248_v25 }
 0x21d   :  { %977 = vrot.lane.b32.xlu2 %v7198_v19, %s6646_s23 }
 0x21e   :  { %10742 = vst [vmem:[#allocation33_spill] sm:$0xff] %v7223_v44  ;;  %v569_v26 = vpop.f32.mrf.mxu2 }
 0x21f   :  { %10743 = vst [vmem:[#allocation34_spill] sm:$0xff] %v7228_v34  ;;  %v570_v54 = vadd.f32 %v569_v26, %v6960_v46  ;;  %v7253_v26 = vld [vmem:[%s10582_s8 + $0xe0] sm:$0xff]  }
 0x220   :  { %10746 = vst [vmem:[#allocation37_spill] sm:$0xff] %v7253_v26 }
 0x221   :  { %v597_v56 = vpack.c.bf16 %v570_v54, %v570_v54 }
 0x223   :  { %v701_v61 = vunpack.c.l.b16 %v597_v56 }
 0x226   :  { %v571_v12 = vpop.f32.mrf.mxu2 }
 0x227   :  { %v572_v42 = vadd.f32 %v571_v12, %v6960_v46  ;;  %v10616_v12 = vunpack.c.l.bf16 %v7243_v62 }
 0x229   :  { %v598_v41 = vpack.c.bf16 %v572_v42, %v572_v42 }
 0x22b   :  { %v702_v17 = vunpack.c.l.b16 %v598_v41 }
 0x22d   :  { %v713_v13 = vpack.c.b16 %v702_v17, %v701_v61 }
 0x22e   :  { %v574_v30 = vpop.f32.mrf.mxu2 }
 0x22f   :  { %v7259_v41 = vunpack.c.l.bf16 %v713_v13  ;;  %v7261_v1 = vunpack.c.h.bf16 %v713_v13  ;;  %v10747_v13 = vunpack.c.h.bf16 %v7248_v25  ;;  %v575_v53 = vadd.f32 %v574_v30, %v6960_v46 }
 0x231   :  { %v7268_v17 = vmul.f32 %v10616_v12, %v7259_v41  ;;  %v7273_v61 = vmul.f32 %v10619_v11, %v7261_v1  ;;  %v7278_v56 = vmul.f32 %v10622_v14, %v7259_v41  ;;  %v7283_v16 = vmul.f32 %v10747_v13, %v7261_v1  ;;  %v7315_v13 = vld [vmem:[%s10582_s8 + $0xa8] sm:$0xff]  }
 0x232   :  { %v10748_v12 = vunpack.c.l.bf16 %v7253_v26  ;;  %v10750_v11 = vunpack.c.h.bf16 %v7253_v26  ;;  %v599_v21 = vpack.c.bf16 %v575_v53, %v575_v53  ;;  %10753 = vst [vmem:[#allocation41_spill] sm:$0xff] %v7315_v13  ;;  %v10646_v28 = vunpack.c.h.bf16 %v7315_v13 }
 0x234   :  { %v7289_v48 = vmul.f32 %v10748_v12, %v7259_v41  ;;  %v7294_v0 = vmul.f32 %v10750_v11, %v7261_v1  ;;  %v7308_v11 = vld [vmem:[%s10582_s8 + $0x68] sm:$0xff]   ;;  %v703_v26 = vunpack.c.l.b16 %v599_v21 }
 0x235   :  { %10752 = vst [vmem:[#allocation40_spill] sm:$0xff] %v7308_v11  ;;  %v10643_v21 = vunpack.c.h.bf16 %v7308_v11 }
 0x236   :  { %10749 = vst [vmem:[#allocation38_spill] sm:$0xff] %v7289_v48  ;;  %v576_v30 = vpop.f32.mrf.mxu2 }
 0x237   :  { %10751 = vst [vmem:[#allocation39_spill] sm:$0xff] %v7294_v0  ;;  %v577_v2 = vadd.f32 %v576_v30, %v6960_v46  ;;  %v10644_v30 = vunpack.c.l.bf16 %v7308_v11  ;;  %v609_v0 = vpack.c.bf16 %v572_v42, %v570_v54 }
 0x239   :  { %v600_v12 = vpack.c.bf16 %v577_v2, %v577_v2  ;;  %v7303_v62 = vpack.c.bf16 %v577_v2, %v575_v53  ;;  %v7320_v2 = vld [vmem:[%s10582_s8 + $0xe8] sm:$0xff]  }
 0x23a   :  { %10754 = vst [vmem:[#allocation42_spill] sm:$0xff] %v7320_v2  ;;  %v10652_v40 = vunpack.c.l.bf16 %v7320_v2 }
 0x23b   :  { %v704_v14 = vunpack.c.l.b16 %v600_v12  ;;  %983 = vrot.lane.b32.xlu1 %v7303_v62, %s6646_s23  ;;  %v10645_v12 = vunpack.c.l.bf16 %v7315_v13 }
 0x23d   :  { %v714_v53 = vpack.c.b16 %v704_v14, %v703_v26 }
 0x23e   :  { %v579_v25 = vpop.f32.mrf.mxu2 }
 0x23f   :  { %v7326_v49 = vunpack.c.l.bf16 %v714_v53  ;;  %v7328_v18 = vunpack.c.h.bf16 %v714_v53  ;;  %v580_v54 = vadd.f32 %v579_v25, %v6960_v46 }
 0x241   :  { %v7335_v14 = vmul.f32 %v10644_v30, %v7326_v49  ;;  %v7340_v26 = vmul.f32 %v10643_v21, %v7328_v18  ;;  %v7345_v53 = vmul.f32 %v10645_v12, %v7326_v49  ;;  %v7350_v48 = vmul.f32 %v10646_v28, %v7328_v18  ;;  %v7378_v12 = vld [vmem:[%s10582_s8 + $0x70] sm:$0xff]  }
 0x242   :  { %v7357_v42 = vmul.f32 %v10652_v40, %v7326_v49  ;;  %v10756_v21 = vunpack.c.h.bf16 %v7320_v2  ;;  %v601_v11 = vpack.c.bf16 %v580_v54, %v580_v54  ;;  %v7373_v40 = vpack.c.bf16 %v6968_v52, %v6963_v47  ;;  %10758 = vst [vmem:[#allocation45_spill] sm:$0xff] %v7378_v12  ;;  %v7391_v47 = vld [vmem:[%s10582_s8 + $0xf0] sm:$0xff]  }
 0x243   :  { %981 = vrot.lane.b32.xlu1 %v609_v0, %s6646_s23  ;;  %10760 = vst [vmem:[#allocation47_spill] sm:$0xff] %v7391_v47  ;;  %v10763_v36 = vunpack.c.l.bf16 %v7391_v47 }
 0x244   :  { %10755 = vst [vmem:[#allocation43_spill] sm:$0xff] %v7357_v42  ;;  %v7362_v30 = vmul.f32 %v10756_v21, %v7328_v18  ;;  %v705_v34 = vunpack.c.l.b16 %v601_v11 }
 0x246   :  { %10757 = vst [vmem:[#allocation44_spill] sm:$0xff] %v7362_v30  ;;  %v581_v13 = vpop.f32.mrf.mxu2 }
 0x247   :  { %v582_v44 = vadd.f32 %v581_v13, %v6960_v46  ;;  %v7386_v13 = vld [vmem:[%s10582_s8 + $0xb0] sm:$0xff]  }
 0x248   :  { %10759 = vst [vmem:[#allocation46_spill] sm:$0xff] %v7386_v13  ;;  %v10666_v25 = vunpack.c.h.bf16 %v7386_v13 }
 0x249   :  { %v602_v2 = vpack.c.bf16 %v582_v44, %v582_v44  ;;  %v611_v21 = vpack.c.bf16 %v582_v44, %v580_v54  ;;  %v10660_v44 = vunpack.c.l.bf16 %v7378_v12  ;;  %v10665_v54 = vunpack.c.l.bf16 %v7386_v13  ;;  %v7453_v13 = vld [vmem:[%s10582_s8 + $0xb8] sm:$0xff]  }
 0x24a   :  { %10768 = vst [vmem:[#allocation53_spill] sm:$0xff] %v7453_v13 }
 0x24b   :  { %v706_v28 = vunpack.c.l.b16 %v602_v2  ;;  %1899 = vrot.lane.b32.xlu2 %v611_v21, %s6643_s27  ;;  %973 = vrot.lane.b32.xlu1 %v7373_v40, %s6646_s23  ;;  %v10662_v2 = vunpack.c.h.bf16 %v7378_v12 }
 0x24d   :  { %v715_v52 = vpack.c.b16 %v706_v28, %v705_v34 }
 0x24e   :  { %v584_v11 = vpop.f32.mrf.mxu2 }
 0x24f   :  { %v7398_v30 = vunpack.c.l.bf16 %v715_v52  ;;  %v7400_v39 = vunpack.c.h.bf16 %v715_v52  ;;  %v585_v55 = vadd.f32 %v584_v11, %v6960_v46 }
 0x251   :  { %v7406_v28 = vmul.f32 %v10660_v44, %v7398_v30  ;;  %v7411_v34 = vmul.f32 %v10662_v2, %v7400_v39  ;;  %v7416_v42 = vmul.f32 %v10665_v54, %v7398_v30  ;;  %v7421_v52 = vmul.f32 %v10666_v25, %v7400_v39 }
 0x252   :  { %v7426_v44 = vmul.f32 %v10763_v36, %v7398_v30  ;;  %v10765_v2 = vunpack.c.h.bf16 %v7391_v47  ;;  %v603_v29 = vpack.c.bf16 %v585_v55, %v585_v55 }
 0x253   :  { %10761 = vst [vmem:[#allocation48_spill] sm:$0xff] %v7416_v42  ;;  %1895 = vrot.lane.b32.xlu1 %v609_v0, %s6643_s27 }
 0x254   :  { %10762 = vst [vmem:[#allocation49_spill] sm:$0xff] %v7421_v52  ;;  %v7433_v12 = vmul.f32 %v10765_v2, %v7400_v39  ;;  %v7445_v2 = vld [vmem:[%s10582_s8 + $0x78] sm:$0xff]   ;;  %v707_v47 = vunpack.c.l.b16 %v603_v29  ;;  %v10679_v29 = vunpack.c.l.bf16 %v7453_v13 }
 0x255   :  { %10764 = vst [vmem:[#allocation50_spill] sm:$0xff] %v7426_v44 }
 0x256   :  { %10766 = vst [vmem:[#allocation51_spill] sm:$0xff] %v7433_v12  ;;  %v586_v36 = vpop.f32.mrf.mxu2 }
 0x257   :  { %v587_v11 = vadd.f32 %v586_v36, %v6960_v46  ;;  %10767 = vst [vmem:[#allocation52_spill] sm:$0xff] %v7445_v2  ;;  %v7458_v46 = vld [vmem:[%s10582_s8 + $0xf8] sm:$0xff]   ;;  %v10675_v36 = vunpack.c.l.bf16 %v7445_v2 }
 0x258   :  { %10769 = vst [vmem:[#allocation54_spill] sm:$0xff] %v7458_v46  ;;  %v10772_v25 = vunpack.c.l.bf16 %v7458_v46 }
 0x259   :  { %v604_v10 = vpack.c.bf16 %v587_v11, %v587_v11  ;;  %v612_v0 = vpack.c.bf16 %v587_v11, %v585_v55  ;;  %v10680_v11 = vunpack.c.h.bf16 %v7453_v13 }
 0x25b   :  { %v708_v60 = vunpack.c.l.b16 %v604_v10  ;;  %987 = vrot.lane.b32.xlu0 %v612_v0, %s6646_s23  ;;  %1893 = vrot.lane.b32.xlu1 %v7169_v63, %s6643_s27  ;;  %v10678_v10 = vunpack.c.h.bf16 %v7445_v2  ;;  %v10774_v2 = vunpack.c.h.bf16 %v7458_v46 }
 0x25d   :  { %v716_v55 = vpack.c.b16 %v708_v60, %v707_v47 }
 0x25f   :  { %v7466_v54 = vunpack.c.l.bf16 %v716_v55  ;;  %v7468_v44 = vunpack.c.h.bf16 %v716_v55 }
 0x261   :  { %v7473_v60 = vmul.f32 %v10675_v36, %v7466_v54  ;;  %v7478_v47 = vmul.f32 %v10678_v10, %v7468_v44  ;;  %v7483_v63 = vmul.f32 %v10679_v29, %v7466_v54  ;;  %v7488_v55 = vmul.f32 %v10680_v11, %v7468_v44 }
 0x262   :  { %v7493_v36 = vmul.f32 %v10772_v25, %v7466_v54  ;;  %v7498_v10 = vmul.f32 %v10774_v2, %v7468_v44  ;;  %v7510_v25 = vpack.c.bf16 %v7039_v45, %v7018_v58 }
 0x263   :  { %10770 = vst [vmem:[#allocation55_spill] sm:$0xff] %v7483_v63  ;;  %985 = vrot.lane.b32.xlu0 %v611_v21, %s6646_s23  ;;  %1901 = vrot.lane.b32.xlu1 %v612_v0, %s6643_s27 }
 0x264   :  { %10771 = vst [vmem:[#allocation56_spill] sm:$0xff] %v7488_v55 }
 0x265   :  { %10773 = vst [vmem:[#allocation57_spill] sm:$0xff] %v7493_v36 }
 0x266   :  { %10775 = vst [vmem:[#allocation58_spill] sm:$0xff] %v7498_v10 }
 0x26b   :  { %975 = vrot.lane.b32.xlu0 %v7510_v25, %s6646_s23 }
 0x26f   :  { %v980_v46 = vpop.permute.xlu2 %979 }
 0x273   :  { %1897 = vrot.lane.b32.xlu0 %v7303_v62, %s6643_s27 }
 0x277   :  { %v978_v36 = vpop.permute.xlu2 %977 }
 0x2a5   :  { %v1900_v63 = vpop.permute.xlu2 %1899 }
 0x2ad   :  { %v984_v21 = vpop.permute.xlu1 %983 }
 0x2ae   :  { %v1102_v55 = vsel %vm989_vm0, %v984_v21, 0 }
 0x2b5   :  { %v982_v0 = vpop.permute.xlu1 %981 }
 0x2b6   :  { %v1099_v52 = vsel %vm989_vm0, %v982_v0, 0 }
 0x2bd   :  { %v974_v2 = vpop.permute.xlu1 %973 }
 0x2c5   :  { %v1896_v29 = vpop.permute.xlu1 %1895 }
 0x2cd   :  { %v988_v12 = vpop.permute.xlu0 %987  ;;  %v1894_v11 = vpop.permute.xlu1 %1893 }
 0x2ce   :  { %v1108_v13 = vsel %vm989_vm0, %v988_v12, 0  ;;  %v1096_v12 = vsel %vm989_vm0, %v980_v46, 0 }
 0x2cf   :  { %1110 = vmatpush.bf16.xpose.msrb.mxu3 %v1108_v13  ;;  %v1093_v13 = vsel %vm989_vm0, %v978_v36, 0 }
 0x2d5   :  { %v986_v58 = vpop.permute.xlu0 %985  ;;  %v1902_v45 = vpop.permute.xlu1 %1901 }
 0x2d6   :  { %1911 = vmatpush.bf16.msrb.mxu0 %v1902_v45  ;;  %v1105_v10 = vsel %vm989_vm0, %v986_v58, 0  ;;  %v7555_v58 = vld [vmem:[%s10582_s8 + $0x10] sm:$0xff]  }
 0x2d7   :  { %1111 = vmatpush.bf16.xpose.msrb.mxu3 %v1105_v10  ;;  %v10705_v45 = vunpack.c.l.bf16 %v7555_v58 }
 0x2da   :  { %1912 = vmatpush.bf16.msrb.mxu0 %v1900_v63  ;;  %v7526_v63 = vld [vmem:[%s10582_s8] sm:$0xff]  }
 0x2dd   :  { %v976_v62 = vpop.permute.xlu0 %975 }
 0x2de   :  { %v1090_v10 = vsel %vm989_vm0, %v976_v62, 0  ;;  %v10697_v62 = vunpack.c.h.bf16 %v7555_v58 }
 0x2df   :  { %1112 = vmatpush.bf16.xpose.msrb.mxu3 %v1102_v55  ;;  %v7541_v55 = vld [vmem:[%s10582_s8 + $0x8] sm:$0xff]  }
 0x2e0   :  { %v5706_v21 = vunpack.c.l.bf16 %v7541_v55  ;;  %v10698_v0 = vunpack.c.h.bf16 %v7541_v55 }
 0x2e5   :  { %v1898_v42 = vpop.permute.xlu0 %1897 }
 0x2e6   :  { %1913 = vmatpush.bf16.msrb.mxu0 %v1898_v42  ;;  %v5702_v42 = vunpack.c.l.bf16 %v7526_v63 }
 0x2e7   :  { %1113 = vmatpush.bf16.xpose.msrb.mxu3 %v1099_v52  ;;  %v10699_v52 = vunpack.c.h.bf16 %v7526_v63 }
 0x2e8   :  { %v805_v46 = vmul.f32 %v5702_v42, %v6991_v6  ;;  %v807_v6 = vmul.f32 %v5706_v21, %v7062_v32  ;;  %v809_v32 = vmul.f32 %v10705_v45, %v7126_v20 }
 0x2e9   :  { %v806_v36 = vmul.f32 %v10699_v52, %v6993_v59  ;;  %v808_v59 = vmul.f32 %v10698_v0, %v7064_v33  ;;  %v810_v33 = vmul.f32 %v10697_v62, %v7128_v24 }
 0x2ea   :  { %1914 = vmatpush.bf16.msrb.mxu0 %v1896_v29  ;;  %v1087_v29 = vsel %vm989_vm0, %v974_v2, 0 }
 0x2eb   :  { %v870_v2 = vpack.c.bf16 %v808_v59, %v807_v6 }
 0x2ee   :  { %1915 = vmatpush.bf16.msrb.mxu0 %v1894_v11  ;;  %v869_v11 = vpack.c.bf16 %v806_v36, %v805_v46  ;;  %v7583_v36 = vld [vmem:[%s10582_s8 + $0x20] sm:$0xff]  }
 0x2ef   :  { %1114 = vmatpush.bf16.xpose.msrb.mxu3 %v1096_v12  ;;  %v871_v12 = vpack.c.bf16 %v810_v33, %v809_v32  ;;  %10777 = vst [vmem:[#allocation60_spill] sm:$0xff] %v7583_v36  ;;  %v10694_v6 = vunpack.c.h.bf16 %v7583_v36 }
 0x2f7   :  { %1115 = vmatpush.bf16.xpose.msrb.mxu3 %v1093_v13  ;;  %v7569_v13 = vld [vmem:[%s10582_s8 + $0x18] sm:$0xff]  }
 0x2f8   :  { %10776 = vst [vmem:[#allocation59_spill] sm:$0xff] %v7569_v13 }
 0x2ff   :  { %1116 = vmatpush.bf16.xpose.msrb.mxu3 %v1090_v10  ;;  %v10704_v10 = vunpack.c.l.bf16 %v7569_v13 }
 0x301   :  { %v811_v20 = vmul.f32 %v10704_v10, %v7194_v22 }
 0x307   :  { %1117 = vmatpush.bf16.xpose.msrb.mxu3 %v1087_v29  ;;  %v10696_v29 = vunpack.c.h.bf16 %v7569_v13 }
 0x309   :  { %v812_v24 = vmul.f32 %v10696_v29, %v7196_v3  ;;  %v814_v3 = vmul.f32 %v10694_v6, %v7261_v1  ;;  %v10808_v29 = vld [vmem:[#allocation28_spill] sm:$0xff] }
 0x30b   :  { %v872_v46 = vpack.c.bf16 %v812_v24, %v811_v20  ;;  %v7611_v20 = vld [vmem:[%s10582_s8 + $0x30] sm:$0xff]  }
 0x30c   :  { %10779 = vst [vmem:[#allocation62_spill] sm:$0xff] %v7611_v20  ;;  %v10701_v24 = vunpack.c.l.bf16 %v7611_v20 }
 0x30e   :  { %5256 = vmatmul.msk.bf16.vlgmr.msrb.gmra.mxu3 %vm989_vm0, %v869_v11  ;;  %v10703_v11 = vunpack.c.l.bf16 %v7583_v36 }
 0x310   :  { %v813_v22 = vmul.f32 %v10703_v11, %v7259_v41 }
 0x312   :  { %v873_v59 = vpack.c.bf16 %v814_v3, %v813_v22  ;;  %v7625_v3 = vld [vmem:[%s10582_s8 + $0x38] sm:$0xff]  }
 0x313   :  { %10780 = vst [vmem:[#allocation63_spill] sm:$0xff] %v7625_v3 }
 0x31e   :  { %5257 = vmatmul.msk.bf16.gmra.mxu3 %vm989_vm0, %v870_v2  ;;  %v7597_v2 = vld [vmem:[%s10582_s8 + $0x28] sm:$0xff]  }
 0x31f   :  { %10778 = vst [vmem:[#allocation61_spill] sm:$0xff] %v7597_v2  ;;  %v10702_v32 = vunpack.c.l.bf16 %v7597_v2  ;;  %v10693_v33 = vunpack.c.h.bf16 %v7597_v2 }
 0x321   :  { %v815_v41 = vmul.f32 %v10702_v32, %v7326_v49  ;;  %v816_v1 = vmul.f32 %v10693_v33, %v7328_v18  ;;  %v817_v49 = vmul.f32 %v10701_v24, %v7398_v30 }
 0x32e   :  { %5258 = vmatmul.msk.bf16.gmra.mxu3 %vm989_vm0, %v871_v12  ;;  %v874_v12 = vpack.c.bf16 %v816_v1, %v815_v41  ;;  %v10695_v41 = vunpack.c.h.bf16 %v7625_v3 }
 0x33e   :  { %5259 = vmatmul.msk.bf16.gmra.mxu3 %vm989_vm0, %v872_v46  ;;  %v10692_v46 = vunpack.c.h.bf16 %v7611_v20 }
 0x340   :  { %v818_v18 = vmul.f32 %v10692_v46, %v7400_v39  ;;  %v820_v39 = vmul.f32 %v10695_v41, %v7468_v44  ;;  %v902_v46 = vld [vmem:[#allocation8 + $0x8] sm:$0xff]  ;;  %v903_v44 = vld [vmem:[#allocation8 + $0x10] sm:$0xff] }
 0x342   :  { %v875_v22 = vpack.c.bf16 %v818_v18, %v817_v49  ;;  %v901_v49 = vld [vmem:[#allocation8] sm:$0xff] }
 0x34e   :  { %5260 = vmatmul.msk.bf16.gmra.mxu3 %vm989_vm0, %v873_v59  ;;  %v10700_v59 = vunpack.c.l.bf16 %v7625_v3 }
 0x350   :  { %v819_v30 = vmul.f32 %v10700_v59, %v7466_v54  ;;  %v10782_v54 = vpack.c.bf16 %v7076_v35, %v7071_v15  ;;  %v906_v35 = vld [vmem:[#allocation8 + $0x28] sm:$0xff] }
 0x352   :  { %v876_v1 = vpack.c.bf16 %v820_v39, %v819_v30 }
 0x35e   :  { %5261 = vmatmul.msk.bf16.gmra.mxu3 %vm989_vm0, %v874_v12  ;;  %v10781_v12 = vpack.c.bf16 %v7005_v8, %v7000_v7  ;;  %v904_v7 = vld [vmem:[#allocation8 + $0x18] sm:$0xff] }
 0x36e   :  { %5262 = vmatmul.msk.bf16.gmra.mxu3 %vm989_vm0, %v875_v22 }
 0x37e   :  { %5263 = vmatmul.msk.bf16.gmra.mxu3 %vm989_vm0, %v876_v1 }
 0x38e   :  { %5264 = vmatmul.msk.bf16.gmra.mxu3 %vm989_vm0, %v10781_v12  ;;  %v10783_v12 = vpack.c.bf16 %v7139_v31, %v7134_v43  ;;  %v907_v43 = vld [vmem:[#allocation8 + $0x30] sm:$0xff] }
 0x391   :  { %v1119_v18 = vpop.f32.mrf.mxu3 }
 0x392   :  { %v1120_v22 = vadd.f32 %v1119_v18, %v901_v49 }
 0x394   :  { %1279 = vmax.xlane.f32.xlu2 %v1120_v22 }
 0x399   :  { %v1121_v33 = vpop.f32.mrf.mxu3 }
 0x39a   :  { %v1122_v6 = vadd.f32 %v1121_v33, %v902_v46  ;;  %v905_v33 = vld [vmem:[#allocation8 + $0x20] sm:$0xff] }
 0x39c   :  { %1281 = vmax.xlane.f32.xlu0 %v1122_v6 }
 0x39e   :  { %5265 = vmatmul.msk.bf16.gmra.mxu3 %vm989_vm0, %v10782_v54  ;;  %v10784_v54 = vpack.c.bf16 %v7208_v5, %v7203_v4  ;;  %v10786_v4 = vpack.c.bf16 %v7340_v26, %v7335_v14 }
 0x3a1   :  { %v1124_v30 = vpop.f32.mrf.mxu3 }
 0x3a2   :  { %v7644_v39 = vadd.f32 %v1124_v30, %v903_v44  ;;  %v908_v30 = vld [vmem:[#allocation8 + $0x38] sm:$0xff] }
 0x3a4   :  { %1283 = vmax.xlane.f32.xlu1 %v7644_v39 }
 0x3a9   :  { %v1126_v8 = vpop.f32.mrf.mxu3 }
 0x3aa   :  { %v1127_v1 = vadd.f32 %v1126_v8, %v904_v7 }
 0x3ac   :  { %1285 = vmax.xlane.f32.xlu2 %v1127_v1 }
 0x3ae   :  { %5266 = vmatmul.msk.bf16.gmra.mxu3 %vm989_vm0, %v10783_v12  ;;  %v10785_v12 = vpack.c.bf16 %v7273_v61, %v7268_v17 }
 0x3b1   :  { %v1129_v46 = vpop.f32.mrf.mxu3 }
 0x3b2   :  { %v7651_v15 = vadd.f32 %v1129_v46, %v905_v33 }
 0x3b4   :  { %1287 = vmax.xlane.f32.xlu2 %v7651_v15 }
 0x3b9   :  { %v1131_v49 = vpop.f32.mrf.mxu3 }
 0x3ba   :  { %v7654_v18 = vadd.f32 %v1131_v49, %v906_v35  ;;  %v10787_v49 = vpack.c.bf16 %v7411_v34, %v7406_v28  ;;  %v10789_v34 = vpack.c.bf16 %v7015_v9, %v7010_v57 }
 0x3bc   :  { %1289 = vmax.xlane.f32.xlu0 %v7654_v18 }
 0x3be   :  { %5267 = vmatmul.msk.bf16.gmra.mxu3 %vm989_vm0, %v10784_v54  ;;  %v10788_v54 = vpack.c.bf16 %v7478_v47, %v7473_v60 }
 0x3c1   :  { %v1134_v31 = vpop.f32.mrf.mxu3 }
 0x3c2   :  { %v7661_v44 = vadd.f32 %v1134_v31, %v907_v43  ;;  %v909_v43 = vld [vmem:[#allocation8 + $0x40] sm:$0xff] }
 0x3c4   :  { %1291 = vmax.xlane.f32.xlu0 %v7661_v44 }
 0x3c9   :  { %v1136_v7 = vpop.f32.mrf.mxu3 }
 0x3ca   :  { %v1137_v8 = vadd.f32 %v1136_v7, %v908_v30 }
 0x3cc   :  { %1293 = vmax.xlane.f32.xlu2 %v1137_v8 }
 0x3ce   :  { %5268 = vmatmul.msk.bf16.gmra.mxu3 %vm989_vm0, %v10785_v12 }
 0x3d1   :  { %v1139_v33 = vpop.f32.mrf.mxu3 }
 0x3d2   :  { %v7690_v30 = vadd.f32 %v1139_v33, %v909_v43  ;;  %v913_v43 = vld [vmem:[#allocation8 + $0x60] sm:$0xff] }
 0x3d9   :  { %v7668_v46 = vpop.f32.mrf.mxu3 }
 0x3de   :  { %5269 = vmatmul.msk.bf16.gmra.mxu3 %vm989_vm0, %v10786_v4  ;;  %v10790_v4 = vpack.c.bf16 %v7086_v51, %v7081_v37  ;;  %v10791_v37 = vpack.c.bf16 %v7149_v27, %v7144_v50  ;;  %v912_v51 = vld [vmem:[#allocation8 + $0x58] sm:$0xff] }
 0x3e1   :  { %v7674_v5 = vpop.f32.mrf.mxu3 }
 0x3e4   :  { %1891 = vrot.lane.b32.xlu2 %v7198_v19, %s6643_s27 }
 0x3e9   :  { %v1146_v35 = vpop.f32.mrf.mxu3 }
 0x3ee   :  { %5270 = vmatmul.msk.bf16.gmra.mxu3 %vm989_vm0, %v10787_v49 }
 0x3f1   :  { %v1149_v17 = vpop.f32.mrf.mxu3 }
 0x3f9   :  { %v7682_v61 = vpop.f32.mrf.mxu3 }
 0x3fe   :  { %5271 = vmatmul.msk.bf16.gmra.mxu3 %vm989_vm0, %v10788_v54 }
 0x401   :  { %v7688_v14 = vpop.f32.mrf.mxu3 }
 0x407   :  { %v1280_v26 = vpop.xlane.xlu2 %1279 }
 0x408   :  { %v1407_v31 = vsub.f32 %v1120_v22, %v1280_v26 }
 0x409   :  { %v7693_v28 = vpop.f32.mrf.mxu3 }
 0x40a   :  { %v1471_v19 = vmul.f32 1.442695, %v1407_v31 }
 0x40c   :  { %5933 = vpow2.f32 %v1471_v19 }
 0x40d   :  { %1295 = vmax.xlane.f32.xlu2 %v7690_v30 }
 0x40e   :  { %5272 = vmatmul.msk.bf16.gmra.mxu3 %vm989_vm0, %v10789_v34  ;;  %v7731_v34 = vadd.f32 %v1149_v17, %v913_v43 }
 0x40f   :  { %v1282_v60 = vpop.xlane.xlu0 %1281 }
 0x410   :  { %v1408_v47 = vsub.f32 %v1122_v6, %v1282_v60 }
 0x411   :  { %v7702_v22 = vpop.f32.mrf.mxu3 }
 0x412   :  { %v7699_v7 = vpop.eup %5933  ;;  %v1473_v12 = vmul.f32 1.442695, %v1408_v47 }
 0x413   :  { %1599 = vadd.xlane.f32.xlu1 %v7699_v7 }
 0x414   :  { %5935 = vpow2.f32 %v1473_v12 }
 0x417   :  { %v1284_v60 = vpop.xlane.xlu1 %1283 }
 0x418   :  { %v1409_v47 = vsub.f32 %v7644_v39, %v1284_v60  ;;  %v10794_v60 = vpack.c.bf16 %v7350_v48, %v7345_v53  ;;  %v916_v48 = vld [vmem:[#allocation8 + $0x78] sm:$0xff] }
 0x419   :  { %v7711_v6 = vpop.f32.mrf.mxu3  ;;  %v7784_v53 = vadd.f32 %v7693_v28, %v916_v48  ;;  %v10802_v48 = vld [vmem:[#allocation18_spill] sm:$0xff] }
 0x41a   :  { %v7704_v33 = vpop.eup %5935 }
 0x41b   :  { %1601 = vadd.xlane.f32.xlu0 %v7704_v33 }
 0x41e   :  { %5273 = vmatmul.msk.bf16.gmra.mxu3 %vm989_vm0, %v10790_v4 }
 0x41f   :  { %v1286_v57 = vpop.xlane.xlu2 %1285 }
 0x420   :  { %v1410_v9 = vsub.f32 %v1127_v1, %v1286_v57  ;;  %v7726_v1 = vadd.f32 %v1146_v35, %v912_v51 }
 0x421   :  { %v7716_v26 = vpop.f32.mrf.mxu3 }
 0x422   :  { %v1477_v49 = vmul.f32 1.442695, %v1410_v9  ;;  %v1475_v9 = vmul.f32 1.442695, %v1409_v47  ;;  %v10795_v47 = vld [vmem:[#allocation49_spill] sm:$0xff] }
 0x424   :  { %5937 = vpow2.f32 %v1477_v49 }
 0x427   :  { %v1288_v19 = vpop.xlane.xlu2 %1287 }
 0x429   :  { %v7729_v31 = vpop.f32.mrf.mxu3 }
 0x42a   :  { %v7713_v54 = vpop.eup %5937 }
 0x42b   :  { %1605 = vadd.xlane.f32.xlu2 %v7713_v54 }
 0x42c   :  { %1887 = vrot.lane.b32.xlu1 %v7373_v40, %s6643_s27  ;;  %v10792_v40 = vpack.c.bf16 %v7218_v38, %v7213_v23  ;;  %v10793_v23 = vpack.c.bf16 %v7283_v16, %v7278_v56  ;;  %v1411_v16 = vsub.f32 %v7651_v15, %v1288_v19 }
 0x42e   :  { %5274 = vmatmul.msk.bf16.gmra.mxu3 %vm989_vm0, %v10791_v37  ;;  %v910_v37 = vld [vmem:[#allocation8 + $0x48] sm:$0xff] }
 0x42f   :  { %1889 = vrot.lane.b32.xlu0 %v7510_v25, %s6643_s27  ;;  %v1290_v4 = vpop.xlane.xlu0 %1289 }
 0x430   :  { %v1412_v38 = vsub.f32 %v7654_v18, %v1290_v4  ;;  %v911_v18 = vld [vmem:[#allocation8 + $0x50] sm:$0xff] }
 0x431   :  { %v7738_v27 = vpop.f32.mrf.mxu3 }
 0x433   :  { %1301 = vmax.xlane.f32.xlu2 %v7726_v1 }
 0x437   :  { %v1292_v39 = vpop.xlane.xlu0 %1291 }
 0x438   :  { %v1413_v43 = vsub.f32 %v7661_v44, %v1292_v39  ;;  %v7772_v44 = vadd.f32 %v7674_v5, %v911_v18  ;;  %v914_v5 = vld [vmem:[#allocation8 + $0x68] sm:$0xff] }
 0x439   :  { %v7743_v57 = vpop.f32.mrf.mxu3 }
 0x43a   :  { %v1483_v56 = vmul.f32 1.442695, %v1413_v43  ;;  %v10799_v43 = vld [vmem:[#allocation55_spill] sm:$0xff] }
 0x43b   :  { %1303 = vmax.xlane.f32.xlu2 %v7731_v34 }
 0x43e   :  { %5275 = vmatmul.msk.bf16.gmra.mxu3 %vm989_vm0, %v10792_v40  ;;  %v7758_v40 = vadd.f32 %v7668_v46, %v910_v37 }
 0x43f   :  { %v1294_v50 = vpop.xlane.xlu2 %1293 }
 0x440   :  { %v1414_v25 = vsub.f32 %v1137_v8, %v1294_v50  ;;  %v1481_v8 = vmul.f32 1.442695, %v1412_v38 }
 0x441   :  { %v7751_v49 = vpop.f32.mrf.mxu3 }
 0x442   :  { %v1485_v35 = vmul.f32 1.442695, %v1414_v25  ;;  %v1479_v25 = vmul.f32 1.442695, %v1411_v16 }
 0x444   :  { %5939 = vpow2.f32 %v1485_v35 }
 0x445   :  { %5941 = vpow2.f32 %v1475_v9  ;;  %v7792_v9 = vadd.f32 %v7682_v61, %v914_v5  ;;  %v10798_v61 = vld [vmem:[#allocation56_spill] sm:$0xff] }
 0x446   :  { %5943 = vpow2.f32 %v1481_v8  ;;  %v915_v8 = vld [vmem:[#allocation8 + $0x70] sm:$0xff]  ;;  %v10800_v16 = vpack.c.bf16 %v10798_v61, %v10799_v43 }
 0x447   :  { %v1892_v12 = vpop.permute.xlu2 %1891  ;;  %5945 = vpow2.f32 %v1483_v56  ;;  %v7802_v39 = vadd.f32 %v7688_v14, %v915_v8  ;;  %v10801_v14 = vld [vmem:[#allocation19_spill] sm:$0xff] }
 0x448   :  { %1916 = vmatpush.bf16.msrb.mxu0 %v1892_v12  ;;  %5947 = vpow2.f32 %v1479_v25  ;;  %v10796_v12 = vld [vmem:[#allocation48_spill] sm:$0xff]  ;;  %v10803_v5 = vpack.c.bf16 %v10801_v14, %v10802_v48 }
 0x449   :  { %v7764_v35 = vpop.f32.mrf.mxu3  ;;  %v10797_v4 = vpack.c.bf16 %v10795_v47, %v10796_v12  ;;  %v918_v47 = vld [vmem:[#allocation8 + $0x88] sm:$0xff] }
 0x44a   :  { %v7741_v17 = vpop.eup %5939 }
 0x44b   :  { %1613 = vadd.xlane.f32.xlu2 %v7741_v17  ;;  %v7753_v51 = vpop.eup %5941 }
 0x44c   :  { %v7762_v50 = vpop.eup %5943 }
 0x44d   :  { %v7775_v15 = vpop.eup %5945 }
 0x44e   :  { %5276 = vmatmul.msk.bf16.gmra.mxu3 %vm989_vm0, %v10793_v23  ;;  %v7778_v46 = vpop.eup %5947  ;;  %v917_v23 = vld [vmem:[#allocation8 + $0x80] sm:$0xff] }
 0x44f   :  { %v7798_v28 = vadd.f32 %v7702_v22, %v917_v23 }
 0x451   :  { %v7780_v19 = vpop.f32.mrf.mxu3 }
 0x456   :  { %1603 = vadd.xlane.f32.xlu1 %v7753_v51 }
 0x459   :  { %1297 = vmax.xlane.f32.xlu0 %v7758_v40  ;;  %v7795_v38 = vpop.f32.mrf.mxu3 }
 0x45e   :  { %1609 = vadd.xlane.f32.xlu1 %v7762_v50  ;;  %5277 = vmatmul.msk.bf16.gmra.mxu3 %vm989_vm0, %v10794_v60 }
 0x461   :  { %1299 = vmax.xlane.f32.xlu0 %v7772_v44  ;;  %v7805_v37 = vpop.f32.mrf.mxu3 }
 0x466   :  { %1611 = vadd.xlane.f32.xlu1 %v7775_v15 }
 0x469   :  { %1607 = vadd.xlane.f32.xlu0 %v7778_v46  ;;  %v7812_v22 = vpop.f32.mrf.mxu3 }
 0x46e   :  { %5278 = vmatmul.msk.bf16.gmra.mxu3 %vm989_vm0, %v10797_v4  ;;  %1309 = vmax.xlane.f32.xlu1 %v7784_v53  ;;  %v7824_v4 = vadd.f32 %v7711_v6, %v918_v47 }
 0x471   :  { %1305 = vmax.xlane.f32.xlu0 %v7792_v9  ;;  %v7821_v12 = vpop.f32.mrf.mxu3 }
 0x476   :  { %1311 = vmax.xlane.f32.xlu1 %v7798_v28 }
 0x479   :  { %1307 = vmax.xlane.f32.xlu0 %v7802_v39  ;;  %v7830_v43 = vpop.f32.mrf.mxu3 }
 0x47e   :  { %5279 = vmatmul.msk.bf16.gmra.mxu3 %vm989_vm0, %v10800_v16  ;;  %v10804_v16 = vld [vmem:[#allocation24_spill] sm:$0xff] }
 0x480   :  { %v1296_v56 = vpop.xlane.xlu2 %1295 }
 0x481   :  { %v1415_v18 = vsub.f32 %v7690_v30, %v1296_v56  ;;  %v919_v30 = vld [vmem:[#allocation8 + $0x90] sm:$0xff]  ;;  %v10805_v56 = vld [vmem:[#allocation23_spill] sm:$0xff] }
 0x482   :  { %v7828_v61 = vadd.f32 %v7716_v26, %v919_v30  ;;  %v7838_v26 = vpop.f32.mrf.mxu3 }
 0x483   :  { %v1487_v25 = vmul.f32 1.442695, %v1415_v18  ;;  %v10806_v18 = vpack.c.bf16 %v10804_v16, %v10805_v56 }
 0x485   :  { %5949 = vpow2.f32 %v1487_v25 }
 0x486   :  { %v1600_v8 = vpop.xlane.xlu1 %1599 }
 0x48a   :  { %v7842_v56 = vpop.f32.mrf.mxu3 }
 0x48b   :  { %v7814_v60 = vpop.eup %5949 }
 0x48c   :  { %1615 = vadd.xlane.f32.xlu2 %v7814_v60 }
 0x48e   :  { %5280 = vmatmul.msk.bf16.gmra.mxu3 %vm989_vm0, %v10803_v5  ;;  %v1602_v23 = vpop.xlane.xlu0 %1601 }
 0x48f   :  { %5951 = vrcp.f32 %v1602_v23 }
 0x490   :  { %5953 = vrcp.f32 %v1600_v8 }
 0x494   :  { %1313 = vmax.xlane.f32.xlu2 %v7824_v4 }
 0x495   :  { %v5952_v25 = vpop.eup %5951 }
 0x496   :  { %v5954_v48 = vpop.eup %5953  ;;  %v1792_v5 = vmul.f32 %v5952_v25, %v7704_v33 }
 0x497   :  { %v1791_v30 = vmul.f32 %v5954_v48, %v7699_v7  ;;  %v922_v48 = vld [vmem:[#allocation8 + $0xa8] sm:$0xff] }
 0x499   :  { %v1855_v41 = vpack.c.bf16 %v1792_v5, %v1791_v30  ;;  %v10810_v5 = vld [vmem:[#allocation34_spill] sm:$0xff] }
 0x49c   :  { %1315 = vmax.xlane.f32.xlu2 %v7828_v61 }
 0x49e   :  { %5281 = vmatmul.msk.bf16.gmra.mxu3 %vm989_vm0, %v10806_v18  ;;  %v1606_v6 = vpop.xlane.xlu2 %1605  ;;  %v1888_v47 = vpop.permute.xlu1 %1887  ;;  %v10807_v18 = vld [vmem:[#allocation29_spill] sm:$0xff] }
 0x4a1   :  { %v1890_v14 = vpop.permute.xlu0 %1889 }
 0x4a2   :  { %1917 = vmatpush.bf16.msrb.mxu0 %v1890_v14  ;;  %v10809_v14 = vpack.c.bf16 %v10807_v18, %v10808_v29  ;;  %v10811_v29 = vld [vmem:[#allocation33_spill] sm:$0xff] }
 0x4a6   :  { %1918 = vmatpush.bf16.msrb.mxu0 %v1888_v47  ;;  %v1302_v23 = vpop.xlane.xlu2 %1301  ;;  %v10812_v47 = vpack.c.bf16 %v10810_v5, %v10811_v29 }
 0x4a7   :  { %v1418_v8 = vsub.f32 %v7726_v1, %v1302_v23  ;;  %v7852_v1 = vpop.f32.mrf.mxu3  ;;  %v923_v23 = vld [vmem:[#allocation8 + $0xb0] sm:$0xff] }
 0x4a9   :  { %v1493_v16 = vmul.f32 1.442695, %v1418_v8  ;;  %1919 = vmatmul.bf16.vlgmr.msrb.gmra.mxu0 %v1855_v41  ;;  %v7868_v8 = vadd.f32 %v7751_v49, %v923_v23 }
 0x4ab   :  { %5955 = vpow2.f32 %v1493_v16 }
 0x4ae   :  { %5282 = vmatmul.msk.bf16.gmra.mxu3 %vm989_vm0, %v10809_v14  ;;  %v1304_v33 = vpop.xlane.xlu2 %1303 }
 0x4af   :  { %v1419_v25 = vsub.f32 %v7731_v34, %v1304_v33  ;;  %v7862_v34 = vadd.f32 %v7743_v57, %v922_v48  ;;  %v7864_v30 = vpop.f32.mrf.mxu3 }
 0x4b1   :  { %v7849_v62 = vpop.eup %5955  ;;  %v1495_v7 = vmul.f32 1.442695, %v1419_v25  ;;  %v10813_v25 = vld [vmem:[#allocation39_spill] sm:$0xff] }
 0x4b2   :  { %1621 = vadd.xlane.f32.xlu1 %v7849_v62 }
 0x4b3   :  { %5957 = vpow2.f32 %v1495_v7  ;;  %v10814_v7 = vld [vmem:[#allocation38_spill] sm:$0xff] }
 0x4b4   :  { %5959 = vrcp.f32 %v1606_v6  ;;  %v10815_v48 = vpack.c.bf16 %v10813_v25, %v10814_v7 }
 0x4b7   :  { %v7871_v18 = vpop.f32.mrf.mxu3 }
 0x4b9   :  { %v7854_v41 = vpop.eup %5957 }
 0x4ba   :  { %1623 = vadd.xlane.f32.xlu1 %v7854_v41  ;;  %v5960_v57 = vpop.eup %5959 }
 0x4be   :  { %5283 = vmatmul.msk.bf16.gmra.mxu3 %vm989_vm0, %v10812_v47  ;;  %v1794_v47 = vmul.f32 %v5960_v57, %v7713_v54 }
 0x4c2   :  { %1321 = vmax.xlane.f32.xlu1 %v7862_v34 }
 0x4c9   :  { %v1604_v16 = vpop.xlane.xlu1 %1603 }
 0x4ca   :  { %5961 = vrcp.f32 %v1604_v16  ;;  %1323 = vmax.xlane.f32.xlu1 %v7868_v8 }
 0x4cc   :  { %v1298_v14 = vpop.xlane.xlu0 %1297 }
 0x4cd   :  { %v1416_v33 = vsub.f32 %v7758_v40, %v1298_v14  ;;  %v7881_v40 = vpop.f32.mrf.mxu3 }
 0x4ce   :  { %5284 = vmatmul.msk.bf16.gmra.mxu3 %vm989_vm0, %v10815_v48  ;;  %v10817_v48 = vld [vmem:[#allocation43_spill] sm:$0xff] }
 0x4cf   :  { %v1489_v5 = vmul.f32 1.442695, %v1416_v33 }
 0x4d0   :  { %v5962_v29 = vpop.eup %5961 }
 0x4d1   :  { %5963 = vpow2.f32 %v1489_v5  ;;  %v1610_v49 = vpop.xlane.xlu1 %1609  ;;  %v1793_v6 = vmul.f32 %v5962_v29, %v7753_v51  ;;  %v10816_v51 = vld [vmem:[#allocation44_spill] sm:$0xff]  ;;  %v920_v29 = vld [vmem:[#allocation8 + $0x98] sm:$0xff] }
 0x4d2   :  { %v10818_v54 = vpack.c.bf16 %v10816_v51, %v10817_v48 }
 0x4d3   :  { %v1856_v23 = vpack.c.bf16 %v1794_v47, %v1793_v6 }
 0x4d4   :  { %v1300_v16 = vpop.xlane.xlu0 %1299 }
 0x4d5   :  { %v1417_v0 = vsub.f32 %v7772_v44, %v1300_v16  ;;  %1924 = vmatmul.bf16.gmra.mxu0 %v1856_v23  ;;  %v7892_v44 = vpop.f32.mrf.mxu3 }
 0x4d7   :  { %v7883_v14 = vpop.eup %5963  ;;  %v1491_v25 = vmul.f32 1.442695, %v1417_v0 }
 0x4d8   :  { %1617 = vadd.xlane.f32.xlu0 %v7883_v14 }
 0x4d9   :  { %5965 = vpow2.f32 %v1491_v25  ;;  %v1612_v33 = vpop.xlane.xlu1 %1611  ;;  %v7899_v25 = vadd.f32 %v7729_v31, %v920_v29  ;;  %v10819_v29 = vld [vmem:[#allocation51_spill] sm:$0xff] }
 0x4da   :  { %5967 = vrcp.f32 %v1610_v49 }
 0x4dc   :  { %v1608_v7 = vpop.xlane.xlu0 %1607 }
 0x4dd   :  { %5969 = vrcp.f32 %v1608_v7  ;;  %v7903_v52 = vpop.f32.mrf.mxu3 }
 0x4de   :  { %5285 = vmatmul.msk.bf16.gmra.mxu3 %vm989_vm0, %v10818_v54  ;;  %v1614_v54 = vpop.xlane.xlu2 %1613 }
 0x4df   :  { %v7890_v57 = vpop.eup %5965 }
 0x4e0   :  { %1619 = vadd.xlane.f32.xlu0 %v7890_v57  ;;  %v5968_v5 = vpop.eup %5967 }
 0x4e1   :  { %v1310_v6 = vpop.xlane.xlu1 %1309  ;;  %v1796_v23 = vmul.f32 %v5968_v5, %v7762_v50 }
 0x4e2   :  { %v1422_v48 = vsub.f32 %v7784_v53, %v1310_v6  ;;  %v10820_v53 = vld [vmem:[#allocation50_spill] sm:$0xff] }
 0x4e3   :  { %v5970_v0 = vpop.eup %5969  ;;  %v10821_v6 = vpack.c.bf16 %v10819_v29, %v10820_v53  ;;  %v925_v53 = vld [vmem:[#allocation8 + $0xc0] sm:$0xff] }
 0x4e4   :  { %v1306_v47 = vpop.xlane.xlu0 %1305  ;;  %v1795_v49 = vmul.f32 %v5970_v0, %v7778_v46  ;;  %v921_v46 = vld [vmem:[#allocation8 + $0xa0] sm:$0xff]  ;;  %v1501_v50 = vmul.f32 1.442695, %v1422_v48 }
 0x4e5   :  { %v1420_v16 = vsub.f32 %v7792_v9, %v1306_v47  ;;  %v7907_v31 = vadd.f32 %v7738_v27, %v921_v46 }
 0x4e6   :  { %v1857_v7 = vpack.c.bf16 %v1796_v23, %v1795_v49 }
 0x4e7   :  { %v1497_v51 = vmul.f32 1.442695, %v1420_v16  ;;  %v7919_v16 = vpop.f32.mrf.mxu3 }
 0x4e8   :  { %1317 = vmax.xlane.f32.xlu0 %v7899_v25  ;;  %1929 = vmatmul.bf16.gmra.mxu0 %v1857_v7 }
 0x4e9   :  { %5971 = vpow2.f32 %v1497_v51  ;;  %v1312_v0 = vpop.xlane.xlu1 %1311 }
 0x4ea   :  { %5973 = vrcp.f32 %v1612_v33 }
 0x4eb   :  { %5975 = vrcp.f32 %v1614_v54 }
 0x4ec   :  { %v1308_v5 = vpop.xlane.xlu0 %1307  ;;  %5977 = vpow2.f32 %v1501_v50 }
 0x4ed   :  { %v1421_v9 = vsub.f32 %v7802_v39, %v1308_v5  ;;  %v1423_v39 = vsub.f32 %v7798_v28, %v1312_v0  ;;  %v924_v28 = vld [vmem:[#allocation8 + $0xb8] sm:$0xff]  ;;  %v10823_v5 = vld [vmem:[#allocation57_spill] sm:$0xff] }
 0x4ee   :  { %5286 = vmatmul.msk.bf16.gmra.mxu3 %vm989_vm0, %v10821_v6  ;;  %v926_v6 = vld [vmem:[#allocation8 + $0xc8] sm:$0xff] }
 0x4ef   :  { %v7913_v47 = vpop.eup %5971  ;;  %v1499_v49 = vmul.f32 1.442695, %v1421_v9  ;;  %v1503_v7 = vmul.f32 1.442695, %v1423_v39  ;;  %v7928_v50 = vpop.f32.mrf.mxu3 }
 0x4f0   :  { %v5974_v23 = vpop.eup %5973  ;;  %1319 = vmax.xlane.f32.xlu0 %v7907_v31  ;;  %1625 = vadd.xlane.f32.xlu2 %v7913_v47 }
 0x4f1   :  { %5979 = vpow2.f32 %v1499_v49  ;;  %v5976_v27 = vpop.eup %5975  ;;  %v1797_v33 = vmul.f32 %v5974_v23, %v7775_v15  ;;  %v10822_v15 = vld [vmem:[#allocation58_spill] sm:$0xff]  ;;  %v7942_v49 = vadd.f32 %v7780_v19, %v925_v53  ;;  %v7945_v23 = vadd.f32 %v7795_v38, %v926_v6 }
 0x4f2   :  { %v1798_v51 = vmul.f32 %v5976_v27, %v7741_v17  ;;  %v7922_v48 = vpop.eup %5977  ;;  %5981 = vpow2.f32 %v1503_v7  ;;  %v10824_v9 = vpack.c.bf16 %v10822_v15, %v10823_v5  ;;  %v7935_v17 = vadd.f32 %v7764_v35, %v924_v28  ;;  %v928_v28 = vld [vmem:[#allocation8 + $0xd8] sm:$0xff] }
 0x4f3   :  { %v7962_v15 = vadd.f32 %v7812_v22, %v928_v28 }
 0x4f4   :  { %v1858_v46 = vpack.c.bf16 %v1798_v51, %v1797_v33  ;;  %v927_v33 = vld [vmem:[#allocation8 + $0xd0] sm:$0xff] }
 0x4f5   :  { %v7951_v7 = vadd.f32 %v7805_v37, %v927_v33 }
 0x4f7   :  { %v7924_v54 = vpop.eup %5979 }
 0x4f8   :  { %1629 = vadd.xlane.f32.xlu0 %v7922_v48  ;;  %1627 = vadd.xlane.f32.xlu2 %v7924_v54  ;;  %v7937_v0 = vpop.eup %5981 }
 0x4f9   :  { %1934 = vmatmul.bf16.gmra.mxu0 %v1858_v46 }
 0x4fe   :  { %5287 = vmatmul.msk.bf16.gmra.mxu3 %vm989_vm0, %v10824_v9 }
 0x4ff   :  { %v1616_v29 = vpop.xlane.xlu2 %1615 }
 0x500   :  { %1631 = vadd.xlane.f32.xlu0 %v7937_v0  ;;  %1325 = vmax.xlane.f32.xlu2 %v7935_v17 }
 0x507   :  { %v1314_v39 = vpop.xlane.xlu2 %1313 }
 0x508   :  { %v1424_v27 = vsub.f32 %v7824_v4, %v1314_v39  ;;  %1329 = vmax.xlane.f32.xlu0 %v7945_v23  ;;  %1327 = vmax.xlane.f32.xlu2 %v7942_v49 }
 0x50a   :  { %v1505_v35 = vmul.f32 1.442695, %v1424_v27 }
 0x50c   :  { %5983 = vpow2.f32 %v1505_v35 }
 0x50f   :  { %v1316_v51 = vpop.xlane.xlu2 %1315 }
 0x510   :  { %v1425_v19 = vsub.f32 %v7828_v61, %v1316_v51  ;;  %1331 = vmax.xlane.f32.xlu0 %v7951_v7  ;;  %v929_v61 = vld [vmem:[#allocation8 + $0xe0] sm:$0xff] }
 0x511   :  { %v7966_v5 = vadd.f32 %v7821_v12, %v929_v61 }
 0x512   :  { %v7955_v38 = vpop.eup %5983  ;;  %v1507_v46 = vmul.f32 1.442695, %v1425_v19  ;;  %v932_v19 = vld [vmem:[#allocation8 + $0xf8] sm:$0xff] }
 0x513   :  { %1633 = vadd.xlane.f32.xlu1 %v7955_v38 }
 0x514   :  { %5985 = vpow2.f32 %v1507_v46 }
 0x51a   :  { %v7958_v4 = vpop.eup %5985 }
 0x51b   :  { %1635 = vadd.xlane.f32.xlu1 %v7958_v4 }
 0x523   :  { %1333 = vmax.xlane.f32.xlu1 %v7962_v15 }
 0x525   :  { %v1622_v37 = vpop.xlane.xlu1 %1621 }
 0x52b   :  { %1335 = vmax.xlane.f32.xlu1 %v7966_v5 }
 0x52d   :  { %v1624_v9 = vpop.xlane.xlu1 %1623 }
 0x535   :  { %v1322_v53 = vpop.xlane.xlu1 %1321 }
 0x536   :  { %v1428_v6 = vsub.f32 %v7862_v34, %v1322_v53  ;;  %v7978_v34 = vadd.f32 %v7842_v56, %v932_v19 }
 0x538   :  { %v1513_v39 = vmul.f32 1.442695, %v1428_v6  ;;  %v933_v6 = vld [vmem:[#allocation8 + $0x100] sm:$0xff] }
 0x53a   :  { %5987 = vpow2.f32 %v1513_v39 }
 0x53d   :  { %v1324_v27 = vpop.xlane.xlu1 %1323 }
 0x53e   :  { %v1429_v35 = vsub.f32 %v7868_v8, %v1324_v27  ;;  %v7984_v27 = vadd.f32 %v7852_v1, %v933_v6  ;;  %v930_v6 = vld [vmem:[#allocation8 + $0xe8] sm:$0xff] }
 0x540   :  { %v7971_v22 = vpop.eup %5987  ;;  %v1515_v33 = vmul.f32 1.442695, %v1429_v35 }
 0x541   :  { %1641 = vadd.xlane.f32.xlu0 %v7971_v22 }
 0x542   :  { %5989 = vpow2.f32 %v1515_v33 }
 0x543   :  { %5991 = vrcp.f32 %v1616_v29 }
 0x548   :  { %v7974_v51 = vpop.eup %5989 }
 0x549   :  { %1643 = vadd.xlane.f32.xlu0 %v7974_v51  ;;  %v5992_v46 = vpop.eup %5991 }
 0x54a   :  { %v1799_v61 = vmul.f32 %v5992_v46, %v7814_v60 }
 0x54b   :  { %v1618_v12 = vpop.xlane.xlu0 %1617 }
 0x54c   :  { %5993 = vrcp.f32 %v1618_v12 }
 0x551   :  { %1341 = vmax.xlane.f32.xlu0 %v7978_v34 }
 0x552   :  { %v5994_v8 = vpop.eup %5993 }
 0x553   :  { %v1620_v28 = vpop.xlane.xlu0 %1619  ;;  %v1800_v53 = vmul.f32 %v5994_v8, %v7883_v14 }
 0x554   :  { %5995 = vrcp.f32 %v1620_v28 }
 0x555   :  { %v1859_v39 = vpack.c.bf16 %v1800_v53, %v1799_v61  ;;  %5997 = vrcp.f32 %v1622_v37 }
 0x557   :  { %1939 = vmatmul.bf16.gmra.mxu0 %v1859_v39 }
 0x559   :  { %1343 = vmax.xlane.f32.xlu0 %v7984_v27 }
 0x55a   :  { %v5996_v35 = vpop.eup %5995 }
 0x55b   :  { %v1318_v56 = vpop.xlane.xlu0 %1317  ;;  %v5998_v12 = vpop.eup %5997  ;;  %v1801_v60 = vmul.f32 %v5996_v35, %v7890_v57 }
 0x55c   :  { %v1426_v29 = vsub.f32 %v7899_v25, %v1318_v56  ;;  %v1802_v46 = vmul.f32 %v5998_v12, %v7849_v62 }
 0x55e   :  { %v1509_v33 = vmul.f32 1.442695, %v1426_v29  ;;  %v1860_v8 = vpack.c.bf16 %v1802_v46, %v1801_v60  ;;  %v931_v60 = vld [vmem:[#allocation8 + $0xf0] sm:$0xff] }
 0x560   :  { %5999 = vpow2.f32 %v1509_v33  ;;  %v8001_v33 = vadd.f32 %v7830_v43, %v930_v6  ;;  %v8007_v43 = vadd.f32 %v7838_v26, %v931_v60  ;;  %v936_v60 = vld [vmem:[#allocation8 + $0x118] sm:$0xff] }
 0x563   :  { %v1320_v14 = vpop.xlane.xlu0 %1319  ;;  %v1626_v19 = vpop.xlane.xlu2 %1625 }
 0x564   :  { %v1427_v1 = vsub.f32 %v7907_v31, %v1320_v14  ;;  %6001 = vrcp.f32 %v1626_v19 }
 0x566   :  { %v7991_v28 = vpop.eup %5999  ;;  %v1511_v61 = vmul.f32 1.442695, %v1427_v1 }
 0x567   :  { %1637 = vadd.xlane.f32.xlu2 %v7991_v28  ;;  %1944 = vmatmul.bf16.gmra.mxu0 %v1860_v8 }
 0x568   :  { %6003 = vpow2.f32 %v1511_v61 }
 0x569   :  { %6005 = vrcp.f32 %v1624_v9 }
 0x56a   :  { %v6002_v53 = vpop.eup %6001 }
 0x56b   :  { %v1630_v25 = vpop.xlane.xlu0 %1629  ;;  %v1628_v37 = vpop.xlane.xlu2 %1627  ;;  %v1804_v31 = vmul.f32 %v6002_v53, %v7913_v47 }
 0x56c   :  { %6007 = vrcp.f32 %v1630_v25 }
 0x56d   :  { %6009 = vrcp.f32 %v1628_v37 }
 0x56e   :  { %v7994_v57 = vpop.eup %6003 }
 0x56f   :  { %1639 = vadd.xlane.f32.xlu2 %v7994_v57  ;;  %v6006_v62 = vpop.eup %6005 }
 0x570   :  { %v1803_v29 = vmul.f32 %v6006_v62, %v7854_v41 }
 0x572   :  { %v1861_v9 = vpack.c.bf16 %v1804_v31, %v1803_v29  ;;  %v6008_v19 = vpop.eup %6007 }
 0x573   :  { %v1632_v39 = vpop.xlane.xlu0 %1631  ;;  %v1326_v56 = vpop.xlane.xlu2 %1325 }
 0x574   :  { %v1430_v35 = vsub.f32 %v7935_v17, %v1326_v56  ;;  %v6010_v17 = vpop.eup %6009 }
 0x575   :  { %v1805_v25 = vmul.f32 %v6010_v17, %v7924_v54  ;;  %v8022_v54 = vpop.f32.mrf.mxu0 }
 0x576   :  { %v1517_v12 = vmul.f32 1.442695, %v1430_v35 }
 0x577   :  { %1337 = vmax.xlane.f32.xlu2 %v8001_v33  ;;  %1949 = vmatmul.bf16.gmra.mxu0 %v1861_v9 }
 0x578   :  { %6011 = vpow2.f32 %v1517_v12 }
 0x57b   :  { %v1330_v47 = vpop.xlane.xlu0 %1329  ;;  %v1328_v14 = vpop.xlane.xlu2 %1327 }
 0x57c   :  { %v1432_v46 = vsub.f32 %v7945_v23, %v1330_v47  ;;  %v1431_v41 = vsub.f32 %v7942_v49, %v1328_v14  ;;  %v1806_v23 = vmul.f32 %v6008_v19, %v7922_v48  ;;  %v934_v48 = vld [vmem:[#allocation8 + $0x108] sm:$0xff]  ;;  %v935_v47 = vld [vmem:[#allocation8 + $0x110] sm:$0xff]  ;;  %v8036_v19 = vadd.f32 %v7881_v40, %v936_v60 }
 0x57d   :  { %v8027_v35 = vadd.f32 %v7864_v30, %v934_v48  ;;  %v8039_v30 = vadd.f32 %v7871_v18, %v935_v47 }
 0x57e   :  { %v8009_v1 = vpop.eup %6011  ;;  %v1521_v8 = vmul.f32 1.442695, %v1432_v46  ;;  %v1519_v61 = vmul.f32 1.442695, %v1431_v41  ;;  %v1862_v53 = vpack.c.bf16 %v1806_v23, %v1805_v25 }
 0x57f   :  { %1339 = vmax.xlane.f32.xlu2 %v8007_v43  ;;  %1645 = vadd.xlane.f32.xlu1 %v8009_v1 }
 0x580   :  { %6013 = vpow2.f32 %v1521_v8  ;;  %v937_v8 = vld [vmem:[#allocation8 + $0x120] sm:$0xff] }
 0x581   :  { %6015 = vpow2.f32 %v1519_v61  ;;  %v8047_v40 = vadd.f32 %v7892_v44, %v937_v8 }
 0x583   :  { %v1332_v37 = vpop.xlane.xlu0 %1331 }
 0x584   :  { %v1433_v49 = vsub.f32 %v7951_v7, %v1332_v37 }
 0x586   :  { %v8016_v26 = vpop.eup %6013  ;;  %v1523_v62 = vmul.f32 1.442695, %v1433_v49  ;;  %v1634_v31 = vpop.xlane.xlu1 %1633  ;;  %v938_v49 = vld [vmem:[#allocation8 + $0x128] sm:$0xff] }
 0x587   :  { %v8018_v6 = vpop.eup %6015  ;;  %6017 = vrcp.f32 %v1634_v31  ;;  %1649 = vadd.xlane.f32.xlu2 %v8016_v26  ;;  %1954 = vmatmul.bf16.gmra.mxu0 %v1862_v53  ;;  %v8062_v53 = vadd.f32 %v7903_v52, %v938_v49 }
 0x588   :  { %6019 = vpow2.f32 %v1523_v62  ;;  %1647 = vadd.xlane.f32.xlu1 %v8018_v6  ;;  %v939_v62 = vld [vmem:[#allocation8 + $0x130] sm:$0xff] }
 0x589   :  { %6021 = vrcp.f32 %v1632_v39  ;;  %v8033_v39 = vpop.f32.mrf.mxu0  ;;  %v8066_v31 = vadd.f32 %v7919_v16, %v939_v62  ;;  %v8079_v16 = vpop.f32.mrf.mxu3 }
 0x58d   :  { %v6018_v56 = vpop.eup %6017 }
 0x58e   :  { %v8024_v7 = vpop.eup %6019  ;;  %v1636_v29 = vpop.xlane.xlu1 %1635  ;;  %v1808_v12 = vmul.f32 %v6018_v56, %v7955_v38 }
 0x58f   :  { %1651 = vadd.xlane.f32.xlu2 %v8024_v7  ;;  %v6022_v9 = vpop.eup %6021 }
 0x590   :  { %1345 = vmax.xlane.f32.xlu1 %v8027_v35  ;;  %v1807_v14 = vmul.f32 %v6022_v9, %v7937_v0 }
 0x591   :  { %v8044_v0 = vpop.f32.mrf.mxu0 }
 0x592   :  { %v1863_v46 = vpack.c.bf16 %v1808_v12, %v1807_v14 }
 0x596   :  { %v1334_v41 = vpop.xlane.xlu1 %1333 }
 0x597   :  { %v1434_v17 = vsub.f32 %v7962_v15, %v1334_v41  ;;  %1349 = vmax.xlane.f32.xlu2 %v8036_v19  ;;  %1959 = vmatmul.bf16.gmra.mxu0 %v1863_v46 }
 0x598   :  { %1347 = vmax.xlane.f32.xlu1 %v8039_v30 }
 0x599   :  { %v1525_v38 = vmul.f32 1.442695, %v1434_v17  ;;  %v8054_v23 = vpop.f32.mrf.mxu0 }
 0x59b   :  { %6023 = vpow2.f32 %v1525_v38 }
 0x59e   :  { %v1336_v61 = vpop.xlane.xlu1 %1335 }
 0x59f   :  { %v1435_v18 = vsub.f32 %v7966_v5, %v1336_v61  ;;  %1351 = vmax.xlane.f32.xlu2 %v8047_v40 }
 0x5a1   :  { %v8051_v25 = vpop.eup %6023  ;;  %v1527_v15 = vmul.f32 1.442695, %v1435_v18  ;;  %v8059_v44 = vpop.f32.mrf.mxu0  ;;  %v942_v18 = vld [vmem:[#allocation8 + $0x148] sm:$0xff] }
 0x5a2   :  { %1653 = vadd.xlane.f32.xlu0 %v8051_v25 }
 0x5a3   :  { %6025 = vpow2.f32 %v1527_v15 }
 0x5a9   :  { %v8056_v37 = vpop.eup %6025  ;;  %v8068_v48 = vpop.f32.mrf.mxu0 }
 0x5aa   :  { %1655 = vadd.xlane.f32.xlu0 %v8056_v37  ;;  %10825 = vst [vmem:[#allocation49_spill] sm:$0xff] %v8068_v48 }
 0x5b1   :  { %v8071_v9 = vpop.f32.mrf.mxu0 }
 0x5b2   :  { %1353 = vmax.xlane.f32.xlu0 %v8062_v53 }
 0x5b4   :  { %v1642_v5 = vpop.xlane.xlu0 %1641 }
 0x5b9   :  { %v8074_v52 = vpop.f32.mrf.mxu0 }
 0x5ba   :  { %1355 = vmax.xlane.f32.xlu0 %v8066_v31  ;;  %10826 = vst [vmem:[#allocation48_spill] sm:$0xff] %v8074_v52 }
 0x5bc   :  { %v1644_v56 = vpop.xlane.xlu0 %1643 }
 0x5c4   :  { %v1342_v12 = vpop.xlane.xlu0 %1341 }
 0x5c5   :  { %v1438_v60 = vsub.f32 %v7978_v34, %v1342_v12  ;;  %v1221_v34 = vpop.f32.mrf.mxu3 }
 0x5c6   :  { %v8089_v15 = vadd.f32 %v1221_v34, %v942_v18 }
 0x5c7   :  { %v1533_v47 = vmul.f32 1.442695, %v1438_v60 }
 0x5c9   :  { %6027 = vpow2.f32 %v1533_v47 }
 0x5cc   :  { %v1344_v14 = vpop.xlane.xlu0 %1343 }
 0x5cd   :  { %v1439_v46 = vsub.f32 %v7984_v27, %v1344_v14  ;;  %v943_v14 = vld [vmem:[#allocation8 + $0x150] sm:$0xff] }
 0x5cf   :  { %v8077_v41 = vpop.eup %6027  ;;  %v1535_v17 = vmul.f32 1.442695, %v1439_v46  ;;  %v1224_v46 = vpop.f32.mrf.mxu3 }
 0x5d0   :  { %1661 = vadd.xlane.f32.xlu2 %v8077_v41 }
 0x5d1   :  { %6029 = vpow2.f32 %v1535_v17 }
 0x5d2   :  { %6031 = vrcp.f32 %v1636_v29 }
 0x5d4   :  { %v8082_v38 = vpop.f32.mrf.mxu0 }
 0x5d7   :  { %v8084_v8 = vpop.eup %6029 }
 0x5d8   :  { %1663 = vadd.xlane.f32.xlu2 %v8084_v8  ;;  %v6032_v49 = vpop.eup %6031 }
 0x5d9   :  { %v1809_v60 = vmul.f32 %v6032_v49, %v7958_v4 }
 0x5da   :  { %v1638_v61 = vpop.xlane.xlu2 %1637 }
 0x5db   :  { %6033 = vrcp.f32 %v1638_v61  ;;  %v8096_v61 = vadd.f32 %v1224_v46, %v943_v14 }
 0x5dc   :  { %v8087_v27 = vpop.f32.mrf.mxu0 }
 0x5dd   :  { %10827 = vst [vmem:[#allocation56_spill] sm:$0xff] %v8087_v27  ;;  %v953_v27 = vld [vmem:[#allocation8 + $0x1a0] sm:$0xff] }
 0x5e0   :  { %1361 = vmax.xlane.f32.xlu2 %v8089_v15 }
 0x5e1   :  { %v6034_v62 = vpop.eup %6033 }
 0x5e2   :  { %v1640_v12 = vpop.xlane.xlu2 %1639  ;;  %v1810_v47 = vmul.f32 %v6034_v62, %v7991_v28 }
 0x5e3   :  { %6035 = vrcp.f32 %v1640_v12 }
 0x5e4   :  { %v8094_v17 = vpop.f32.mrf.mxu0  ;;  %v1864_v29 = vpack.c.bf16 %v1810_v47, %v1809_v60  ;;  %6037 = vrcp.f32 %v1642_v5 }
 0x5e6   :  { %1964 = vmatmul.bf16.gmra.mxu0 %v1864_v29 }
 0x5e8   :  { %1363 = vmax.xlane.f32.xlu2 %v8096_v61 }
 0x5e9   :  { %v6036_v4 = vpop.eup %6035 }
 0x5ea   :  { %v1338_v34 = vpop.xlane.xlu2 %1337  ;;  %v6038_v28 = vpop.eup %6037  ;;  %v1811_v62 = vmul.f32 %v6036_v4, %v7994_v57 }
 0x5eb   :  { %v1436_v18 = vsub.f32 %v8001_v33, %v1338_v34  ;;  %v1812_v47 = vmul.f32 %v6038_v28, %v7971_v22 }
 0x5ec   :  { %v8100_v59 = vpop.f32.mrf.mxu0 }
 0x5ed   :  { %10828 = vst [vmem:[#allocation55_spill] sm:$0xff] %v8100_v59  ;;  %v1529_v49 = vmul.f32 1.442695, %v1436_v18  ;;  %v1865_v5 = vpack.c.bf16 %v1812_v47, %v1811_v62 }
 0x5ef   :  { %6039 = vpow2.f32 %v1529_v49  ;;  %v940_v49 = vld [vmem:[#allocation8 + $0x138] sm:$0xff] }
 0x5f2   :  { %v1646_v24 = vpop.xlane.xlu1 %1645  ;;  %v1340_v60 = vpop.xlane.xlu2 %1339 }
 0x5f3   :  { %v1437_v12 = vsub.f32 %v8007_v43, %v1340_v60  ;;  %6041 = vrcp.f32 %v1646_v24 }
 0x5f4   :  { %v8105_v14 = vpop.f32.mrf.mxu0 }
 0x5f5   :  { %v8107_v46 = vpop.eup %6039  ;;  %v1531_v33 = vmul.f32 1.442695, %v1437_v12  ;;  %v8121_v12 = vadd.f32 %v7928_v50, %v940_v49  ;;  %v2080_v49 = vpack.c.bf16 %v8022_v54, %v8022_v54 }
 0x5f6   :  { %1969 = vmatmul.bf16.gmra.mxu0 %v1865_v5  ;;  %1657 = vadd.xlane.f32.xlu1 %v8107_v46 }
 0x5f7   :  { %6043 = vpow2.f32 %v1531_v33 }
 0x5f8   :  { %6045 = vrcp.f32 %v1644_v56 }
 0x5f9   :  { %v6042_v34 = vpop.eup %6041 }
 0x5fa   :  { %v1650_v29 = vpop.xlane.xlu2 %1649  ;;  %v1814_v4 = vmul.f32 %v6042_v34, %v8009_v1  ;;  %v941_v1 = vld [vmem:[#allocation8 + $0x140] sm:$0xff]  ;;  %v1226_v34 = vpop.f32.mrf.mxu3 }
 0x5fb   :  { %v1648_v57 = vpop.xlane.xlu1 %1647  ;;  %6047 = vrcp.f32 %v1650_v29 }
 0x5fc   :  { %v8110_v18 = vpop.f32.mrf.mxu0  ;;  %6049 = vrcp.f32 %v1648_v57 }
 0x5fd   :  { %10829 = vst [vmem:[#allocation19_spill] sm:$0xff] %v8110_v18  ;;  %v8112_v22 = vpop.eup %6043 }
 0x5fe   :  { %1659 = vadd.xlane.f32.xlu1 %v8112_v22  ;;  %v6046_v43 = vpop.eup %6045 }
 0x5ff   :  { %v1813_v24 = vmul.f32 %v6046_v43, %v7974_v51 }
 0x601   :  { %v1866_v47 = vpack.c.bf16 %v1814_v4, %v1813_v24 }
 0x602   :  { %v1652_v28 = vpop.xlane.xlu2 %1651 }
 0x603   :  { %v1346_v62 = vpop.xlane.xlu1 %1345 }
 0x604   :  { %v1440_v60 = vsub.f32 %v8027_v35, %v1346_v62  ;;  %v8118_v56 = vpop.f32.mrf.mxu0  ;;  %v6048_v35 = vpop.eup %6047  ;;  %v8126_v62 = vadd.f32 %v8079_v16, %v941_v1  ;;  %v2144_v16 = vunpack.c.l.bf16 %v2080_v49  ;;  %v944_v49 = vld [vmem:[#allocation8 + $0x158] sm:$0xff] }
 0x605   :  { %v6050_v29 = vpop.eup %6049 }
 0x606   :  { %v1537_v5 = vmul.f32 1.442695, %v1440_v60  ;;  %1974 = vmatmul.bf16.gmra.mxu0 %v1866_v47  ;;  %1357 = vmax.xlane.f32.xlu1 %v8121_v12 }
 0x608   :  { %6051 = vpow2.f32 %v1537_v5 }
 0x60a   :  { %v1350_v33 = vpop.xlane.xlu2 %1349 }
 0x60b   :  { %v1348_v51 = vpop.xlane.xlu1 %1347  ;;  %v1442_v43 = vsub.f32 %v8036_v19, %v1350_v33  ;;  %v1815_v19 = vmul.f32 %v6050_v29, %v8018_v6 }
 0x60c   :  { %v1441_v50 = vsub.f32 %v8039_v30, %v1348_v51  ;;  %v8129_v4 = vpop.f32.mrf.mxu0  ;;  %v1816_v30 = vmul.f32 %v6048_v35, %v8016_v26  ;;  %v1229_v51 = vpop.f32.mrf.mxu3 }
 0x60d   :  { %10830 = vst [vmem:[#allocation18_spill] sm:$0xff] %v8129_v4  ;;  %v1541_v57 = vmul.f32 1.442695, %v1442_v43  ;;  %v2208_v43 = vmul.f32 %v5702_v42, %v2144_v16 }
 0x60e   :  { %v8133_v24 = vpop.eup %6051  ;;  %v1539_v60 = vmul.f32 1.442695, %v1441_v50  ;;  %1359 = vmax.xlane.f32.xlu1 %v8126_v62  ;;  %v1867_v54 = vpack.c.bf16 %v1816_v30, %v1815_v19 }
 0x60f   :  { %6053 = vpow2.f32 %v1541_v57  ;;  %1665 = vadd.xlane.f32.xlu0 %v8133_v24  ;;  %v2272_v6 = vpack.c.bf16 %v2208_v43, %v2208_v43 }
 0x610   :  { %6055 = vpow2.f32 %v1539_v60 }
 0x611   :  { %v2336_v16 = vunpack.c.l.bf16 %v2272_v6 }
 0x612   :  { %v1352_v47 = vpop.xlane.xlu2 %1351 }
 0x613   :  { %v1443_v5 = vsub.f32 %v8047_v40, %v1352_v47  ;;  %v10831_v40 = vld [vmem:[#allocation15_spill] sm:$0xff] }
 0x614   :  { %v1960_v1 = vpop.f32.mrf.mxu0  ;;  %v10832_v35 = vunpack.c.l.bf16 %v10831_v40 }
 0x615   :  { %v8140_v33 = vpop.eup %6053  ;;  %v1543_v50 = vmul.f32 1.442695, %v1443_v5  ;;  %v2096_v57 = vpack.c.bf16 %v1960_v1, %v1960_v1  ;;  %v1654_v32 = vpop.xlane.xlu0 %1653  ;;  %v8154_v5 = vadd.f32 %v1226_v34, %v944_v49 }
 0x616   :  { %v8144_v60 = vpop.eup %6055  ;;  %6057 = vrcp.f32 %v1654_v32  ;;  %1979 = vmatmul.bf16.gmra.mxu0 %v1867_v54  ;;  %1669 = vadd.xlane.f32.xlu1 %v8140_v33  ;;  %v1231_v54 = vpop.f32.mrf.mxu3 }
 0x617   :  { %6059 = vpow2.f32 %v1543_v50  ;;  %v2160_v26 = vunpack.c.l.bf16 %v2096_v57  ;;  %1667 = vadd.xlane.f32.xlu0 %v8144_v60  ;;  %v946_v50 = vld [vmem:[#allocation8 + $0x168] sm:$0xff]  ;;  %v945_v57 = vld [vmem:[#allocation8 + $0x160] sm:$0xff] }
 0x618   :  { %6061 = vrcp.f32 %v1652_v28 }
 0x619   :  { %v2224_v29 = vmul.f32 %v10832_v35, %v2160_v26  ;;  %v8162_v35 = vadd.f32 %v1231_v54, %v946_v50 }
 0x61b   :  { %v2288_v42 = vpack.c.bf16 %v2224_v29, %v2224_v29  ;;  %v8164_v29 = vadd.f32 %v1229_v51, %v945_v57 }
 0x61c   :  { %v6058_v19 = vpop.eup %6057 }
 0x61d   :  { %v8150_v30 = vpop.eup %6059  ;;  %v2352_v47 = vunpack.c.l.bf16 %v2288_v42  ;;  %v8152_v32 = vpop.xlane.xlu0 %1655  ;;  %v1818_v28 = vmul.f32 %v6058_v19, %v8051_v25 }
 0x61e   :  { %1671 = vadd.xlane.f32.xlu1 %v8150_v30  ;;  %v6062_v1 = vpop.eup %6061  ;;  %v1234_v25 = vpop.f32.mrf.mxu3 }
 0x61f   :  { %v8157_v43 = vadd.f32 %v2352_v47, %v2336_v16  ;;  %1365 = vmax.xlane.f32.xlu0 %v8154_v5  ;;  %v1817_v26 = vmul.f32 %v6062_v1, %v8024_v7  ;;  %v947_v16 = vld [vmem:[#allocation8 + $0x170] sm:$0xff] }
 0x620   :  { %v8169_v19 = vadd.f32 %v1234_v25, %v947_v16 }
 0x621   :  { %v1868_v6 = vpack.c.bf16 %v1818_v28, %v1817_v26  ;;  %v948_v28 = vld [vmem:[#allocation8 + $0x178] sm:$0xff] }
 0x625   :  { %v1354_v34 = vpop.xlane.xlu0 %1353 }
 0x626   :  { %v1444_v49 = vsub.f32 %v8062_v53, %v1354_v34  ;;  %1984 = vmatmul.bf16.gmra.mxu0 %v1868_v6  ;;  %1369 = vmax.xlane.f32.xlu1 %v8162_v35  ;;  %v1236_v54 = vpop.f32.mrf.mxu3 }
 0x627   :  { %1367 = vmax.xlane.f32.xlu0 %v8164_v29  ;;  %v8179_v50 = vadd.f32 %v1236_v54, %v948_v28 }
 0x628   :  { %v1545_v42 = vmul.f32 1.442695, %v1444_v49 }
 0x62a   :  { %6063 = vpow2.f32 %v1545_v42 }
 0x62d   :  { %v1356_v7 = vpop.xlane.xlu0 %1355 }
 0x62e   :  { %v1445_v47 = vsub.f32 %v8066_v31, %v1356_v7  ;;  %1371 = vmax.xlane.f32.xlu1 %v8169_v19  ;;  %v949_v31 = vld [vmem:[#allocation8 + $0x180] sm:$0xff]  ;;  %v1239_v26 = vpop.f32.mrf.mxu3  ;;  %v8190_v7 = vpop.f32.mrf.mxu0 }
 0x62f   :  { %v8182_v6 = vadd.f32 %v1239_v26, %v949_v31 }
 0x630   :  { %v8173_v51 = vpop.eup %6063  ;;  %v1547_v1 = vmul.f32 1.442695, %v1445_v47 }
 0x631   :  { %1673 = vadd.xlane.f32.xlu2 %v8173_v51 }
 0x632   :  { %6065 = vpow2.f32 %v1547_v1  ;;  %v2082_v1 = vpack.c.bf16 %v8044_v0, %v8044_v0 }
 0x634   :  { %v2146_v11 = vunpack.c.l.bf16 %v2082_v1 }
 0x636   :  { %v8187_v42 = vpop.f32.mrf.mxu3 }
 0x638   :  { %v8176_v53 = vpop.eup %6065 }
 0x639   :  { %1675 = vadd.xlane.f32.xlu2 %v8176_v53 }
 0x63e   :  { %v8197_v31 = vpop.f32.mrf.mxu3 }
 0x641   :  { %1373 = vmax.xlane.f32.xlu2 %v8179_v50 }
 0x643   :  { %v1662_v57 = vpop.xlane.xlu2 %1661 }
 0x646   :  { %v1246_v0 = vpop.f32.mrf.mxu3 }
 0x649   :  { %1375 = vmax.xlane.f32.xlu2 %v8182_v6 }
 0x64b   :  { %v8185_v34 = vpop.xlane.xlu2 %1663 }
 0x653   :  { %v1362_v49 = vpop.xlane.xlu2 %1361 }
 0x654   :  { %v1448_v16 = vsub.f32 %v8089_v15, %v1362_v49  ;;  %v2210_v49 = vmul.f32 %v5706_v21, %v2146_v11  ;;  %v2084_v11 = vpack.c.bf16 %v8059_v44, %v8059_v44  ;;  %v10835_v44 = vunpack.c.l.bf16 %v7555_v58 }
 0x656   :  { %v1553_v25 = vmul.f32 1.442695, %v1448_v16 }
 0x658   :  { %6067 = vpow2.f32 %v1553_v25 }
 0x65b   :  { %v1364_v47 = vpop.xlane.xlu2 %1363 }
 0x65c   :  { %v1449_v54 = vsub.f32 %v8096_v61, %v1364_v47  ;;  %v2274_v61 = vpack.c.bf16 %v2210_v49, %v2210_v49  ;;  %v10833_v47 = vld [vmem:[#allocation20_spill] sm:$0xff] }
 0x65e   :  { %v8195_v28 = vpop.eup %6067  ;;  %v1555_v26 = vmul.f32 1.442695, %v1449_v54  ;;  %v10834_v54 = vunpack.c.l.bf16 %v10833_v47  ;;  %v2338_v21 = vunpack.c.l.bf16 %v2274_v61  ;;  %v1249_v61 = vpop.f32.mrf.mxu3 }
 0x65f   :  { %1681 = vadd.xlane.f32.xlu1 %v8195_v28 }
 0x660   :  { %6069 = vpow2.f32 %v1555_v26  ;;  %v952_v26 = vld [vmem:[#allocation8 + $0x198] sm:$0xff] }
 0x661   :  { %6071 = vrcp.f32 %v8152_v32 }
 0x663   :  { %v1965_v15 = vpop.f32.mrf.mxu0 }
 0x664   :  { %v2098_v16 = vpack.c.bf16 %v1965_v15, %v1965_v15 }
 0x666   :  { %v8202_v25 = vpop.eup %6069  ;;  %v2162_v10 = vunpack.c.l.bf16 %v2098_v16  ;;  %v8212_v16 = vadd.f32 %v1246_v0, %v952_v26  ;;  %v8221_v26 = vadd.f32 %v1249_v61, %v953_v27 }
 0x667   :  { %1683 = vadd.xlane.f32.xlu1 %v8202_v25  ;;  %v6072_v59 = vpop.eup %6071 }
 0x668   :  { %v2226_v45 = vmul.f32 %v10834_v54, %v2162_v10  ;;  %v2148_v10 = vunpack.c.l.bf16 %v2084_v11 }
 0x669   :  { %v1658_v4 = vpop.xlane.xlu1 %1657 }
 0x66a   :  { %v2290_v1 = vpack.c.bf16 %v2226_v45, %v2226_v45  ;;  %6073 = vrcp.f32 %v1658_v4  ;;  %v1819_v45 = vmul.f32 %v6072_v59, %v8056_v37  ;;  %v2212_v0 = vmul.f32 %v10835_v44, %v2148_v10  ;;  %v10836_v59 = vld [vmem:[#allocation25_spill] sm:$0xff] }
 0x66b   :  { %v8208_v18 = vpop.f32.mrf.mxu0  ;;  %v10837_v37 = vunpack.c.l.bf16 %v10836_v59 }
 0x66c   :  { %v2354_v15 = vunpack.c.l.bf16 %v2290_v1  ;;  %v2276_v11 = vpack.c.bf16 %v2212_v0, %v2212_v0 }
 0x66e   :  { %v8214_v49 = vadd.f32 %v2354_v15, %v2338_v21 }
 0x66f   :  { %1381 = vmax.xlane.f32.xlu1 %v8212_v16 }
 0x670   :  { %v6074_v32 = vpop.eup %6073 }
 0x671   :  { %v1660_v54 = vpop.xlane.xlu1 %1659  ;;  %v1820_v4 = vmul.f32 %v6074_v32, %v8107_v46 }
 0x672   :  { %6075 = vrcp.f32 %v1660_v54 }
 0x673   :  { %v1970_v52 = vpop.f32.mrf.mxu0  ;;  %v1869_v48 = vpack.c.bf16 %v1820_v4, %v1819_v45  ;;  %6077 = vrcp.f32 %v1662_v57 }
 0x674   :  { %v2100_v1 = vpack.c.bf16 %v1970_v52, %v1970_v52  ;;  %v2340_v52 = vunpack.c.l.bf16 %v2276_v11 }
 0x675   :  { %1989 = vmatmul.bf16.gmra.mxu0 %v1869_v48  ;;  %v2086_v48 = vpack.c.bf16 %v8071_v9, %v8071_v9  ;;  %v10838_v9 = vunpack.c.l.bf16 %v7569_v13 }
 0x676   :  { %v2164_v21 = vunpack.c.l.bf16 %v2100_v1 }
 0x677   :  { %1383 = vmax.xlane.f32.xlu1 %v8221_v26  ;;  %v2150_v0 = vunpack.c.l.bf16 %v2086_v48 }
 0x678   :  { %v2228_v46 = vmul.f32 %v10837_v37, %v2164_v21  ;;  %v6076_v10 = vpop.eup %6075 }
 0x679   :  { %v1358_v15 = vpop.xlane.xlu1 %1357  ;;  %v6078_v61 = vpop.eup %6077  ;;  %v1821_v57 = vmul.f32 %v6076_v10, %v8112_v22 }
 0x67a   :  { %v2292_v32 = vpack.c.bf16 %v2228_v46, %v2228_v46  ;;  %v1446_v45 = vsub.f32 %v8121_v12, %v1358_v15  ;;  %v1822_v21 = vmul.f32 %v6078_v61, %v8077_v41  ;;  %v10839_v41 = vld [vmem:[#allocation30_spill] sm:$0xff] }
 0x67b   :  { %v8227_v4 = vpop.f32.mrf.mxu0 }
 0x67c   :  { %v2356_v27 = vunpack.c.l.bf16 %v2292_v32  ;;  %v1549_v54 = vmul.f32 1.442695, %v1446_v45  ;;  %v1870_v11 = vpack.c.bf16 %v1822_v21, %v1821_v57  ;;  %v2214_v32 = vmul.f32 %v10838_v9, %v2150_v0 }
 0x67e   :  { %v8231_v44 = vadd.f32 %v2356_v27, %v2340_v52  ;;  %6079 = vpow2.f32 %v1549_v54  ;;  %v2278_v10 = vpack.c.bf16 %v2214_v32, %v2214_v32  ;;  %v950_v32 = vld [vmem:[#allocation8 + $0x188] sm:$0xff] }
 0x680   :  { %v2342_v21 = vunpack.c.l.bf16 %v2278_v10 }
 0x681   :  { %v1360_v1 = vpop.xlane.xlu1 %1359 }
 0x682   :  { %v1666_v12 = vpop.xlane.xlu0 %1665  ;;  %v1447_v37 = vsub.f32 %v8126_v62, %v1360_v1  ;;  %v10840_v62 = vunpack.c.l.bf16 %v10839_v41 }
 0x683   :  { %v1975_v46 = vpop.f32.mrf.mxu0  ;;  %6081 = vrcp.f32 %v1666_v12  ;;  %v2088_v12 = vpack.c.bf16 %v8082_v38, %v8082_v38 }
 0x684   :  { %v8236_v15 = vpop.eup %6079  ;;  %v1551_v45 = vmul.f32 1.442695, %v1447_v37  ;;  %v2102_v52 = vpack.c.bf16 %v1975_v46, %v1975_v46 }
 0x685   :  { %1677 = vadd.xlane.f32.xlu0 %v8236_v15  ;;  %1994 = vmatmul.bf16.gmra.mxu0 %v1870_v11  ;;  %v2152_v9 = vunpack.c.l.bf16 %v2088_v12 }
 0x686   :  { %6083 = vpow2.f32 %v1551_v45  ;;  %v2166_v22 = vunpack.c.l.bf16 %v2102_v52 }
 0x687   :  { %6085 = vrcp.f32 %v8185_v34 }
 0x688   :  { %v2230_v48 = vmul.f32 %v10840_v62, %v2166_v22 }
 0x689   :  { %v1670_v27 = vpop.xlane.xlu1 %1669  ;;  %v6082_v57 = vpop.eup %6081 }
 0x68a   :  { %v2294_v54 = vpack.c.bf16 %v2230_v48, %v2230_v48  ;;  %v1668_v61 = vpop.xlane.xlu0 %1667  ;;  %v1824_v11 = vmul.f32 %v6082_v57, %v8133_v24  ;;  %v8257_v48 = vadd.f32 %v8187_v42, %v950_v32  ;;  %6087 = vrcp.f32 %v1670_v27  ;;  %v1251_v32 = vpop.f32.mrf.mxu3 }
 0x68b   :  { %v8244_v1 = vpop.f32.mrf.mxu0  ;;  %6089 = vrcp.f32 %v1668_v61 }
 0x68c   :  { %v8246_v0 = vpop.eup %6083  ;;  %v2358_v37 = vunpack.c.l.bf16 %v2294_v54  ;;  %v10841_v54 = vunpack.c.l.bf16 %v7583_v36 }
 0x68d   :  { %1679 = vadd.xlane.f32.xlu0 %v8246_v0  ;;  %v6086_v46 = vpop.eup %6085 }
 0x68e   :  { %v8251_v34 = vadd.f32 %v2358_v37, %v2342_v21  ;;  %v1823_v52 = vmul.f32 %v6086_v46, %v8084_v8  ;;  %v2216_v13 = vmul.f32 %v10841_v54, %v2152_v9  ;;  %v951_v8 = vld [vmem:[#allocation8 + $0x190] sm:$0xff] }
 0x68f   :  { %v8266_v27 = vadd.f32 %v8197_v31, %v951_v8 }
 0x690   :  { %v1871_v38 = vpack.c.bf16 %v1824_v11, %v1823_v52  ;;  %v2280_v57 = vpack.c.bf16 %v2216_v13, %v2216_v13  ;;  %v2090_v13 = vpack.c.bf16 %v8094_v17, %v8094_v17 }
 0x691   :  { %v1672_v45 = vpop.xlane.xlu1 %1671 }
 0x692   :  { %v1366_v22 = vpop.xlane.xlu0 %1365  ;;  %v2154_v8 = vunpack.c.l.bf16 %v2090_v13  ;;  %v954_v13 = vld [vmem:[#allocation8 + $0x1a8] sm:$0xff] }
 0x693   :  { %v1450_v62 = vsub.f32 %v8154_v5, %v1366_v22  ;;  %v1980_v10 = vpop.f32.mrf.mxu0  ;;  %v10842_v5 = vld [vmem:[#allocation35_spill] sm:$0xff]  ;;  %v6088_v22 = vpop.eup %6087 }
 0x694   :  { %v2104_v21 = vpack.c.bf16 %v1980_v10, %v1980_v10  ;;  %v10843_v12 = vunpack.c.l.bf16 %v10842_v5  ;;  %v6090_v10 = vpop.eup %6089  ;;  %v1826_v31 = vmul.f32 %v6088_v22, %v8140_v33 }
 0x695   :  { %v1557_v37 = vmul.f32 1.442695, %v1450_v62  ;;  %1377 = vmax.xlane.f32.xlu0 %v8257_v48  ;;  %1999 = vmatmul.bf16.gmra.mxu0 %v1871_v38  ;;  %v2344_v38 = vunpack.c.l.bf16 %v2280_v57 }
 0x696   :  { %v2168_v24 = vunpack.c.l.bf16 %v2104_v21 }
 0x697   :  { %6091 = vpow2.f32 %v1557_v37 }
 0x698   :  { %v2232_v46 = vmul.f32 %v10843_v12, %v2168_v24 }
 0x699   :  { %v1370_v42 = vpop.xlane.xlu1 %1369 }
 0x69a   :  { %v2296_v11 = vpack.c.bf16 %v2232_v46, %v2232_v46  ;;  %v1368_v52 = vpop.xlane.xlu0 %1367  ;;  %v1452_v9 = vsub.f32 %v8162_v35, %v1370_v42 }
 0x69b   :  { %v1451_v62 = vsub.f32 %v8164_v29, %v1368_v52  ;;  %v8269_v61 = vpop.f32.mrf.mxu0  ;;  %v1825_v29 = vmul.f32 %v6090_v10, %v8144_v60  ;;  %v10845_v52 = vunpack.c.l.bf16 %v7597_v2 }
 0x69c   :  { %10844 = vst [vmem:[#allocation24_spill] sm:$0xff] %v8269_v61  ;;  %v2360_v54 = vunpack.c.l.bf16 %v2296_v11  ;;  %v1561_v21 = vmul.f32 1.442695, %v1452_v9  ;;  %v1254_v11 = vpop.f32.mrf.mxu3 }
 0x69d   :  { %v8273_v37 = vpop.eup %6091  ;;  %v1559_v24 = vmul.f32 1.442695, %v1451_v62  ;;  %1379 = vmax.xlane.f32.xlu0 %v8266_v27  ;;  %v1872_v46 = vpack.c.bf16 %v1826_v31, %v1825_v29  ;;  %v2218_v9 = vmul.f32 %v10845_v52, %v2154_v8 }
 0x69e   :  { %v8276_v35 = vadd.f32 %v2360_v54, %v2344_v38  ;;  %6093 = vpow2.f32 %v1561_v21  ;;  %1685 = vadd.xlane.f32.xlu2 %v8273_v37 }
 0x69f   :  { %6095 = vpow2.f32 %v1559_v24  ;;  %v2282_v60 = vpack.c.bf16 %v2218_v9, %v2218_v9 }
 0x6a1   :  { %v1372_v57 = vpop.xlane.xlu1 %1371  ;;  %v2346_v8 = vunpack.c.l.bf16 %v2282_v60 }
 0x6a2   :  { %v1453_v17 = vsub.f32 %v8169_v19, %v1372_v57  ;;  %v10846_v19 = vld [vmem:[#allocation40_spill] sm:$0xff] }
 0x6a3   :  { %v1985_v12 = vpop.f32.mrf.mxu0  ;;  %v10847_v22 = vunpack.c.l.bf16 %v10846_v19 }
 0x6a4   :  { %v8282_v42 = vpop.eup %6093  ;;  %v1563_v62 = vmul.f32 1.442695, %v1453_v17  ;;  %v2106_v38 = vpack.c.bf16 %v1985_v12, %v1985_v12  ;;  %v1674_v54 = vpop.xlane.xlu2 %1673  ;;  %v8296_v12 = vadd.f32 %v1251_v32, %v954_v13 }
 0x6a5   :  { %v8286_v21 = vpop.eup %6095  ;;  %6097 = vrcp.f32 %v1674_v54  ;;  %1689 = vadd.xlane.f32.xlu0 %v8282_v42  ;;  %2004 = vmatmul.bf16.gmra.mxu0 %v1872_v46  ;;  %v1256_v52 = vpop.f32.mrf.mxu3 }
 0x6a6   :  { %6099 = vpow2.f32 %v1563_v62  ;;  %v2170_v33 = vunpack.c.l.bf16 %v2106_v38  ;;  %1687 = vadd.xlane.f32.xlu2 %v8286_v21  ;;  %v956_v62 = vld [vmem:[#allocation8 + $0x1b8] sm:$0xff]  ;;  %v955_v38 = vld [vmem:[#allocation8 + $0x1b0] sm:$0xff] }
 0x6a7   :  { %6101 = vrcp.f32 %v1672_v45 }
 0x6a8   :  { %v2234_v10 = vmul.f32 %v10847_v22, %v2170_v33  ;;  %v8304_v33 = vadd.f32 %v1256_v52, %v956_v62  ;;  %v8306_v22 = vadd.f32 %v1254_v11, %v955_v38  ;;  %v958_v52 = vld [vmem:[#allocation8 + $0x1c8] sm:$0xff] }
 0x6aa   :  { %v2298_v24 = vpack.c.bf16 %v2234_v10, %v2234_v10 }
 0x6ab   :  { %v6098_v29 = vpop.eup %6097 }
 0x6ac   :  { %v8292_v31 = vpop.eup %6099  ;;  %v2362_v57 = vunpack.c.l.bf16 %v2298_v24  ;;  %v8294_v17 = vpop.xlane.xlu2 %1675  ;;  %v1828_v45 = vmul.f32 %v6098_v29, %v8173_v51  ;;  %v957_v24 = vld [vmem:[#allocation8 + $0x1c0] sm:$0xff] }
 0x6ad   :  { %1691 = vadd.xlane.f32.xlu0 %v8292_v31  ;;  %v6102_v46 = vpop.eup %6101  ;;  %v1259_v51 = vpop.f32.mrf.mxu3 }
 0x6ae   :  { %v8299_v9 = vadd.f32 %v2362_v57, %v2346_v8  ;;  %1385 = vmax.xlane.f32.xlu2 %v8296_v12  ;;  %v1827_v54 = vmul.f32 %v6102_v46, %v8150_v30  ;;  %v8311_v29 = vadd.f32 %v1259_v51, %v957_v24  ;;  %v8332_v51 = vpop.f32.mrf.mxu0 }
 0x6af   :  { %10848 = vst [vmem:[#allocation23_spill] sm:$0xff] %v8332_v51 }
 0x6b0   :  { %v1873_v60 = vpack.c.bf16 %v1828_v45, %v1827_v54 }
 0x6b4   :  { %v1374_v32 = vpop.xlane.xlu2 %1373 }
 0x6b5   :  { %v1454_v10 = vsub.f32 %v8179_v50, %v1374_v32  ;;  %1389 = vmax.xlane.f32.xlu0 %v8304_v33  ;;  %2009 = vmatmul.bf16.gmra.mxu0 %v1873_v60  ;;  %v1261_v46 = vpop.f32.mrf.mxu3 }
 0x6b6   :  { %1387 = vmax.xlane.f32.xlu2 %v8306_v22  ;;  %v8321_v45 = vadd.f32 %v1261_v46, %v958_v52 }
 0x6b7   :  { %v1565_v13 = vmul.f32 1.442695, %v1454_v10 }
 0x6b9   :  { %6103 = vpow2.f32 %v1565_v13 }
 0x6bc   :  { %v1376_v30 = vpop.xlane.xlu2 %1375 }
 0x6bd   :  { %v1455_v8 = vsub.f32 %v8182_v6, %v1376_v30  ;;  %1391 = vmax.xlane.f32.xlu0 %v8311_v29  ;;  %v959_v6 = vld [vmem:[#allocation8 + $0x1d0] sm:$0xff]  ;;  %v1264_v38 = vpop.f32.mrf.mxu3 }
 0x6be   :  { %v8324_v54 = vadd.f32 %v1264_v38, %v959_v6 }
 0x6bf   :  { %v8315_v11 = vpop.eup %6103  ;;  %v1567_v57 = vmul.f32 1.442695, %v1455_v8  ;;  %v2092_v8 = vpack.c.bf16 %v8105_v14, %v8105_v14 }
 0x6c0   :  { %1693 = vadd.xlane.f32.xlu1 %v8315_v11 }
 0x6c1   :  { %6105 = vpow2.f32 %v1567_v57  ;;  %v2156_v38 = vunpack.c.l.bf16 %v2092_v8  ;;  %v962_v8 = vld [vmem:[#allocation8 + $0x1e8] sm:$0xff] }
 0x6c5   :  { %v8329_v10 = vpop.f32.mrf.mxu3 }
 0x6c7   :  { %v8318_v50 = vpop.eup %6105 }
 0x6c8   :  { %1695 = vadd.xlane.f32.xlu1 %v8318_v50 }
 0x6cd   :  { %v8339_v52 = vpop.f32.mrf.mxu3 }
 0x6d0   :  { %1393 = vmax.xlane.f32.xlu1 %v8321_v45 }
 0x6d2   :  { %v1682_v62 = vpop.xlane.xlu1 %1681 }
 0x6d5   :  { %v1271_v14 = vpop.f32.mrf.mxu3 }
 0x6d8   :  { %1395 = vmax.xlane.f32.xlu1 %v8324_v54 }
 0x6da   :  { %v8327_v60 = vpop.xlane.xlu1 %1683 }
 0x6e2   :  { %v1382_v32 = vpop.xlane.xlu1 %1381 }
 0x6e3   :  { %v1458_v13 = vsub.f32 %v8212_v16, %v1382_v32  ;;  %v10849_v32 = vunpack.c.l.bf16 %v7611_v20 }
 0x6e5   :  { %v1573_v24 = vmul.f32 1.442695, %v1458_v13  ;;  %v2220_v13 = vmul.f32 %v10849_v32, %v2156_v38 }
 0x6e7   :  { %6107 = vpow2.f32 %v1573_v24 }
 0x6ea   :  { %v1384_v30 = vpop.xlane.xlu1 %1383 }
 0x6eb   :  { %v1459_v57 = vsub.f32 %v8221_v26, %v1384_v30  ;;  %v2284_v26 = vpack.c.bf16 %v2220_v13, %v2220_v13  ;;  %v10850_v30 = vld [vmem:[#allocation45_spill] sm:$0xff] }
 0x6ed   :  { %v8337_v46 = vpop.eup %6107  ;;  %v1575_v6 = vmul.f32 1.442695, %v1459_v57  ;;  %v10851_v57 = vunpack.c.l.bf16 %v10850_v30  ;;  %v2348_v38 = vunpack.c.l.bf16 %v2284_v26  ;;  %v963_v30 = vld [vmem:[#allocation8 + $0x1f0] sm:$0xff]  ;;  %v1274_v26 = vpop.f32.mrf.mxu3 }
 0x6ee   :  { %1701 = vadd.xlane.f32.xlu0 %v8337_v46 }
 0x6ef   :  { %6109 = vpow2.f32 %v1575_v6 }
 0x6f0   :  { %6111 = vrcp.f32 %v8294_v17 }
 0x6f2   :  { %v1990_v16 = vpop.f32.mrf.mxu0 }
 0x6f3   :  { %v2108_v24 = vpack.c.bf16 %v1990_v16, %v1990_v16  ;;  %v2094_v16 = vpack.c.bf16 %v8118_v56, %v8118_v56  ;;  %v10853_v56 = vunpack.c.l.bf16 %v7625_v3 }
 0x6f5   :  { %v8344_v2 = vpop.eup %6109  ;;  %v2172_v19 = vunpack.c.l.bf16 %v2108_v24  ;;  %v8354_v24 = vadd.f32 %v1271_v14, %v962_v8 }
 0x6f6   :  { %1703 = vadd.xlane.f32.xlu0 %v8344_v2  ;;  %v6112_v20 = vpop.eup %6111 }
 0x6f7   :  { %v2236_v51 = vmul.f32 %v10851_v57, %v2172_v19  ;;  %v2158_v19 = vunpack.c.l.bf16 %v2094_v16 }
 0x6f8   :  { %v1678_v36 = vpop.xlane.xlu0 %1677 }
 0x6f9   :  { %v2300_v6 = vpack.c.bf16 %v2236_v51, %v2236_v51  ;;  %6113 = vrcp.f32 %v1678_v36  ;;  %v1829_v51 = vmul.f32 %v6112_v20, %v8176_v53  ;;  %v2222_v14 = vmul.f32 %v10853_v56, %v2158_v19  ;;  %v10854_v20 = vld [vmem:[#allocation52_spill] sm:$0xff] }
 0x6fa   :  { %v8350_v5 = vpop.f32.mrf.mxu0  ;;  %v10855_v53 = vunpack.c.l.bf16 %v10854_v20 }
 0x6fb   :  { %10852 = vst [vmem:[#allocation29_spill] sm:$0xff] %v8350_v5  ;;  %v2364_v32 = vunpack.c.l.bf16 %v2300_v6  ;;  %v8363_v6 = vadd.f32 %v1274_v26, %v963_v30  ;;  %v2286_v16 = vpack.c.bf16 %v2222_v14, %v2222_v14 }
 0x6fd   :  { %v8356_v13 = vadd.f32 %v2364_v32, %v2348_v38 }
 0x6fe   :  { %1401 = vmax.xlane.f32.xlu0 %v8354_v24 }
 0x6ff   :  { %v6114_v17 = vpop.eup %6113 }
 0x700   :  { %v1680_v57 = vpop.xlane.xlu0 %1679  ;;  %v1830_v36 = vmul.f32 %v6114_v17, %v8236_v15 }
 0x701   :  { %6115 = vrcp.f32 %v1680_v57 }
 0x702   :  { %v1995_v5 = vpop.f32.mrf.mxu0  ;;  %v1874_v61 = vpack.c.bf16 %v1830_v36, %v1829_v51  ;;  %6117 = vrcp.f32 %v1682_v62 }
 0x703   :  { %v2110_v8 = vpack.c.bf16 %v1995_v5, %v1995_v5  ;;  %v2350_v5 = vunpack.c.l.bf16 %v2286_v16 }
 0x704   :  { %2014 = vmatmul.bf16.gmra.mxu0 %v1874_v61 }
 0x705   :  { %v2174_v38 = vunpack.c.l.bf16 %v2110_v8 }
 0x706   :  { %1403 = vmax.xlane.f32.xlu0 %v8363_v6 }
 0x707   :  { %v2238_v15 = vmul.f32 %v10855_v53, %v2174_v38  ;;  %v6116_v19 = vpop.eup %6115 }
 0x708   :  { %v1378_v32 = vpop.xlane.xlu0 %1377  ;;  %v6118_v61 = vpop.eup %6117  ;;  %v1831_v56 = vmul.f32 %v6116_v19, %v8246_v0  ;;  %v2384_v0 = vpack.c.bf16 %v8157_v43, %v8157_v43 }
 0x709   :  { %v2302_v17 = vpack.c.bf16 %v2238_v15, %v2238_v15  ;;  %v1456_v51 = vsub.f32 %v8257_v48, %v1378_v32  ;;  %v1832_v14 = vmul.f32 %v6118_v61, %v8195_v28  ;;  %v10856_v28 = vld [vmem:[#allocation16_spill] sm:$0xff] }
 0x70a   :  { %v8369_v36 = vpop.f32.mrf.mxu0 }
 0x70b   :  { %v2366_v30 = vunpack.c.l.bf16 %v2302_v17  ;;  %v1569_v26 = vmul.f32 1.442695, %v1456_v51  ;;  %v1875_v48 = vpack.c.bf16 %v1832_v14, %v1831_v56 }
 0x70d   :  { %v8371_v57 = vadd.f32 %v2366_v30, %v2350_v5  ;;  %6119 = vpow2.f32 %v1569_v26 }
 0x710   :  { %v1380_v62 = vpop.xlane.xlu0 %1379 }
 0x711   :  { %v1457_v8 = vsub.f32 %v8266_v27, %v1380_v62  ;;  %v1686_v38 = vpop.xlane.xlu2 %1685  ;;  %v10857_v27 = vunpack.c.l.bf16 %v10856_v28  ;;  %v2400_v62 = vunpack.c.l.bf16 %v2384_v0 }
 0x712   :  { %v2000_v53 = vpop.f32.mrf.mxu0  ;;  %6121 = vrcp.f32 %v1686_v38 }
 0x713   :  { %v8376_v15 = vpop.eup %6119  ;;  %v1571_v32 = vmul.f32 1.442695, %v1457_v8  ;;  %v2112_v16 = vpack.c.bf16 %v2000_v53, %v2000_v53 }
 0x714   :  { %1697 = vadd.xlane.f32.xlu2 %v8376_v15  ;;  %2019 = vmatmul.bf16.gmra.mxu0 %v1875_v48 }
 0x715   :  { %6123 = vpow2.f32 %v1571_v32  ;;  %v2176_v17 = vunpack.c.l.bf16 %v2112_v16 }
 0x716   :  { %6125 = vrcp.f32 %v8327_v60  ;;  %v960_v60 = vld [vmem:[#allocation8 + $0x1d8] sm:$0xff] }
 0x717   :  { %v2240_v51 = vmul.f32 %v10857_v27, %v2176_v17  ;;  %v8394_v16 = vadd.f32 %v8329_v10, %v960_v60 }
 0x718   :  { %v1690_v19 = vpop.xlane.xlu0 %1689  ;;  %v6122_v26 = vpop.eup %6121 }
 0x719   :  { %v2304_v5 = vpack.c.bf16 %v2240_v51, %v2240_v51  ;;  %v1688_v30 = vpop.xlane.xlu2 %1687  ;;  %v1834_v43 = vmul.f32 %v6122_v26, %v8273_v37  ;;  %6127 = vrcp.f32 %v1690_v19  ;;  %v961_v26 = vld [vmem:[#allocation8 + $0x1e0] sm:$0xff] }
 0x71a   :  { %v8384_v61 = vpop.f32.mrf.mxu0  ;;  %6129 = vrcp.f32 %v1688_v30 }
 0x71b   :  { %v8386_v56 = vpop.eup %6123  ;;  %v2416_v14 = vunpack.c.l.bf16 %v2304_v5 }
 0x71c   :  { %1699 = vadd.xlane.f32.xlu2 %v8386_v56  ;;  %v6126_v8 = vpop.eup %6125 }
 0x71d   :  { %v8389_v38 = vadd.f32 %v2416_v14, %v2400_v62  ;;  %v1833_v48 = vmul.f32 %v6126_v8, %v8202_v25  ;;  %v2386_v25 = vpack.c.bf16 %v8214_v49, %v8214_v49  ;;  %v10858_v62 = vld [vmem:[#allocation21_spill] sm:$0xff] }
 0x71e   :  { %v10859_v10 = vunpack.c.l.bf16 %v10858_v62 }
 0x71f   :  { %v1876_v0 = vpack.c.bf16 %v1834_v43, %v1833_v48  ;;  %v6128_v19 = vpop.eup %6127  ;;  %v8404_v48 = vadd.f32 %v8339_v52, %v961_v26 }
 0x720   :  { %v1692_v53 = vpop.xlane.xlu0 %1691 }
 0x721   :  { %v1386_v32 = vpop.xlane.xlu2 %1385 }
 0x722   :  { %v1460_v17 = vsub.f32 %v8296_v12, %v1386_v32  ;;  %v2005_v27 = vpop.f32.mrf.mxu0 }
 0x723   :  { %v2114_v51 = vpack.c.bf16 %v2005_v27, %v2005_v27  ;;  %v2402_v27 = vunpack.c.l.bf16 %v2386_v25 }
 0x724   :  { %v1577_v5 = vmul.f32 1.442695, %v1460_v17  ;;  %1397 = vmax.xlane.f32.xlu2 %v8394_v16  ;;  %2024 = vmatmul.bf16.gmra.mxu0 %v1876_v0  ;;  %v6130_v17 = vpop.eup %6129 }
 0x725   :  { %v2178_v37 = vunpack.c.l.bf16 %v2114_v51 }
 0x726   :  { %6131 = vpow2.f32 %v1577_v5 }
 0x727   :  { %v2242_v14 = vmul.f32 %v10859_v10, %v2178_v37 }
 0x728   :  { %v1390_v8 = vpop.xlane.xlu0 %1389 }
 0x729   :  { %v2306_v12 = vpack.c.bf16 %v2242_v14, %v2242_v14  ;;  %v1462_v43 = vsub.f32 %v8304_v33, %v1390_v8  ;;  %v1388_v60 = vpop.xlane.xlu2 %1387  ;;  %v1835_v33 = vmul.f32 %v6130_v17, %v8286_v21  ;;  %v964_v17 = vld [vmem:[#allocation8 + $0x1f8] sm:$0xff] }
 0x72a   :  { %v1461_v30 = vsub.f32 %v8306_v22, %v1388_v60  ;;  %v8407_v32 = vpop.f32.mrf.mxu0  ;;  %v1836_v22 = vmul.f32 %v6128_v19, %v8282_v42  ;;  %v2388_v42 = vpack.c.bf16 %v8231_v44, %v8231_v44 }
 0x72b   :  { %v2418_v0 = vunpack.c.l.bf16 %v2306_v12  ;;  %v1581_v49 = vmul.f32 1.442695, %v1462_v43 }
 0x72c   :  { %v8409_v51 = vpop.eup %6131  ;;  %v1579_v5 = vmul.f32 1.442695, %v1461_v30  ;;  %1399 = vmax.xlane.f32.xlu2 %v8404_v48  ;;  %v1877_v10 = vpack.c.bf16 %v1836_v22, %v1835_v33  ;;  %v2404_v22 = vunpack.c.l.bf16 %v2388_v42 }
 0x72d   :  { %v8412_v37 = vadd.f32 %v2418_v0, %v2402_v27  ;;  %6133 = vpow2.f32 %v1581_v49  ;;  %1705 = vadd.xlane.f32.xlu1 %v8409_v51  ;;  %v1276_v27 = vpop.f32.mrf.mxu3 }
 0x72e   :  { %6135 = vpow2.f32 %v1579_v5  ;;  %v8430_v33 = vadd.f32 %v1276_v27, %v964_v17 }
 0x730   :  { %v1392_v52 = vpop.xlane.xlu0 %1391 }
 0x731   :  { %v1463_v26 = vsub.f32 %v8311_v29, %v1392_v52  ;;  %v10860_v29 = vld [vmem:[#allocation26_spill] sm:$0xff] }
 0x732   :  { %v2010_v25 = vpop.f32.mrf.mxu0  ;;  %v10861_v19 = vunpack.c.l.bf16 %v10860_v29 }
 0x733   :  { %v8418_v14 = vpop.eup %6133  ;;  %v1583_v8 = vmul.f32 1.442695, %v1463_v26  ;;  %v2116_v12 = vpack.c.bf16 %v2010_v25, %v2010_v25  ;;  %v1694_v43 = vpop.xlane.xlu1 %1693 }
 0x734   :  { %v8420_v60 = vpop.eup %6135  ;;  %6137 = vrcp.f32 %v1694_v43  ;;  %1709 = vadd.xlane.f32.xlu2 %v8418_v14  ;;  %2029 = vmatmul.bf16.gmra.mxu0 %v1877_v10 }
 0x735   :  { %6139 = vpow2.f32 %v1583_v8  ;;  %v2180_v21 = vunpack.c.l.bf16 %v2116_v12  ;;  %1707 = vadd.xlane.f32.xlu1 %v8420_v60 }
 0x736   :  { %6141 = vrcp.f32 %v1692_v53 }
 0x737   :  { %v2244_v30 = vmul.f32 %v10861_v19, %v2180_v21 }
 0x739   :  { %v2308_v0 = vpack.c.bf16 %v2244_v30, %v2244_v30 }
 0x73a   :  { %v6138_v49 = vpop.eup %6137 }
 0x73b   :  { %v8428_v5 = vpop.eup %6139  ;;  %v2420_v52 = vunpack.c.l.bf16 %v2308_v0  ;;  %v1696_v26 = vpop.xlane.xlu1 %1695  ;;  %v1838_v44 = vmul.f32 %v6138_v49, %v8315_v11 }
 0x73c   :  { %1711 = vadd.xlane.f32.xlu2 %v8428_v5  ;;  %v6142_v25 = vpop.eup %6141 }
 0x73d   :  { %v8433_v10 = vadd.f32 %v2420_v52, %v2404_v22  ;;  %1405 = vmax.xlane.f32.xlu1 %v8430_v33  ;;  %v1837_v53 = vmul.f32 %v6142_v25, %v8292_v31  ;;  %v8449_v22 = vpop.f32.mrf.mxu0 }
 0x73f   :  { %v1878_v8 = vpack.c.bf16 %v1838_v44, %v1837_v53  ;;  %v2390_v53 = vpack.c.bf16 %v8251_v34, %v8251_v34 }
 0x743   :  { %v1394_v12 = vpop.xlane.xlu1 %1393 }
 0x744   :  { %v1464_v43 = vsub.f32 %v8321_v45, %v1394_v12  ;;  %2034 = vmatmul.bf16.gmra.mxu0 %v1878_v8  ;;  %v10862_v8 = vld [vmem:[#allocation31_spill] sm:$0xff] }
 0x745   :  { %v10863_v12 = vunpack.c.l.bf16 %v10862_v8 }
 0x746   :  { %v1585_v21 = vmul.f32 1.442695, %v1464_v43 }
 0x748   :  { %6143 = vpow2.f32 %v1585_v21 }
 0x74b   :  { %v1396_v42 = vpop.xlane.xlu1 %1395 }
 0x74c   :  { %v1465_v19 = vsub.f32 %v8324_v54, %v1396_v42 }
 0x74e   :  { %v8440_v30 = vpop.eup %6143  ;;  %v1587_v17 = vmul.f32 1.442695, %v1465_v19  ;;  %v2406_v19 = vunpack.c.l.bf16 %v2390_v53  ;;  %v10864_v53 = vld [vmem:[#allocation36_spill] sm:$0xff] }
 0x74f   :  { %1713 = vadd.xlane.f32.xlu0 %v8440_v30 }
 0x750   :  { %6145 = vpow2.f32 %v1587_v17 }
 0x756   :  { %v8443_v27 = vpop.eup %6145 }
 0x757   :  { %1715 = vadd.xlane.f32.xlu1 %v8443_v27 }
 0x761   :  { %v1702_v31 = vpop.xlane.xlu0 %1701 }
 0x769   :  { %v8446_v11 = vpop.xlane.xlu0 %1703 }
 0x771   :  { %v1402_v45 = vpop.xlane.xlu0 %1401 }
 0x772   :  { %v1468_v0 = vsub.f32 %v8354_v24, %v1402_v45 }
 0x774   :  { %v1593_v49 = vmul.f32 1.442695, %v1468_v0 }
 0x776   :  { %6147 = vpow2.f32 %v1593_v49 }
 0x777   :  { %6149 = vrcp.f32 %v1696_v26 }
 0x77c   :  { %v8451_v54 = vpop.eup %6147 }
 0x77d   :  { %1721 = vadd.xlane.f32.xlu1 %v8451_v54  ;;  %v6150_v45 = vpop.eup %6149 }
 0x781   :  { %v2015_v52 = vpop.f32.mrf.mxu0 }
 0x782   :  { %v2118_v25 = vpack.c.bf16 %v2015_v52, %v2015_v52 }
 0x784   :  { %v2182_v44 = vunpack.c.l.bf16 %v2118_v25  ;;  %v1839_v25 = vmul.f32 %v6150_v45, %v8318_v50 }
 0x786   :  { %v2246_v43 = vmul.f32 %v10863_v12, %v2182_v44  ;;  %v2392_v12 = vpack.c.bf16 %v8276_v35, %v8276_v35 }
 0x787   :  { %v1698_v21 = vpop.xlane.xlu2 %1697 }
 0x788   :  { %v2310_v24 = vpack.c.bf16 %v2246_v43, %v2246_v43  ;;  %6151 = vrcp.f32 %v1698_v21  ;;  %v10865_v43 = vunpack.c.l.bf16 %v10864_v53 }
 0x789   :  { %v8458_v42 = vpop.f32.mrf.mxu0 }
 0x78a   :  { %v2422_v17 = vunpack.c.l.bf16 %v2310_v24  ;;  %v1404_v24 = vpop.xlane.xlu0 %1403 }
 0x78c   :  { %v8460_v0 = vadd.f32 %v2422_v17, %v2406_v19 }
 0x78e   :  { %v6152_v49 = vpop.eup %6151 }
 0x78f   :  { %v1700_v52 = vpop.xlane.xlu2 %1699  ;;  %v1840_v34 = vmul.f32 %v6152_v49, %v8376_v15  ;;  %v2408_v49 = vunpack.c.l.bf16 %v2392_v12 }
 0x790   :  { %6153 = vrcp.f32 %v1700_v52 }
 0x791   :  { %v2020_v26 = vpop.f32.mrf.mxu0  ;;  %v1879_v3 = vpack.c.bf16 %v1840_v34, %v1839_v25  ;;  %6155 = vrcp.f32 %v1702_v31 }
 0x792   :  { %v2120_v20 = vpack.c.bf16 %v2020_v26, %v2020_v26 }
 0x793   :  { %2039 = vmatmul.bf16.gmra.mxu0 %v1879_v3  ;;  %v1469_v3 = vsub.f32 %v8363_v6, %v1404_v24 }
 0x794   :  { %v2184_v44 = vunpack.c.l.bf16 %v2120_v20 }
 0x795   :  { %v1595_v31 = vmul.f32 1.442695, %v1469_v3 }
 0x796   :  { %v2248_v21 = vmul.f32 %v10865_v43, %v2184_v44  ;;  %v6154_v15 = vpop.eup %6153 }
 0x797   :  { %v1398_v19 = vpop.xlane.xlu2 %1397  ;;  %v6156_v25 = vpop.eup %6155  ;;  %v1841_v35 = vmul.f32 %v6154_v15, %v8386_v56 }
 0x798   :  { %v2312_v17 = vpack.c.bf16 %v2248_v21, %v2248_v21  ;;  %v1466_v50 = vsub.f32 %v8394_v16, %v1398_v19  ;;  %v1842_v44 = vmul.f32 %v6156_v25, %v8337_v46  ;;  %v10866_v46 = vld [vmem:[#allocation41_spill] sm:$0xff] }
 0x799   :  { %v8469_v45 = vpop.f32.mrf.mxu0 }
 0x79a   :  { %v2424_v52 = vunpack.c.l.bf16 %v2312_v17  ;;  %v1589_v20 = vmul.f32 1.442695, %v1466_v50  ;;  %v1880_v19 = vpack.c.bf16 %v1842_v44, %v1841_v35  ;;  %v2394_v17 = vpack.c.bf16 %v8299_v9, %v8299_v9 }
 0x79c   :  { %v8472_v34 = vadd.f32 %v2424_v52, %v2408_v49  ;;  %6157 = vpow2.f32 %v1589_v20  ;;  %v2410_v35 = vunpack.c.l.bf16 %v2394_v17 }
 0x79d   :  { %6159 = vpow2.f32 %v1595_v31 }
 0x79f   :  { %v1400_v26 = vpop.xlane.xlu2 %1399 }
 0x7a0   :  { %v1706_v43 = vpop.xlane.xlu1 %1705  ;;  %v1467_v16 = vsub.f32 %v8404_v48, %v1400_v26  ;;  %v10867_v48 = vunpack.c.l.bf16 %v10866_v46 }
 0x7a1   :  { %v2025_v21 = vpop.f32.mrf.mxu0  ;;  %6161 = vrcp.f32 %v1706_v43 }
 0x7a2   :  { %v8477_v12 = vpop.eup %6157  ;;  %v1591_v6 = vmul.f32 1.442695, %v1467_v16  ;;  %v2122_v24 = vpack.c.bf16 %v2025_v21, %v2025_v21 }
 0x7a3   :  { %2044 = vmatmul.bf16.gmra.mxu0 %v1880_v19  ;;  %1717 = vadd.xlane.f32.xlu2 %v8477_v12  ;;  %v8485_v15 = vpop.eup %6159 }
 0x7a4   :  { %6163 = vpow2.f32 %v1591_v6  ;;  %v2186_v56 = vunpack.c.l.bf16 %v2122_v24 }
 0x7a5   :  { %6165 = vrcp.f32 %v8446_v11 }
 0x7a6   :  { %v2250_v50 = vmul.f32 %v10867_v48, %v2186_v56  ;;  %v2396_v48 = vpack.c.bf16 %v8356_v13, %v8356_v13 }
 0x7a7   :  { %v6162_v52 = vpop.eup %6161  ;;  %v1710_v43 = vpop.xlane.xlu2 %1709 }
 0x7a8   :  { %v2314_v49 = vpack.c.bf16 %v2250_v50, %v2250_v50  ;;  %v1708_v3 = vpop.xlane.xlu1 %1707  ;;  %v1844_v26 = vmul.f32 %v6162_v52, %v8409_v51  ;;  %6167 = vrcp.f32 %v1710_v43  ;;  %v10868_v50 = vld [vmem:[#allocation46_spill] sm:$0xff] }
 0x7a9   :  { %v8487_v20 = vpop.f32.mrf.mxu0  ;;  %6169 = vrcp.f32 %v1708_v3  ;;  %v10869_v51 = vunpack.c.l.bf16 %v10868_v50 }
 0x7aa   :  { %v8489_v25 = vpop.eup %6163  ;;  %v2426_v31 = vunpack.c.l.bf16 %v2314_v49 }
 0x7ab   :  { %1723 = vadd.xlane.f32.xlu2 %v8485_v15  ;;  %1719 = vadd.xlane.f32.xlu0 %v8489_v25  ;;  %v6166_v9 = vpop.eup %6165 }
 0x7ac   :  { %v8493_v11 = vadd.f32 %v2426_v31, %v2410_v35  ;;  %v1843_v44 = vmul.f32 %v6166_v9, %v8344_v2  ;;  %v2412_v31 = vunpack.c.l.bf16 %v2396_v48 }
 0x7ae   :  { %v1881_v6 = vpack.c.bf16 %v1844_v26, %v1843_v44  ;;  %v6168_v52 = vpop.eup %6167 }
 0x7af   :  { %v1846_v13 = vmul.f32 %v6168_v52, %v8418_v14 }
 0x7b0   :  { %v1406_v16 = vpop.xlane.xlu1 %1405 }
 0x7b1   :  { %v1470_v21 = vsub.f32 %v8430_v33, %v1406_v16  ;;  %v2030_v19 = vpop.f32.mrf.mxu0  ;;  %v6170_v33 = vpop.eup %6169 }
 0x7b2   :  { %v2124_v24 = vpack.c.bf16 %v2030_v19, %v2030_v19  ;;  %v1845_v3 = vmul.f32 %v6170_v33, %v8420_v60 }
 0x7b3   :  { %v1597_v56 = vmul.f32 1.442695, %v1470_v21  ;;  %2049 = vmatmul.bf16.gmra.mxu0 %v1881_v6  ;;  %v1712_v6 = vpop.xlane.xlu2 %1711 }
 0x7b4   :  { %v2188_v17 = vunpack.c.l.bf16 %v2124_v24  ;;  %v1882_v16 = vpack.c.bf16 %v1846_v13, %v1845_v3  ;;  %v2081_v13 = vpack.c.bf16 %v8033_v39, %v8033_v39  ;;  %v2113_v39 = vpack.c.bf16 %v8384_v61, %v8384_v61 }
 0x7b5   :  { %6171 = vpow2.f32 %v1597_v56  ;;  %v2398_v56 = vpack.c.bf16 %v8371_v57, %v8371_v57  ;;  %v2097_v57 = vpack.c.bf16 %v8190_v7, %v8190_v7 }
 0x7b6   :  { %v2252_v49 = vmul.f32 %v10869_v51, %v2188_v17  ;;  %v10870_v17 = vld [vmem:[#allocation53_spill] sm:$0xff] }
 0x7b7   :  { %v10871_v48 = vunpack.c.l.bf16 %v10870_v17  ;;  %v2414_v60 = vunpack.c.l.bf16 %v2398_v56  ;;  %v6477_v56 = vld [vmem:[#allocation5 + $0x78] sm:$0xff] }
 0x7b8   :  { %v2316_v2 = vpack.c.bf16 %v2252_v49, %v2252_v49 }
 0x7b9   :  { %v8502_v35 = vpop.f32.mrf.mxu0 }
 0x7ba   :  { %v2428_v9 = vunpack.c.l.bf16 %v2316_v2 }
 0x7bb   :  { %v8504_v26 = vpop.eup %6171 }
 0x7bc   :  { %v8506_v44 = vadd.f32 %v2428_v9, %v2412_v31  ;;  %1725 = vadd.xlane.f32.xlu0 %v8504_v26 }
 0x7c1   :  { %v2035_v43 = vpop.f32.mrf.mxu0 }
 0x7c2   :  { %v2126_v21 = vpack.c.bf16 %v2035_v43, %v2035_v43  ;;  %v1714_v19 = vpop.xlane.xlu0 %1713  ;;  %v2161_v43 = vunpack.c.l.bf16 %v2097_v57 }
 0x7c3   :  { %2054 = vmatmul.bf16.gmra.mxu0 %v1882_v16  ;;  %6173 = vrcp.f32 %v1714_v19  ;;  %v5635_v16 = vld [vmem:[%s10577_s3 + $0x8] sm:$0xff]  ;;  %v10872_v19 = vunpack.c.h.bf16 %v10831_v40  ;;  %v6478_v40 = vld [vmem:[#allocation5 + $0x70] sm:$0xff] }
 0x7c4   :  { %v2190_v24 = vunpack.c.l.bf16 %v2126_v21  ;;  %6175 = vrcp.f32 %v1712_v6  ;;  %v2145_v21 = vunpack.c.l.bf16 %v2081_v13  ;;  %2567 = vmatpush.bf16.msrb.mxu1 %v5635_v16  ;;  %v10873_v6 = vunpack.c.h.bf16 %v7526_v63  ;;  %v6481_v13 = vld [vmem:[#allocation5 + $0x58] sm:$0xff] }
 0x7c5   :  { %v2083_v63 = vpack.c.bf16 %v8054_v23, %v8054_v23 }
 0x7c6   :  { %v2254_v51 = vmul.f32 %v10871_v48, %v2190_v24  ;;  %v2209_v7 = vmul.f32 %v10873_v6, %v2145_v21 }
 0x7c8   :  { %v2318_v49 = vpack.c.bf16 %v2254_v51, %v2254_v51  ;;  %v2273_v51 = vpack.c.bf16 %v2209_v7, %v2209_v7 }
 0x7c9   :  { %v6174_v2 = vpop.eup %6173  ;;  %v8535_v48 = vpop.f32.mrf.mxu0 }
 0x7ca   :  { %v2430_v33 = vunpack.c.l.bf16 %v2318_v49  ;;  %v6176_v14 = vpop.eup %6175  ;;  %v1848_v31 = vmul.f32 %v6174_v2, %v8440_v30  ;;  %v2225_v30 = vmul.f32 %v10872_v19, %v2161_v43  ;;  %v2177_v49 = vunpack.c.l.bf16 %v2113_v39  ;;  %v6482_v19 = vld [vmem:[#allocation5 + $0x50] sm:$0xff]  ;;  %v1716_v23 = vpop.xlane.xlu1 %1715 }
 0x7cb   :  { %v1847_v9 = vmul.f32 %v6176_v14, %v8428_v5  ;;  %v5634_v5 = vld [vmem:[%s10577_s3] sm:$0xff]  ;;  %v2099_v2 = vpack.c.bf16 %v8208_v18, %v8208_v18  ;;  %v2337_v61 = vunpack.c.l.bf16 %v2273_v51  ;;  %v10874_v14 = vunpack.c.h.bf16 %v10856_v28  ;;  %v6483_v28 = vld [vmem:[#allocation5 + $0x48] sm:$0xff] }
 0x7cc   :  { %v8515_v52 = vadd.f32 %v2430_v33, %v2414_v60  ;;  %2568 = vmatpush.bf16.msrb.mxu1 %v5634_v5  ;;  %v2289_v24 = vpack.c.bf16 %v2225_v30, %v2225_v30  ;;  %v6479_v33 = vld [vmem:[#allocation5 + $0x68] sm:$0xff]  ;;  %v2147_v43 = vunpack.c.l.bf16 %v2083_v63  ;;  %v10875_v30 = vunpack.c.h.bf16 %v10833_v47  ;;  %v10877_v47 = vld [vmem:[#allocation17_spill] sm:$0xff] }
 0x7cd   :  { %v1883_v3 = vpack.c.bf16 %v1848_v31, %v1847_v9  ;;  %v2241_v31 = vmul.f32 %v10874_v14, %v2177_v49  ;;  %v6480_v9 = vld [vmem:[#allocation5 + $0x60] sm:$0xff]  ;;  %v10876_v39 = vunpack.c.h.bf16 %v7541_v55  ;;  %v2115_v51 = vpack.c.bf16 %v8407_v32, %v8407_v32 }
 0x7ce   :  { %v2353_v60 = vunpack.c.l.bf16 %v2289_v24  ;;  %6177 = vrcp.f32 %v1716_v23  ;;  %v6484_v49 = vld [vmem:[#allocation5 + $0x40] sm:$0xff]  ;;  %v2448_v23 = vpack.c.bf16 %v8389_v38, %v8389_v38 }
 0x7cf   :  { %v2305_v21 = vpack.c.bf16 %v2241_v31, %v2241_v31  ;;  %v2211_v24 = vmul.f32 %v10876_v39, %v2147_v43 }
 0x7d0   :  { %2723 = vmatpush.msra.mxu1 %v6477_v56  ;;  %v2369_v57 = vadd.f32 %v2353_v60, %v2337_v61  ;;  %v6485_v61 = vld [vmem:[#allocation5 + $0x38] sm:$0xff] }
 0x7d1   :  { %v2417_v56 = vunpack.c.l.bf16 %v2305_v21  ;;  %v2275_v14 = vpack.c.bf16 %v2211_v24, %v2211_v24  ;;  %v10881_v24 = vunpack.c.h.bf16 %v10877_v47 }
 0x7d2   :  { %2724 = vmatpush.msra.mxu1 %v6478_v40  ;;  %v2385_v6 = vpack.c.bf16 %v2369_v57, %v2369_v57  ;;  %v6486_v57 = vld [vmem:[#allocation5 + $0x30] sm:$0xff] }
 0x7d3   :  { %2059 = vmatmul.bf16.gmra.mxu0 %v1883_v3  ;;  %v2163_v3 = vunpack.c.l.bf16 %v2099_v2 }
 0x7d4   :  { %2725 = vmatpush.msra.mxu1 %v6479_v33  ;;  %v2401_v60 = vunpack.c.l.bf16 %v2385_v6  ;;  %v10878_v33 = vunpack.c.l.bf16 %v10877_v47  ;;  %v6178_v43 = vpop.eup %6177 }
 0x7d5   :  { %v2227_v5 = vmul.f32 %v10875_v30, %v2163_v3  ;;  %v10879_v30 = vld [vmem:[#allocation49_spill] sm:$0xff] }
 0x7d6   :  { %2726 = vmatpush.msra.mxu1 %v6480_v9  ;;  %v2433_v55 = vadd.f32 %v2417_v56, %v2401_v60  ;;  %v2179_v9 = vunpack.c.l.bf16 %v2115_v51  ;;  %v6488_v56 = vld [vmem:[#allocation5 + $0x20] sm:$0xff] }
 0x7d7   :  { %v2291_v40 = vpack.c.bf16 %v2227_v5, %v2227_v5  ;;  %v2085_v5 = vpack.c.bf16 %v10879_v30, %v10879_v30 }
 0x7d8   :  { %2727 = vmatpush.msra.mxu1 %v6481_v13  ;;  %v2101_v13 = vpack.c.bf16 %v8227_v4, %v8227_v4 }
 0x7d9   :  { %v2355_v32 = vunpack.c.l.bf16 %v2291_v40  ;;  %v1849_v40 = vmul.f32 %v6178_v43, %v8443_v27  ;;  %v2149_v38 = vunpack.c.l.bf16 %v2085_v5  ;;  %v10882_v27 = vunpack.c.h.bf16 %v10836_v59 }
 0x7da   :  { %2728 = vmatpush.msra.mxu1 %v6482_v19  ;;  %v2339_v19 = vunpack.c.l.bf16 %v2275_v14 }
 0x7dc   :  { %2729 = vmatpush.msra.mxu1 %v6483_v28  ;;  %v10880_v28 = vunpack.c.h.bf16 %v10858_v62  ;;  %v2371_v51 = vadd.f32 %v2355_v32, %v2339_v19  ;;  %v10883_v19 = vunpack.c.h.bf16 %v7555_v58 }
 0x7de   :  { %2730 = vmatpush.msra.mxu1 %v6484_v49  ;;  %v2243_v39 = vmul.f32 %v10880_v28, %v2179_v9  ;;  %v2165_v49 = vunpack.c.l.bf16 %v2101_v13  ;;  %v2387_v32 = vpack.c.bf16 %v2371_v51, %v2371_v51  ;;  %v2213_v30 = vmul.f32 %v10883_v19, %v2149_v38 }
 0x7e0   :  { %2731 = vmatpush.msra.mxu1 %v6485_v61  ;;  %v2464_v61 = vunpack.c.l.bf16 %v2448_v23  ;;  %v2307_v47 = vpack.c.bf16 %v2243_v39, %v2243_v39  ;;  %v2229_v13 = vmul.f32 %v10882_v27, %v2165_v49  ;;  %v2117_v23 = vpack.c.bf16 %v8449_v22, %v8449_v22  ;;  %v10884_v39 = vld [vmem:[#allocation22_spill] sm:$0xff] }
 0x7e1   :  { %v2403_v28 = vunpack.c.l.bf16 %v2387_v32  ;;  %v2103_v22 = vpack.c.bf16 %v8244_v1, %v8244_v1 }
 0x7e2   :  { %2732 = vmatpush.msra.mxu1 %v6486_v57  ;;  %v6490_v57 = vld [vmem:[#allocation5 + $0x10] sm:$0xff]  ;;  %v2419_v5 = vunpack.c.l.bf16 %v2307_v47  ;;  %v2293_v59 = vpack.c.bf16 %v2229_v13, %v2229_v13 }
 0x7e3   :  { %v2167_v27 = vunpack.c.l.bf16 %v2103_v22 }
 0x7e4   :  { %v2435_v58 = vadd.f32 %v2419_v5, %v2403_v28 }
 0x7e6   :  { %v2451_v47 = vpack.c.bf16 %v2435_v58, %v2435_v58 }
 0x810   :  { %v2040_v16 = vpop.f32.mrf.mxu0 }
 0x811   :  { %v2128_v18 = vpack.c.bf16 %v2040_v16, %v2040_v16 }
 0x813   :  { %v2192_v7 = vunpack.c.l.bf16 %v2128_v18  ;;  %v6487_v18 = vld [vmem:[#allocation5 + $0x28] sm:$0xff] }
 0x814   :  { %2733 = vmatpush.msra.mxu1 %v6487_v18  ;;  %v6491_v18 = vld [vmem:[#allocation5 + $0x8] sm:$0xff] }
 0x815   :  { %v2256_v63 = vmul.f32 %v10878_v33, %v2192_v7  ;;  %v2449_v7 = vpack.c.bf16 %v2433_v55, %v2433_v55 }
 0x816   :  { %v1718_v2 = vpop.xlane.xlu2 %1717  ;;  %2734 = vmatpush.msra.mxu1 %v6488_v56  ;;  %v2277_v56 = vpack.c.bf16 %v2213_v30, %v2213_v30 }
 0x817   :  { %6179 = vrcp.f32 %v1718_v2  ;;  %v2320_v16 = vpack.c.bf16 %v2256_v63, %v2256_v63  ;;  %v6489_v63 = vld [vmem:[#allocation5 + $0x18] sm:$0xff]  ;;  %v2465_v55 = vunpack.c.l.bf16 %v2449_v7  ;;  %v6492_v7 = vld [vmem:[#allocation5] sm:$0xff] }
 0x818   :  { %v2042_v31 = vpop.f32.mrf.mxu0  ;;  %2735 = vmatpush.msra.mxu1 %v6489_v63 }
 0x819   :  { %v2129_v3 = vpack.c.bf16 %v2042_v31, %v2042_v31  ;;  %v2480_v60 = vunpack.c.l.bf16 %v2320_v16 }
 0x81a   :  { %2736 = vmatpush.msra.mxu1 %v6490_v57  ;;  %v10888_v57 = vunpack.c.h.bf16 %v10884_v39 }
 0x81b   :  { %v2193_v21 = vunpack.c.l.bf16 %v2129_v3  ;;  %v2496_v43 = vadd.f32 %v2480_v60, %v2464_v61  ;;  %v2357_v60 = vunpack.c.l.bf16 %v2293_v59  ;;  %v2341_v61 = vunpack.c.l.bf16 %v2277_v56 }
 0x81c   :  { %2737 = vmatpush.msra.mxu1 %v6491_v18 }
 0x81d   :  { %v6180_v6 = vpop.eup %6179  ;;  %v2257_v4 = vmul.f32 %v10881_v24, %v2193_v21  ;;  %v10885_v24 = vunpack.c.l.bf16 %v10884_v39  ;;  %v2373_v1 = vadd.f32 %v2357_v60, %v2341_v61  ;;  %v10892_v60 = vld [vmem:[#allocation27_spill] sm:$0xff] }
 0x81e   :  { %v1850_v2 = vmul.f32 %v6180_v6, %v8477_v12  ;;  %v1720_v14 = vpop.xlane.xlu0 %1719  ;;  %v1722_v12 = vpop.xlane.xlu1 %1721  ;;  %2738 = vmatpush.msra.mxu1 %v6492_v7 }
 0x81f   :  { %v2321_v33 = vpack.c.bf16 %v2257_v4, %v2257_v4  ;;  %6181 = vrcp.f32 %v1720_v14  ;;  %v10886_v14 = vld [vmem:[#allocation48_spill] sm:$0xff]  ;;  %v1724_v59 = vpop.xlane.xlu2 %1723 }
 0x820   :  { %v2045_v62 = vpop.f32.mrf.mxu0  ;;  %v1884_v31 = vpack.c.bf16 %v1850_v2, %v1849_v40  ;;  %6183 = vrcp.f32 %v1722_v12  ;;  %v2181_v40 = vunpack.c.l.bf16 %v2117_v23  ;;  %v2467_v23 = vunpack.c.l.bf16 %v2451_v47  ;;  %v10894_v47 = vld [vmem:[#allocation24_spill] sm:$0xff] }
 0x821   :  { %v2481_v9 = vunpack.c.l.bf16 %v2321_v33  ;;  %v2130_v3 = vpack.c.bf16 %v2045_v62, %v2045_v62  ;;  %v2087_v62 = vpack.c.bf16 %v10886_v14, %v10886_v14 }
 0x822   :  { %2064 = vmatmul.bf16.gmra.mxu0 %v1884_v31  ;;  %v2450_v31 = vpack.c.bf16 %v8412_v37, %v8412_v37 }
 0x823   :  { %v2497_v16 = vadd.f32 %v2481_v9, %v2465_v55  ;;  %v2194_v21 = vunpack.c.l.bf16 %v2130_v3  ;;  %v10887_v9 = vunpack.c.h.bf16 %v10860_v29  ;;  %v2389_v29 = vpack.c.bf16 %v2373_v1, %v2373_v1 }
 0x825   :  { %v2512_v6 = vpack.c.bf16 %v2497_v16, %v2496_v43  ;;  %v2258_v4 = vmul.f32 %v10885_v24, %v2194_v21  ;;  %v6182_v49 = vpop.eup %6181  ;;  %v2245_v3 = vmul.f32 %v10887_v9, %v2181_v40  ;;  %v2151_v16 = vunpack.c.l.bf16 %v2087_v62  ;;  %v10890_v24 = vld [vmem:[#allocation59_spill] sm:$0xff] }
 0x826   :  { %v6184_v33 = vpop.eup %6183  ;;  %v1851_v55 = vmul.f32 %v6182_v49, %v8489_v25  ;;  %v2466_v21 = vunpack.c.l.bf16 %v2450_v31  ;;  %v2119_v49 = vpack.c.bf16 %v8458_v42, %v8458_v42  ;;  %v2105_v42 = vpack.c.bf16 %v10894_v47, %v10894_v47 }
 0x827   :  { %5296 = vmatmul.msk.bf16.vlgmr.msrb.gmra.mxu1 %vm989_vm0, %v2512_v6  ;;  %v2322_v63 = vpack.c.bf16 %v2258_v4, %v2258_v4  ;;  %v1852_v13 = vmul.f32 %v6184_v33, %v8451_v54  ;;  %v2309_v30 = vpack.c.bf16 %v2245_v3, %v2245_v3  ;;  %v10889_v6 = vunpack.c.h.bf16 %v10839_v41 }
 0x828   :  { %v2047_v51 = vpop.f32.mrf.mxu0  ;;  %v10891_v4 = vunpack.c.h.bf16 %v10890_v24  ;;  %v10893_v41 = vunpack.c.l.bf16 %v10892_v60  ;;  %v2183_v14 = vunpack.c.l.bf16 %v2119_v49 }
 0x829   :  { %v2131_v2 = vpack.c.bf16 %v2047_v51, %v2047_v51  ;;  %v2482_v12 = vunpack.c.l.bf16 %v2322_v63  ;;  %v1885_v37 = vpack.c.bf16 %v1852_v13, %v1851_v55  ;;  %v2231_v7 = vmul.f32 %v10889_v6, %v2167_v27 }
 0x82a   :  { %v2215_v56 = vmul.f32 %v10891_v4, %v2151_v16  ;;  %v2421_v51 = vunpack.c.l.bf16 %v2309_v30  ;;  %v2452_v27 = vpack.c.bf16 %v8433_v10, %v8433_v10  ;;  %v2169_v30 = vunpack.c.l.bf16 %v2105_v42 }
 0x82b   :  { %v2195_v38 = vunpack.c.l.bf16 %v2131_v2  ;;  %v2498_v54 = vadd.f32 %v2482_v12, %v2466_v21  ;;  %v2295_v40 = vpack.c.bf16 %v2231_v7, %v2231_v7  ;;  %v2405_v2 = vunpack.c.l.bf16 %v2389_v29 }
 0x82c   :  { %v2279_v33 = vpack.c.bf16 %v2215_v56, %v2215_v56  ;;  %v10897_v21 = vunpack.c.h.bf16 %v10892_v60  ;;  %v2468_v29 = vunpack.c.l.bf16 %v2452_v27 }
 0x82d   :  { %v2259_v32 = vmul.f32 %v10888_v57, %v2195_v38  ;;  %v2437_v61 = vadd.f32 %v2421_v51, %v2405_v2  ;;  %v2359_v31 = vunpack.c.l.bf16 %v2295_v40  ;;  %v2121_v2 = vpack.c.bf16 %v8469_v45, %v8469_v45 }
 0x82e   :  { %v2343_v57 = vunpack.c.l.bf16 %v2279_v33  ;;  %v10902_v33 = vld [vmem:[#allocation32_spill] sm:$0xff] }
 0x82f   :  { %v2323_v43 = vpack.c.bf16 %v2259_v32, %v2259_v32  ;;  %v1726_v18 = vpop.xlane.xlu0 %1725  ;;  %v10895_v32 = vld [vmem:[#allocation56_spill] sm:$0xff]  ;;  %v2453_v12 = vpack.c.bf16 %v2437_v61, %v2437_v61  ;;  %v10905_v27 = vunpack.c.h.bf16 %v10902_v33 }
 0x830   :  { %v2050_v19 = vpop.f32.mrf.mxu0  ;;  %6185 = vrcp.f32 %v1726_v18  ;;  %v2089_v1 = vpack.c.bf16 %v10895_v32, %v10895_v32  ;;  %v10904_v32 = vunpack.c.h.bf16 %v10864_v53 }
 0x831   :  { %v2483_v25 = vunpack.c.l.bf16 %v2323_v43  ;;  %v2132_v5 = vpack.c.bf16 %v2050_v19, %v2050_v19  ;;  %6187 = vrcp.f32 %v1724_v59  ;;  %v10896_v43 = vunpack.c.h.bf16 %v10862_v8  ;;  %v10898_v8 = vld [vmem:[#allocation35_spill] sm:$0xff] }
 0x832   :  { %2069 = vmatmul.bf16.gmra.mxu0 %v1885_v37  ;;  %v2375_v19 = vadd.f32 %v2359_v31, %v2343_v57  ;;  %v2185_v31 = vunpack.c.l.bf16 %v2121_v2 }
 0x833   :  { %v2196_v28 = vunpack.c.l.bf16 %v2132_v5  ;;  %v2499_v39 = vadd.f32 %v2483_v25, %v2467_v23  ;;  %v2247_v16 = vmul.f32 %v10896_v43, %v2183_v14  ;;  %v2153_v23 = vunpack.c.l.bf16 %v2089_v1 }
 0x834   :  { %v2249_v1 = vmul.f32 %v10904_v32, %v2185_v31  ;;  %v10911_v31 = vld [vmem:[#allocation40_spill] sm:$0xff] }
 0x835   :  { %v2513_v58 = vpack.c.bf16 %v2499_v39, %v2498_v54  ;;  %v2260_v22 = vmul.f32 %v10893_v41, %v2196_v28  ;;  %v2311_v10 = vpack.c.bf16 %v2247_v16, %v2247_v16  ;;  %v2469_v28 = vunpack.c.l.bf16 %v2453_v12 }
 0x836   :  { %v6186_v38 = vpop.eup %6185  ;;  %v2391_v54 = vpack.c.bf16 %v2375_v19, %v2375_v19  ;;  %v10899_v39 = vunpack.c.h.bf16 %v10898_v8  ;;  %v2313_v19 = vpack.c.bf16 %v2249_v1, %v2249_v1 }
 0x837   :  { %5297 = vmatmul.msk.bf16.gmra.mxu1 %vm989_vm0, %v2513_v58  ;;  %v6188_v55 = vpop.eup %6187  ;;  %v2324_v9 = vpack.c.bf16 %v2260_v22, %v2260_v22  ;;  %v1854_v13 = vmul.f32 %v6186_v38, %v8504_v26  ;;  %v2423_v40 = vunpack.c.l.bf16 %v2311_v10  ;;  %v10906_v10 = vld [vmem:[#allocation37_spill] sm:$0xff] }
 0x838   :  { %v2052_v63 = vpop.f32.mrf.mxu0  ;;  %v1853_v37 = vmul.f32 %v6188_v55, %v8485_v15  ;;  %v2233_v24 = vmul.f32 %v10899_v39, %v2169_v30  ;;  %v10900_v15 = vld [vmem:[#allocation60_spill] sm:$0xff]  ;;  %v2407_v41 = vunpack.c.l.bf16 %v2391_v54 }
 0x839   :  { %v2133_v62 = vpack.c.bf16 %v2052_v63, %v2052_v63  ;;  %v2484_v25 = vunpack.c.l.bf16 %v2324_v9  ;;  %v10901_v49 = vunpack.c.h.bf16 %v10900_v15  ;;  %v10903_v63 = vunpack.c.l.bf16 %v10902_v33 }
 0x83a   :  { %v1886_v7 = vpack.c.bf16 %v1854_v13, %v1853_v37  ;;  %v2297_v22 = vpack.c.bf16 %v2233_v24, %v2233_v24 }
 0x83b   :  { %v2197_v3 = vunpack.c.l.bf16 %v2133_v62  ;;  %v2500_v56 = vadd.f32 %v2484_v25, %v2468_v29  ;;  %v2217_v58 = vmul.f32 %v10901_v49, %v2153_v23  ;;  %v2439_v62 = vadd.f32 %v2423_v40, %v2407_v41 }
 0x83c   :  { %v2361_v47 = vunpack.c.l.bf16 %v2297_v22 }
 0x83d   :  { %v2261_v18 = vmul.f32 %v10897_v21, %v2197_v3  ;;  %v2281_v14 = vpack.c.bf16 %v2217_v58, %v2217_v58  ;;  %v2454_v3 = vpack.c.bf16 %v8460_v0, %v8460_v0  ;;  %v2455_v57 = vpack.c.bf16 %v2439_v62, %v2439_v62 }
 0x83f   :  { %v2325_v5 = vpack.c.bf16 %v2261_v18, %v2261_v18  ;;  %v2345_v45 = vunpack.c.l.bf16 %v2281_v14  ;;  %v2470_v21 = vunpack.c.l.bf16 %v2454_v3  ;;  %v2471_v25 = vunpack.c.l.bf16 %v2455_v57 }
 0x840   :  { %v2055_v6 = vpop.f32.mrf.mxu0 }
 0x841   :  { %v2485_v59 = vunpack.c.l.bf16 %v2325_v5  ;;  %v2134_v26 = vpack.c.bf16 %v2055_v6, %v2055_v6  ;;  %v2377_v12 = vadd.f32 %v2361_v47, %v2345_v45  ;;  %v2425_v6 = vunpack.c.l.bf16 %v2313_v19 }
 0x842   :  { %2074 = vmatmul.bf16.gmra.mxu0 %v1886_v7  ;;  %v2123_v45 = vpack.c.bf16 %v8487_v20, %v8487_v20 }
 0x843   :  { %v2198_v4 = vunpack.c.l.bf16 %v2134_v26  ;;  %v2501_v51 = vadd.f32 %v2485_v59, %v2469_v28  ;;  %v2393_v5 = vpack.c.bf16 %v2377_v12, %v2377_v12  ;;  %v10907_v59 = vunpack.c.l.bf16 %v10906_v10 }
 0x844   :  { %v2187_v1 = vunpack.c.l.bf16 %v2123_v45 }
 0x845   :  { %v2514_v60 = vpack.c.bf16 %v2501_v51, %v2500_v56  ;;  %v2262_v38 = vmul.f32 %v10903_v63, %v2198_v4  ;;  %v2409_v53 = vunpack.c.l.bf16 %v2393_v5  ;;  %v2456_v4 = vpack.c.bf16 %v8472_v34, %v8472_v34  ;;  %v10909_v63 = vld [vmem:[#allocation23_spill] sm:$0xff] }
 0x846   :  { %v10908_v51 = vunpack.c.h.bf16 %v10906_v10  ;;  %v8649_v10 = vld [vmem:[%s10580_s6 + $0x1] ss:$0 sm:$0xff] }
 0x847   :  { %5298 = vmatmul.msk.bf16.gmra.mxu1 %vm989_vm0, %v2514_v60  ;;  %v2326_v42 = vpack.c.bf16 %v2262_v38, %v2262_v38  ;;  %v2441_v54 = vadd.f32 %v2425_v6, %v2409_v53  ;;  %v2472_v40 = vunpack.c.l.bf16 %v2456_v4  ;;  %v2107_v38 = vpack.c.bf16 %v10909_v63, %v10909_v63 }
 0x848   :  { %v2057_v61 = vpop.f32.mrf.mxu0 }
 0x849   :  { %v2135_v55 = vpack.c.bf16 %v2057_v61, %v2057_v61  ;;  %v2486_v43 = vunpack.c.l.bf16 %v2326_v42  ;;  %v2457_v56 = vpack.c.bf16 %v2441_v54, %v2441_v54  ;;  %v10910_v61 = vld [vmem:[#allocation55_spill] sm:$0xff]  ;;  %v2171_v14 = vunpack.c.l.bf16 %v2107_v38  ;;  %v10913_v42 = vld [vmem:[#allocation61_spill] sm:$0xff] }
 0x84a   :  { %v2091_v34 = vpack.c.bf16 %v10910_v61, %v10910_v61  ;;  %v2125_v54 = vpack.c.bf16 %v8502_v35, %v8502_v35  ;;  %v2111_v35 = vpack.c.bf16 %v8369_v36, %v8369_v36 }
 0x84b   :  { %v2199_v9 = vunpack.c.l.bf16 %v2135_v55  ;;  %v2502_v0 = vadd.f32 %v2486_v43, %v2470_v21  ;;  %v2473_v60 = vunpack.c.l.bf16 %v2457_v56  ;;  %v10912_v55 = vunpack.c.h.bf16 %v10911_v31  ;;  %v10916_v43 = vld [vmem:[#allocation19_spill] sm:$0xff]  ;;  %v10922_v56 = vld [vmem:[#allocation42_spill] sm:$0xff] }
 0x84c   :  { %v2155_v62 = vunpack.c.l.bf16 %v2091_v34  ;;  %v10924_v34 = vld [vmem:[#allocation18_spill] sm:$0xff] }
 0x84d   :  { %v2263_v13 = vmul.f32 %v10905_v27, %v2199_v9  ;;  %v2235_v47 = vmul.f32 %v10912_v55, %v2171_v14  ;;  %v10914_v9 = vunpack.c.h.bf16 %v10913_v42  ;;  %v10915_v27 = vld [vmem:[#allocation29_spill] sm:$0xff]  ;;  %v2095_v14 = vpack.c.bf16 %v10924_v34, %v10924_v34 }
 0x84e   :  { %v10925_v55 = vunpack.c.h.bf16 %v10868_v50  ;;  %v10926_v42 = vunpack.c.h.bf16 %v10922_v56 }
 0x84f   :  { %v2327_v16 = vpack.c.bf16 %v2263_v13, %v2263_v13  ;;  %v2219_v3 = vmul.f32 %v10914_v9, %v2155_v62  ;;  %v2299_v57 = vpack.c.bf16 %v2235_v47, %v2235_v47  ;;  %v2109_v13 = vpack.c.bf16 %v10915_v27, %v10915_v27 }
 0x850   :  { %v2060_v18 = vpop.f32.mrf.mxu0  ;;  %v2458_v62 = vpack.c.bf16 %v8493_v11, %v8493_v11  ;;  %v2159_v27 = vunpack.c.l.bf16 %v2095_v14 }
 0x851   :  { %v2487_v37 = vunpack.c.l.bf16 %v2327_v16  ;;  %v2136_v30 = vpack.c.bf16 %v2060_v18, %v2060_v18  ;;  %v2283_v32 = vpack.c.bf16 %v2219_v3, %v2219_v3  ;;  %v2363_v12 = vunpack.c.l.bf16 %v2299_v57 }
 0x852   :  { %v2093_v16 = vpack.c.bf16 %v10916_v43, %v10916_v43  ;;  %v10917_v18 = vunpack.c.h.bf16 %v10866_v46  ;;  %v2175_v57 = vunpack.c.l.bf16 %v2111_v35 }
 0x853   :  { %v2200_v23 = vunpack.c.l.bf16 %v2136_v30  ;;  %v2503_v29 = vadd.f32 %v2487_v37, %v2471_v25  ;;  %v2347_v21 = vunpack.c.l.bf16 %v2283_v32  ;;  %v2173_v37 = vunpack.c.l.bf16 %v2109_v13 }
 0x854   :  { %v2251_v19 = vmul.f32 %v10917_v18, %v2187_v1  ;;  %v2157_v25 = vunpack.c.l.bf16 %v2093_v16  ;;  %v2474_v13 = vunpack.c.l.bf16 %v2458_v62 }
 0x855   :  { %v2515_v7 = vpack.c.bf16 %v2503_v29, %v2502_v0  ;;  %v2264_v26 = vmul.f32 %v10907_v59, %v2200_v23  ;;  %v2379_v30 = vadd.f32 %v2363_v12, %v2347_v21  ;;  %v10918_v0 = vld [vmem:[#allocation45_spill] sm:$0xff]  ;;  %v10920_v59 = vld [vmem:[#allocation62_spill] sm:$0xff]  ;;  %v6494_v12 = vld [vmem:[#allocation2 + $0x8] sm:$0xff] }
 0x856   :  { %v2315_v23 = vpack.c.bf16 %v2251_v19, %v2251_v19  ;;  %v10919_v29 = vunpack.c.h.bf16 %v10918_v0  ;;  %v10929_v0 = vld [vmem:[#allocation63_spill] sm:$0xff] }
 0x857   :  { %5299 = vmatmul.msk.bf16.gmra.mxu1 %vm989_vm0, %v2515_v7  ;;  %v2328_v39 = vpack.c.bf16 %v2264_v26, %v2264_v26  ;;  %v2395_v7 = vpack.c.bf16 %v2379_v30, %v2379_v30  ;;  %v10921_v26 = vunpack.c.h.bf16 %v10920_v59 }
 0x858   :  { %v2062_v28 = vpop.f32.mrf.mxu0  ;;  %v2237_v6 = vmul.f32 %v10919_v29, %v2173_v37  ;;  %v10927_v37 = vld [vmem:[#allocation52_spill] sm:$0xff]  ;;  %v10930_v29 = vunpack.c.h.bf16 %v10929_v0 }
 0x859   :  { %v2137_v8 = vpack.c.bf16 %v2062_v28, %v2062_v28  ;;  %v2488_v49 = vunpack.c.l.bf16 %v2328_v39  ;;  %v2221_v46 = vmul.f32 %v10921_v26, %v2157_v25  ;;  %v2427_v28 = vunpack.c.l.bf16 %v2315_v23 }
 0x85a   :  { %v2301_v39 = vpack.c.bf16 %v2237_v6, %v2237_v6  ;;  %v2411_v4 = vunpack.c.l.bf16 %v2395_v7  ;;  %v10928_v30 = vunpack.c.h.bf16 %v10927_v37  ;;  %v2223_v6 = vmul.f32 %v10930_v29, %v2159_v27 }
 0x85b   :  { %v2201_v24 = vunpack.c.l.bf16 %v2137_v8  ;;  %v2504_v41 = vadd.f32 %v2488_v49, %v2472_v40  ;;  %v2285_v49 = vpack.c.bf16 %v2221_v46, %v2221_v46 }
 0x85c   :  { %v2239_v25 = vmul.f32 %v10928_v30, %v2175_v57  ;;  %v6497_v30 = vld [vmem:[#allocation2 + $0x20] sm:$0xff] }
 0x85d   :  { %v2265_v15 = vmul.f32 %v10908_v51, %v2201_v24  ;;  %v10923_v51 = vunpack.c.l.bf16 %v10922_v56  ;;  %v2349_v61 = vunpack.c.l.bf16 %v2285_v49 }
 0x85f   :  { %v2329_v58 = vpack.c.bf16 %v2265_v15, %v2265_v15 }
 0x861   :  { %v2489_v2 = vunpack.c.l.bf16 %v2329_v58  ;;  %v6493_v58 = vld [vmem:[#allocation2] sm:$0xff] }
 0x863   :  { %v2505_v22 = vadd.f32 %v2489_v2, %v2473_v60  ;;  %v2443_v60 = vadd.f32 %v2427_v28, %v2411_v4  ;;  %v6495_v4 = vld [vmem:[#allocation2 + $0x10] sm:$0xff] }
 0x865   :  { %v2516_v33 = vpack.c.bf16 %v2505_v22, %v2504_v41  ;;  %v2189_v41 = vunpack.c.l.bf16 %v2125_v54  ;;  %v2459_v31 = vpack.c.bf16 %v2443_v60, %v2443_v60  ;;  %v2303_v54 = vpack.c.bf16 %v2239_v25, %v2239_v25 }
 0x867   :  { %5300 = vmatmul.msk.bf16.gmra.mxu1 %vm989_vm0, %v2516_v33  ;;  %v2365_v33 = vunpack.c.l.bf16 %v2301_v39  ;;  %v2253_v47 = vmul.f32 %v10925_v55, %v2189_v41  ;;  %v2475_v18 = vunpack.c.l.bf16 %v2459_v31 }
 0x869   :  { %v2381_v45 = vadd.f32 %v2365_v33, %v2349_v61  ;;  %v2317_v16 = vpack.c.bf16 %v2253_v47, %v2253_v47 }
 0x86b   :  { %v2397_v19 = vpack.c.bf16 %v2381_v45, %v2381_v45  ;;  %v2429_v7 = vunpack.c.l.bf16 %v2317_v16 }
 0x86d   :  { %v2413_v28 = vunpack.c.l.bf16 %v2397_v19 }
 0x86f   :  { %v2445_v49 = vadd.f32 %v2429_v7, %v2413_v28 }
 0x871   :  { %v2461_v35 = vpack.c.bf16 %v2445_v49, %v2445_v49 }
 0x89f   :  { %v2065_v5 = vpop.f32.mrf.mxu0 }
 0x8a0   :  { %v2138_v20 = vpack.c.bf16 %v2065_v5, %v2065_v5 }
 0x8a2   :  { %v2202_v53 = vunpack.c.l.bf16 %v2138_v20 }
 0x8a4   :  { %v2570_v8 = vpop.f32.mrf.mxu1  ;;  %v2266_v15 = vmul.f32 %v10923_v51, %v2202_v53  ;;  %v2127_v53 = vpack.c.bf16 %v8535_v48, %v8535_v48  ;;  %v2367_v48 = vunpack.c.l.bf16 %v2303_v54 }
 0x8a5   :  { %v2571_v24 = vadd.f32 %v2570_v8, %v8649_v10  ;;  %v10931_v8 = vld [vmem:[#allocation47_spill] sm:$0xff] }
 0x8a6   :  { %v2330_v63 = vpack.c.bf16 %v2266_v15, %v2266_v15  ;;  %v10932_v39 = vunpack.c.l.bf16 %v10931_v8  ;;  %v2287_v15 = vpack.c.bf16 %v2223_v6, %v2223_v6  ;;  %v10934_v61 = vunpack.c.h.bf16 %v10931_v8  ;;  %v6498_v8 = vld [vmem:[#allocation2 + $0x28] sm:$0xff] }
 0x8a7   :  { %v8658_v40 = vadd.f32 %v6493_v58, %v2571_v24  ;;  %v2067_v2 = vpop.f32.mrf.mxu0  ;;  %v2191_v58 = vunpack.c.l.bf16 %v2127_v53  ;;  %v2462_v6 = vpack.c.bf16 %v8515_v52, %v8515_v52 }
 0x8a8   :  { %v2139_v22 = vpack.c.bf16 %v2067_v2, %v2067_v2  ;;  %v2490_v32 = vunpack.c.l.bf16 %v2330_v63  ;;  %v2351_v33 = vunpack.c.l.bf16 %v2287_v15  ;;  %v10933_v63 = vunpack.c.h.bf16 %v10870_v17 }
 0x8a9   :  { %2642 = vmatmul.f32.vlgmr.msra.gmra.mxu2 %v8658_v40 }
 0x8aa   :  { %v2203_v38 = vunpack.c.l.bf16 %v2139_v22  ;;  %v2506_v23 = vadd.f32 %v2490_v32, %v2474_v13  ;;  %v2460_v22 = vpack.c.bf16 %v8506_v44, %v8506_v44  ;;  %v2383_v31 = vadd.f32 %v2367_v48, %v2351_v33  ;;  %v6499_v48 = vld [vmem:[#allocation2 + $0x30] sm:$0xff]  ;;  %v6500_v33 = vld [vmem:[#allocation2 + $0x38] sm:$0xff] }
 0x8ab   :  { %v2477_v32 = vunpack.c.l.bf16 %v2461_v35 }
 0x8ac   :  { %v2267_v9 = vmul.f32 %v10926_v42, %v2203_v38  ;;  %v2572_v3 = vpop.f32.mrf.mxu1  ;;  %v2255_v38 = vmul.f32 %v10933_v63, %v2191_v58  ;;  %v2476_v42 = vunpack.c.l.bf16 %v2460_v22  ;;  %v2399_v17 = vpack.c.bf16 %v2383_v31, %v2383_v31  ;;  %v6502_v31 = vld [vmem:[#allocation2 + $0x48] sm:$0xff] }
 0x8ad   :  { %v2573_v36 = vadd.f32 %v2572_v3, %v8649_v10 }
 0x8ae   :  { %v2331_v1 = vpack.c.bf16 %v2267_v9, %v2267_v9  ;;  %v6496_v9 = vld [vmem:[#allocation2 + $0x18] sm:$0xff]  ;;  %v2319_v44 = vpack.c.bf16 %v2255_v38, %v2255_v38 }
 0x8af   :  { %v8672_v43 = vadd.f32 %v6494_v12, %v2573_v36  ;;  %v2070_v11 = vpop.f32.mrf.mxu0 }
 0x8b0   :  { %v2491_v21 = vunpack.c.l.bf16 %v2331_v1  ;;  %v2140_v50 = vpack.c.bf16 %v2070_v11, %v2070_v11  ;;  %v2431_v12 = vunpack.c.l.bf16 %v2319_v44 }
 0x8b1   :  { %2645 = vmatmul.f32.gmra.mxu2 %v8672_v43 }
 0x8b2   :  { %v2204_v5 = vunpack.c.l.bf16 %v2140_v50  ;;  %v2507_v20 = vadd.f32 %v2491_v21, %v2475_v18  ;;  %v2415_v50 = vunpack.c.l.bf16 %v2399_v17  ;;  %v10936_v18 = vld [vmem:[#allocation54_spill] sm:$0xff] }
 0x8b3   :  { %v10937_v19 = vunpack.c.l.bf16 %v10936_v18  ;;  %v10939_v53 = vunpack.c.h.bf16 %v10936_v18  ;;  %v6504_v18 = vld [vmem:[#allocation2 + $0x58] sm:$0xff] }
 0x8b4   :  { %v2575_v59 = vpop.f32.mrf.mxu1  ;;  %v2517_v26 = vpack.c.bf16 %v2507_v20, %v2506_v23  ;;  %v2268_v24 = vmul.f32 %v10932_v39, %v2204_v5  ;;  %v2447_v23 = vadd.f32 %v2431_v12, %v2415_v50 }
 0x8b5   :  { %v2576_v46 = vadd.f32 %v2575_v59, %v8649_v10 }
 0x8b6   :  { %5301 = vmatmul.msk.bf16.gmra.mxu1 %vm989_vm0, %v2517_v26  ;;  %v2332_v60 = vpack.c.bf16 %v2268_v24, %v2268_v24  ;;  %v2463_v7 = vpack.c.bf16 %v2447_v23, %v2447_v23  ;;  %v2478_v24 = vunpack.c.l.bf16 %v2462_v6 }
 0x8b7   :  { %v8685_v56 = vadd.f32 %v6495_v4, %v2576_v46  ;;  %v2072_v51 = vpop.f32.mrf.mxu0 }
 0x8b8   :  { %v2141_v2 = vpack.c.bf16 %v2072_v51, %v2072_v51  ;;  %v2492_v55 = vunpack.c.l.bf16 %v2332_v60  ;;  %v2479_v51 = vunpack.c.l.bf16 %v2463_v7 }
 0x8b9   :  { %2648 = vmatmul.f32.gmra.mxu2 %v8685_v56 }
 0x8ba   :  { %v2205_v41 = vunpack.c.l.bf16 %v2141_v2  ;;  %v2508_v27 = vadd.f32 %v2492_v55, %v2476_v42  ;;  %v5526_v42 = vld [vmem:[%s10578_s4 + $0xf8] sm:$0xf0] }
 0x8bc   :  { %v2269_v34 = vmul.f32 %v10934_v61, %v2205_v41  ;;  %v2577_v14 = vpop.f32.mrf.mxu1  ;;  %v6501_v61 = vld [vmem:[#allocation2 + $0x40] sm:$0xff] }
 0x8bd   :  { %v2578_v62 = vadd.f32 %v2577_v14, %v8649_v10 }
 0x8be   :  { %v2333_v47 = vpack.c.bf16 %v2269_v34, %v2269_v34 }
 0x8bf   :  { %v8695_v3 = vadd.f32 %v6496_v9, %v2578_v62  ;;  %v2075_v45 = vpop.f32.mrf.mxu0 }
 0x8c0   :  { %v2493_v36 = vunpack.c.l.bf16 %v2333_v47  ;;  %v2142_v57 = vpack.c.bf16 %v2075_v45, %v2075_v45  ;;  %v5682_v47 = vld [vmem:[%s10578_s4 + $0xec] sm:$0xf] }
 0x8c1   :  { %10935 = vst [vmem:[#allocation28_spill] sm:$0xff] %v8695_v3  ;;  %2651 = vmatmul.f32.gmra.mxu2 %v8695_v3  ;;  %v5529_v9 = vor.u32 %v5682_v47, %v5526_v42  ;;  %v6508_v42 = vld [vmem:[#allocation2 + $0x78] sm:$0xff] }
 0x8c2   :  { %v2206_v1 = vunpack.c.l.bf16 %v2142_v57  ;;  %v2509_v13 = vadd.f32 %v2493_v36, %v2477_v32 }
 0x8c3   :  { %4224 = vmatpush.bf16.msra.mxu3 %v5529_v9 }
 0x8c4   :  { %v2580_v11 = vpop.f32.mrf.mxu1  ;;  %v2518_v16 = vpack.c.bf16 %v2509_v13, %v2508_v27  ;;  %v2270_v37 = vmul.f32 %v10937_v19, %v2206_v1  ;;  %v6503_v27 = vld [vmem:[#allocation2 + $0x50] sm:$0xff] }
 0x8c5   :  { %v2581_v21 = vadd.f32 %v2580_v11, %v8649_v10 }
 0x8c6   :  { %5302 = vmatmul.msk.bf16.gmra.mxu1 %vm989_vm0, %v2518_v16  ;;  %v2334_v0 = vpack.c.bf16 %v2270_v37, %v2270_v37 }
 0x8c7   :  { %v8702_v25 = vadd.f32 %v6497_v30, %v2581_v21  ;;  %v2077_v5 = vpop.f32.mrf.mxu0 }
 0x8c8   :  { %v2143_v20 = vpack.c.bf16 %v2077_v5, %v2077_v5  ;;  %v2494_v28 = vunpack.c.l.bf16 %v2334_v0  ;;  %v6505_v0 = vld [vmem:[#allocation2 + $0x60] sm:$0xff] }
 0x8c9   :  { %10938 = vst [vmem:[#allocation34_spill] sm:$0xff] %v8702_v25  ;;  %2654 = vmatmul.f32.gmra.mxu2 %v8702_v25 }
 0x8ca   :  { %v2207_v29 = vunpack.c.l.bf16 %v2143_v20  ;;  %v2510_v15 = vadd.f32 %v2494_v28, %v2478_v24 }
 0x8cc   :  { %v2271_v59 = vmul.f32 %v10939_v53, %v2207_v29  ;;  %v2582_v26 = vpop.f32.mrf.mxu1 }
 0x8cd   :  { %v2583_v46 = vadd.f32 %v2582_v26, %v8649_v10 }
 0x8ce   :  { %v2335_v54 = vpack.c.bf16 %v2271_v59, %v2271_v59 }
 0x8cf   :  { %v8710_v39 = vadd.f32 %v6498_v8, %v2583_v46  ;;  %v6506_v46 = vld [vmem:[#allocation2 + $0x68] sm:$0xff] }
 0x8d0   :  { %v2495_v4 = vunpack.c.l.bf16 %v2335_v54 }
 0x8d1   :  { %10940 = vst [vmem:[#allocation33_spill] sm:$0xff] %v8710_v39  ;;  %2657 = vmatmul.f32.gmra.mxu2 %v8710_v39 }
 0x8d2   :  { %v2511_v49 = vadd.f32 %v2495_v4, %v2479_v51 }
 0x8d4   :  { %v2585_v52 = vpop.f32.mrf.mxu1  ;;  %v2519_v58 = vpack.c.bf16 %v2511_v49, %v2510_v15  ;;  %v6507_v15 = vld [vmem:[#allocation2 + $0x70] sm:$0xff] }
 0x8d5   :  { %v2586_v2 = vadd.f32 %v2585_v52, %v8649_v10 }
 0x8d6   :  { %5303 = vmatmul.msk.bf16.gmra.mxu1 %vm989_vm0, %v2519_v58  ;;  %v5680_v58 = vld [vmem:[%s10578_s4 + $0xcc] sm:$0xf] }
 0x8d7   :  { %v8715_v60 = vadd.f32 %v6499_v48, %v2586_v2  ;;  %v5518_v2 = vld [vmem:[%s10578_s4 + $0xd8] sm:$0xf0]  ;;  %v5363_v48 = vld [vmem:[%s10578_s4 + $0xe0] sm:$0xf] }
 0x8d9   :  { %10941 = vst [vmem:[#allocation39_spill] sm:$0xff] %v8715_v60  ;;  %2660 = vmatmul.f32.gmra.mxu2 %v8715_v60 }
 0x8dc   :  { %v2587_v41 = vpop.f32.mrf.mxu1 }
 0x8dd   :  { %v2588_v22 = vadd.f32 %v2587_v41, %v8649_v10  ;;  %v5521_v41 = vor.u32 %v5680_v58, %v5518_v2  ;;  %v5323_v58 = vld [vmem:[%s10578_s4 + $0x40] sm:$0xf]  ;;  %v5641_v2 = vld [vmem:[%s10578_s4 + $0x4c] sm:$0xf0] }
 0x8df   :  { %v8719_v35 = vadd.f32 %v6500_v33, %v2588_v22  ;;  %v5651_v22 = vld [vmem:[%s10578_s4 + $0xec] sm:$0xf0]  ;;  %v5355_v33 = vld [vmem:[%s10578_s4 + $0xc0] sm:$0xf]  ;;  %4225 = vmatpush.bf16.msra.mxu3 %v5521_v41  ;;  %v5324_v41 = vor.u32 %v5641_v2, %v5323_v58  ;;  %v5341_v58 = vld [vmem:[%s10578_s4 + $0x90] sm:$0xf0] }
 0x8e1   :  { %10942 = vst [vmem:[#allocation38_spill] sm:$0xff] %v8719_v35  ;;  %2663 = vmatmul.f32.gmra.mxu2 %v8719_v35 }
 0x8e4   :  { %v2590_v63 = vpop.f32.mrf.mxu1 }
 0x8e5   :  { %v2591_v38 = vadd.f32 %v2590_v63, %v8649_v10  ;;  %v5649_v63 = vld [vmem:[%s10578_s4 + $0xcc] sm:$0xf0] }
 0x8e6   :  { %v5356_v47 = vor.u32 %v5649_v63, %v5355_v33  ;;  %v5315_v63 = vld [vmem:[%s10578_s4 + $0x20] sm:$0xf] }
 0x8e7   :  { %v8723_v34 = vadd.f32 %v6501_v61, %v2591_v38  ;;  %v5364_v61 = vor.u32 %v5651_v22, %v5363_v48  ;;  %v5672_v48 = vld [vmem:[%s10578_s4 + $0x4c] sm:$0xf]  ;;  %v5486_v22 = vld [vmem:[%s10578_s4 + $0x58] sm:$0xf0] }
 0x8e8   :  { %v5489_v33 = vor.u32 %v5672_v48, %v5486_v22 }
 0x8e9   :  { %10943 = vst [vmem:[#allocation44_spill] sm:$0xff] %v8723_v34  ;;  %2666 = vmatmul.f32.gmra.mxu2 %v8723_v34 }
 0x8ea   :  { %3076 = vmatpush.bf16.msrb.mxu2 %v5364_v61  ;;  %v5670_v61 = vld [vmem:[%s10578_s4 + $0x2c] sm:$0xf] }
 0x8ec   :  { %v2592_v14 = vpop.f32.mrf.mxu1 }
 0x8ed   :  { %v2593_v62 = vadd.f32 %v2592_v14, %v8649_v10 }
 0x8ee   :  { %3077 = vmatpush.bf16.msrb.mxu2 %v5356_v47 }
 0x8ef   :  { %v8727_v55 = vadd.f32 %v6502_v31, %v2593_v62 }
 0x8f1   :  { %10944 = vst [vmem:[#allocation43_spill] sm:$0xff] %v8727_v55  ;;  %2669 = vmatmul.f32.gmra.mxu2 %v8727_v55 }
 0x92c   :  { %v2643_v45 = vpop.f32.mrf.mxu2 }
 0x92d   :  { %v8737_v44 = vsub.f32 %v8658_v40, %v2643_v45 }
 0x92f   :  { %v2707_v36 = vmul.f32 %v8737_v44, %v8737_v44 }
 0x931   :  { %2739 = vmatmul.f32.vlgmr.msra.gmra.mxu1 %v2707_v36 }
 0x933   :  { %v2595_v57 = vpop.f32.mrf.mxu1 }
 0x934   :  { %v2596_v32 = vadd.f32 %v2595_v57, %v8649_v10  ;;  %v2646_v17 = vpop.f32.mrf.mxu2 }
 0x935   :  { %v8743_v1 = vsub.f32 %v8672_v43, %v2646_v17 }
 0x936   :  { %v8745_v13 = vadd.f32 %v6503_v27, %v2596_v32 }
 0x937   :  { %v2708_v12 = vmul.f32 %v8743_v1, %v8743_v1 }
 0x938   :  { %10945 = vst [vmem:[#allocation51_spill] sm:$0xff] %v8745_v13  ;;  %2672 = vmatmul.f32.gmra.mxu2 %v8745_v13 }
 0x939   :  { %2742 = vmatmul.f32.gmra.mxu1 %v2708_v12 }
 0x93b   :  { %v2597_v11 = vpop.f32.mrf.mxu1 }
 0x93c   :  { %v2598_v16 = vadd.f32 %v2597_v11, %v8649_v10  ;;  %v2649_v21 = vpop.f32.mrf.mxu2 }
 0x93d   :  { %v8752_v50 = vsub.f32 %v8685_v56, %v2649_v21  ;;  %v5347_v21 = vld [vmem:[%s10578_s4 + $0xa0] sm:$0xf] }
 0x93e   :  { %v8754_v19 = vadd.f32 %v6504_v18, %v2598_v16  ;;  %v5647_v18 = vld [vmem:[%s10578_s4 + $0xac] sm:$0xf0] }
 0x93f   :  { %v2709_v37 = vmul.f32 %v8752_v50, %v8752_v50 }
 0x940   :  { %10946 = vst [vmem:[#allocation50_spill] sm:$0xff] %v8754_v19  ;;  %2675 = vmatmul.f32.gmra.mxu2 %v8754_v19 }
 0x941   :  { %2745 = vmatmul.f32.gmra.mxu1 %v2709_v37  ;;  %v5678_v37 = vld [vmem:[%s10578_s4 + $0xac] sm:$0xf] }
 0x943   :  { %v2600_v30 = vpop.f32.mrf.mxu1 }
 0x944   :  { %v2601_v5 = vadd.f32 %v2600_v30, %v8649_v10  ;;  %v2652_v23 = vpop.f32.mrf.mxu2  ;;  %v5348_v30 = vor.u32 %v5647_v18, %v5347_v21  ;;  %v5650_v21 = vld [vmem:[%s10578_s4 + $0xe4] sm:$0xf]  ;;  %v5365_v18 = vld [vmem:[%s10578_s4 + $0xf0] sm:$0xf0] }
 0x945   :  { %v8761_v20 = vsub.f32 %v8695_v3, %v2652_v23 }
 0x946   :  { %v8763_v29 = vadd.f32 %v6505_v0, %v2601_v5  ;;  %v5510_v5 = vld [vmem:[%s10578_s4 + $0xb8] sm:$0xf0]  ;;  %3078 = vmatpush.bf16.msrb.mxu2 %v5348_v30  ;;  %v5339_v0 = vld [vmem:[%s10578_s4 + $0x80] sm:$0xf]  ;;  %v5648_v30 = vld [vmem:[%s10578_s4 + $0xc4] sm:$0xf] }
 0x947   :  { %v2710_v6 = vmul.f32 %v8761_v20, %v8761_v20  ;;  %v5513_v23 = vor.u32 %v5678_v37, %v5510_v5  ;;  %v5368_v37 = vor.u32 %v5650_v21, %v5365_v18  ;;  %v5357_v5 = vld [vmem:[%s10578_s4 + $0xd0] sm:$0xf0] }
 0x948   :  { %10947 = vst [vmem:[#allocation58_spill] sm:$0xff] %v8763_v29  ;;  %2678 = vmatmul.f32.gmra.mxu2 %v8763_v29 }
 0x949   :  { %2748 = vmatmul.f32.gmra.mxu1 %v2710_v6  ;;  %4226 = vmatpush.bf16.msra.mxu3 %v5513_v23  ;;  %v5645_v6 = vld [vmem:[%s10578_s4 + $0x8c] sm:$0xf0]  ;;  %v5360_v23 = vor.u32 %v5648_v30, %v5357_v5 }
 0x94a   :  { %3125 = vmatpush.bf16.msrb.mxu1 %v5368_v37 }
 0x94b   :  { %v2602_v7 = vpop.f32.mrf.mxu1 }
 0x94c   :  { %v2603_v53 = vadd.f32 %v2602_v7, %v8649_v10  ;;  %v2655_v59 = vpop.f32.mrf.mxu2  ;;  %v5676_v7 = vld [vmem:[%s10578_s4 + $0x8c] sm:$0xf] }
 0x94d   :  { %v8770_v26 = vsub.f32 %v8702_v25, %v2655_v59  ;;  %v5502_v59 = vld [vmem:[%s10578_s4 + $0x98] sm:$0xf0] }
 0x94e   :  { %v8772_v28 = vadd.f32 %v6506_v46, %v2603_v53  ;;  %v5340_v53 = vor.u32 %v5645_v6, %v5339_v0  ;;  %v5505_v46 = vor.u32 %v5676_v7, %v5502_v59  ;;  %3126 = vmatpush.bf16.msrb.mxu1 %v5360_v23  ;;  %v5646_v59 = vld [vmem:[%s10578_s4 + $0xa4] sm:$0xf] }
 0x94f   :  { %v2711_v54 = vmul.f32 %v8770_v26, %v8770_v26 }
 0x950   :  { %10948 = vst [vmem:[#allocation57_spill] sm:$0xff] %v8772_v28  ;;  %2681 = vmatmul.f32.gmra.mxu2 %v8772_v28  ;;  %4227 = vmatpush.bf16.msra.mxu3 %v5505_v46  ;;  %v5349_v46 = vld [vmem:[%s10578_s4 + $0xb0] sm:$0xf0] }
 0x951   :  { %2751 = vmatmul.f32.gmra.mxu1 %v2711_v54  ;;  %3079 = vmatpush.bf16.msrb.mxu2 %v5340_v53  ;;  %v5331_v54 = vld [vmem:[%s10578_s4 + $0x60] sm:$0xf] }
 0x953   :  { %v2605_v8 = vpop.f32.mrf.mxu1 }
 0x954   :  { %v2606_v24 = vadd.f32 %v2605_v8, %v8649_v10  ;;  %v2658_v4 = vpop.f32.mrf.mxu2  ;;  %v5643_v8 = vld [vmem:[%s10578_s4 + $0x6c] sm:$0xf0] }
 0x955   :  { %v8779_v51 = vsub.f32 %v8710_v39, %v2658_v4  ;;  %v5332_v4 = vor.u32 %v5643_v8, %v5331_v54  ;;  %v5352_v54 = vor.u32 %v5646_v59, %v5349_v46  ;;  %v5317_v59 = vld [vmem:[%s10578_s4 + $0x30] sm:$0xf0] }
 0x956   :  { %v8781_v49 = vadd.f32 %v6507_v15, %v2606_v24  ;;  %v5674_v24 = vld [vmem:[%s10578_s4 + $0x6c] sm:$0xf]  ;;  %v5494_v15 = vld [vmem:[%s10578_s4 + $0x78] sm:$0xf0] }
 0x957   :  { %v2712_v52 = vmul.f32 %v8779_v51, %v8779_v51  ;;  %3080 = vmatpush.bf16.msrb.mxu2 %v5332_v4  ;;  %3127 = vmatpush.bf16.msrb.mxu1 %v5352_v54 }
 0x958   :  { %10949 = vst [vmem:[#allocation15_spill] sm:$0xff] %v8781_v49  ;;  %2684 = vmatmul.f32.gmra.mxu2 %v8781_v49 }
 0x959   :  { %2754 = vmatmul.f32.gmra.mxu1 %v2712_v52  ;;  %v5497_v52 = vor.u32 %v5674_v24, %v5494_v15 }
 0x95b   :  { %v2607_v38 = vpop.f32.mrf.mxu1  ;;  %4228 = vmatpush.bf16.msra.mxu3 %v5497_v52  ;;  %3081 = vmatpush.bf16.msrb.mxu2 %v5324_v41  ;;  %v5644_v52 = vld [vmem:[%s10578_s4 + $0x84] sm:$0xf] }
 0x95c   :  { %v2608_v14 = vadd.f32 %v2607_v38, %v8649_v10  ;;  %v2661_v62 = vpop.f32.mrf.mxu2  ;;  %v5639_v38 = vld [vmem:[%s10578_s4 + $0x2c] sm:$0xf0]  ;;  %v5344_v2 = vor.u32 %v5644_v52, %v5341_v58  ;;  %v5636_v58 = vld [vmem:[%s10578_s4 + $0x4] sm:$0xf] }
 0x95d   :  { %v8806_v31 = vsub.f32 %v8715_v60, %v2661_v62  ;;  %v5478_v62 = vld [vmem:[%s10578_s4 + $0x38] sm:$0xf0] }
 0x95e   :  { %v8808_v9 = vadd.f32 %v6508_v42, %v2608_v14  ;;  %v5316_v14 = vor.u32 %v5639_v38, %v5315_v63  ;;  %v5481_v47 = vor.u32 %v5670_v61, %v5478_v62  ;;  %v5307_v42 = vld [vmem:[%s10578_s4] sm:$0xf]  ;;  %3128 = vmatpush.bf16.msrb.mxu1 %v5344_v2  ;;  %v5642_v61 = vld [vmem:[%s10578_s4 + $0x64] sm:$0xf]  ;;  %v5309_v2 = vld [vmem:[%s10578_s4 + $0x10] sm:$0xf0] }
 0x95f   :  { %v2713_v45 = vmul.f32 %v8806_v31, %v8806_v31  ;;  %4229 = vmatpush.bf16.msra.mxu3 %v5489_v33 }
 0x960   :  { %10950 = vst [vmem:[#allocation20_spill] sm:$0xff] %v8808_v9  ;;  %2687 = vmatmul.f32.gmra.mxu2 %v8808_v9 }
 0x961   :  { %2757 = vmatmul.f32.gmra.mxu1 %v2713_v45  ;;  %3082 = vmatpush.bf16.msrb.mxu2 %v5316_v14  ;;  %v5637_v45 = vld [vmem:[%s10578_s4 + $0xc] sm:$0xf0]  ;;  %v5333_v14 = vld [vmem:[%s10578_s4 + $0x70] sm:$0xf0] }
 0x962   :  { %v5336_v62 = vor.u32 %v5642_v61, %v5333_v14 }
 0x963   :  { %4230 = vmatpush.bf16.msra.mxu3 %v5481_v47 }
 0x964   :  { %v2664_v36 = vpop.f32.mrf.mxu2  ;;  %3129 = vmatpush.bf16.msrb.mxu1 %v5336_v62 }
 0x965   :  { %v8814_v10 = vsub.f32 %v8719_v35, %v2664_v36  ;;  %v5668_v36 = vld [vmem:[%s10578_s4 + $0xc] sm:$0xf] }
 0x967   :  { %v2714_v57 = vmul.f32 %v8814_v10, %v8814_v10 }
 0x969   :  { %2760 = vmatmul.f32.gmra.mxu1 %v2714_v57  ;;  %v5308_v57 = vor.u32 %v5637_v45, %v5307_v42 }
 0x96b   :  { %3083 = vmatpush.bf16.msrb.mxu2 %v5308_v57 }
 0x96c   :  { %v2667_v32 = vpop.f32.mrf.mxu2 }
 0x96d   :  { %v8819_v17 = vsub.f32 %v8723_v34, %v2667_v32  ;;  %v5470_v32 = vld [vmem:[%s10578_s4 + $0x18] sm:$0xf0] }
 0x96f   :  { %v2715_v27 = vmul.f32 %v8819_v17, %v8819_v17 }
 0x971   :  { %2763 = vmatmul.f32.gmra.mxu1 %v2715_v27  ;;  %v5473_v27 = vor.u32 %v5668_v36, %v5470_v32  ;;  %v5640_v32 = vld [vmem:[%s10578_s4 + $0x44] sm:$0xf] }
 0x973   :  { %4231 = vmatpush.bf16.msra.mxu3 %v5473_v27  ;;  %v5325_v27 = vld [vmem:[%s10578_s4 + $0x50] sm:$0xf0] }
 0x974   :  { %v2670_v12 = vpop.f32.mrf.mxu2 }
 0x975   :  { %v8824_v11 = vsub.f32 %v8727_v55, %v2670_v12 }
 0x977   :  { %v2716_v16 = vmul.f32 %v8824_v11, %v8824_v11 }
 0x979   :  { %2766 = vmatmul.f32.gmra.mxu1 %v2716_v16 }
 0x9ae   :  { %v2740_v12 = vpop.f32.mrf.mxu1 }
 0x9af   :  { %v2741_v16 = vadd.f32 1e-05, %v2740_v12  ;;  %v5328_v12 = vor.u32 %v5640_v32, %v5325_v27 }
 0x9b1   :  { %6189 = vrsqrt.f32 %v2741_v16  ;;  %vm2794_vm2 = vweird.f32 %v2741_v16  ;;  %3130 = vmatpush.bf16.msrb.mxu1 %v5328_v12 }
 0x9b6   :  { %v2743_v0 = vpop.f32.mrf.mxu1 }
 0x9b7   :  { %v6190_v6 = vpop.eup %6189  ;;  %v2744_v7 = vadd.f32 1e-05, %v2743_v0 }
 0x9b8   :  { %v2789_v53 = vmul.f32 %v6190_v6, %v2741_v16  ;;  %vm2795_vm1 = vweird.f32 %v6190_v6  ;;  %v5638_v16 = vld [vmem:[%s10578_s4 + $0x24] sm:$0xf] }
 0x9b9   :  { %6191 = vrsqrt.f32 %v2744_v7  ;;  %vm2796_vm4 = vmor %vm2794_vm2, %vm2795_vm1  ;;  %vm2804_vm5 = vweird.f32 %v2744_v7  ;;  %v5320_v46 = vor.u32 %v5638_v16, %v5317_v59  ;;  %v5691_v16 = vld [vmem:[#allocation7 + $0xb8] sm:$0xff] }
 0x9ba   :  { %v2790_v8 = vmul.f32 %v6190_v6, %v2789_v53  ;;  %5057 = vmatpush.bf16.msra.mxu0 %v5691_v16 }
 0x9bb   :  { %v2673_v24 = vpop.f32.mrf.mxu2  ;;  %3131 = vmatpush.bf16.msrb.mxu1 %v5320_v46 }
 0x9bc   :  { %v2791_v4 = vmul.f32 0.5, %v2790_v8  ;;  %v8919_v15 = vsub.f32 %v8745_v13, %v2673_v24 }
 0x9be   :  { %v2717_v48 = vmul.f32 %v8919_v15, %v8919_v15  ;;  %v2746_v41 = vpop.f32.mrf.mxu1  ;;  %v2792_v63 = vsub.f32 1.5, %v2791_v4 }
 0x9bf   :  { %v6192_v22 = vpop.eup %6191  ;;  %v8929_v33 = vadd.f32 1e-05, %v2746_v41  ;;  %v5312_v41 = vor.u32 %v5636_v58, %v5309_v2 }
 0x9c0   :  { %v2799_v38 = vmul.f32 %v6192_v22, %v2744_v7  ;;  %2769 = vmatmul.f32.gmra.mxu1 %v2717_v48  ;;  %v2793_v45 = vmul.f32 %v6190_v6, %v2792_v63  ;;  %vm2805_vm3 = vweird.f32 %v6192_v22 }
 0x9c1   :  { %6193 = vrsqrt.f32 %v8929_v33  ;;  %vm2806_vm6 = vmor %vm2804_vm5, %vm2805_vm3  ;;  %3132 = vmatpush.bf16.msrb.mxu1 %v5312_v41  ;;  %vm2814_vm8 = vweird.f32 %v8929_v33 }
 0x9c2   :  { %v2800_v47 = vmul.f32 %v6192_v22, %v2799_v38  ;;  %v2797_v23 = vsel %vm2796_vm4, %v6190_v6, %v2793_v45 }
 0x9c3   :  { %v2676_v42 = vpop.f32.mrf.mxu2  ;;  %v2948_v6 = vmul.f32 %v2797_v23, %v8737_v44 }
 0x9c4   :  { %v2801_v36 = vmul.f32 0.5, %v2800_v47  ;;  %v8939_v57 = vsub.f32 %v8754_v19, %v2676_v42  ;;  %v5492_v19 = vld [vmem:[%s10578_s4 + $0x68] sm:$0xf] }
 0x9c6   :  { %v2802_v21 = vsub.f32 1.5, %v2801_v36  ;;  %v2718_v18 = vmul.f32 %v8939_v57, %v8939_v57  ;;  %v2749_v37 = vpop.f32.mrf.mxu1 }
 0x9c7   :  { %v6194_v30 = vpop.eup %6193  ;;  %v2750_v5 = vadd.f32 1e-05, %v2749_v37 }
 0x9c8   :  { %v2803_v0 = vmul.f32 %v6192_v22, %v2802_v21  ;;  %v2809_v53 = vmul.f32 %v6194_v30, %v8929_v33  ;;  %2772 = vmatmul.f32.gmra.mxu1 %v2718_v18  ;;  %vm2815_vm7 = vweird.f32 %v6194_v30 }
 0x9c9   :  { %6195 = vrsqrt.f32 %v2750_v5  ;;  %vm2816_vm10 = vmor %vm2814_vm8, %vm2815_vm7  ;;  %vm2824_vm11 = vweird.f32 %v2750_v5 }
 0x9ca   :  { %v2807_v54 = vsel %vm2806_vm6, %v6192_v22, %v2803_v0  ;;  %v2810_v8 = vmul.f32 %v6194_v30, %v2809_v53 }
 0x9cb   :  { %v2949_v7 = vmul.f32 %v2807_v54, %v8743_v1  ;;  %v2679_v24 = vpop.f32.mrf.mxu2 }
 0x9cc   :  { %v2811_v4 = vmul.f32 0.5, %v2810_v8  ;;  %v8959_v52 = vsub.f32 %v8763_v29, %v2679_v24 }
 0x9cd   :  { %v8967_v48 = vpack.c.bf16 %v2949_v7, %v2948_v6 }
 0x9ce   :  { %v2719_v44 = vmul.f32 %v8959_v52, %v8959_v52  ;;  %v2752_v1 = vpop.f32.mrf.mxu1  ;;  %v2812_v38 = vsub.f32 1.5, %v2811_v4 }
 0x9cf   :  { %v6196_v22 = vpop.eup %6195  ;;  %v2753_v63 = vadd.f32 1e-05, %v2752_v1  ;;  %3084 = vmatmul.bf16.vlgmr.msrb.gmra.mxu2 %v8967_v48  ;;  %4232 = vmatmul.bf16.vlgmr.msra.gmra.mxu3 %v8967_v48 }
 0x9d0   :  { %v2819_v61 = vmul.f32 %v6196_v22, %v2750_v5  ;;  %2775 = vmatmul.f32.gmra.mxu1 %v2719_v44  ;;  %v2813_v47 = vmul.f32 %v6194_v30, %v2812_v38  ;;  %vm2825_vm9 = vweird.f32 %v6196_v22 }
 0x9d1   :  { %6197 = vrsqrt.f32 %v2753_v63  ;;  %vm2826_vm12 = vmor %vm2824_vm11, %vm2825_vm9  ;;  %vm2834_vm14 = vweird.f32 %v2753_v63 }
 0x9d2   :  { %v2820_v14 = vmul.f32 %v6196_v22, %v2819_v61  ;;  %v2817_v18 = vsel %vm2816_vm10, %v6194_v30, %v2813_v47 }
 0x9d3   :  { %v2682_v62 = vpop.f32.mrf.mxu2  ;;  %v2950_v33 = vmul.f32 %v2817_v18, %v8752_v50 }
 0x9d4   :  { %v2821_v42 = vmul.f32 0.5, %v2820_v14  ;;  %v8974_v45 = vsub.f32 %v8772_v28, %v2682_v62 }
 0x9d6   :  { %v2822_v36 = vsub.f32 1.5, %v2821_v42  ;;  %v2720_v32 = vmul.f32 %v8974_v45, %v8974_v45  ;;  %v2755_v27 = vpop.f32.mrf.mxu1 }
 0x9d7   :  { %v6198_v12 = vpop.eup %6197  ;;  %v2756_v21 = vadd.f32 1e-05, %v2755_v27 }
 0x9d8   :  { %v2823_v37 = vmul.f32 %v6196_v22, %v2822_v36  ;;  %v2829_v23 = vmul.f32 %v6198_v12, %v2753_v63  ;;  %2778 = vmatmul.f32.gmra.mxu1 %v2720_v32  ;;  %vm2835_vm13 = vweird.f32 %v6198_v12 }
 0x9d9   :  { %6199 = vrsqrt.f32 %v2756_v21  ;;  %vm2836_vm0 = vmor %vm2834_vm14, %vm2835_vm13  ;;  %vm2844_vm1 = vweird.f32 %v2756_v21 }
 0x9da   :  { %v2827_v0 = vsel %vm2826_vm12, %v6196_v22, %v2823_v37  ;;  %v2830_v53 = vmul.f32 %v6198_v12, %v2829_v23 }
 0x9db   :  { %v2685_v59 = vpop.f32.mrf.mxu2  ;;  %v2951_v46 = vmul.f32 %v2827_v0, %v8761_v20 }
 0x9dc   :  { %v2831_v54 = vmul.f32 0.5, %v2830_v53  ;;  %v8982_v8 = vsub.f32 %v8781_v49, %v2685_v59 }
 0x9dd   :  { %v8984_v30 = vpack.c.bf16 %v2951_v46, %v2950_v33 }
 0x9de   :  { %v2721_v5 = vmul.f32 %v8982_v8, %v8982_v8  ;;  %v2758_v6 = vpop.f32.mrf.mxu1  ;;  %v2832_v50 = vsub.f32 1.5, %v2831_v54 }
 0x9df   :  { %v6200_v7 = vpop.eup %6199  ;;  %v2759_v24 = vadd.f32 1e-05, %v2758_v6  ;;  %3089 = vmatmul.bf16.gmra.mxu2 %v8984_v30  ;;  %4237 = vmatmul.bf16.gmra.mxu3 %v8984_v30 }
 0x9e0   :  { %v2839_v4 = vmul.f32 %v6200_v7, %v2756_v21  ;;  %2781 = vmatmul.f32.gmra.mxu1 %v2721_v5  ;;  %v2833_v2 = vmul.f32 %v6198_v12, %v2832_v50  ;;  %vm2845_vm15 = vweird.f32 %v6200_v7 }
 0x9e1   :  { %6201 = vrsqrt.f32 %v2759_v24  ;;  %vm2846_vm2 = vmor %vm2844_vm1, %vm2845_vm15  ;;  %vm2854_vm4 = vweird.f32 %v2759_v24 }
 0x9e2   :  { %v2840_v20 = vmul.f32 %v6200_v7, %v2839_v4  ;;  %v2837_v62 = vsel %vm2836_vm0, %v6198_v12, %v2833_v2 }
 0x9e3   :  { %v2688_v58 = vpop.f32.mrf.mxu2  ;;  %v2952_v63 = vmul.f32 %v2837_v62, %v8770_v26 }
 0x9e4   :  { %v2841_v41 = vmul.f32 0.5, %v2840_v20  ;;  %v8991_v44 = vsub.f32 %v8808_v9, %v2688_v58 }
 0x9e6   :  { %v2842_v1 = vsub.f32 1.5, %v2841_v41  ;;  %v2722_v22 = vmul.f32 %v8991_v44, %v8991_v44  ;;  %v2761_v38 = vpop.f32.mrf.mxu1 }
 0x9e7   :  { %v6202_v61 = vpop.eup %6201  ;;  %v2762_v14 = vadd.f32 1e-05, %v2761_v38  ;;  %v5690_v38 = vld [vmem:[#allocation7 + $0xb0] sm:$0xff] }
 0x9e8   :  { %v2843_v47 = vmul.f32 %v6200_v7, %v2842_v1  ;;  %v2849_v42 = vmul.f32 %v6202_v61, %v2759_v24  ;;  %2784 = vmatmul.f32.gmra.mxu1 %v2722_v22  ;;  %vm2855_vm3 = vweird.f32 %v6202_v61  ;;  %5058 = vmatpush.bf16.msra.mxu0 %v5690_v38 }
 0x9e9   :  { %6203 = vrsqrt.f32 %v2762_v14  ;;  %vm2856_vm6 = vmor %vm2854_vm4, %vm2855_vm3  ;;  %vm2864_vm7 = vweird.f32 %v2762_v14 }
 0x9ea   :  { %v2847_v36 = vsel %vm2846_vm2, %v6200_v7, %v2843_v47  ;;  %v2850_v32 = vmul.f32 %v6202_v61, %v2849_v42 }
 0x9eb   :  { %v2953_v27 = vmul.f32 %v2847_v36, %v8779_v51 }
 0x9ec   :  { %v2851_v18 = vmul.f32 0.5, %v2850_v32 }
 0x9ed   :  { %v8997_v37 = vpack.c.bf16 %v2953_v27, %v2952_v63  ;;  %v5659_v27 = vld [vmem:[#allocation7 + $0x38] sm:$0xff] }
 0x9ee   :  { %v2764_v23 = vpop.f32.mrf.mxu1  ;;  %v2852_v12 = vsub.f32 1.5, %v2851_v18  ;;  %3958 = vmatpush.bf16.msra.mxu2 %v5659_v27 }
 0x9ef   :  { %v6204_v0 = vpop.eup %6203  ;;  %v2765_v53 = vadd.f32 1e-05, %v2764_v23  ;;  %3094 = vmatmul.bf16.gmra.mxu2 %v8997_v37  ;;  %4242 = vmatmul.bf16.gmra.mxu3 %v8997_v37 }
 0x9f0   :  { %v2859_v21 = vmul.f32 %v6204_v0, %v2762_v14  ;;  %3133 = vmatmul.bf16.vlgmr.msrb.gmra.mxu1 %v8967_v48  ;;  %v2853_v33 = vmul.f32 %v6202_v61, %v2852_v12  ;;  %vm2865_vm5 = vweird.f32 %v6204_v0 }
 0x9f1   :  { %6205 = vrsqrt.f32 %v2765_v53  ;;  %vm2866_vm8 = vmor %vm2864_vm7, %vm2865_vm5  ;;  %vm2874_vm10 = vweird.f32 %v2765_v53 }
 0x9f2   :  { %v2860_v16 = vmul.f32 %v6204_v0, %v2859_v21  ;;  %v2857_v5 = vsel %vm2856_vm6, %v6202_v61, %v2853_v33 }
 0x9f3   :  { %v2954_v20 = vmul.f32 %v2857_v5, %v8806_v31 }
 0x9f4   :  { %v2861_v26 = vmul.f32 0.5, %v2860_v16 }
 0x9f6   :  { %v2862_v51 = vsub.f32 1.5, %v2861_v26  ;;  %v2767_v59 = vpop.f32.mrf.mxu1 }
 0x9f7   :  { %v6206_v46 = vpop.eup %6205  ;;  %v2768_v54 = vadd.f32 1e-05, %v2767_v59 }
 0x9f8   :  { %v2863_v6 = vmul.f32 %v6204_v0, %v2862_v51  ;;  %v2869_v7 = vmul.f32 %v6206_v46, %v2765_v53  ;;  %vm2875_vm9 = vweird.f32 %v6206_v46 }
 0x9f9   :  { %6207 = vrsqrt.f32 %v2768_v54  ;;  %vm2876_vm12 = vmor %vm2874_vm10, %vm2875_vm9  ;;  %vm2884_vm13 = vweird.f32 %v2768_v54 }
 0x9fa   :  { %v2867_v50 = vsel %vm2866_vm8, %v6204_v0, %v2863_v6  ;;  %v2870_v4 = vmul.f32 %v6206_v46, %v2869_v7 }
 0x9fb   :  { %v2955_v58 = vmul.f32 %v2867_v50, %v8814_v10 }
 0x9fc   :  { %v2871_v2 = vmul.f32 0.5, %v2870_v4 }
 0x9fd   :  { %v9004_v24 = vpack.c.bf16 %v2955_v58, %v2954_v20 }
 0x9fe   :  { %v2872_v1 = vsub.f32 1.5, %v2871_v2 }
 0x9ff   :  { %v6208_v41 = vpop.eup %6207  ;;  %3099 = vmatmul.bf16.gmra.mxu2 %v9004_v24  ;;  %4247 = vmatmul.bf16.gmra.mxu3 %v9004_v24 }
 0xa00   :  { %v2879_v22 = vmul.f32 %v6208_v41, %v2768_v54  ;;  %3138 = vmatmul.bf16.gmra.mxu1 %v8984_v30  ;;  %v2873_v14 = vmul.f32 %v6206_v46, %v2872_v1  ;;  %vm2885_vm11 = vweird.f32 %v6208_v41 }
 0xa01   :  { %vm2886_vm14 = vmor %vm2884_vm13, %vm2885_vm11 }
 0xa02   :  { %v2880_v61 = vmul.f32 %v6208_v41, %v2879_v22  ;;  %v2877_v62 = vsel %vm2876_vm12, %v6206_v46, %v2873_v14  ;;  %v5657_v22 = vld [vmem:[#allocation7 + $0x28] sm:$0xff] }
 0xa03   :  { %v2956_v36 = vmul.f32 %v2877_v62, %v8819_v17  ;;  %v5658_v17 = vld [vmem:[#allocation7 + $0x30] sm:$0xff] }
 0xa04   :  { %v2881_v31 = vmul.f32 0.5, %v2880_v61  ;;  %3959 = vmatpush.bf16.msra.mxu2 %v5658_v17 }
 0xa06   :  { %v2882_v10 = vsub.f32 1.5, %v2881_v31 }
 0xa08   :  { %v2883_v47 = vmul.f32 %v6208_v41, %v2882_v10  ;;  %3960 = vmatpush.bf16.msra.mxu2 %v5657_v22 }
 0xa0a   :  { %v2887_v42 = vsel %vm2886_vm14, %v6208_v41, %v2883_v47  ;;  %v5656_v47 = vld [vmem:[#allocation7 + $0x20] sm:$0xff] }
 0xa0b   :  { %v2957_v32 = vmul.f32 %v2887_v42, %v8824_v11 }
 0xa0c   :  { %3961 = vmatpush.bf16.msra.mxu2 %v5656_v47 }
 0xa0d   :  { %v9011_v63 = vpack.c.bf16 %v2957_v32, %v2956_v36 }
 0xa0f   :  { %3104 = vmatmul.bf16.gmra.mxu2 %v9011_v63  ;;  %4252 = vmatmul.bf16.gmra.mxu3 %v9011_v63 }
 0xa10   :  { %3143 = vmatmul.bf16.gmra.mxu1 %v8997_v37 }
 0xa20   :  { %3148 = vmatmul.bf16.gmra.mxu1 %v9004_v24 }
 0xa30   :  { %3153 = vmatmul.bf16.gmra.mxu1 %v9011_v63 }
 0xa3d   :  { %v2770_v18 = vpop.f32.mrf.mxu1 }
 0xa3e   :  { %v2771_v23 = vadd.f32 1e-05, %v2770_v18  ;;  %v5667_v18 = vld [vmem:[#allocation7 + $0x78] sm:$0xff] }
 0xa3f   :  { %4007 = vmatpush.bf16.msra.mxu1 %v5667_v18 }
 0xa40   :  { %6209 = vrsqrt.f32 %v2771_v23  ;;  %vm2894_vm0 = vweird.f32 %v2771_v23 }
 0xa45   :  { %v2773_v11 = vpop.f32.mrf.mxu1 }
 0xa46   :  { %v6210_v0 = vpop.eup %6209  ;;  %v2774_v53 = vadd.f32 1e-05, %v2773_v11 }
 0xa47   :  { %v2889_v12 = vmul.f32 %v6210_v0, %v2771_v23  ;;  %vm2895_vm15 = vweird.f32 %v6210_v0 }
 0xa48   :  { %6211 = vrsqrt.f32 %v2774_v53  ;;  %vm2896_vm2 = vmor %vm2894_vm0, %vm2895_vm15  ;;  %vm2904_vm3 = vweird.f32 %v2774_v53 }
 0xa49   :  { %v2890_v21 = vmul.f32 %v6210_v0, %v2889_v12 }
 0xa4b   :  { %v2891_v16 = vmul.f32 0.5, %v2890_v21 }
 0xa4d   :  { %v2776_v33 = vpop.f32.mrf.mxu1  ;;  %v2892_v51 = vsub.f32 1.5, %v2891_v16 }
 0xa4e   :  { %v6212_v26 = vpop.eup %6211  ;;  %v2777_v20 = vadd.f32 1e-05, %v2776_v33 }
 0xa4f   :  { %v2899_v59 = vmul.f32 %v6212_v26, %v2774_v53  ;;  %v2893_v54 = vmul.f32 %v6210_v0, %v2892_v51  ;;  %vm2905_vm1 = vweird.f32 %v6212_v26  ;;  %v5666_v51 = vld [vmem:[#allocation7 + $0x70] sm:$0xff] }
 0xa50   :  { %vm2906_vm4 = vmor %vm2904_vm3, %vm2905_vm1  ;;  %6213 = vrsqrt.f32 %v2777_v20  ;;  %4008 = vmatpush.bf16.msra.mxu1 %v5666_v51  ;;  %vm2914_vm7 = vweird.f32 %v2777_v20 }
 0xa51   :  { %v2900_v46 = vmul.f32 %v6212_v26, %v2899_v59  ;;  %v2897_v50 = vsel %vm2896_vm2, %v6210_v0, %v2893_v54 }
 0xa52   :  { %v2958_v41 = vmul.f32 %v2897_v50, %v8919_v15  ;;  %v3085_v61 = vpop.f32.mrf.mxu2 }
 0xa53   :  { %v2901_v5 = vmul.f32 0.5, %v2900_v46 }
 0xa55   :  { %v2902_v6 = vsub.f32 1.5, %v2901_v5  ;;  %v2779_v7 = vpop.f32.mrf.mxu1  ;;  %v5655_v5 = vld [vmem:[#allocation7 + $0x18] sm:$0xff] }
 0xa56   :  { %v2780_v2 = vadd.f32 1e-05, %v2779_v7  ;;  %v6214_v14 = vpop.eup %6213  ;;  %3962 = vmatpush.bf16.msra.mxu2 %v5655_v5 }
 0xa57   :  { %v2903_v4 = vmul.f32 %v6212_v26, %v2902_v6  ;;  %v2909_v62 = vmul.f32 %v6214_v14, %v2777_v20  ;;  %vm2915_vm5 = vweird.f32 %v6214_v14  ;;  %v5689_v6 = vld [vmem:[#allocation7 + $0xa8] sm:$0xff] }
 0xa58   :  { %6215 = vrsqrt.f32 %v2780_v2  ;;  %vm2916_vm8 = vmor %vm2914_vm7, %vm2915_vm5  ;;  %vm2924_vm9 = vweird.f32 %v2780_v2  ;;  %5059 = vmatpush.bf16.msra.mxu0 %v5689_v6 }
 0xa59   :  { %v2907_v58 = vsel %vm2906_vm4, %v6212_v26, %v2903_v4  ;;  %v2910_v42 = vmul.f32 %v6214_v14, %v2909_v62  ;;  %v5665_v62 = vld [vmem:[#allocation7 + $0x68] sm:$0xff] }
 0xa5a   :  { %v2959_v1 = vmul.f32 %v2907_v58, %v8939_v57  ;;  %v5304_v57 = vld [vmem:[%s10580_s6 + $0x2] ss:$8 sm:$0x3]  ;;  %v3087_v32 = vpop.f32.mrf.mxu2  ;;  %4009 = vmatpush.bf16.msra.mxu1 %v5665_v62 }
 0xa5b   :  { %v9028_v27 = vperm.slane %v5304_v57, 0  ;;  %v2911_v17 = vmul.f32 0.5, %v2910_v42  ;;  %v9044_v50 = vperm.slane %v5304_v57, 1 }
 0xa5c   :  { %v9020_v38 = vpack.c.bf16 %v2959_v1, %v2958_v41 }
 0xa5d   :  { %v2782_v10 = vpop.f32.mrf.mxu1  ;;  %v9031_v0 = vadd.f32 %v3087_v32, %v9028_v27  ;;  %v9034_v53 = vadd.f32 %v3085_v61, %v9028_v27  ;;  %v2912_v21 = vsub.f32 1.5, %v2911_v17  ;;  %v5654_v32 = vld [vmem:[#allocation7 + $0x10] sm:$0xff]  ;;  %v5664_v17 = vld [vmem:[#allocation7 + $0x60] sm:$0xff] }
 0xa5e   :  { %3158 = vmatmul.bf16.gmra.mxu1 %v9020_v38  ;;  %3109 = vmatmul.bf16.gmra.mxu2 %v9020_v38  ;;  %v6216_v31 = vpop.eup %6215  ;;  %v9039_v26 = vadd.f32 1e-05, %v2782_v10 }
 0xa5f   :  { %4257 = vmatmul.bf16.gmra.mxu3 %v9020_v38  ;;  %v2919_v15 = vmul.f32 %v6216_v31, %v2780_v2  ;;  %v5371_v33 = vmul.f32 -1.442695, %v9031_v0  ;;  %v5369_v59 = vmul.f32 -1.442695, %v9034_v53  ;;  %v2913_v46 = vmul.f32 %v6214_v14, %v2912_v21  ;;  %3963 = vmatpush.bf16.msra.mxu2 %v5654_v32 }
 0xa60   :  { %vm2925_vm6 = vweird.f32 %v6216_v31  ;;  %4010 = vmatpush.bf16.msra.mxu1 %v5664_v17  ;;  %vm2934_vm15 = vweird.f32 %v9039_v26 }
 0xa61   :  { %v2920_v36 = vmul.f32 %v6216_v31, %v2919_v15  ;;  %vm2926_vm10 = vmor %vm2924_vm9, %vm2925_vm6  ;;  %v2917_v4 = vsel %vm2916_vm8, %v6214_v14, %v2913_v46 }
 0xa62   :  { %v2960_v61 = vmul.f32 %v2917_v4, %v8959_v52  ;;  %v3090_v10 = vpop.f32.mrf.mxu2 }
 0xa63   :  { %v2921_v11 = vmul.f32 0.5, %v2920_v36 }
 0xa65   :  { %v2785_v23 = vpop.f32.mrf.mxu1  ;;  %v2922_v16 = vsub.f32 1.5, %v2921_v11 }
 0xa66   :  { %v9036_v12 = vadd.f32 1e-05, %v2785_v23 }
 0xa67   :  { %v2923_v54 = vmul.f32 %v6216_v31, %v2922_v16  ;;  %v5653_v16 = vld [vmem:[#allocation7 + $0x8] sm:$0xff] }
 0xa68   :  { %6217 = vrsqrt.f32 %v9036_v12  ;;  %3964 = vmatpush.bf16.msra.mxu2 %v5653_v16  ;;  %vm2944_vm13 = vweird.f32 %v9036_v12 }
 0xa69   :  { %6219 = vpow2.f32 %v5371_v33  ;;  %v2927_v58 = vsel %vm2926_vm10, %v6216_v31, %v2923_v54  ;;  %v5663_v54 = vld [vmem:[#allocation7 + $0x58] sm:$0xff] }
 0xa6a   :  { %6221 = vrsqrt.f32 %v9039_v26  ;;  %v2961_v2 = vmul.f32 %v2927_v58, %v8974_v45  ;;  %v3092_v33 = vpop.f32.mrf.mxu2  ;;  %4011 = vmatpush.bf16.msra.mxu1 %v5663_v54 }
 0xa6b   :  { %6223 = vpow2.f32 %v5369_v59 }
 0xa6c   :  { %v9060_v57 = vpack.c.bf16 %v2961_v2, %v2960_v61  ;;  %v9087_v61 = vadd.f32 %v3090_v10, %v9028_v27 }
 0xa6d   :  { %v3134_v7 = vpop.f32.mrf.mxu1 }
 0xa6e   :  { %v9046_v41 = vpop.eup %6217  ;;  %v9049_v22 = vadd.f32 %v3134_v7, %v9044_v50  ;;  %3114 = vmatmul.bf16.gmra.mxu2 %v9060_v57  ;;  %3163 = vmatmul.bf16.gmra.mxu1 %v9060_v57  ;;  %v5652_v7 = vld [vmem:[#allocation7] sm:$0xff]  ;;  %v5373_v10 = vmul.f32 -1.442695, %v9087_v61 }
 0xa6f   :  { %v6220_v1 = vpop.eup %6219  ;;  %v2939_v15 = vmul.f32 %v9046_v41, %v9036_v12  ;;  %4262 = vmatmul.bf16.gmra.mxu3 %v9060_v57  ;;  %3965 = vmatpush.bf16.msra.mxu2 %v5652_v7  ;;  %vm2945_vm11 = vweird.f32 %v9046_v41  ;;  %v9110_v12 = vadd.f32 %v3092_v33, %v9028_v27 }
 0xa70   :  { %v9051_v20 = vpop.eup %6221  ;;  %v5370_v14 = vmul.f32 -1.442695, %v9049_v22  ;;  %v9058_v47 = vadd.f32 1.0, %v6220_v1  ;;  %vm9099_vm14 = vmor %vm2944_vm13, %vm2945_vm11 }
 0xa71   :  { %v6224_v31 = vpop.eup %6223  ;;  %v2929_v42 = vmul.f32 %v9051_v20, %v9039_v26  ;;  %v2940_v36 = vmul.f32 %v9046_v41, %v2939_v15  ;;  %vm2935_vm12 = vweird.f32 %v9051_v20  ;;  %v5661_v26 = vld [vmem:[#allocation7 + $0x48] sm:$0xff]  ;;  %v5375_v33 = vmul.f32 -1.442695, %v9110_v12 }
 0xa72   :  { %6225 = vpow2.f32 %v5370_v14  ;;  %v9066_v45 = vadd.f32 1.0, %v6224_v31  ;;  %vm2936_vm0 = vmor %vm2934_vm15, %vm2935_vm12  ;;  %vm3337_vm3 = vweird.f32 %v9058_v47 }
 0xa73   :  { %6227 = vrcp.f32 %v9058_v47  ;;  %v2930_v18 = vmul.f32 %v9051_v20, %v2929_v42  ;;  %v2941_v21 = vmul.f32 0.5, %v2940_v36  ;;  %v5662_v42 = vld [vmem:[#allocation7 + $0x50] sm:$0xff] }
 0xa74   :  { %6229 = vrcp.f32 %v9066_v45  ;;  %4012 = vmatpush.bf16.msra.mxu1 %v5662_v42  ;;  %v3311_v7 = vand.u32 2147483647, %v9066_v45  ;;  %vm3307_vm2 = vweird.f32 %v9066_v45  ;;  %v3343_v42 = vand.u32 2147483648, %v9058_v47 }
 0xa75   :  { %v3136_v52 = vpop.f32.mrf.mxu1  ;;  %v2931_v51 = vmul.f32 0.5, %v2930_v18  ;;  %v2942_v6 = vsub.f32 1.5, %v2941_v21  ;;  %v3095_v18 = vpop.f32.mrf.mxu2 }
 0xa76   :  { %v9073_v23 = vadd.f32 %v3136_v52, %v9044_v50  ;;  %vm9136_vm5 = vcmp.eq.f32.partialorder %v3311_v7, 8.507059e+37 }
 0xa77   :  { %v2932_v1 = vsub.f32 1.5, %v2931_v51  ;;  %v2943_v2 = vmul.f32 %v9046_v41, %v2942_v6  ;;  %v3313_v6 = vand.u32 2147483648, %v9066_v45 }
 0xa78   :  { %v6226_v11 = vpop.eup %6225  ;;  %v5372_v46 = vmul.f32 -1.442695, %v9073_v23  ;;  %4013 = vmatpush.bf16.msra.mxu1 %v5661_v26 }
 0xa79   :  { %v9076_v59 = vadd.f32 1.0, %v6226_v11  ;;  %v9079_v5 = vpop.eup %6227  ;;  %v2933_v31 = vmul.f32 %v9051_v20, %v2932_v1  ;;  %v2947_v17 = vsel %vm9099_vm14, %v9046_v41, %v2943_v2 }
 0xa7a   :  { %v9082_v4 = vpop.eup %6229  ;;  %v3333_v58 = vmul.f32 %v9079_v5, %v9058_v47  ;;  %v2963_v41 = vmul.f32 %v2947_v17, %v8991_v44  ;;  %vm3338_vm1 = vweird.f32 %v9079_v5 }
 0xa7b   :  { %6231 = vrcp.f32 %v9076_v59  ;;  %v3303_v62 = vmul.f32 %v9082_v4, %v9066_v45  ;;  %v2937_v54 = vsel %vm2936_vm0, %v9051_v20, %v2933_v31  ;;  %vm3308_vm4 = vweird.f32 %v9082_v4  ;;  %vm9140_vm6 = vmor %vm3337_vm3, %vm3338_vm1 }
 0xa7c   :  { %6233 = vpow2.f32 %v5372_v46  ;;  %v3334_v14 = vsub.f32 1.0, %v3333_v58  ;;  %v2962_v58 = vmul.f32 %v2937_v54, %v8982_v8  ;;  %v3341_v8 = vand.u32 2147483647, %v9058_v47  ;;  %vm9174_vm11 = vmor %vm3307_vm2, %vm3308_vm4 }
 0xa7d   :  { %v3139_v16 = vpop.f32.mrf.mxu1  ;;  %v3304_v51 = vsub.f32 1.0, %v3303_v62  ;;  %v3314_v62 = vor.u32 1.1754944e-38, %v3313_v6  ;;  %vm3322_vm8 = vweird.f32 %v9076_v59  ;;  %v3326_v54 = vand.u32 2147483647, %v9076_v59 }
 0xa7e   :  { %v3335_v46 = vmul.f32 %v9079_v5, %v3334_v14  ;;  %v9128_v44 = vadd.f32 %v3139_v16, %v9044_v50  ;;  %v9130_v14 = vpack.c.bf16 %v2963_v41, %v2962_v58  ;;  %vm3342_vm9 = vcmp.eq.f32.partialorder %v3341_v8, 8.507059e+37  ;;  %v5660_v58 = vld [vmem:[#allocation7 + $0x40] sm:$0xff] }
 0xa7f   :  { %v3305_v2 = vmul.f32 %v9082_v4, %v3304_v51  ;;  %v3328_v51 = vand.u32 2147483648, %v9076_v59  ;;  %4014 = vmatpush.bf16.msra.mxu1 %v5660_v58  ;;  %vm3327_vm13 = vcmp.eq.f32.partialorder %v3326_v54, 8.507059e+37 }
 0xa80   :  { %v3336_v20 = vadd.f32 %v9079_v5, %v3335_v46  ;;  %3119 = vmatmul.bf16.gmra.mxu2 %v9130_v14  ;;  %3168 = vmatmul.bf16.gmra.mxu1 %v9130_v14  ;;  %v9155_v46 = vadd.f32 %v3095_v18, %v9028_v27  ;;  %v5374_v6 = vmul.f32 -1.442695, %v9128_v44 }
 0xa81   :  { %v9093_v15 = vpop.eup %6231  ;;  %v3306_v47 = vadd.f32 %v9082_v4, %v3305_v2  ;;  %4267 = vmatmul.bf16.gmra.mxu3 %v9130_v14  ;;  %v3329_v36 = vor.u32 1.1754944e-38, %v3328_v51 }
 0xa82   :  { %v6234_v52 = vpop.eup %6233  ;;  %v3318_v32 = vmul.f32 %v9093_v15, %v9076_v59  ;;  %vm3323_vm7 = vweird.f32 %v9093_v15  ;;  %v3340_v16 = vsel %vm9140_vm6, %v9079_v5, %v3336_v20  ;;  %v5377_v45 = vmul.f32 -1.442695, %v9155_v46 }
 0xa83   :  { %v9112_v11 = vadd.f32 1.0, %v6234_v52  ;;  %vm9165_vm10 = vmor %vm3322_vm8, %vm3323_vm7 }
 0xa84   :  { %v3319_v21 = vsub.f32 1.0, %v3318_v32 }
 0xa85   :  { %6235 = vrcp.f32 %v9112_v11  ;;  %v3141_v41 = vpop.f32.mrf.mxu1  ;;  %v3358_v18 = vand.u32 2147483648, %v9112_v11  ;;  %v3356_v20 = vand.u32 2147483647, %v9112_v11  ;;  %vm3352_vm14 = vweird.f32 %v9112_v11 }
 0xa86   :  { %6237 = vpow2.f32 %v5373_v10  ;;  %v3320_v1 = vmul.f32 %v9093_v15, %v3319_v21  ;;  %v3097_v21 = vpop.f32.mrf.mxu2  ;;  %v9191_v5 = vadd.f32 %v3141_v41, %v9044_v50 }
 0xa87   :  { %6239 = vpow2.f32 %v5375_v33  ;;  %v3344_v33 = vor.u32 1.1754944e-38, %v3343_v42  ;;  %v3310_v42 = vsel %vm9174_vm11, %v9082_v4, %v3306_v47  ;;  %vm3357_vm0 = vcmp.eq.f32.partialorder %v3356_v20, 8.507059e+37 }
 0xa88   :  { %v3321_v32 = vadd.f32 %v9093_v15, %v3320_v1  ;;  %6241 = vpow2.f32 %v5374_v6 }
 0xa8a   :  { %v3325_v1 = vsel %vm9165_vm10, %v9093_v15, %v3321_v32  ;;  %v3359_v32 = vor.u32 1.1754944e-38, %v3358_v18 }
 0xa8b   :  { %v6236_v31 = vpop.eup %6235  ;;  %v3330_v15 = vsel %vm3327_vm13, %v3329_v36, %v3325_v1 }
 0xa8c   :  { %v6238_v52 = vpop.eup %6237  ;;  %v3348_v17 = vmul.f32 %v6236_v31, %v9112_v11  ;;  %vm3353_vm12 = vweird.f32 %v6236_v31  ;;  %v3783_v54 = vmul.f32 %v3330_v15, %v9049_v22 }
 0xa8d   :  { %v9161_v7 = vadd.f32 1.0, %v6238_v52  ;;  %v6240_v8 = vpop.eup %6239  ;;  %v3345_v52 = vsel %vm3342_vm9, %v3344_v33, %v3340_v16  ;;  %vm3354_vm15 = vmor %vm3352_vm14, %vm3353_vm12  ;;  %v3315_v16 = vsel %vm9136_vm5, %v3314_v62, %v3310_v42  ;;  %v5376_v33 = vmul.f32 -1.442695, %v9191_v5  ;;  %v3144_v62 = vpop.f32.mrf.mxu1 }
 0xa8e   :  { %v3349_v26 = vsub.f32 1.0, %v3348_v17  ;;  %v9194_v4 = vadd.f32 1.0, %v6240_v8  ;;  %v3784_v51 = vmul.f32 %v3345_v52, %v9031_v0  ;;  %v3100_v6 = vpop.f32.mrf.mxu2  ;;  %v6242_v18 = vpop.eup %6241 }
 0xa8f   :  { %6243 = vrcp.f32 %v9161_v7  ;;  %v9207_v22 = vadd.f32 1.0, %v6242_v18  ;;  %vm3367_vm2 = vweird.f32 %v9161_v7 }
 0xa90   :  { %v3350_v2 = vmul.f32 %v6236_v31, %v3349_v26  ;;  %v9188_v26 = vadd.f32 %v3097_v21, %v9028_v27  ;;  %6245 = vpow2.f32 %v5377_v45  ;;  %v3403_v9 = vand.u32 2147483648, %v9194_v4 }
 0xa91   :  { %6247 = vrcp.f32 %v9194_v4  ;;  %vm3397_vm6 = vweird.f32 %v9194_v4  ;;  %vm3382_vm12 = vweird.f32 %v9207_v22 }
 0xa92   :  { %v3351_v17 = vadd.f32 %v6236_v31, %v3350_v2  ;;  %v5379_v41 = vmul.f32 -1.442695, %v9188_v26  ;;  %6249 = vpow2.f32 %v5376_v33 }
 0xa94   :  { %v3355_v47 = vsel %vm3354_vm15, %v6236_v31, %v3351_v17  ;;  %v3782_v31 = vmul.f32 %v3315_v16, %v9034_v53  ;;  %6251 = vpow2.f32 %v5379_v41  ;;  %v9223_v17 = vadd.f32 %v3100_v6, %v9028_v27 }
 0xa95   :  { %v3360_v11 = vsel %vm3357_vm0, %v3359_v32, %v3355_v47  ;;  %v9205_v58 = vpop.eup %6243  ;;  %6253 = vrcp.f32 %v9207_v22 }
 0xa96   :  { %v3785_v21 = vmul.f32 %v3360_v11, %v9073_v23  ;;  %v3814_v0 = vpack.c.bf16 %v3784_v51, %v3782_v31  ;;  %v9210_v23 = vadd.f32 %v3144_v62, %v9044_v50  ;;  %v6246_v59 = vpop.eup %6245  ;;  %v3363_v53 = vmul.f32 %v9205_v58, %v9161_v7  ;;  %v3102_v8 = vpop.f32.mrf.mxu2 }
 0xa97   :  { %v9214_v1 = vpop.eup %6247  ;;  %v9218_v36 = vadd.f32 1.0, %v6246_v59  ;;  %v9231_v47 = vadd.f32 %v3102_v8, %v9028_v27  ;;  %v3146_v51 = vpop.f32.mrf.mxu1  ;;  %vm3368_vm1 = vweird.f32 %v9205_v58  ;;  %v3373_v59 = vand.u32 2147483648, %v9161_v7 }
 0xa98   :  { %v3815_v10 = vpack.c.bf16 %v3785_v21, %v3783_v54  ;;  %3966 = vmatmul.bf16.vlgmr.msra.gmra.mxu2 %v3814_v0  ;;  %v6250_v2 = vpop.eup %6249  ;;  %v5378_v20 = vmul.f32 -1.442695, %v9210_v23  ;;  %v3364_v52 = vsub.f32 1.0, %v3363_v53  ;;  %v3393_v45 = vmul.f32 %v9214_v1, %v9194_v4  ;;  %vm9258_vm3 = vmor %vm3367_vm2, %vm3368_vm1 }
 0xa99   :  { %v9225_v15 = vadd.f32 1.0, %v6250_v2  ;;  %v5381_v21 = vmul.f32 -1.442695, %v9223_v17  ;;  %v5383_v41 = vmul.f32 -1.442695, %v9231_v47  ;;  %v9256_v2 = vadd.f32 %v3146_v51, %v9044_v50 }
 0xa9a   :  { %4015 = vmatmul.bf16.vlgmr.msra.gmra.mxu1 %v3815_v10  ;;  %v6252_v42 = vpop.eup %6251  ;;  %6255 = vpow2.f32 %v5378_v20  ;;  %v3365_v11 = vmul.f32 %v9205_v58, %v3364_v52  ;;  %v3394_v54 = vsub.f32 1.0, %v3393_v45  ;;  %v3371_v8 = vand.u32 2147483647, %v9161_v7 }
 0xa9b   :  { %v9227_v32 = vadd.f32 1.0, %v6252_v42  ;;  %6257 = vrcp.f32 %v9225_v15  ;;  %v9233_v16 = vpop.eup %6253  ;;  %vm3398_vm4 = vweird.f32 %v9214_v1  ;;  %v3388_v20 = vand.u32 2147483648, %v9207_v22 }
 0xa9c   :  { %6259 = vrcp.f32 %v9218_v36  ;;  %v3378_v6 = vmul.f32 %v9233_v16, %v9207_v22  ;;  %v3366_v18 = vadd.f32 %v9205_v58, %v3365_v11  ;;  %v3395_v10 = vmul.f32 %v9214_v1, %v3394_v54  ;;  %vm9281_vm7 = vmor %vm3397_vm6, %vm3398_vm4 }
 0xa9d   :  { %6261 = vrcp.f32 %v9227_v32  ;;  %v3401_v11 = vand.u32 2147483647, %v9194_v4  ;;  %vm3372_vm5 = vcmp.eq.f32.partialorder %v3371_v8, 8.507059e+37  ;;  %v3404_v4 = vor.u32 1.1754944e-38, %v3403_v9 }
 0xa9e   :  { %6263 = vpow2.f32 %v5381_v21  ;;  %v9247_v62 = vpop.f32.mrf.mxu2  ;;  %v3379_v42 = vsub.f32 1.0, %v3378_v6  ;;  %v3370_v45 = vsel %vm9258_vm3, %v9205_v58, %v3366_v18  ;;  %v3396_v51 = vadd.f32 %v9214_v1, %v3395_v10 }
 0xa9f   :  { %6265 = vpow2.f32 %v5383_v41  ;;  %v3374_v6 = vor.u32 1.1754944e-38, %v3373_v59  ;;  %v3149_v58 = vpop.f32.mrf.mxu1  ;;  %vm9290_vm8 = vcmp.eq.f32.partialorder %v3401_v11, 8.507059e+37  ;;  %vm3383_vm10 = vweird.f32 %v9233_v16 }
 0xaa0   :  { %v6256_v33 = vpop.eup %6255  ;;  %v3400_v49 = vsel %vm9281_vm7, %v9214_v1, %v3396_v51  ;;  %v3418_v1 = vand.u32 2147483648, %v9225_v15  ;;  %vm3412_vm11 = vweird.f32 %v9225_v15  ;;  %v3416_v9 = vand.u32 2147483647, %v9225_v15  ;;  %vm9322_vm14 = vmor %vm3382_vm12, %vm3383_vm10 }
 0xaa1   :  { %v9244_v31 = vpop.eup %6257  ;;  %v9263_v52 = vadd.f32 1.0, %v6256_v33  ;;  %v5380_v33 = vmul.f32 -1.442695, %v9256_v2  ;;  %v3375_v10 = vsel %vm3372_vm5, %v3374_v6, %v3370_v45  ;;  %vm3457_vm3 = vweird.f32 %v9227_v32 }
 0xaa2   :  { %v9249_v0 = vpop.eup %6259  ;;  %v3408_v53 = vmul.f32 %v9244_v31, %v9225_v15  ;;  %vm3413_vm9 = vweird.f32 %v9244_v31  ;;  %v3419_v8 = vor.u32 1.1754944e-38, %v3418_v1  ;;  %vm3417_vm15 = vcmp.eq.f32.partialorder %v3416_v9, 8.507059e+37 }
 0xaa3   :  { %v9269_v21 = vpop.eup %6261  ;;  %v3423_v7 = vmul.f32 %v9249_v0, %v9218_v36  ;;  %6267 = vrcp.f32 %v9263_v52  ;;  %vm9315_vm13 = vmor %vm3412_vm11, %vm3413_vm9  ;;  %vm3428_vm1 = vweird.f32 %v9249_v0  ;;  %vm3427_vm4 = vweird.f32 %v9218_v36 }
 0xaa4   :  { %v3409_v54 = vsub.f32 1.0, %v3408_v53  ;;  %v6264_v18 = vpop.eup %6263  ;;  %v3380_v53 = vmul.f32 %v9233_v16, %v3379_v42  ;;  %v3453_v59 = vmul.f32 %v9269_v21, %v9227_v32  ;;  %6269 = vpow2.f32 %v5380_v33  ;;  %vm9388_vm6 = vmor %vm3427_vm4, %vm3428_vm1 }
 0xaa5   :  { %v3424_v42 = vsub.f32 1.0, %v3423_v7  ;;  %v9294_v28 = vadd.f32 1.0, %v6264_v18  ;;  %v3786_v33 = vmul.f32 %v3375_v10, %v9087_v61  ;;  %v3405_v18 = vsel %vm9290_vm8, %v3404_v4, %v3400_v49 }
 0xaa6   :  { %v3410_v41 = vmul.f32 %v9244_v31, %v3409_v54  ;;  %v6266_v54 = vpop.eup %6265  ;;  %v3381_v6 = vadd.f32 %v9233_v16, %v3380_v53  ;;  %v3107_v11 = vpop.f32.mrf.mxu2  ;;  %v3454_v51 = vsub.f32 1.0, %v3453_v59  ;;  %v3386_v53 = vand.u32 2147483647, %v9207_v22 }
 0xaa7   :  { %v9304_v7 = vadd.f32 1.0, %v6266_v54  ;;  %v3425_v15 = vmul.f32 %v9249_v0, %v3424_v42  ;;  %6271 = vrcp.f32 %v9294_v28  ;;  %v9331_v61 = vadd.f32 %v3107_v11, %v9028_v27 }
 0xaa8   :  { %v3411_v45 = vadd.f32 %v9244_v31, %v3410_v41  ;;  %v3385_v22 = vsel %vm9322_vm14, %v9233_v16, %v3381_v6  ;;  %v3389_v10 = vor.u32 1.1754944e-38, %v3388_v20  ;;  %v9338_v4 = vadd.f32 %v9247_v62, %v9028_v27 }
 0xaa9   :  { %v9306_v41 = vpop.eup %6267  ;;  %v3455_v29 = vmul.f32 %v9269_v21, %v3454_v51  ;;  %6273 = vrcp.f32 %v9304_v7  ;;  %v3788_v11 = vmul.f32 %v3405_v18, %v9110_v12  ;;  %v3431_v16 = vand.u32 2147483647, %v9218_v36 }
 0xaaa   :  { %v3415_v49 = vsel %vm9315_vm13, %v9244_v31, %v3411_v45  ;;  %v6270_v42 = vpop.eup %6269  ;;  %v3438_v31 = vmul.f32 %v9306_v41, %v9263_v52  ;;  %v3151_v45 = vpop.f32.mrf.mxu1  ;;  %vm3387_vm0 = vcmp.eq.f32.partialorder %v3386_v53, 8.507059e+37  ;;  %v5387_v62 = vmul.f32 -1.442695, %v9331_v61 }
 0xaab   :  { %v3420_v6 = vsel %vm3417_vm15, %v3419_v8, %v3415_v49  ;;  %v3390_v20 = vsel %vm3387_vm0, %v3389_v10, %v3385_v22  ;;  %v9346_v1 = vadd.f32 1.0, %v6270_v42  ;;  %v9350_v51 = vadd.f32 %v3149_v58, %v9044_v50 }
 0xaac   :  { %v3426_v9 = vadd.f32 %v9249_v0, %v3425_v15  ;;  %vm3458_vm2 = vweird.f32 %v9269_v21  ;;  %v5385_v12 = vmul.f32 -1.442695, %v9338_v4  ;;  %v3456_v53 = vadd.f32 %v9269_v21, %v3455_v29 }
 0xaad   :  { %v9356_v18 = vpop.eup %6271  ;;  %v3789_v59 = vmul.f32 %v3420_v6, %v9191_v5  ;;  %v3439_v54 = vsub.f32 1.0, %v3438_v31  ;;  %6275 = vrcp.f32 %v9346_v1  ;;  %v3461_v58 = vand.u32 2147483647, %v9227_v32  ;;  %v5688_v5 = vld [vmem:[#allocation7 + $0xa0] sm:$0xff]  ;;  %vm9375_vm5 = vmor %vm3457_vm3, %vm3458_vm2 }
 0xaae   :  { %v3463_v15 = vand.u32 2147483648, %v9227_v32  ;;  %v3787_v49 = vmul.f32 %v3390_v20, %v9128_v44  ;;  %6277 = vpow2.f32 %v5387_v62  ;;  %v5382_v10 = vmul.f32 -1.442695, %v9350_v51  ;;  %5060 = vmatpush.bf16.msra.mxu0 %v5688_v5 }
 0xaaf   :  { %v9365_v22 = vpop.eup %6273  ;;  %v3816_v8 = vpack.c.bf16 %v3788_v11, %v3786_v33  ;;  %v9369_v29 = vadd.f32 %v3151_v45, %v9044_v50  ;;  %v3433_v42 = vand.u32 2147483648, %v9218_v36  ;;  %v3483_v44 = vmul.f32 %v9356_v18, %v9294_v28 }
 0xab0   :  { %6279 = vpow2.f32 %v5385_v12  ;;  %v3460_v33 = vsel %vm9375_vm5, %v9269_v21, %v3456_v53  ;;  %v3440_v31 = vmul.f32 %v9306_v41, %v3439_v54  ;;  %v3817_v36 = vpack.c.bf16 %v3789_v59, %v3787_v49 }
 0xab1   :  { %3971 = vmatmul.bf16.gmra.mxu2 %v3816_v8  ;;  %v5384_v45 = vmul.f32 -1.442695, %v9369_v29  ;;  %v3464_v20 = vor.u32 1.1754944e-38, %v3463_v15  ;;  %v3513_v62 = vmul.f32 %v9365_v22, %v9304_v7  ;;  %6281 = vpow2.f32 %v5382_v10 }
 0xab2   :  { %v3154_v11 = vpop.f32.mrf.mxu1  ;;  %v3430_v53 = vsel %vm9388_vm6, %v9249_v0, %v3426_v9  ;;  %vm3432_vm7 = vcmp.eq.f32.partialorder %v3431_v16, 8.507059e+37  ;;  %vm3462_vm8 = vcmp.eq.f32.partialorder %v3461_v58, 8.507059e+37  ;;  %4020 = vmatmul.bf16.gmra.mxu1 %v3817_v36  ;;  %v3434_v59 = vor.u32 1.1754944e-38, %v3433_v42 }
 0xab3   :  { %v9395_v21 = vadd.f32 %v3154_v11, %v9044_v50  ;;  %v6276_v12 = vpop.eup %6275  ;;  %6283 = vpow2.f32 %v5384_v45  ;;  %v3465_v54 = vsel %vm3462_vm8, %v3464_v20, %v3460_v33  ;;  %v3484_v49 = vsub.f32 1.0, %v3483_v44 }
 0xab4   :  { %v3468_v15 = vmul.f32 %v6276_v12, %v9346_v1  ;;  %v6278_v8 = vpop.eup %6277  ;;  %v3441_v10 = vadd.f32 %v9306_v41, %v3440_v31  ;;  %vm3443_vm9 = vweird.f32 %v9306_v41  ;;  %v3448_v5 = vand.u32 2147483648, %v9263_v52 }
 0xab5   :  { %v5386_v32 = vmul.f32 -1.442695, %v9395_v21  ;;  %v3435_v0 = vsel %vm3432_vm7, %v3434_v59, %v3430_v53  ;;  %v3514_v16 = vsub.f32 1.0, %v3513_v62  ;;  %vm3442_vm10 = vweird.f32 %v9263_v52 }
 0xab6   :  { %v6280_v11 = vpop.eup %6279  ;;  %v3469_v9 = vsub.f32 1.0, %v3468_v15  ;;  %v3446_v58 = vand.u32 2147483647, %v9263_v52  ;;  %v3478_v42 = vand.u32 2147483648, %v9346_v1  ;;  %v9408_v44 = vadd.f32 1.0, %v6278_v8  ;;  %vm9411_vm11 = vmor %vm3442_vm10, %vm3443_vm9 }
 0xab7   :  { %6285 = vpow2.f32 %v5386_v32  ;;  %v6282_v33 = vpop.eup %6281  ;;  %v3792_v31 = vmul.f32 %v3465_v54, %v9188_v26  ;;  %vm3473_vm12 = vweird.f32 %v6276_v12  ;;  %v3476_v6 = vand.u32 2147483647, %v9346_v1 }
 0xab8   :  { %v3470_v36 = vmul.f32 %v6276_v12, %v3469_v9  ;;  %v3485_v62 = vmul.f32 %v9356_v18, %v3484_v49  ;;  %v3445_v52 = vsel %vm9411_vm11, %v9306_v41, %v3441_v10  ;;  %v3449_v53 = vor.u32 1.1754944e-38, %v3448_v5 }
 0xab9   :  { %v6284_v20 = vpop.eup %6283  ;;  %v9420_v59 = vadd.f32 1.0, %v6280_v11  ;;  %vm3472_vm13 = vweird.f32 %v9346_v1  ;;  %v9423_v26 = vadd.f32 1.0, %v6282_v33  ;;  %v3515_v8 = vmul.f32 %v9365_v22, %v3514_v16 }
 0xaba   :  { %v3471_v15 = vadd.f32 %v6276_v12, %v3470_v36  ;;  %v9425_v54 = vadd.f32 1.0, %v6284_v20  ;;  %vm3447_vm14 = vcmp.eq.f32.partialorder %v3446_v58, 8.507059e+37  ;;  %vm3474_vm15 = vmor %vm3472_vm13, %vm3473_vm12  ;;  %v3479_v32 = vor.u32 1.1754944e-38, %v3478_v42 }
 0xabb   :  { %6287 = vrcp.f32 %v9408_v44  ;;  %v3450_v49 = vsel %vm3447_vm14, %v3449_v53, %v3445_v52  ;;  %vm3477_vm0 = vcmp.eq.f32.partialorder %v3476_v6, 8.507059e+37  ;;  %v3790_v10 = vmul.f32 %v3435_v0, %v9155_v46  ;;  %v3156_v0 = vpop.f32.mrf.mxu1 }
 0xabc   :  { %v3475_v9 = vsel %vm3474_vm15, %v6276_v12, %v3471_v15  ;;  %6289 = vrcp.f32 %v9423_v26  ;;  %v3491_v1 = vand.u32 2147483647, %v9294_v28  ;;  %v3493_v11 = vand.u32 2147483648, %v9294_v28 }
 0xabd   :  { %v6286_v41 = vpop.eup %6285  ;;  %6291 = vrcp.f32 %v9420_v59  ;;  %v3480_v5 = vsel %vm3477_vm0, %v3479_v32, %v3475_v9  ;;  %v3521_v16 = vand.u32 2147483647, %v9304_v7  ;;  %v3516_v12 = vadd.f32 %v9365_v22, %v3515_v8 }
 0xabe   :  { %v3793_v58 = vmul.f32 %v3480_v5, %v9256_v2  ;;  %6293 = vrcp.f32 %v9425_v54  ;;  %vm3518_vm1 = vweird.f32 %v9365_v22  ;;  %v3791_v42 = vmul.f32 %v3450_v49, %v9210_v23 }
 0xabf   :  { %v3818_v46 = vpack.c.bf16 %v3792_v31, %v3790_v10  ;;  %v3486_v33 = vadd.f32 %v9356_v18, %v3485_v62  ;;  %vm3488_vm2 = vweird.f32 %v9356_v18  ;;  %v3523_v45 = vand.u32 2147483648, %v9304_v7 }
 0xac0   :  { %v9443_v36 = vadd.f32 1.0, %v6286_v41  ;;  %vm3517_vm3 = vweird.f32 %v9304_v7  ;;  %v3819_v2 = vpack.c.bf16 %v3793_v58, %v3791_v42  ;;  %vm3487_vm4 = vweird.f32 %v9294_v28  ;;  %v5683_v41 = vld [vmem:[%s10578_s4 + $0xf4] sm:$0xf0] }
 0xac1   :  { %v9445_v6 = vpop.eup %6287  ;;  %3976 = vmatmul.bf16.gmra.mxu2 %v3818_v46  ;;  %vm9451_vm5 = vcmp.eq.f32.partialorder %v3491_v1, 8.507059e+37  ;;  %vm9457_vm6 = vmor %vm3517_vm3, %vm3518_vm1  ;;  %v9462_v62 = vadd.f32 %v3156_v0, %v9044_v50  ;;  %v3494_v28 = vor.u32 1.1754944e-38, %v3493_v11  ;;  %vm3522_vm8 = vcmp.eq.f32.partialorder %v3521_v16, 8.507059e+37  ;;  %v5681_v42 = vld [vmem:[%s10578_s4 + $0xd4] sm:$0xf0] }
 0xac2   :  { %v9448_v20 = vpop.eup %6289  ;;  %vm9466_vm7 = vmor %vm3487_vm4, %vm3488_vm2  ;;  %v3520_v53 = vsel %vm9457_vm6, %v9365_v22, %v3516_v12  ;;  %6295 = vrcp.f32 %v9443_v36  ;;  %4025 = vmatmul.bf16.gmra.mxu1 %v3819_v2  ;;  %v3524_v49 = vor.u32 1.1754944e-38, %v3523_v45  ;;  %v3573_v9 = vmul.f32 %v9445_v6, %v9408_v44  ;;  %v5524_v22 = vld [vmem:[%s10578_s4 + $0xe8] sm:$0xf] }
 0xac3   :  { %v9464_v7 = vpop.eup %6291  ;;  %v3498_v15 = vmul.f32 %v9448_v20, %v9423_v26  ;;  %v3490_v32 = vsel %vm9466_vm7, %v9356_v18, %v3486_v33  ;;  %v3506_v1 = vand.u32 2147483647, %v9423_v26  ;;  %v3508_v5 = vand.u32 2147483648, %v9423_v26  ;;  %v5516_v12 = vld [vmem:[%s10578_s4 + $0xc8] sm:$0xf] }
 0xac4   :  { %v6294_v8 = vpop.eup %6293  ;;  %v3525_v11 = vsel %vm3522_vm8, %v3524_v49, %v3520_v53  ;;  %v3543_v16 = vmul.f32 %v9464_v7, %v9420_v59  ;;  %vm3502_vm9 = vweird.f32 %v9423_v26  ;;  %v5388_v58 = vmul.f32 -1.442695, %v9462_v62  ;;  %v5679_v26 = vld [vmem:[%s10578_s4 + $0xb4] sm:$0xf0] }
 0xac5   :  { %v3499_v10 = vsub.f32 1.0, %v3498_v15  ;;  %v3528_v18 = vmul.f32 %v6294_v8, %v9425_v54  ;;  %vm3503_vm10 = vweird.f32 %v9448_v20  ;;  %v5525_v33 = vor.u32 %v5683_v41, %v5524_v22 }
 0xac6   :  { %v3574_v45 = vsub.f32 1.0, %v3573_v9  ;;  %v3536_v2 = vand.u32 2147483647, %v9425_v54  ;;  %v3538_v31 = vand.u32 2147483648, %v9425_v54  ;;  %6297 = vpow2.f32 %v5388_v58  ;;  %vm9514_vm12 = vmor %vm3502_vm9, %vm3503_vm10 }
 0xac7   :  { %v3500_v46 = vmul.f32 %v9448_v20, %v3499_v10  ;;  %v3529_v0 = vsub.f32 1.0, %v3528_v18  ;;  %vm3533_vm11 = vweird.f32 %v6294_v8  ;;  %4175 = vmatpush.bf16.msrb.mxu2 %v5525_v33  ;;  %v5517_v49 = vor.u32 %v5681_v42, %v5516_v12 }
 0xac8   :  { %v9504_v52 = vpop.eup %6295  ;;  %v3495_v10 = vsel %vm9451_vm5, %v3494_v28, %v3490_v32  ;;  %v3796_v18 = vmul.f32 %v3525_v11, %v9231_v47  ;;  %v3544_v22 = vsub.f32 1.0, %v3543_v16  ;;  %v3509_v12 = vor.u32 1.1754944e-38, %v3508_v5  ;;  %v5508_v47 = vld [vmem:[%s10578_s4 + $0xa8] sm:$0xf] }
 0xac9   :  { %v3501_v53 = vadd.f32 %v9448_v20, %v3500_v46  ;;  %v3530_v15 = vmul.f32 %v6294_v8, %v3529_v0  ;;  %vm3532_vm13 = vweird.f32 %v9425_v54  ;;  %v3575_v28 = vmul.f32 %v9445_v6, %v3574_v45 }
 0xaca   :  { %vm3507_vm14 = vcmp.eq.f32.partialorder %v3506_v1, 8.507059e+37  ;;  %vm3534_vm15 = vmor %vm3532_vm13, %vm3533_vm11  ;;  %v3539_v32 = vor.u32 1.1754944e-38, %v3538_v31  ;;  %v3794_v54 = vmul.f32 %v3495_v10, %v9223_v17  ;;  %vm3537_vm0 = vcmp.eq.f32.partialorder %v3536_v2, 8.507059e+37 }
 0xacb   :  { %v3505_v58 = vsel %vm9514_vm12, %v9448_v20, %v3501_v53  ;;  %v3531_v42 = vadd.f32 %v6294_v8, %v3530_v15  ;;  %v3558_v20 = vmul.f32 %v9504_v52, %v9443_v36  ;;  %4176 = vmatpush.bf16.msrb.mxu2 %v5517_v49  ;;  %v3545_v46 = vmul.f32 %v9464_v7, %v3544_v22 }
 0xacc   :  { %v3510_v5 = vsel %vm3507_vm14, %v3509_v12, %v3505_v58  ;;  %v6298_v16 = vpop.eup %6297  ;;  %v5509_v33 = vor.u32 %v5679_v26, %v5508_v47  ;;  %v3820_v53 = vpack.c.bf16 %v3796_v18, %v3794_v54  ;;  %v3576_v31 = vadd.f32 %v9445_v6, %v3575_v28 }
 0xacd   :  { %v3535_v11 = vsel %vm3534_vm15, %v6294_v8, %v3531_v42  ;;  %v9535_v1 = vadd.f32 1.0, %v6298_v16  ;;  %vm3578_vm1 = vweird.f32 %v9445_v6  ;;  %v3795_v17 = vmul.f32 %v3510_v5, %v9350_v51 }
 0xace   :  { %v3540_v0 = vsel %vm3537_vm0, %v3539_v32, %v3535_v11  ;;  %v3559_v15 = vsub.f32 1.0, %v3558_v20  ;;  %vm3548_vm2 = vweird.f32 %v9464_v7  ;;  %v3583_v8 = vand.u32 2147483648, %v9408_v44 }
 0xacf   :  { %v3797_v45 = vmul.f32 %v3540_v0, %v9369_v29  ;;  %6299 = vrcp.f32 %v9535_v1  ;;  %v3546_v2 = vadd.f32 %v9464_v7, %v3545_v46  ;;  %vm3577_vm3 = vweird.f32 %v9408_v44  ;;  %4177 = vmatpush.bf16.msrb.mxu2 %v5509_v33 }
 0xad0   :  { %v3581_v29 = vand.u32 2147483647, %v9408_v44  ;;  %v3551_v10 = vand.u32 2147483647, %v9420_v59  ;;  %v3553_v51 = vand.u32 2147483648, %v9420_v59  ;;  %vm9548_vm4 = vmor %vm3577_vm3, %vm3578_vm1  ;;  %vm3547_vm5 = vweird.f32 %v9420_v59 }
 0xad1   :  { %3981 = vmatmul.bf16.gmra.mxu2 %v3820_v53  ;;  %v3821_v49 = vpack.c.bf16 %v3797_v45, %v3795_v17  ;;  %v3580_v22 = vsel %vm9548_vm4, %v9445_v6, %v3576_v31  ;;  %v3560_v9 = vmul.f32 %v9504_v52, %v3559_v15  ;;  %vm9559_vm6 = vmor %vm3547_vm5, %vm3548_vm2  ;;  %v3584_v12 = vor.u32 1.1754944e-38, %v3583_v8  ;;  %v5677_v45 = vld [vmem:[%s10578_s4 + $0x94] sm:$0xf0] }
 0xad2   :  { %v3550_v59 = vsel %vm9559_vm6, %v9464_v7, %v3546_v2  ;;  %vm3582_vm7 = vcmp.eq.f32.partialorder %v3581_v29, 8.507059e+37  ;;  %vm3552_vm8 = vcmp.eq.f32.partialorder %v3551_v10, 8.507059e+37  ;;  %v3554_v28 = vor.u32 1.1754944e-38, %v3553_v51  ;;  %v4233_v10 = vpop.f32.mrf.mxu3 }
 0xad3   :  { %4030 = vmatmul.bf16.gmra.mxu1 %v3821_v49  ;;  %v3585_v32 = vsel %vm3582_vm7, %v3584_v12, %v3580_v22  ;;  %v3561_v54 = vadd.f32 %v9504_v52, %v3560_v9  ;;  %vm3563_vm9 = vweird.f32 %v9504_v52  ;;  %vm3562_vm10 = vweird.f32 %v9443_v36  ;;  %v5465_v49 = vld [vmem:[%s10580_s6 + $0x12] ss:$8 sm:$0x3] }
 0xad4   :  { %v3555_v7 = vsel %vm3552_vm8, %v3554_v28, %v3550_v59  ;;  %v3566_v16 = vand.u32 2147483647, %v9443_v36  ;;  %v3800_v33 = vmul.f32 %v3585_v32, %v9331_v61  ;;  %vm9587_vm11 = vmor %vm3562_vm10, %vm3563_vm9  ;;  %v3596_v53 = vand.u32 2147483647, %v9535_v1 }
 0xad5   :  { %v6300_v26 = vpop.eup %6299  ;;  %v3598_v31 = vand.u32 2147483648, %v9535_v1  ;;  %v3565_v15 = vsel %vm9587_vm11, %v9504_v52, %v3561_v54  ;;  %v3798_v61 = vmul.f32 %v3555_v7, %v9338_v4  ;;  %vm3592_vm14 = vweird.f32 %v9535_v1 }
 0xad6   :  { %vm3593_vm12 = vweird.f32 %v6300_v26  ;;  %vm3567_vm13 = vcmp.eq.f32.partialorder %v3566_v16, 8.507059e+37  ;;  %vm3597_vm0 = vcmp.eq.f32.partialorder %v3596_v53, 8.507059e+37  ;;  %v9603_v9 = vperm.slane %v5465_v49, 1 }
 0xad7   :  { %vm3594_vm15 = vmor %vm3592_vm14, %vm3593_vm12  ;;  %v3599_v52 = vor.u32 1.1754944e-38, %v3598_v31  ;;  %v3822_v18 = vpack.c.bf16 %v3800_v33, %v3798_v61  ;;  %v5500_v33 = vld [vmem:[%s10578_s4 + $0x88] sm:$0xf] }
 0xad8   :  { %v9608_v54 = vadd.f32 %v4233_v10, %v9603_v9 }
 0xadb   :  { %v3159_v41 = vpop.f32.mrf.mxu1 }
 0xadc   :  { %v9564_v42 = vadd.f32 %v3159_v41, %v9044_v50  ;;  %v3588_v41 = vmul.f32 %v6300_v26, %v9535_v1 }
 0xade   :  { %v5390_v11 = vmul.f32 -1.442695, %v9564_v42  ;;  %v3589_v46 = vsub.f32 1.0, %v3588_v41 }
 0xae0   :  { %6301 = vpow2.f32 %v5390_v11  ;;  %v4235_v11 = vpop.f32.mrf.mxu3 }
 0xae1   :  { %v3110_v23 = vpop.f32.mrf.mxu2  ;;  %3986 = vmatmul.bf16.gmra.mxu2 %v3822_v18  ;;  %v9632_v53 = vadd.f32 %v4235_v11, %v9603_v9 }
 0xae2   :  { %v9570_v6 = vadd.f32 %v3110_v23, %v9028_v27  ;;  %v3568_v23 = vand.u32 2147483648, %v9443_v36  ;;  %v3590_v36 = vmul.f32 %v6300_v26, %v3589_v46  ;;  %v5531_v46 = vmul.f32 -1.442695, %v9608_v54 }
 0xae3   :  { %v3161_v44 = vpop.f32.mrf.mxu1  ;;  %v5533_v61 = vmul.f32 -1.442695, %v9632_v53 }
 0xae4   :  { %v9573_v20 = vadd.f32 %v3161_v44, %v9044_v50  ;;  %v5389_v0 = vmul.f32 -1.442695, %v9570_v6  ;;  %v3569_v2 = vor.u32 1.1754944e-38, %v3568_v23  ;;  %v3591_v29 = vadd.f32 %v6300_v26, %v3590_v36 }
 0xae6   :  { %v5392_v17 = vmul.f32 -1.442695, %v9573_v20  ;;  %6303 = vpow2.f32 %v5389_v0  ;;  %v3570_v51 = vsel %vm3567_vm13, %v3569_v2, %v3565_v15  ;;  %v3595_v22 = vsel %vm3594_vm15, %v6300_v26, %v3591_v29  ;;  %v6302_v58 = vpop.eup %6301 }
 0xae7   :  { %v3600_v4 = vsel %vm3597_vm0, %v3599_v52, %v3595_v22  ;;  %v3799_v1 = vmul.f32 %v3570_v51, %v9395_v21  ;;  %v9610_v26 = vadd.f32 1.0, %v6302_v58  ;;  %v5687_v21 = vld [vmem:[#allocation7 + $0x98] sm:$0xff] }
 0xae8   :  { %6305 = vpow2.f32 %v5392_v17  ;;  %v3801_v44 = vmul.f32 %v3600_v4, %v9462_v62  ;;  %5061 = vmatpush.bf16.msra.mxu0 %v5687_v21  ;;  %v5501_v17 = vor.u32 %v5677_v45, %v5500_v33 }
 0xae9   :  { %v3112_v47 = vpop.f32.mrf.mxu2  ;;  %v3626_v33 = vand.u32 2147483647, %v9610_v26  ;;  %v3628_v45 = vand.u32 2147483648, %v9610_v26  ;;  %vm3622_vm1 = vweird.f32 %v9610_v26 }
 0xaea   :  { %v9579_v5 = vadd.f32 %v3112_v47, %v9028_v27  ;;  %v3823_v59 = vpack.c.bf16 %v3801_v44, %v3799_v1  ;;  %4178 = vmatpush.bf16.msrb.mxu2 %v5501_v17 }
 0xaeb   :  { %v3164_v12 = vpop.f32.mrf.mxu1  ;;  %vm9687_vm2 = vcmp.eq.f32.partialorder %v3626_v33, 8.507059e+37 }
 0xaec   :  { %v5391_v8 = vmul.f32 -1.442695, %v9579_v5  ;;  %v6304_v47 = vpop.eup %6303  ;;  %4035 = vmatmul.bf16.gmra.mxu1 %v3823_v59  ;;  %v9615_v7 = vadd.f32 %v3164_v12, %v9044_v50 }
 0xaed   :  { %v9612_v41 = vadd.f32 1.0, %v6304_v47  ;;  %v4238_v47 = vpop.f32.mrf.mxu3 }
 0xaee   :  { %6307 = vpow2.f32 %v5391_v8  ;;  %v6306_v28 = vpop.eup %6305  ;;  %v5394_v0 = vmul.f32 -1.442695, %v9615_v7 }
 0xaef   :  { %v9617_v62 = vadd.f32 1.0, %v6306_v28  ;;  %6309 = vrcp.f32 %v9610_v26  ;;  %vm3607_vm4 = vweird.f32 %v9612_v41 }
 0xaf0   :  { %6311 = vrcp.f32 %v9612_v41 }
 0xaf1   :  { %v3115_v23 = vpop.f32.mrf.mxu2  ;;  %6313 = vrcp.f32 %v9617_v62  ;;  %vm3652_vm11 = vweird.f32 %v9617_v62  ;;  %v3656_v55 = vand.u32 2147483647, %v9617_v62 }
 0xaf2   :  { %v9637_v15 = vadd.f32 %v3115_v23, %v9028_v27 }
 0xaf3   :  { %v3166_v31 = vpop.f32.mrf.mxu1  ;;  %vm3657_vm15 = vcmp.eq.f32.partialorder %v3656_v55, 8.507059e+37 }
 0xaf4   :  { %v6308_v32 = vpop.eup %6307  ;;  %v9640_v36 = vadd.f32 %v3166_v31, %v9044_v50  ;;  %v5393_v2 = vmul.f32 -1.442695, %v9637_v15 }
 0xaf5   :  { %v9619_v16 = vadd.f32 1.0, %v6308_v32  ;;  %v9642_v8 = vpop.eup %6309 }
 0xaf6   :  { %v9646_v29 = vpop.eup %6311  ;;  %v5396_v49 = vmul.f32 -1.442695, %v9640_v36  ;;  %v3618_v4 = vmul.f32 %v9642_v8, %v9610_v26  ;;  %vm3623_vm3 = vweird.f32 %v9642_v8  ;;  %v5675_v26 = vld [vmem:[%s10578_s4 + $0x74] sm:$0xf0] }
 0xaf7   :  { %6315 = vrcp.f32 %v9619_v16  ;;  %v9649_v51 = vpop.eup %6313  ;;  %v3603_v1 = vmul.f32 %v9646_v29, %v9612_v41  ;;  %vm3608_vm5 = vweird.f32 %v9646_v29  ;;  %vm9716_vm7 = vmor %vm3622_vm1, %vm3623_vm3  ;;  %v3643_v34 = vand.u32 2147483648, %v9619_v16 }
 0xaf8   :  { %6317 = vpow2.f32 %v5531_v46  ;;  %v3648_v12 = vmul.f32 %v9649_v51, %v9617_v62  ;;  %v3619_v21 = vsub.f32 1.0, %v3618_v4  ;;  %vm3653_vm6 = vweird.f32 %v9649_v51  ;;  %vm9734_vm9 = vmor %vm3607_vm4, %vm3608_vm5 }
 0xaf9   :  { %6319 = vpow2.f32 %v5394_v0  ;;  %v3117_v10 = vpop.f32.mrf.mxu2  ;;  %v3604_v23 = vsub.f32 1.0, %v3603_v1  ;;  %vm9753_vm12 = vmor %vm3652_vm11, %vm3653_vm6  ;;  %vm3637_vm13 = vweird.f32 %v9619_v16  ;;  %v3644_v3 = vor.u32 1.1754944e-38, %v3643_v34 }
 0xafa   :  { %6321 = vpow2.f32 %v5393_v2  ;;  %v9652_v52 = vadd.f32 %v3117_v10, %v9028_v27  ;;  %v3649_v46 = vsub.f32 1.0, %v3648_v12  ;;  %v3620_v10 = vmul.f32 %v9642_v8, %v3619_v21 }
 0xafb   :  { %6323 = vpow2.f32 %v5533_v61 }
 0xafc   :  { %v5395_v44 = vmul.f32 -1.442695, %v9652_v52  ;;  %6325 = vpow2.f32 %v5396_v49  ;;  %v9675_v49 = vadd.f32 %v4238_v47, %v9603_v9  ;;  %v3629_v47 = vor.u32 1.1754944e-38, %v3628_v45 }
 0xafd   :  { %v9654_v18 = vpop.eup %6315  ;;  %v3169_v17 = vpop.f32.mrf.mxu1 }
 0xafe   :  { %v6318_v22 = vpop.eup %6317  ;;  %v3633_v59 = vmul.f32 %v9654_v18, %v9619_v16  ;;  %6327 = vpow2.f32 %v5395_v44  ;;  %v3650_v44 = vmul.f32 %v9649_v51, %v3649_v46  ;;  %v4240_v46 = vpop.f32.mrf.mxu3  ;;  %vm3638_vm8 = vweird.f32 %v9654_v18 }
 0xaff   :  { %v6320_v58 = vpop.eup %6319  ;;  %v9665_v28 = vadd.f32 1.0, %v6318_v22  ;;  %v3605_v22 = vmul.f32 %v9646_v29, %v3604_v23  ;;  %v3611_v23 = vand.u32 2147483647, %v9612_v41  ;;  %vm9766_vm14 = vmor %vm3637_vm13, %vm3638_vm8  ;;  %v9794_v34 = vmul.f32 -1.442695, %v9675_v49 }
 0xb00   :  { %v6322_v32 = vpop.eup %6321  ;;  %v9667_v11 = vadd.f32 1.0, %v6320_v58  ;;  %v3634_v31 = vsub.f32 1.0, %v3633_v59  ;;  %v9685_v58 = vadd.f32 %v3169_v17, %v9044_v50 }
 0xb01   :  { %v6324_v0 = vpop.eup %6323  ;;  %6329 = vrcp.f32 %v9665_v28  ;;  %v9672_v2 = vadd.f32 1.0, %v6322_v32  ;;  %v3606_v33 = vadd.f32 %v9646_v29, %v3605_v22  ;;  %v3613_v22 = vand.u32 2147483648, %v9612_v41 }
 0xb02   :  { %v6326_v61 = vpop.eup %6325  ;;  %6331 = vrcp.f32 %v9667_v11  ;;  %v9680_v1 = vadd.f32 1.0, %v6324_v0  ;;  %v3635_v59 = vmul.f32 %v9654_v18, %v3634_v31  ;;  %v3621_v0 = vadd.f32 %v9642_v8, %v3620_v10 }
 0xb03   :  { %v9692_v32 = vadd.f32 1.0, %v6326_v61  ;;  %6333 = vrcp.f32 %v9672_v2  ;;  %v3651_v31 = vadd.f32 %v9649_v51, %v3650_v44  ;;  %v5398_v17 = vmul.f32 -1.442695, %v9685_v58  ;;  %v3120_v35 = vpop.f32.mrf.mxu2 }
 0xb04   :  { %v6328_v4 = vpop.eup %6327  ;;  %v3636_v44 = vadd.f32 %v9654_v18, %v3635_v59  ;;  %vm9738_vm10 = vcmp.eq.f32.partialorder %v3611_v23, 8.507059e+37  ;;  %v3625_v60 = vsel %vm9716_vm7, %v9642_v8, %v3621_v0  ;;  %v3610_v41 = vsel %vm9734_vm9, %v9646_v29, %v3606_v33 }
 0xb05   :  { %v9694_v21 = vadd.f32 1.0, %v6328_v4  ;;  %6335 = vrcp.f32 %v9692_v32  ;;  %v3658_v4 = vand.u32 2147483648, %v9617_v62  ;;  %v3641_v62 = vand.u32 2147483647, %v9619_v16 }
 0xb06   :  { %v3655_v8 = vsel %vm9753_vm12, %v9649_v51, %v3651_v31  ;;  %v5493_v0 = vor.u32 %v5675_v26, %v5492_v19  ;;  %v3614_v16 = vor.u32 1.1754944e-38, %v3613_v22  ;;  %v3640_v23 = vsel %vm9766_vm14, %v9654_v18, %v3636_v44  ;;  %v9796_v55 = vpop.f32.mrf.mxu3 }
 0xb07   :  { %v9704_v45 = vpop.eup %6329  ;;  %6337 = vrcp.f32 %v9694_v21  ;;  %v3659_v10 = vor.u32 1.1754944e-38, %v3658_v4  ;;  %v9778_v51 = vadd.f32 %v3120_v35, %v9028_v27  ;;  %v3630_v25 = vsel %vm9687_vm2, %v3629_v47, %v3625_v60 }
 0xb08   :  { %v9710_v61 = vpop.eup %6331  ;;  %6339 = vpow2.f32 %v5398_v17  ;;  %4179 = vmatpush.bf16.msrb.mxu2 %v5493_v0  ;;  %v3615_v17 = vsel %vm9738_vm10, %v3614_v16, %v3610_v41  ;;  %vm3642_vm0 = vcmp.eq.f32.partialorder %v3641_v62, 8.507059e+37  ;;  %v9800_v26 = vadd.f32 %v4240_v46, %v9603_v9  ;;  %v3171_v0 = vpop.f32.mrf.mxu1 }
 0xb09   :  { %v9759_v39 = vpop.eup %6333  ;;  %v3678_v29 = vmul.f32 %v9710_v61, %v9667_v11  ;;  %v3660_v22 = vsel %vm3657_vm15, %v3659_v10, %v3655_v8  ;;  %v3645_v18 = vsel %vm3642_vm0, %v3644_v3, %v3640_v23  ;;  %6341 = vrcp.f32 %v9680_v1 }
 0xb0a   :  { %v3663_v12 = vmul.f32 %v9759_v39, %v9672_v2  ;;  %v5397_v47 = vmul.f32 -1.442695, %v9778_v51  ;;  %v3803_v3 = vmul.f32 %v3630_v25, %v9564_v42  ;;  %v3805_v59 = vmul.f32 %v3660_v22, %v9573_v20 }
 0xb0b   :  { %v9772_v33 = vpop.eup %6335  ;;  %v3679_v4 = vsub.f32 1.0, %v3678_v29  ;;  %v3802_v62 = vmul.f32 %v3615_v17, %v9570_v6  ;;  %v3804_v8 = vmul.f32 %v3645_v18, %v9579_v5  ;;  %v3688_v13 = vand.u32 2147483648, %v9667_v11  ;;  %v3122_v25 = vpop.f32.mrf.mxu2 }
 0xb0c   :  { %v3708_v19 = vmul.f32 %v9772_v33, %v9692_v32  ;;  %vm3682_vm1 = vweird.f32 %v9667_v11  ;;  %v3686_v46 = vand.u32 2147483647, %v9667_v11  ;;  %v3664_v10 = vsub.f32 1.0, %v3663_v12 }
 0xb0d   :  { %v9780_v31 = vpop.eup %6337  ;;  %v3680_v16 = vmul.f32 %v9710_v61, %v3679_v4  ;;  %v3716_v42 = vand.u32 2147483647, %v9692_v32  ;;  %v3718_v20 = vand.u32 2147483648, %v9692_v32  ;;  %6343 = vpow2.f32 %v5397_v47 }
 0xb0e   :  { %v3693_v35 = vmul.f32 %v9780_v31, %v9694_v21  ;;  %v3709_v60 = vsub.f32 1.0, %v3708_v19  ;;  %v6340_v44 = vpop.eup %6339  ;;  %vm3713_vm2 = vweird.f32 %v9772_v33  ;;  %v9818_v5 = vadd.f32 %v3171_v0, %v9044_v50  ;;  %v9853_v0 = vpop.f32.mrf.mxu3 }
 0xb0f   :  { %v9813_v23 = vadd.f32 1.0, %v6340_v44  ;;  %v3825_v19 = vpack.c.bf16 %v3805_v59, %v3803_v3  ;;  %v9820_v17 = vpop.eup %6341  ;;  %vm3683_vm3 = vweird.f32 %v9710_v61  ;;  %v3689_v22 = vor.u32 1.1754944e-38, %v3688_v13 }
 0xb10   :  { %v3710_v41 = vmul.f32 %v9772_v33, %v3709_v60  ;;  %v3694_v29 = vsub.f32 1.0, %v3693_v35  ;;  %v3681_v18 = vadd.f32 %v9710_v61, %v3680_v16  ;;  %v3665_v4 = vmul.f32 %v9759_v39, %v3664_v10  ;;  %vm9842_vm8 = vmor %vm3682_vm1, %vm3683_vm3  ;;  %v5484_v10 = vld [vmem:[%s10578_s4 + $0x48] sm:$0xf] }
 0xb11   :  { %6345 = vrcp.f32 %v9813_v23  ;;  %v3671_v12 = vand.u32 2147483647, %v9672_v2  ;;  %vm3712_vm4 = vweird.f32 %v9692_v32  ;;  %4040 = vmatmul.bf16.gmra.mxu1 %v3825_v19  ;;  %vm9833_vm6 = vcmp.eq.f32.partialorder %v3716_v42, 8.507059e+37  ;;  %v5476_v60 = vld [vmem:[%s10578_s4 + $0x28] sm:$0xf] }
 0xb12   :  { %v3711_v6 = vadd.f32 %v9772_v33, %v3710_v41  ;;  %v3695_v35 = vmul.f32 %v9780_v31, %v3694_v29  ;;  %vm9829_vm5 = vmor %vm3712_vm4, %vm3713_vm2  ;;  %vm3697_vm7 = vweird.f32 %v9694_v21  ;;  %v3701_v47 = vand.u32 2147483647, %v9694_v21 }
 0xb13   :  { %v5400_v44 = vmul.f32 -1.442695, %v9818_v5  ;;  %v3719_v59 = vor.u32 1.1754944e-38, %v3718_v20  ;;  %v3703_v41 = vand.u32 2147483648, %v9694_v21  ;;  %v9851_v13 = vadd.f32 %v3122_v25, %v9028_v27  ;;  %v6344_v29 = vpop.eup %6343  ;;  %v5699_v27 = vld [vmem:[#allocation7 + $0xf8] sm:$0xff] }
 0xb14   :  { %v3715_v32 = vsel %vm9829_vm5, %v9772_v33, %v3711_v6  ;;  %v3696_v16 = vadd.f32 %v9780_v31, %v3695_v35  ;;  %vm3698_vm9 = vweird.f32 %v9780_v31  ;;  %v3824_v11 = vpack.c.bf16 %v3804_v8, %v3802_v62  ;;  %v5673_v33 = vld [vmem:[%s10578_s4 + $0x54] sm:$0xf0]  ;;  %5106 = vmatpush.bf16.msrb.mxu1 %v5699_v27 }
 0xb15   :  { %6347 = vpow2.f32 %v5400_v44  ;;  %v3685_v25 = vsel %vm9842_vm8, %v9710_v61, %v3681_v18  ;;  %v3666_v20 = vadd.f32 %v9759_v39, %v3665_v4  ;;  %v9867_v6 = vadd.f32 1.0, %v6344_v29  ;;  %v5698_v61 = vld [vmem:[#allocation7 + $0xf0] sm:$0xff]  ;;  %vm9883_vm13 = vmor %vm3697_vm7, %vm3698_vm9 }
 0xb16   :  { %v5399_v62 = vmul.f32 -1.442695, %v9851_v13  ;;  %vm3668_vm10 = vweird.f32 %v9759_v39  ;;  %v3720_v35 = vsel %vm9833_vm6, %v3719_v59, %v3715_v32  ;;  %3991 = vmatmul.bf16.gmra.mxu2 %v3824_v11  ;;  %v5485_v50 = vor.u32 %v5673_v33, %v5484_v10  ;;  %v5697_v10 = vld [vmem:[#allocation7 + $0xe8] sm:$0xff] }
 0xb17   :  { %v4016_v42 = vpop.f32.mrf.mxu1  ;;  %v9870_v19 = vpop.eup %6345  ;;  %vm3687_vm11 = vcmp.eq.f32.partialorder %v3686_v46, 8.507059e+37  ;;  %vm3667_vm12 = vweird.f32 %v9672_v2  ;;  %v3673_v18 = vand.u32 2147483648, %v9672_v2  ;;  %6349 = vrcp.f32 %v9867_v6  ;;  %v5671_v46 = vld [vmem:[%s10578_s4 + $0x34] sm:$0xf0] }
 0xb18   :  { %v3690_v3 = vsel %vm3687_vm11, %v3689_v22, %v3685_v25  ;;  %v3700_v2 = vsel %vm9883_vm13, %v9780_v31, %v3696_v16  ;;  %v3738_v21 = vmul.f32 %v9870_v19, %v9813_v23  ;;  %6351 = vpow2.f32 %v5399_v62  ;;  %4180 = vmatpush.bf16.msrb.mxu2 %v5485_v50  ;;  %vm9902_vm14 = vmor %vm3667_vm12, %vm3668_vm10  ;;  %5107 = vmatpush.bf16.msrb.mxu1 %v5698_v61 }
 0xb19   :  { %v5537_v32 = vmul.f32 -1.442695, %v9800_v26  ;;  %v3809_v29 = vmul.f32 %v3720_v35, %v9640_v36  ;;  %v3704_v22 = vor.u32 1.1754944e-38, %v3703_v41  ;;  %v3670_v31 = vsel %vm9902_vm14, %v9759_v39, %v3666_v20  ;;  %v5686_v36 = vld [vmem:[#allocation7 + $0x90] sm:$0xff] }
 0xb1a   :  { %vm3702_vm15 = vcmp.eq.f32.partialorder %v3701_v47, 8.507059e+37  ;;  %v5477_v16 = vor.u32 %v5671_v46, %v5476_v60  ;;  %v3807_v33 = vmul.f32 %v3690_v3, %v9615_v7  ;;  %6353 = vpow2.f32 %v9794_v34  ;;  %v9918_v7 = vpop.f32.mrf.mxu3  ;;  %5062 = vmatpush.bf16.msra.mxu0 %v5686_v36 }
 0xb1b   :  { %v3967_v8 = vpop.f32.mrf.mxu2  ;;  %v6348_v11 = vpop.eup %6347  ;;  %v3705_v27 = vsel %vm3702_vm15, %v3704_v22, %v3700_v2  ;;  %vm3672_vm0 = vcmp.eq.f32.partialorder %v3671_v12, 8.507059e+37  ;;  %v3739_v25 = vsub.f32 1.0, %v3738_v21  ;;  %v4447_v39 = vmul.f32 %v9820_v17, %v9680_v1  ;;  %v5696_v12 = vld [vmem:[#allocation7 + $0xe0] sm:$0xff]  ;;  %v5695_v21 = vld [vmem:[#allocation7 + $0xd8] sm:$0xff] }
 0xb1c   :  { %v9875_v44 = vadd.f32 %v4016_v42, %v3967_v8  ;;  %v3674_v42 = vor.u32 1.1754944e-38, %v3673_v18  ;;  %v9912_v62 = vadd.f32 1.0, %v6348_v11  ;;  %4181 = vmatpush.bf16.msrb.mxu2 %v5477_v16  ;;  %6355 = vpow2.f32 %v5537_v32  ;;  %5108 = vmatpush.bf16.msrb.mxu1 %v5697_v10 }
 0xb1d   :  { %v9914_v41 = vpop.eup %6349  ;;  %v3827_v20 = vpack.c.bf16 %v3809_v29, %v3807_v33  ;;  %v3808_v35 = vmul.f32 %v3705_v27, %v9652_v52  ;;  %v9926_v50 = vmul.f32 %v9704_v45, %v9665_v28  ;;  %v3740_v18 = vmul.f32 %v9870_v19, %v3739_v25 }
 0xb1e   :  { %v3675_v47 = vsel %vm3672_vm0, %v3674_v42, %v3670_v31  ;;  %v6352_v8 = vpop.eup %6351  ;;  %v3723_v34 = vmul.f32 %v9914_v41, %v9867_v6  ;;  %6357 = vrcp.f32 %v9912_v62  ;;  %v4448_v60 = vsub.f32 1.0, %v4447_v39  ;;  %v5669_v31 = vld [vmem:[%s10578_s4 + $0x14] sm:$0xf0]  ;;  %v5694_v39 = vld [vmem:[#allocation7 + $0xd0] sm:$0xff] }
 0xb1f   :  { %v3806_v61 = vmul.f32 %v3675_v47, %v9637_v15  ;;  %v9930_v4 = vadd.f32 1.0, %v6352_v8  ;;  %v9934_v3 = vadd.f32 %v9796_v55, %v9603_v9  ;;  %v9939_v15 = vadd.f32 %v9853_v0, %v9603_v9  ;;  %v5468_v55 = vld [vmem:[%s10578_s4 + $0x8] sm:$0xf]  ;;  %v9965_v36 = vpop.f32.mrf.mxu1 }
 0xb20   :  { %v3724_v52 = vsub.f32 1.0, %v3723_v34  ;;  %v6354_v46 = vpop.eup %6353  ;;  %5109 = vmatpush.bf16.msrb.mxu1 %v5696_v12  ;;  %v3748_v59 = vand.u32 2147483648, %v9813_v23  ;;  %v4418_v22 = vsub.f32 1.0, %v9926_v50  ;;  %v3741_v11 = vadd.f32 %v9870_v19, %v3740_v18 }
 0xb21   :  { %4045 = vmatmul.bf16.gmra.mxu1 %v3827_v20  ;;  %6359 = vrcp.f32 %v9930_v4  ;;  %v3826_v2 = vpack.c.bf16 %v3808_v35, %v3806_v61  ;;  %vm3743_vm1 = vweird.f32 %v9870_v19  ;;  %v9952_v0 = vmul.f32 %v9820_v17, %v4448_v60 }
 0xb22   :  { %v6356_v32 = vpop.eup %6355  ;;  %v9954_v16 = vadd.f32 1.0, %v6354_v46  ;;  %v3725_v10 = vmul.f32 %v9914_v41, %v3724_v52  ;;  %v9961_v27 = vmul.f32 -1.442695, %v9934_v3  ;;  %vm3742_vm2 = vweird.f32 %v9813_v23  ;;  %v9974_v61 = vpop.f32.mrf.mxu3 }
 0xb23   :  { %v9958_v42 = vadd.f32 1.0, %v6356_v32  ;;  %v3746_v25 = vand.u32 2147483647, %v9813_v23  ;;  %v5541_v47 = vmul.f32 -1.442695, %v9939_v15  ;;  %vm9970_vm3 = vmor %vm3742_vm2, %vm3743_vm1  ;;  %v3749_v8 = vor.u32 1.1754944e-38, %v3748_v59  ;;  %v9987_v32 = vpop.f32.mrf.mxu2 }
 0xb24   :  { %v6358_v29 = vpop.eup %6357  ;;  %5110 = vmatpush.bf16.msrb.mxu1 %v5695_v21  ;;  %v5469_v34 = vor.u32 %v5669_v31, %v5468_v55  ;;  %v3745_v23 = vsel %vm9970_vm3, %v9870_v19, %v3741_v11  ;;  %vm3728_vm4 = vweird.f32 %v9914_v41  ;;  %v3776_v18 = vand.u32 2147483647, %v9912_v62  ;;  %v5693_v59 = vld [vmem:[#allocation7 + $0xc8] sm:$0xff] }
 0xb25   :  { %v3768_v33 = vmul.f32 %v6358_v29, %v9912_v62  ;;  %v3778_v60 = vand.u32 2147483648, %v9912_v62  ;;  %v3726_v52 = vadd.f32 %v9914_v41, %v3725_v10  ;;  %vm3773_vm5 = vweird.f32 %v6358_v29 }
 0xb26   :  { %3996 = vmatmul.bf16.gmra.mxu2 %v3826_v2  ;;  %vm3747_vm6 = vcmp.eq.f32.partialorder %v3746_v25, 8.507059e+37  ;;  %vm3727_vm7 = vweird.f32 %v9867_v6  ;;  %v3731_v21 = vand.u32 2147483647, %v9867_v6  ;;  %v3733_v19 = vand.u32 2147483648, %v9867_v6 }
 0xb27   :  { %v3769_v35 = vsub.f32 1.0, %v3768_v33  ;;  %v6360_v12 = vpop.eup %6359  ;;  %4182 = vmatpush.bf16.msrb.mxu2 %v5469_v34  ;;  %v3750_v11 = vsel %vm3747_vm6, %v3749_v8, %v3745_v23  ;;  %vm9991_vm8 = vmor %vm3727_vm7, %vm3728_vm4  ;;  %vm3772_vm9 = vweird.f32 %v9912_v62  ;;  %vm3777_vm11 = vcmp.eq.f32.partialorder %v3776_v18, 8.507059e+37  ;;  %v5692_v34 = vld [vmem:[#allocation7 + $0xc0] sm:$0xff] }
 0xb28   :  { %v3753_v2 = vmul.f32 %v6360_v12, %v9930_v4  ;;  %5111 = vmatpush.bf16.msrb.mxu1 %v5694_v39  ;;  %vm3774_vm10 = vmor %vm3772_vm9, %vm3773_vm5  ;;  %v3779_v33 = vor.u32 1.1754944e-38, %v3778_v60  ;;  %v3761_v6 = vand.u32 2147483647, %v9930_v4  ;;  %v3763_v25 = vand.u32 2147483648, %v9930_v4 }
 0xb29   :  { %v3770_v46 = vmul.f32 %v6358_v29, %v3769_v35  ;;  %v3730_v39 = vsel %vm9991_vm8, %v9914_v41, %v3726_v52  ;;  %vm3758_vm12 = vweird.f32 %v6360_v12  ;;  %6361 = vrcp.f32 %v9958_v42 }
 0xb2a   :  { %v3754_v10 = vsub.f32 1.0, %v3753_v2  ;;  %vm3732_vm13 = vcmp.eq.f32.partialorder %v3731_v21, 8.507059e+37  ;;  %v3734_v62 = vor.u32 1.1754944e-38, %v3733_v19  ;;  %v3811_v23 = vmul.f32 %v3750_v11, %v9685_v58  ;;  %v10011_v58 = vpop.f32.mrf.mxu3 }
 0xb2b   :  { %v3771_v31 = vadd.f32 %v6358_v29, %v3770_v46  ;;  %vm3757_vm14 = vweird.f32 %v9930_v4  ;;  %v4419_v41 = vmul.f32 %v9704_v45, %v4418_v22  ;;  %6363 = vrcp.f32 %v9954_v16 }
 0xb2c   :  { %v3755_v8 = vmul.f32 %v6360_v12, %v3754_v10  ;;  %5112 = vmatpush.bf16.msrb.mxu1 %v5693_v59  ;;  %vm3759_vm15 = vmor %vm3757_vm14, %vm3758_vm12  ;;  %v3764_v52 = vor.u32 1.1754944e-38, %v3763_v25  ;;  %6365 = vpow2.f32 %v5541_v47  ;;  %vm3762_vm0 = vcmp.eq.f32.partialorder %v3761_v6, 8.507059e+37 }
 0xb2d   :  { %v3775_v20 = vsel %vm3774_vm10, %v6358_v29, %v3771_v31  ;;  %v3735_v29 = vsel %vm3732_vm13, %v3734_v62, %v3730_v39  ;;  %vm4452_vm1 = vweird.f32 %v9820_v17  ;;  %v4450_v50 = vadd.f32 %v9820_v17, %v9952_v0 }
 0xb2e   :  { %v3780_v35 = vsel %vm3777_vm11, %v3779_v33, %v3775_v20  ;;  %v3756_v60 = vadd.f32 %v6360_v12, %v3755_v8  ;;  %6367 = vpow2.f32 %v9961_v27  ;;  %v3810_v4 = vmul.f32 %v3735_v29, %v9778_v51 }
 0xb2f   :  { %v3813_v18 = vmul.f32 %v3780_v35, %v9818_v5  ;;  %v4021_v46 = vpop.f32.mrf.mxu1  ;;  %v10018_v47 = vpop.eup %6361  ;;  %vm4422_vm2 = vweird.f32 %v9704_v45  ;;  %vm4451_vm3 = vweird.f32 %v9680_v1  ;;  %v4420_v59 = vadd.f32 %v9704_v45, %v4419_v41 }
 0xb30   :  { %v3760_v2 = vsel %vm3759_vm15, %v6360_v12, %v3756_v60  ;;  %5113 = vmatpush.bf16.msrb.mxu1 %v5692_v34  ;;  %v4457_v12 = vand.u32 2147483648, %v9680_v1  ;;  %v4455_v0 = vand.u32 2147483647, %v9680_v1  ;;  %vm10032_vm4 = vmor %vm4451_vm3, %vm4452_vm1  ;;  %vm4421_vm5 = vweird.f32 %v9665_v28 }
 0xb31   :  { %v3829_v21 = vpack.c.bf16 %v3813_v18, %v3811_v23  ;;  %v3765_v5 = vsel %vm3762_vm0, %v3764_v52, %v3760_v2  ;;  %v10027_v51 = vpop.eup %6363  ;;  %v4425_v10 = vand.u32 2147483647, %v9665_v28  ;;  %v4454_v1 = vsel %vm10032_vm4, %v9820_v17, %v4450_v50  ;;  %vm4423_vm6 = vmor %vm4421_vm5, %vm4422_vm2 }
 0xb32   :  { %v3812_v22 = vmul.f32 %v3765_v5, %v9851_v13  ;;  %v4427_v13 = vand.u32 2147483648, %v9665_v28  ;;  %v6366_v31 = vpop.eup %6365  ;;  %v4507_v33 = vmul.f32 %v10018_v47, %v9958_v42  ;;  %v4458_v6 = vor.u32 1.1754944e-38, %v4457_v12  ;;  %v4255_v60 = vpop.f32.mrf.mxu3 }
 0xb33   :  { %4050 = vmatmul.bf16.gmra.mxu1 %v3829_v21  ;;  %v4424_v20 = vsel %vm4423_vm6, %v9704_v45, %v4420_v59  ;;  %vm4456_vm7 = vcmp.eq.f32.partialorder %v4455_v0, 8.507059e+37  ;;  %v4477_v28 = vmul.f32 %v10027_v51, %v9954_v16  ;;  %v10052_v17 = vadd.f32 %v9974_v61, %v9603_v9 }
 0xb34   :  { %v3972_v19 = vpop.f32.mrf.mxu2  ;;  %v3828_v27 = vpack.c.bf16 %v3812_v22, %v3810_v4  ;;  %v6368_v39 = vpop.eup %6367  ;;  %v4428_v8 = vor.u32 1.1754944e-38, %v4427_v13  ;;  %v4459_v62 = vsel %vm4456_vm7, %v4458_v6, %v4454_v1  ;;  %v10054_v35 = vadd.f32 1.0, %v6366_v31 }
 0xb35   :  { %v10025_v11 = vadd.f32 %v4021_v46, %v3972_v19  ;;  %vm4426_vm8 = vcmp.eq.f32.partialorder %v4425_v10, 8.507059e+37  ;;  %v4508_v34 = vsub.f32 1.0, %v4507_v33  ;;  %v10058_v23 = vadd.f32 %v9918_v7, %v9603_v9 }
 0xb36   :  { %4001 = vmatmul.bf16.gmra.mxu2 %v3828_v27  ;;  %v4429_v18 = vsel %vm4426_vm8, %v4428_v8, %v4424_v20  ;;  %v10060_v45 = vadd.f32 1.0, %v6368_v39  ;;  %v4884_v29 = vmul.f32 %v4459_v62, %v9632_v53  ;;  %v4478_v61 = vsub.f32 1.0, %v4477_v28 }
 0xb37   :  { %v10045_v25 = vpop.f32.mrf.mxu1  ;;  %v5545_v52 = vmul.f32 -1.442695, %v10052_v17  ;;  %6369 = vrcp.f32 %v10054_v35  ;;  %v4882_v46 = vmul.f32 %v4429_v18, %v9608_v54  ;;  %v4509_v2 = vmul.f32 %v10018_v47, %v4508_v34 }
 0xb38   :  { %v5543_v7 = vmul.f32 -1.442695, %v10058_v23  ;;  %6371 = vrcp.f32 %v10060_v45  ;;  %v4479_v50 = vmul.f32 %v10027_v51, %v4478_v61  ;;  %vm4512_vm9 = vweird.f32 %v10018_v47 }
 0xb39   :  { %v4914_v5 = vpack.c.bf16 %v4884_v29, %v4882_v46  ;;  %6373 = vpow2.f32 %v5545_v52  ;;  %v4510_v53 = vadd.f32 %v10018_v47, %v4509_v2  ;;  %vm4482_vm10 = vweird.f32 %v10027_v51 }
 0xb3a   :  { %6375 = vpow2.f32 %v5543_v7  ;;  %v4517_v54 = vand.u32 2147483648, %v9958_v42  ;;  %v10078_v22 = vpop.f32.mrf.mxu3  ;;  %v4480_v19 = vadd.f32 %v10027_v51, %v4479_v50  ;;  %vm4511_vm11 = vweird.f32 %v9958_v42 }
 0xb3b   :  { %v4515_v59 = vand.u32 2147483647, %v9958_v42  ;;  %v4487_v13 = vand.u32 2147483648, %v9954_v16  ;;  %vm10088_vm12 = vmor %vm4511_vm11, %vm4512_vm9  ;;  %vm4481_vm13 = vweird.f32 %v9954_v16  ;;  %v4485_v10 = vand.u32 2147483647, %v9954_v16 }
 0xb3c   :  { %v10062_v41 = vpop.f32.mrf.mxu2  ;;  %v4514_v1 = vsel %vm10088_vm12, %v10018_v47, %v4510_v53  ;;  %vm4483_vm14 = vmor %vm4481_vm13, %vm4482_vm10  ;;  %v4518_v33 = vor.u32 1.1754944e-38, %v4517_v54  ;;  %v10108_v47 = vadd.f32 %v4255_v60, %v9603_v9  ;;  %v10114_v34 = vadd.f32 %v10011_v58, %v9603_v9  ;;  %v5685_v53 = vld [vmem:[#allocation7 + $0x88] sm:$0xff] }
 0xb3d   :  { %v10074_v4 = vpop.eup %6369  ;;  %v4484_v20 = vsel %vm4483_vm14, %v10027_v51, %v4480_v19  ;;  %vm4516_vm15 = vcmp.eq.f32.partialorder %v4515_v59, 8.507059e+37  ;;  %v4488_v28 = vor.u32 1.1754944e-38, %v4487_v13  ;;  %vm4486_vm0 = vcmp.eq.f32.partialorder %v4485_v10, 8.507059e+37  ;;  %5063 = vmatpush.bf16.msra.mxu0 %v5685_v53 }
 0xb3e   :  { %v10085_v27 = vpop.eup %6371  ;;  %v4567_v42 = vmul.f32 %v10074_v4, %v10054_v35  ;;  %v4519_v8 = vsel %vm4516_vm15, %v4518_v33, %v4514_v1  ;;  %v5549_v60 = vmul.f32 -1.442695, %v10108_v47  ;;  %v5547_v58 = vmul.f32 -1.442695, %v10114_v34 }
 0xb3f   :  { %v4026_v21 = vpop.f32.mrf.mxu1  ;;  %v6374_v31 = vpop.eup %6373  ;;  %v4537_v16 = vmul.f32 %v10085_v27, %v10060_v45  ;;  %v4489_v18 = vsel %vm4486_vm0, %v4488_v28, %v4484_v20  ;;  %v4888_v61 = vmul.f32 %v4519_v8, %v9800_v26  ;;  %vm4572_vm1 = vweird.f32 %v10074_v4 }
 0xb40   :  { %v6376_v39 = vpop.eup %6375  ;;  %v10110_v62 = vadd.f32 1.0, %v6374_v31  ;;  %v4886_v2 = vmul.f32 %v4489_v18, %v9675_v49  ;;  %vm4542_vm2 = vweird.f32 %v10085_v27  ;;  %v4577_v49 = vand.u32 2147483648, %v10054_v35 }
 0xb41   :  { %v10116_v29 = vadd.f32 1.0, %v6376_v39  ;;  %v4538_v52 = vsub.f32 1.0, %v4537_v16  ;;  %vm4571_vm3 = vweird.f32 %v10054_v35  ;;  %v4575_v59 = vand.u32 2147483647, %v10054_v35 }
 0xb42   :  { %6377 = vrcp.f32 %v10110_v62  ;;  %v4260_v46 = vpop.f32.mrf.mxu3  ;;  %v4916_v50 = vpack.c.bf16 %v4888_v61, %v4886_v2  ;;  %v4547_v31 = vand.u32 2147483648, %v10060_v45  ;;  %vm10144_vm4 = vmor %vm4571_vm3, %vm4572_vm1  ;;  %vm4541_vm5 = vweird.f32 %v10060_v45 }
 0xb43   :  { %5114 = vmatmul.bf16.vlgmr.msrb.gmra.mxu1 %v4914_v5  ;;  %6379 = vrcp.f32 %v10116_v29  ;;  %vm10158_vm6 = vmor %vm4541_vm5, %vm4542_vm2  ;;  %v4578_v20 = vor.u32 1.1754944e-38, %v4577_v49  ;;  %vm4576_vm7 = vcmp.eq.f32.partialorder %v4575_v59, 8.507059e+37  ;;  %v10168_v8 = vadd.f32 %v4260_v46, %v9603_v9 }
 0xb44   :  { %v3977_v12 = vpop.f32.mrf.mxu2  ;;  %6381 = vpow2.f32 %v5549_v60  ;;  %v10176_v60 = vadd.f32 %v10078_v22, %v9603_v9  ;;  %vm4631_vm11 = vweird.f32 %v10110_v62  ;;  %v4635_v10 = vand.u32 2147483647, %v10110_v62 }
 0xb45   :  { %v10083_v0 = vadd.f32 %v4026_v21, %v3977_v12  ;;  %v4539_v21 = vmul.f32 %v10085_v27, %v4538_v52  ;;  %6383 = vpow2.f32 %v5547_v58  ;;  %vm4601_vm13 = vweird.f32 %v10116_v29 }
 0xb46   :  { %4183 = vmatmul.bf16.vlgmr.msrb.gmra.mxu2 %v8967_v48  ;;  %v4568_v48 = vsub.f32 1.0, %v4567_v42  ;;  %v4545_v42 = vand.u32 2147483647, %v10060_v45  ;;  %vm4636_vm15 = vcmp.eq.f32.partialorder %v4635_v10, 8.507059e+37 }
 0xb47   :  { %v10102_v6 = vpop.f32.mrf.mxu1  ;;  %v4540_v19 = vadd.f32 %v10085_v27, %v4539_v21  ;;  %v5553_v21 = vmul.f32 -1.442695, %v10168_v8 }
 0xb48   :  { %v4569_v7 = vmul.f32 %v10074_v4, %v4568_v48  ;;  %v10130_v54 = vpop.eup %6377  ;;  %v4548_v48 = vor.u32 1.1754944e-38, %v4547_v31  ;;  %vm4546_vm8 = vcmp.eq.f32.partialorder %v4545_v42, 8.507059e+37 }
 0xb49   :  { %v10139_v55 = vpop.eup %6379  ;;  %v4627_v33 = vmul.f32 %v10130_v54, %v10110_v62  ;;  %v4544_v45 = vsel %vm10158_vm6, %v10085_v27, %v4540_v19  ;;  %vm4632_vm9 = vweird.f32 %v10130_v54 }
 0xb4a   :  { %v4570_v26 = vadd.f32 %v10074_v4, %v4569_v7  ;;  %v6382_v1 = vpop.eup %6381  ;;  %v4263_v16 = vpop.f32.mrf.mxu3  ;;  %v4549_v27 = vsel %vm4546_vm8, %v4548_v48, %v4544_v45  ;;  %vm4602_vm10 = vweird.f32 %v10139_v55  ;;  %vm10204_vm12 = vmor %vm4631_vm11, %vm4632_vm9 }
 0xb4b   :  { %v6384_v28 = vpop.eup %6383  ;;  %v10172_v61 = vadd.f32 1.0, %v6382_v1  ;;  %v4628_v52 = vsub.f32 1.0, %v4627_v33  ;;  %vm4603_vm14 = vmor %vm4601_vm13, %vm4602_vm10 }
 0xb4c   :  { %v10118_v51 = vpop.f32.mrf.mxu2  ;;  %v4574_v35 = vsel %vm10144_vm4, %v10074_v4, %v4570_v26  ;;  %v4597_v4 = vmul.f32 %v10139_v55, %v10116_v29  ;;  %v10178_v2 = vadd.f32 1.0, %v6384_v28  ;;  %v5551_v26 = vmul.f32 -1.442695, %v10176_v60 }
 0xb4d   :  { %v4579_v18 = vsel %vm4576_vm7, %v4578_v20, %v4574_v35  ;;  %6385 = vrcp.f32 %v10172_v61  ;;  %v4607_v35 = vand.u32 2147483648, %v10116_v29  ;;  %v4605_v20 = vand.u32 2147483647, %v10116_v29 }
 0xb4e   :  { %v4892_v46 = vmul.f32 %v4579_v18, %v9939_v15  ;;  %v4598_v58 = vsub.f32 1.0, %v4597_v4  ;;  %6387 = vrcp.f32 %v10178_v2  ;;  %vm4691_vm3 = vweird.f32 %v10172_v61 }
 0xb4f   :  { %6389 = vpow2.f32 %v5553_v21  ;;  %vm4606_vm0 = vcmp.eq.f32.partialorder %v4605_v20, 8.507059e+37  ;;  %vm4661_vm5 = vweird.f32 %v10178_v2 }
 0xb50   :  { %v4031_v5 = vpop.f32.mrf.mxu1  ;;  %v4599_v22 = vmul.f32 %v10139_v55, %v4598_v58  ;;  %6391 = vpow2.f32 %v5551_v26 }
 0xb52   :  { %v4265_v49 = vpop.f32.mrf.mxu3  ;;  %v4600_v31 = vadd.f32 %v10139_v55, %v4599_v22 }
 0xb53   :  { %5119 = vmatmul.bf16.gmra.mxu1 %v4916_v50  ;;  %v4629_v50 = vmul.f32 %v10130_v54, %v4628_v52  ;;  %v10192_v19 = vpop.eup %6385  ;;  %v10222_v18 = vadd.f32 %v4265_v49, %v9603_v9 }
 0xb54   :  { %v3982_v12 = vpop.f32.mrf.mxu2  ;;  %v10201_v42 = vpop.eup %6387  ;;  %v4604_v48 = vsel %vm4603_vm14, %v10139_v55, %v4600_v31  ;;  %vm4692_vm1 = vweird.f32 %v10192_v19 }
 0xb55   :  { %v10137_v13 = vadd.f32 %v4031_v5, %v3982_v12  ;;  %v4890_v5 = vmul.f32 %v4549_v27, %v9934_v3  ;;  %v4630_v15 = vadd.f32 %v10130_v54, %v4629_v50  ;;  %v4637_v3 = vand.u32 2147483648, %v10110_v62  ;;  %v6390_v39 = vpop.eup %6389  ;;  %vm10253_vm4 = vmor %vm4691_vm3, %vm4692_vm1 }
 0xb56   :  { %4188 = vmatmul.bf16.gmra.mxu2 %v8984_v30  ;;  %v4687_v62 = vmul.f32 %v10192_v19, %v10172_v61  ;;  %v6392_v4 = vpop.eup %6391  ;;  %v4657_v29 = vmul.f32 %v10201_v42, %v10178_v2  ;;  %v10224_v27 = vadd.f32 1.0, %v6390_v39  ;;  %vm4662_vm2 = vweird.f32 %v10201_v42 }
 0xb57   :  { %v4918_v53 = vpack.c.bf16 %v4892_v46, %v4890_v5  ;;  %v4634_v28 = vsel %vm10204_vm12, %v10130_v54, %v4630_v15  ;;  %v4638_v45 = vor.u32 1.1754944e-38, %v4637_v3  ;;  %v4608_v54 = vor.u32 1.1754944e-38, %v4607_v35  ;;  %vm4663_vm6 = vmor %vm4661_vm5, %vm4662_vm2 }
 0xb58   :  { %v10170_v30 = vpop.f32.mrf.mxu1  ;;  %v10227_v46 = vadd.f32 %v4263_v16, %v9603_v9  ;;  %v10229_v5 = vadd.f32 1.0, %v6392_v4  ;;  %v4658_v22 = vsub.f32 1.0, %v4657_v29  ;;  %6393 = vrcp.f32 %v10224_v27 }
 0xb59   :  { %v4639_v52 = vsel %vm4636_vm15, %v4638_v45, %v4634_v28  ;;  %v4609_v21 = vsel %vm4606_vm0, %v4608_v54, %v4604_v48  ;;  %v4695_v35 = vand.u32 2147483647, %v10172_v61  ;;  %v4667_v39 = vand.u32 2147483648, %v10178_v2 }
 0xb5a   :  { %v4268_v55 = vpop.f32.mrf.mxu3  ;;  %v4896_v26 = vmul.f32 %v4639_v52, %v10052_v17  ;;  %v4894_v15 = vmul.f32 %v4609_v21, %v10058_v23  ;;  %6395 = vrcp.f32 %v10229_v5  ;;  %v4659_v3 = vmul.f32 %v10201_v42, %v4658_v22 }
 0xb5b   :  { %v4697_v23 = vand.u32 2147483648, %v10172_v61  ;;  %v4665_v45 = vand.u32 2147483647, %v10178_v2  ;;  %vm4696_vm7 = vcmp.eq.f32.partialorder %v4695_v35, 8.507059e+37  ;;  %vm4751_vm11 = vweird.f32 %v10224_v27 }
 0xb5c   :  { %v10180_v7 = vpop.f32.mrf.mxu2  ;;  %v4660_v10 = vadd.f32 %v10201_v42, %v4659_v3  ;;  %vm4721_vm13 = vweird.f32 %v10229_v5 }
 0xb5d   :  { %v4698_v48 = vor.u32 1.1754944e-38, %v4697_v23  ;;  %vm4666_vm8 = vcmp.eq.f32.partialorder %v4665_v45, 8.507059e+37 }
 0xb5e   :  { %v10243_v31 = vpop.eup %6393  ;;  %v4664_v54 = vsel %vm4663_vm6, %v10201_v42, %v4660_v10  ;;  %v4727_v10 = vand.u32 2147483648, %v10229_v5 }
 0xb5f   :  { %v4747_v61 = vmul.f32 %v10243_v31, %v10224_v27  ;;  %vm4752_vm9 = vweird.f32 %v10243_v31 }
 0xb60   :  { %v10250_v33 = vpop.eup %6395  ;;  %vm4753_vm12 = vmor %vm4751_vm11, %vm4752_vm9 }
 0xb61   :  { %v4717_v52 = vmul.f32 %v10250_v33, %v10229_v5  ;;  %v4748_v21 = vsub.f32 1.0, %v4747_v61  ;;  %vm4722_vm10 = vweird.f32 %v10250_v33  ;;  %v4728_v61 = vor.u32 1.1754944e-38, %v4727_v10 }
 0xb62   :  { %v4270_v28 = vpop.f32.mrf.mxu3  ;;  %vm4723_vm14 = vmor %vm4721_vm13, %vm4722_vm10 }
 0xb63   :  { %5124 = vmatmul.bf16.gmra.mxu1 %v4918_v53  ;;  %v5557_v53 = vmul.f32 -1.442695, %v10222_v18  ;;  %v10269_v2 = vadd.f32 %v4270_v28, %v9603_v9  ;;  %v4718_v22 = vsub.f32 1.0, %v4717_v52 }
 0xb64   :  { %v3987_v59 = vpop.f32.mrf.mxu2 }
 0xb65   :  { %6397 = vpow2.f32 %v5557_v53  ;;  %v5561_v53 = vmul.f32 -1.442695, %v10269_v2 }
 0xb66   :  { %4193 = vmatmul.bf16.gmra.mxu2 %v8997_v37  ;;  %v4688_v37 = vsub.f32 1.0, %v4687_v62 }
 0xb68   :  { %v4689_v16 = vmul.f32 %v10192_v19, %v4688_v37  ;;  %v4668_v37 = vor.u32 1.1754944e-38, %v4667_v39  ;;  %v4725_v39 = vand.u32 2147483647, %v10229_v5 }
 0xb69   :  { %v4036_v12 = vpop.f32.mrf.mxu1 }
 0xb6a   :  { %v10199_v1 = vadd.f32 %v4036_v12, %v3987_v59  ;;  %v5555_v12 = vmul.f32 -1.442695, %v10227_v46  ;;  %v4920_v59 = vpack.c.bf16 %v4896_v26, %v4894_v15  ;;  %v4690_v17 = vadd.f32 %v10192_v19, %v4689_v16 }
 0xb6b   :  { %v6398_v62 = vpop.eup %6397  ;;  %v4749_v16 = vmul.f32 %v10243_v31, %v4748_v21  ;;  %vm4726_vm0 = vcmp.eq.f32.partialorder %v4725_v39, 8.507059e+37 }
 0xb6c   :  { %v3989_v50 = vpop.f32.mrf.mxu2  ;;  %6399 = vpow2.f32 %v5555_v12  ;;  %v4694_v4 = vsel %vm10253_vm4, %v10192_v19, %v4690_v17  ;;  %v10271_v19 = vadd.f32 1.0, %v6398_v62  ;;  %v4755_v17 = vand.u32 2147483647, %v10224_v27 }
 0xb6d   :  { %v4750_v3 = vadd.f32 %v10243_v31, %v4749_v16 }
 0xb6e   :  { %6401 = vrcp.f32 %v10271_v19  ;;  %vm4756_vm15 = vcmp.eq.f32.partialorder %v4755_v17, 8.507059e+37  ;;  %vm4811_vm3 = vweird.f32 %v10271_v19 }
 0xb6f   :  { %v4754_v20 = vsel %vm4753_vm12, %v10243_v31, %v4750_v3 }
 0xb71   :  { %v4038_v58 = vpop.f32.mrf.mxu1 }
 0xb72   :  { %v10233_v49 = vadd.f32 %v4038_v58, %v3989_v50  ;;  %v6400_v29 = vpop.eup %6399  ;;  %v4699_v58 = vsel %vm4696_vm7, %v4698_v48, %v4694_v4  ;;  %v4669_v50 = vsel %vm4666_vm8, %v4668_v37, %v4664_v54 }
 0xb73   :  { %5129 = vmatmul.bf16.gmra.mxu1 %v4920_v59  ;;  %v10276_v26 = vadd.f32 1.0, %v6400_v29  ;;  %v4900_v42 = vmul.f32 %v4699_v58, %v10108_v47  ;;  %v4898_v15 = vmul.f32 %v4669_v50, %v10114_v34  ;;  %v4757_v34 = vand.u32 2147483648, %v10224_v27 }
 0xb74   :  { %v10288_v47 = vpop.eup %6401 }
 0xb75   :  { %6403 = vrcp.f32 %v10276_v26  ;;  %v4807_v28 = vmul.f32 %v10288_v47, %v10271_v19  ;;  %v4758_v62 = vor.u32 1.1754944e-38, %v4757_v34  ;;  %vm4812_vm1 = vweird.f32 %v10288_v47  ;;  %v5684_v34 = vld [vmem:[#allocation7 + $0x80] sm:$0xff] }
 0xb76   :  { %4198 = vmatmul.bf16.gmra.mxu2 %v9004_v24  ;;  %v10274_v24 = vadd.f32 %v4268_v55, %v9603_v9  ;;  %v4719_v9 = vmul.f32 %v10250_v33, %v4718_v22  ;;  %6405 = vpow2.f32 %v5561_v53  ;;  %v4922_v55 = vpack.c.bf16 %v4900_v42, %v4898_v15  ;;  %vm4813_vm4 = vmor %vm4811_vm3, %vm4812_vm1  ;;  %5064 = vmatpush.bf16.msra.mxu0 %v5684_v34 }
 0xb77   :  { %v4759_v48 = vsel %vm4756_vm15, %v4758_v62, %v4754_v20  ;;  %v4808_v5 = vsub.f32 1.0, %v4807_v28  ;;  %v4787_v16 = vand.u32 2147483648, %v10276_v26  ;;  %vm4781_vm5 = vweird.f32 %v10276_v26 }
 0xb78   :  { %v5559_v12 = vmul.f32 -1.442695, %v10274_v24  ;;  %v4720_v59 = vadd.f32 %v10250_v33, %v4719_v9 }
 0xb79   :  { %v4809_v37 = vmul.f32 %v10288_v47, %v4808_v5  ;;  %v4788_v10 = vor.u32 1.1754944e-38, %v4787_v16 }
 0xb7a   :  { %6407 = vpow2.f32 %v5559_v12  ;;  %v4724_v45 = vsel %vm4723_vm14, %v10250_v33, %v4720_v59  ;;  %v4785_v12 = vand.u32 2147483647, %v10276_v26 }
 0xb7b   :  { %v10295_v23 = vpop.eup %6403  ;;  %v4729_v31 = vsel %vm4726_vm0, %v4728_v61, %v4724_v45  ;;  %v4810_v42 = vadd.f32 %v10288_v47, %v4809_v37 }
 0xb7c   :  { %v6406_v35 = vpop.eup %6405  ;;  %v4777_v4 = vmul.f32 %v10295_v23, %v10276_v26  ;;  %v4902_v33 = vmul.f32 %v4729_v31, %v10176_v60  ;;  %vm4782_vm2 = vweird.f32 %v10295_v23  ;;  %v4815_v60 = vand.u32 2147483647, %v10271_v19 }
 0xb7d   :  { %v10307_v29 = vadd.f32 1.0, %v6406_v35  ;;  %v4814_v9 = vsel %vm4813_vm4, %v10288_v47, %v4810_v42  ;;  %vm4783_vm6 = vmor %vm4781_vm5, %vm4782_vm2  ;;  %vm4786_vm8 = vcmp.eq.f32.partialorder %v4785_v12, 8.507059e+37 }
 0xb7e   :  { %v4778_v52 = vsub.f32 1.0, %v4777_v4  ;;  %vm4816_vm7 = vcmp.eq.f32.partialorder %v4815_v60, 8.507059e+37 }
 0xb7f   :  { %6409 = vrcp.f32 %v10307_v29  ;;  %v4877_v5 = vand.u32 2147483648, %v10307_v29  ;;  %vm4871_vm11 = vweird.f32 %v10307_v29 }
 0xb80   :  { %v6408_v27 = vpop.eup %6407  ;;  %v4779_v21 = vmul.f32 %v10295_v23, %v4778_v52 }
 0xb81   :  { %v10309_v54 = vadd.f32 1.0, %v6408_v27  ;;  %v4878_v37 = vor.u32 1.1754944e-38, %v4877_v5 }
 0xb82   :  { %v4780_v53 = vadd.f32 %v10295_v23, %v4779_v21 }
 0xb83   :  { %5134 = vmatmul.bf16.gmra.mxu1 %v4922_v55  ;;  %6411 = vrcp.f32 %v10309_v54  ;;  %vm4841_vm13 = vweird.f32 %v10309_v54  ;;  %v4845_v52 = vand.u32 2147483647, %v10309_v54 }
 0xb84   :  { %v4784_v59 = vsel %vm4783_vm6, %v10295_v23, %v4780_v53 }
 0xb85   :  { %v6410_v22 = vpop.eup %6409  ;;  %v4789_v47 = vsel %vm4786_vm8, %v4788_v10, %v4784_v59  ;;  %vm4846_vm0 = vcmp.eq.f32.partialorder %v4845_v52, 8.507059e+37 }
 0xb86   :  { %4203 = vmatmul.bf16.gmra.mxu2 %v9011_v63  ;;  %v4904_v63 = vmul.f32 %v4759_v48, %v10168_v8  ;;  %v4817_v8 = vand.u32 2147483648, %v10271_v19  ;;  %v4867_v55 = vmul.f32 %v6410_v22, %v10307_v29  ;;  %v4906_v62 = vmul.f32 %v4789_v47, %v10227_v46 }
 0xb87   :  { %vm4872_vm9 = vweird.f32 %v6410_v22  ;;  %v4847_v46 = vand.u32 2147483648, %v10309_v54 }
 0xb88   :  { %v4924_v50 = vpack.c.bf16 %v4904_v63, %v4902_v33  ;;  %v4818_v3 = vor.u32 1.1754944e-38, %v4817_v8  ;;  %v4868_v26 = vsub.f32 1.0, %v4867_v55  ;;  %vm4873_vm12 = vmor %vm4871_vm11, %vm4872_vm9 }
 0xb89   :  { %v6412_v15 = vpop.eup %6411 }
 0xb8a   :  { %v4837_v19 = vmul.f32 %v6412_v15, %v10309_v54  ;;  %v4819_v35 = vsel %vm4816_vm7, %v4818_v3, %v4814_v9  ;;  %v4869_v27 = vmul.f32 %v6410_v22, %v4868_v26  ;;  %vm4842_vm10 = vweird.f32 %v6412_v15 }
 0xb8b   :  { %vm4843_vm14 = vmor %vm4841_vm13, %vm4842_vm10 }
 0xb8c   :  { %v4838_v28 = vsub.f32 1.0, %v4837_v19  ;;  %v4870_v48 = vadd.f32 %v6410_v22, %v4869_v27 }
 0xb8e   :  { %v4041_v58 = vpop.f32.mrf.mxu1  ;;  %v4839_v23 = vmul.f32 %v6412_v15, %v4838_v28  ;;  %v4874_v33 = vsel %vm4873_vm12, %v6410_v22, %v4870_v48 }
 0xb90   :  { %v4840_v63 = vadd.f32 %v6412_v15, %v4839_v23 }
 0xb93   :  { %5139 = vmatmul.bf16.gmra.mxu1 %v4924_v50  ;;  %v4848_v50 = vor.u32 1.1754944e-38, %v4847_v46 }
 0xb96   :  { %4208 = vmatmul.bf16.gmra.mxu2 %v9020_v38  ;;  %v4043_v39 = vpop.f32.mrf.mxu1  ;;  %v4908_v38 = vmul.f32 %v4819_v35, %v10222_v18  ;;  %v4875_v18 = vand.u32 2147483647, %v10307_v29 }
 0xb98   :  { %v4926_v45 = vpack.c.bf16 %v4908_v38, %v4906_v62  ;;  %vm4876_vm15 = vcmp.eq.f32.partialorder %v4875_v18, 8.507059e+37 }
 0xb99   :  { %v3992_v17 = vpop.f32.mrf.mxu2  ;;  %v4879_v42 = vsel %vm4876_vm15, %v4878_v37, %v4874_v33 }
 0xb9a   :  { %v10332_v20 = vadd.f32 %v4041_v58, %v3992_v17  ;;  %v4844_v58 = vsel %vm4843_vm14, %v6412_v15, %v4840_v63  ;;  %v4912_v53 = vmul.f32 %v4879_v42, %v10269_v2  ;;  %v6509_v2 = vld [vmem:[%s10580_s6 + $0x12] ss:$8 sm:$0x3] }
 0xb9b   :  { %v4849_v29 = vsel %vm4846_vm0, %v4848_v50, %v4844_v58 }
 0xb9c   :  { %v4910_v16 = vmul.f32 %v4849_v29, %v10274_v24  ;;  %v10359_v24 = vperm.slane %v6509_v2, 0 }
 0xb9e   :  { %v4046_v31 = vpop.f32.mrf.mxu1  ;;  %v4928_v54 = vpack.c.bf16 %v4912_v53, %v4910_v16 }
 0xba1   :  { %v3994_v4 = vpop.f32.mrf.mxu2 }
 0xba2   :  { %v10336_v61 = vadd.f32 %v4043_v39, %v3994_v4 }
 0xba3   :  { %5144 = vmatmul.bf16.gmra.mxu1 %v4926_v45 }
 0xba6   :  { %4213 = vmatmul.bf16.gmra.mxu2 %v9060_v57  ;;  %v4048_v60 = vpop.f32.mrf.mxu1 }
 0xba9   :  { %v3997_v21 = vpop.f32.mrf.mxu2 }
 0xbaa   :  { %v10345_v8 = vadd.f32 %v4046_v31, %v3997_v21 }
 0xbb0   :  { %v4051_v57 = vpop.f32.mrf.mxu1 }
 0xbb1   :  { %v3999_v22 = vpop.f32.mrf.mxu2 }
 0xbb2   :  { %v10349_v12 = vadd.f32 %v4048_v60, %v3999_v22 }
 0xbb3   :  { %5149 = vmatmul.bf16.gmra.mxu1 %v4928_v54 }
 0xbb6   :  { %4218 = vmatmul.bf16.gmra.mxu2 %v9130_v14 }
 0xbb8   :  { %v4053_v55 = vpop.f32.mrf.mxu1 }
 0xbb9   :  { %v4002_v15 = vpop.f32.mrf.mxu2 }
 0xbba   :  { %v10352_v9 = vadd.f32 %v4051_v57, %v4002_v15 }
 0xbc1   :  { %v4004_v3 = vpop.f32.mrf.mxu2 }
 0xbc2   :  { %v10354_v34 = vadd.f32 %v4053_v55, %v4004_v3 }
 0xbc9   :  { %v4184_v59 = vpop.f32.mrf.mxu2 }
 0xbca   :  { %v4185_v19 = vadd.f32 %v4184_v59, %v10359_v24 }
 0xbcc   :  { %v5530_v17 = vmul.f32 -1.442695, %v4185_v19 }
 0xbce   :  { %6413 = vpow2.f32 %v5530_v17 }
 0xbd1   :  { %v4186_v14 = vpop.f32.mrf.mxu2 }
 0xbd2   :  { %v4187_v10 = vadd.f32 %v4186_v14, %v10359_v24 }
 0xbd4   :  { %v6414_v35 = vpop.eup %6413  ;;  %v5532_v39 = vmul.f32 -1.442695, %v4187_v10 }
 0xbd5   :  { %v4369_v26 = vadd.f32 1.0, %v6414_v35 }
 0xbd6   :  { %6415 = vpow2.f32 %v5532_v39 }
 0xbd7   :  { %6417 = vrcp.f32 %v4369_v26  ;;  %v4412_v58 = vand.u32 2147483648, %v4369_v26  ;;  %vm4406_vm2 = vweird.f32 %v4369_v26  ;;  %v4410_v21 = vand.u32 2147483647, %v4369_v26 }
 0xbd9   :  { %v4189_v47 = vpop.f32.mrf.mxu2  ;;  %v4413_v57 = vor.u32 1.1754944e-38, %v4412_v58  ;;  %vm4411_vm5 = vcmp.eq.f32.partialorder %v4410_v21, 8.507059e+37 }
 0xbda   :  { %v10364_v38 = vadd.f32 %v4189_v47, %v10359_v24 }
 0xbdc   :  { %v6416_v28 = vpop.eup %6415  ;;  %v5534_v62 = vmul.f32 -1.442695, %v10364_v38 }
 0xbdd   :  { %v6418_v27 = vpop.eup %6417  ;;  %v4371_v23 = vadd.f32 1.0, %v6416_v28 }
 0xbde   :  { %v4402_v45 = vmul.f32 %v6418_v27, %v4369_v26  ;;  %6419 = vpow2.f32 %v5534_v62  ;;  %vm4407_vm1 = vweird.f32 %v6418_v27 }
 0xbdf   :  { %6421 = vrcp.f32 %v4371_v23  ;;  %vm10374_vm3 = vmor %vm4406_vm2, %vm4407_vm1  ;;  %v4440_v29 = vand.u32 2147483647, %v4371_v23  ;;  %v4442_v53 = vand.u32 2147483648, %v4371_v23  ;;  %vm4436_vm6 = vweird.f32 %v4371_v23 }
 0xbe0   :  { %v4403_v4 = vsub.f32 1.0, %v4402_v45 }
 0xbe1   :  { %v4191_v48 = vpop.f32.mrf.mxu2  ;;  %v4443_v17 = vor.u32 1.1754944e-38, %v4442_v53  ;;  %vm4441_vm8 = vcmp.eq.f32.partialorder %v4440_v29, 8.507059e+37 }
 0xbe2   :  { %v4404_v5 = vmul.f32 %v6418_v27, %v4403_v4  ;;  %v10368_v31 = vadd.f32 %v4191_v48, %v10359_v24 }
 0xbe4   :  { %v6420_v63 = vpop.eup %6419  ;;  %v5536_v18 = vmul.f32 -1.442695, %v10368_v31  ;;  %v4405_v33 = vadd.f32 %v6418_v27, %v4404_v5 }
 0xbe5   :  { %v6422_v46 = vpop.eup %6421  ;;  %v10371_v52 = vadd.f32 1.0, %v6420_v63 }
 0xbe6   :  { %v4432_v37 = vmul.f32 %v6422_v46, %v4371_v23  ;;  %6423 = vpow2.f32 %v5536_v18  ;;  %v4409_v16 = vsel %vm10374_vm3, %v6418_v27, %v4405_v33  ;;  %vm4437_vm4 = vweird.f32 %v6422_v46 }
 0xbe7   :  { %6425 = vrcp.f32 %v10371_v52  ;;  %v4414_v59 = vsel %vm4411_vm5, %v4413_v57, %v4409_v16  ;;  %vm4438_vm7 = vmor %vm4436_vm6, %vm4437_vm4  ;;  %vm4466_vm10 = vweird.f32 %v10371_v52 }
 0xbe8   :  { %v4433_v50 = vsub.f32 1.0, %v4432_v37  ;;  %v4881_v47 = vmul.f32 %v4414_v59, %v4185_v19  ;;  %v4472_v19 = vand.u32 2147483648, %v10371_v52 }
 0xbe9   :  { %v4194_v60 = vpop.f32.mrf.mxu2 }
 0xbea   :  { %v4434_v54 = vmul.f32 %v6422_v46, %v4433_v50  ;;  %v10381_v22 = vadd.f32 %v4194_v60, %v10359_v24  ;;  %v4473_v16 = vor.u32 1.1754944e-38, %v4472_v19 }
 0xbec   :  { %v6424_v15 = vpop.eup %6423  ;;  %v4435_v55 = vadd.f32 %v6422_v46, %v4434_v54  ;;  %v5538_v3 = vmul.f32 -1.442695, %v10381_v22 }
 0xbed   :  { %v6426_v2 = vpop.eup %6425  ;;  %v4375_v14 = vadd.f32 1.0, %v6424_v15 }
 0xbee   :  { %v4439_v35 = vsel %vm4438_vm7, %v6422_v46, %v4435_v55  ;;  %v4462_v39 = vmul.f32 %v6426_v2, %v10371_v52  ;;  %6427 = vpow2.f32 %v5538_v3  ;;  %vm4467_vm9 = vweird.f32 %v6426_v2 }
 0xbef   :  { %v4444_v26 = vsel %vm4441_vm8, %v4443_v17, %v4439_v35  ;;  %6429 = vrcp.f32 %v4375_v14  ;;  %vm10395_vm11 = vmor %vm4466_vm10, %vm4467_vm9  ;;  %v4500_v21 = vand.u32 2147483647, %v4375_v14  ;;  %v4502_v50 = vand.u32 2147483648, %v4375_v14 }
 0xbf0   :  { %v4883_v28 = vmul.f32 %v4444_v26, %v4187_v10  ;;  %v4463_v62 = vsub.f32 1.0, %v4462_v39  ;;  %v4470_v10 = vand.u32 2147483647, %v10371_v52  ;;  %vm4496_vm14 = vweird.f32 %v4375_v14 }
 0xbf1   :  { %v4196_v27 = vpop.f32.mrf.mxu2  ;;  %v4503_v3 = vor.u32 1.1754944e-38, %v4502_v50  ;;  %vm4501_vm0 = vcmp.eq.f32.partialorder %v4500_v21, 8.507059e+37 }
 0xbf2   :  { %v4913_v45 = vpack.c.bf16 %v4883_v28, %v4881_v47  ;;  %v4464_v23 = vmul.f32 %v6426_v2, %v4463_v62  ;;  %v10386_v4 = vadd.f32 %v4196_v27, %v10359_v24  ;;  %vm4471_vm13 = vcmp.eq.f32.partialorder %v4470_v10, 8.507059e+37 }
 0xbf4   :  { %v6428_v48 = vpop.eup %6427  ;;  %v5540_v5 = vmul.f32 -1.442695, %v10386_v4  ;;  %5065 = vmatmul.bf16.vlgmr.msra.gmra.mxu0 %v4913_v45  ;;  %v4465_v46 = vadd.f32 %v6426_v2, %v4464_v23 }
 0xbf5   :  { %v6430_v63 = vpop.eup %6429  ;;  %v10389_v18 = vadd.f32 1.0, %v6428_v48 }
 0xbf6   :  { %v4492_v33 = vmul.f32 %v6430_v63, %v4375_v14  ;;  %6431 = vpow2.f32 %v5540_v5  ;;  %v4469_v29 = vsel %vm10395_vm11, %v6426_v2, %v4465_v46  ;;  %vm4497_vm12 = vweird.f32 %v6430_v63 }
 0xbf7   :  { %6433 = vrcp.f32 %v10389_v18  ;;  %v4474_v55 = vsel %vm4471_vm13, %v4473_v16, %v4469_v29  ;;  %vm4498_vm15 = vmor %vm4496_vm14, %vm4497_vm12  ;;  %vm4526_vm2 = vweird.f32 %v10389_v18 }
 0xbf8   :  { %v4493_v37 = vsub.f32 1.0, %v4492_v33  ;;  %v4885_v39 = vmul.f32 %v4474_v55, %v10364_v38  ;;  %v4532_v38 = vand.u32 2147483648, %v10389_v18 }
 0xbf9   :  { %v4199_v42 = vpop.f32.mrf.mxu2 }
 0xbfa   :  { %v4494_v53 = vmul.f32 %v6430_v63, %v4493_v37  ;;  %v10402_v60 = vadd.f32 %v4199_v42, %v10359_v24  ;;  %v4533_v29 = vor.u32 1.1754944e-38, %v4532_v38 }
 0xbfc   :  { %v6432_v54 = vpop.eup %6431  ;;  %v4495_v52 = vadd.f32 %v6430_v63, %v4494_v53  ;;  %v5542_v57 = vmul.f32 -1.442695, %v10402_v60 }
 0xbfd   :  { %v6434_v15 = vpop.eup %6433  ;;  %v4379_v59 = vadd.f32 1.0, %v6432_v54 }
 0xbfe   :  { %v4499_v17 = vsel %vm4498_vm15, %v6430_v63, %v4495_v52  ;;  %v4522_v2 = vmul.f32 %v6434_v15, %v10389_v18  ;;  %6435 = vpow2.f32 %v5542_v57  ;;  %vm4527_vm1 = vweird.f32 %v6434_v15 }
 0xbff   :  { %v4504_v35 = vsel %vm4501_vm0, %v4503_v3, %v4499_v17  ;;  %6437 = vrcp.f32 %v4379_v59  ;;  %vm10418_vm3 = vmor %vm4526_vm2, %vm4527_vm1  ;;  %v4560_v10 = vand.u32 2147483647, %v4379_v59  ;;  %v4562_v37 = vand.u32 2147483648, %v4379_v59 }
 0xc00   :  { %v4887_v26 = vmul.f32 %v4504_v35, %v10368_v31  ;;  %v4523_v47 = vsub.f32 1.0, %v4522_v2  ;;  %v4530_v31 = vand.u32 2147483647, %v10389_v18  ;;  %vm4556_vm6 = vweird.f32 %v4379_v59 }
 0xc01   :  { %v4201_v14 = vpop.f32.mrf.mxu2  ;;  %v4563_v57 = vor.u32 1.1754944e-38, %v4562_v37  ;;  %vm4561_vm8 = vcmp.eq.f32.partialorder %v4560_v10, 8.507059e+37 }
 0xc02   :  { %v4524_v28 = vmul.f32 %v6434_v15, %v4523_v47  ;;  %v10409_v62 = vadd.f32 %v4201_v14, %v10359_v24  ;;  %v4915_v27 = vpack.c.bf16 %v4887_v26, %v4885_v39  ;;  %vm4531_vm5 = vcmp.eq.f32.partialorder %v4530_v31, 8.507059e+37 }
 0xc04   :  { %v6436_v45 = vpop.eup %6435  ;;  %v5544_v23 = vmul.f32 -1.442695, %v10409_v62  ;;  %5070 = vmatmul.bf16.gmra.mxu0 %v4915_v27  ;;  %v4525_v63 = vadd.f32 %v6434_v15, %v4524_v28 }
 0xc05   :  { %v6438_v48 = vpop.eup %6437  ;;  %v10412_v5 = vadd.f32 1.0, %v6436_v45 }
 0xc06   :  { %v4552_v46 = vmul.f32 %v6438_v48, %v4379_v59  ;;  %6439 = vpow2.f32 %v5544_v23  ;;  %v4529_v21 = vsel %vm10418_vm3, %v6434_v15, %v4525_v63  ;;  %vm4557_vm4 = vweird.f32 %v6438_v48 }
 0xc07   :  { %6441 = vrcp.f32 %v10412_v5  ;;  %v4534_v52 = vsel %vm4531_vm5, %v4533_v29, %v4529_v21  ;;  %vm4558_vm7 = vmor %vm4556_vm6, %vm4557_vm4  ;;  %vm4586_vm10 = vweird.f32 %v10412_v5 }
 0xc08   :  { %v4553_v33 = vsub.f32 1.0, %v4552_v46  ;;  %v4889_v2 = vmul.f32 %v4534_v52, %v10381_v22  ;;  %v4592_v22 = vand.u32 2147483648, %v10412_v5 }
 0xc09   :  { %v4204_v58 = vpop.f32.mrf.mxu2 }
 0xc0a   :  { %v4554_v50 = vmul.f32 %v6438_v48, %v4553_v33  ;;  %v10425_v42 = vadd.f32 %v4204_v58, %v10359_v24  ;;  %v4593_v21 = vor.u32 1.1754944e-38, %v4592_v22 }
 0xc0c   :  { %v6440_v53 = vpop.eup %6439  ;;  %v4555_v18 = vadd.f32 %v6438_v48, %v4554_v50  ;;  %v5546_v16 = vmul.f32 -1.442695, %v10425_v42 }
 0xc0d   :  { %v6442_v54 = vpop.eup %6441  ;;  %v4383_v55 = vadd.f32 1.0, %v6440_v53 }
 0xc0e   :  { %v4559_v3 = vsel %vm4558_vm7, %v6438_v48, %v4555_v18  ;;  %v4582_v15 = vmul.f32 %v6442_v54, %v10412_v5  ;;  %6443 = vpow2.f32 %v5546_v16  ;;  %vm4587_vm9 = vweird.f32 %v6442_v54 }
 0xc0f   :  { %v4564_v17 = vsel %vm4561_vm8, %v4563_v57, %v4559_v3  ;;  %6445 = vrcp.f32 %v4383_v55  ;;  %vm10441_vm11 = vmor %vm4586_vm10, %vm4587_vm9  ;;  %v4620_v31 = vand.u32 2147483647, %v4383_v55  ;;  %v4622_v33 = vand.u32 2147483648, %v4383_v55 }
 0xc10   :  { %v4891_v35 = vmul.f32 %v4564_v17, %v10386_v4  ;;  %v4583_v39 = vsub.f32 1.0, %v4582_v15  ;;  %v4590_v4 = vand.u32 2147483647, %v10412_v5  ;;  %vm4616_vm14 = vweird.f32 %v4383_v55 }
 0xc11   :  { %v4206_v59 = vpop.f32.mrf.mxu2  ;;  %v4623_v16 = vor.u32 1.1754944e-38, %v4622_v33  ;;  %vm4621_vm0 = vcmp.eq.f32.partialorder %v4620_v31, 8.507059e+37 }
 0xc12   :  { %v4584_v26 = vmul.f32 %v6442_v54, %v4583_v39  ;;  %v10432_v47 = vadd.f32 %v4206_v59, %v10359_v24  ;;  %v4917_v14 = vpack.c.bf16 %v4891_v35, %v4889_v2  ;;  %vm4591_vm13 = vcmp.eq.f32.partialorder %v4590_v4, 8.507059e+37 }
 0xc14   :  { %v6444_v28 = vpop.eup %6443  ;;  %v5548_v27 = vmul.f32 -1.442695, %v10432_v47  ;;  %5075 = vmatmul.bf16.gmra.mxu0 %v4917_v14  ;;  %v4585_v48 = vadd.f32 %v6442_v54, %v4584_v26 }
 0xc15   :  { %v6446_v45 = vpop.eup %6445  ;;  %v10435_v23 = vadd.f32 1.0, %v6444_v28 }
 0xc16   :  { %v4612_v63 = vmul.f32 %v6446_v45, %v4383_v55  ;;  %6447 = vpow2.f32 %v5548_v27  ;;  %v4589_v10 = vsel %vm10441_vm11, %v6442_v54, %v4585_v48  ;;  %vm4617_vm12 = vweird.f32 %v6446_v45 }
 0xc17   :  { %6449 = vrcp.f32 %v10435_v23  ;;  %v4594_v18 = vsel %vm4591_vm13, %v4593_v21, %v4589_v10  ;;  %vm4618_vm15 = vmor %vm4616_vm14, %vm4617_vm12  ;;  %vm4646_vm2 = vweird.f32 %v10435_v23 }
 0xc18   :  { %v4613_v46 = vsub.f32 1.0, %v4612_v63  ;;  %v4893_v15 = vmul.f32 %v4594_v18, %v10402_v60  ;;  %v4652_v60 = vand.u32 2147483648, %v10435_v23 }
 0xc19   :  { %v4209_v19 = vpop.f32.mrf.mxu2 }
 0xc1a   :  { %v4614_v37 = vmul.f32 %v6446_v45, %v4613_v46  ;;  %v10448_v58 = vadd.f32 %v4209_v19, %v10359_v24  ;;  %v4653_v10 = vor.u32 1.1754944e-38, %v4652_v60 }
 0xc1c   :  { %v6448_v50 = vpop.eup %6447  ;;  %v4615_v5 = vadd.f32 %v6446_v45, %v4614_v37  ;;  %v5550_v29 = vmul.f32 -1.442695, %v10448_v58 }
 0xc1d   :  { %v6450_v53 = vpop.eup %6449  ;;  %v4387_v52 = vadd.f32 1.0, %v6448_v50 }
 0xc1e   :  { %v4619_v57 = vsel %vm4618_vm15, %v6446_v45, %v4615_v5  ;;  %v4642_v54 = vmul.f32 %v6450_v53, %v10435_v23  ;;  %6451 = vpow2.f32 %v5550_v29  ;;  %vm4647_vm1 = vweird.f32 %v6450_v53 }
 0xc1f   :  { %v4624_v3 = vsel %vm4621_vm0, %v4623_v16, %v4619_v57  ;;  %6453 = vrcp.f32 %v4387_v52  ;;  %vm10464_vm3 = vmor %vm4646_vm2, %vm4647_vm1  ;;  %v4680_v4 = vand.u32 2147483647, %v4387_v52  ;;  %v4682_v46 = vand.u32 2147483648, %v4387_v52 }
 0xc20   :  { %v4895_v17 = vmul.f32 %v4624_v3, %v10409_v62  ;;  %v4643_v2 = vsub.f32 1.0, %v4642_v54  ;;  %v4650_v62 = vand.u32 2147483647, %v10435_v23  ;;  %vm4676_vm6 = vweird.f32 %v4387_v52 }
 0xc21   :  { %v4211_v55 = vpop.f32.mrf.mxu2  ;;  %v4683_v29 = vor.u32 1.1754944e-38, %v4682_v46  ;;  %vm4681_vm8 = vcmp.eq.f32.partialorder %v4680_v4, 8.507059e+37 }
 0xc22   :  { %v4644_v35 = vmul.f32 %v6450_v53, %v4643_v2  ;;  %v10455_v39 = vadd.f32 %v4211_v55, %v10359_v24  ;;  %v4919_v59 = vpack.c.bf16 %v4895_v17, %v4893_v15  ;;  %vm4651_vm5 = vcmp.eq.f32.partialorder %v4650_v62, 8.507059e+37 }
 0xc24   :  { %v6452_v26 = vpop.eup %6451  ;;  %v5552_v14 = vmul.f32 -1.442695, %v10455_v39  ;;  %5080 = vmatmul.bf16.gmra.mxu0 %v4919_v59  ;;  %v4645_v45 = vadd.f32 %v6450_v53, %v4644_v35 }
 0xc25   :  { %v6454_v28 = vpop.eup %6453  ;;  %v10458_v27 = vadd.f32 1.0, %v6452_v26 }
 0xc26   :  { %v4672_v48 = vmul.f32 %v6454_v28, %v4387_v52  ;;  %6455 = vpow2.f32 %v5552_v14  ;;  %v4649_v31 = vsel %vm10464_vm3, %v6450_v53, %v4645_v45  ;;  %vm4677_vm4 = vweird.f32 %v6454_v28 }
 0xc27   :  { %6457 = vrcp.f32 %v10458_v27  ;;  %v4654_v5 = vsel %vm4651_vm5, %v4653_v10, %v4649_v31  ;;  %vm4678_vm7 = vmor %vm4676_vm6, %vm4677_vm4  ;;  %vm4706_vm10 = vweird.f32 %v10458_v27 }
 0xc28   :  { %v4673_v63 = vsub.f32 1.0, %v4672_v48  ;;  %v4897_v54 = vmul.f32 %v4654_v5, %v10425_v42  ;;  %v4712_v42 = vand.u32 2147483648, %v10458_v27 }
 0xc29   :  { %v4214_v38 = vpop.f32.mrf.mxu2 }
 0xc2a   :  { %v4674_v33 = vmul.f32 %v6454_v28, %v4673_v63  ;;  %v10471_v19 = vadd.f32 %v4214_v38, %v10359_v24  ;;  %v4713_v31 = vor.u32 1.1754944e-38, %v4712_v42 }
 0xc2c   :  { %v6456_v37 = vpop.eup %6455  ;;  %v4675_v23 = vadd.f32 %v6454_v28, %v4674_v33  ;;  %v5554_v21 = vmul.f32 -1.442695, %v10471_v19 }
 0xc2d   :  { %v6458_v50 = vpop.eup %6457  ;;  %v4391_v18 = vadd.f32 1.0, %v6456_v37 }
 0xc2e   :  { %v4679_v16 = vsel %vm4678_vm7, %v6454_v28, %v4675_v23  ;;  %v4702_v53 = vmul.f32 %v6458_v50, %v10458_v27  ;;  %6459 = vpow2.f32 %v5554_v21  ;;  %vm4707_vm9 = vweird.f32 %v6458_v50 }
 0xc2f   :  { %v4684_v57 = vsel %vm4681_vm8, %v4683_v29, %v4679_v16  ;;  %6461 = vrcp.f32 %v4391_v18  ;;  %vm10487_vm11 = vmor %vm4706_vm10, %vm4707_vm9  ;;  %v4740_v62 = vand.u32 2147483647, %v4391_v18  ;;  %v4742_v63 = vand.u32 2147483648, %v4391_v18 }
 0xc30   :  { %v4899_v3 = vmul.f32 %v4684_v57, %v10432_v47  ;;  %v4703_v15 = vsub.f32 1.0, %v4702_v53  ;;  %v4710_v47 = vand.u32 2147483647, %v10458_v27  ;;  %vm4736_vm14 = vweird.f32 %v4391_v18 }
 0xc31   :  { %v4216_v52 = vpop.f32.mrf.mxu2  ;;  %v4743_v21 = vor.u32 1.1754944e-38, %v4742_v63  ;;  %vm4741_vm0 = vcmp.eq.f32.partialorder %v4740_v62, 8.507059e+37 }
 0xc32   :  { %v4704_v17 = vmul.f32 %v6458_v50, %v4703_v15  ;;  %v10478_v2 = vadd.f32 %v4216_v52, %v10359_v24  ;;  %v4921_v55 = vpack.c.bf16 %v4899_v3, %v4897_v54  ;;  %vm4711_vm13 = vcmp.eq.f32.partialorder %v4710_v47, 8.507059e+37 }
 0xc34   :  { %v6460_v35 = vpop.eup %6459  ;;  %v5556_v59 = vmul.f32 -1.442695, %v10478_v2  ;;  %5085 = vmatmul.bf16.gmra.mxu0 %v4921_v55  ;;  %v4705_v28 = vadd.f32 %v6458_v50, %v4704_v17 }
 0xc35   :  { %v6462_v26 = vpop.eup %6461  ;;  %v10481_v14 = vadd.f32 1.0, %v6460_v35 }
 0xc36   :  { %v4732_v45 = vmul.f32 %v6462_v26, %v4391_v18  ;;  %6463 = vpow2.f32 %v5556_v59  ;;  %v4709_v4 = vsel %vm10487_vm11, %v6458_v50, %v4705_v28  ;;  %vm4737_vm12 = vweird.f32 %v6462_v26 }
 0xc37   :  { %6465 = vrcp.f32 %v10481_v14  ;;  %v4714_v23 = vsel %vm4711_vm13, %v4713_v31, %v4709_v4  ;;  %vm4738_vm15 = vmor %vm4736_vm14, %vm4737_vm12  ;;  %vm4766_vm2 = vweird.f32 %v10481_v14 }
 0xc38   :  { %v4733_v48 = vsub.f32 1.0, %v4732_v45  ;;  %v4901_v53 = vmul.f32 %v4714_v23, %v10448_v58  ;;  %v4772_v58 = vand.u32 2147483648, %v10481_v14 }
 0xc39   :  { %v4219_v22 = vpop.f32.mrf.mxu2 }
 0xc3a   :  { %v4734_v46 = vmul.f32 %v6462_v26, %v4733_v48  ;;  %v10494_v38 = vadd.f32 %v4219_v22, %v10359_v24  ;;  %v4773_v60 = vor.u32 1.1754944e-38, %v4772_v58 }
 0xc3c   :  { %v6464_v33 = vpop.eup %6463  ;;  %v4735_v27 = vadd.f32 %v6462_v26, %v4734_v46  ;;  %v5558_v10 = vmul.f32 -1.442695, %v10494_v38 }
 0xc3d   :  { %v6466_v37 = vpop.eup %6465  ;;  %v4395_v5 = vadd.f32 1.0, %v6464_v33 }
 0xc3e   :  { %v4739_v29 = vsel %vm4738_vm15, %v6462_v26, %v4735_v27  ;;  %v4762_v50 = vmul.f32 %v6466_v37, %v10481_v14  ;;  %6467 = vpow2.f32 %v5558_v10  ;;  %vm4767_vm1 = vweird.f32 %v6466_v37 }
 0xc3f   :  { %v4744_v16 = vsel %vm4741_vm0, %v4743_v21, %v4739_v29  ;;  %6469 = vrcp.f32 %v4395_v5  ;;  %vm4768_vm3 = vmor %vm4766_vm2, %vm4767_vm1  ;;  %v4802_v45 = vand.u32 2147483648, %v4395_v5  ;;  %v4800_v48 = vand.u32 2147483647, %v4395_v5 }
 0xc40   :  { %v4903_v57 = vmul.f32 %v4744_v16, %v10455_v39  ;;  %v4763_v54 = vsub.f32 1.0, %v4762_v50  ;;  %v4770_v39 = vand.u32 2147483647, %v10481_v14  ;;  %vm4796_vm6 = vweird.f32 %v4395_v5  ;;  %v5115_v50 = vpop.f32.mrf.mxu1 }
 0xc41   :  { %v4221_v18 = vpop.f32.mrf.mxu2  ;;  %v4803_v46 = vor.u32 1.1754944e-38, %v4802_v45  ;;  %vm4801_vm8 = vcmp.eq.f32.partialorder %v4800_v48, 8.507059e+37 }
 0xc42   :  { %v4764_v3 = vmul.f32 %v6466_v37, %v4763_v54  ;;  %v10501_v15 = vadd.f32 %v4221_v18, %v10359_v24  ;;  %v4923_v52 = vpack.c.bf16 %v4903_v57, %v4901_v53  ;;  %vm4771_vm5 = vcmp.eq.f32.partialorder %v4770_v39, 8.507059e+37 }
 0xc44   :  { %v6468_v17 = vpop.eup %6467  ;;  %v5560_v55 = vmul.f32 -1.442695, %v10501_v15  ;;  %5090 = vmatmul.bf16.gmra.mxu0 %v4923_v52  ;;  %v4765_v26 = vadd.f32 %v6466_v37, %v4764_v3 }
 0xc45   :  { %v6470_v35 = vpop.eup %6469  ;;  %v4397_v59 = vadd.f32 1.0, %v6468_v17 }
 0xc46   :  { %v4792_v28 = vmul.f32 %v6470_v35, %v4395_v5  ;;  %6471 = vpow2.f32 %v5560_v55  ;;  %v4769_v42 = vsel %vm4768_vm3, %v6466_v37, %v4765_v26  ;;  %vm4797_vm4 = vweird.f32 %v6470_v35 }
 0xc47   :  { %6473 = vrcp.f32 %v4397_v59  ;;  %v4774_v4 = vsel %vm4771_vm5, %v4773_v60, %v4769_v42  ;;  %vm4798_vm7 = vmor %vm4796_vm6, %vm4797_vm4  ;;  %v4832_v57 = vand.u32 2147483648, %v4397_v59  ;;  %vm4826_vm10 = vweird.f32 %v4397_v59 }
 0xc48   :  { %v4793_v24 = vsub.f32 1.0, %v4792_v28  ;;  %v4905_v10 = vmul.f32 %v4774_v4, %v10471_v19  ;;  %v4830_v54 = vand.u32 2147483647, %v4397_v59 }
 0xc4a   :  { %v4794_v47 = vmul.f32 %v6470_v35, %v4793_v24  ;;  %vm4831_vm13 = vcmp.eq.f32.partialorder %v4830_v54, 8.507059e+37 }
 0xc4c   :  { %v6472_v62 = vpop.eup %6471  ;;  %v4795_v63 = vadd.f32 %v6470_v35, %v4794_v47  ;;  %v10514_v47 = vld [vmem:[%s10580_s6 + $0x3] ss:$0 sm:$0xff]  ;;  %s6647_s6 = smov [#allocation10]  }
 0xc4d   :  { %v6474_v22 = vpop.eup %6473  ;;  %v4399_v31 = vadd.f32 1.0, %v6472_v62  ;;  %v4056_v62 = vadd.f32 %v9875_v44, %v10514_v47  ;;  %v4058_v44 = vadd.f32 %v10025_v11, %v10514_v47  ;;  %v4060_v11 = vadd.f32 %v10083_v0, %v10514_v47  ;;  %s5207_s29 = sshll.u32 %s6647_s6, 4  ;;  %s5208_s29 = int_to_ptr.vmem [resolvable:$true] %s5207_s29 }
 0xc4e   :  { %v4799_v33 = vsel %vm4798_vm7, %v6470_v35, %v4795_v63  ;;  %v4822_v14 = vmul.f32 %v6474_v22, %v4397_v59  ;;  %vm4827_vm9 = vweird.f32 %v6474_v22  ;;  %v5117_v35 = vpop.f32.mrf.mxu1  ;;  %v4062_v0 = vadd.f32 %v10137_v13, %v10514_v47 }
 0xc4f   :  { %v4804_v27 = vsel %vm4801_vm8, %v4803_v46, %v4799_v33  ;;  %6475 = vrcp.f32 %v4399_v31  ;;  %vm4828_vm11 = vmor %vm4826_vm10, %vm4827_vm9  ;;  %v4862_v3 = vand.u32 2147483648, %v4399_v31  ;;  %v4860_v19 = vand.u32 2147483647, %v4399_v31 }
 0xc50   :  { %v4907_v37 = vmul.f32 %v4804_v27, %v10478_v2  ;;  %v4823_v23 = vsub.f32 1.0, %v4822_v14  ;;  %v4833_v2 = vor.u32 1.1754944e-38, %v4832_v57  ;;  %vm4856_vm14 = vweird.f32 %v4399_v31 }
 0xc51   :  { %v4863_v28 = vor.u32 1.1754944e-38, %v4862_v3  ;;  %vm4861_vm0 = vcmp.eq.f32.partialorder %v4860_v19, 8.507059e+37  ;;  %v4064_v13 = vadd.f32 %v10199_v1, %v10514_v47  ;;  %v4066_v1 = vadd.f32 %v10332_v20, %v10514_v47 }
 0xc52   :  { %v4824_v21 = vmul.f32 %v6474_v22, %v4823_v23  ;;  %v4925_v29 = vpack.c.bf16 %v4907_v37, %v4905_v10 }
 0xc54   :  { %5095 = vmatmul.bf16.gmra.mxu0 %v4925_v29  ;;  %v4825_v16 = vadd.f32 %v6474_v22, %v4824_v21 }
 0xc55   :  { %v6476_v5 = vpop.eup %6475 }
 0xc56   :  { %v4852_v53 = vmul.f32 %v6476_v5, %v4399_v31  ;;  %v4829_v52 = vsel %vm4828_vm11, %v6474_v22, %v4825_v16  ;;  %vm4857_vm12 = vweird.f32 %v6476_v5  ;;  %v5120_v42 = vpop.f32.mrf.mxu1 }
 0xc57   :  { %v4834_v26 = vsel %vm4831_vm13, %v4833_v2, %v4829_v52  ;;  %vm4858_vm15 = vmor %vm4856_vm14, %vm4857_vm12 }
 0xc58   :  { %v4853_v18 = vsub.f32 1.0, %v4852_v53  ;;  %v4909_v59 = vmul.f32 %v4834_v26, %v10494_v38  ;;  %v4019_v38 = vadd.f32 %v9965_v36, %v9987_v32 }
 0xc5a   :  { %v4854_v17 = vmul.f32 %v6476_v5, %v4853_v18  ;;  %v4057_v46 = vadd.f32 %v4019_v38, %v10514_v47 }
 0xc5c   :  { %v4855_v55 = vadd.f32 %v6476_v5, %v4854_v17 }
 0xc5e   :  { %v4859_v58 = vsel %vm4858_vm15, %v6476_v5, %v4855_v55  ;;  %v5122_v48 = vpop.f32.mrf.mxu1  ;;  %v11043_v55 = vld [vmem:[#allocation33_spill] sm:$0xff] }
 0xc5f   :  { %v4864_v39 = vsel %vm4861_vm0, %v4863_v28, %v4859_v58 }
 0xc60   :  { %v4911_v24 = vmul.f32 %v4864_v39, %v10501_v15 }
 0xc62   :  { %v4927_v45 = vpack.c.bf16 %v4911_v24, %v4909_v59 }
 0xc64   :  { %5100 = vmatmul.bf16.gmra.mxu0 %v4927_v45 }
 0xc66   :  { %v5125_v33 = vpop.f32.mrf.mxu1 }
 0xc6e   :  { %v5127_v21 = vpop.f32.mrf.mxu1 }
 0xc71   :  { %v5066_v60 = vpop.f32.mrf.mxu0 }
 0xc72   :  { %v5116_v63 = vadd.f32 %v5115_v50, %v5066_v60 }
 0xc74   :  { %v5155_v22 = vadd.f32 %v5116_v63, %v4056_v62  ;;  %v11045_v62 = vld [vmem:[#allocation38_spill] sm:$0xff] }
 0xc76   :  { %v5171_v15 = vadd.f32 %v5155_v22, %v8658_v40  ;;  %v4024_v40 = vadd.f32 %v10045_v25, %v10062_v41  ;;  %v5130_v53 = vpop.f32.mrf.mxu1  ;;  %v4029_v25 = vadd.f32 %v10102_v6, %v10118_v51  ;;  %v4034_v6 = vadd.f32 %v10170_v30, %v10180_v7  ;;  %v11044_v51 = vld [vmem:[#allocation39_spill] sm:$0xff] }
 0xc78   :  { %5187 = vst [vmem:[#allocation10] sm:$0xff] %v5171_v15  ;;  %v4059_v29 = vadd.f32 %v4024_v40, %v10514_v47  ;;  %v4061_v17 = vadd.f32 %v4029_v25, %v10514_v47  ;;  %v4063_v45 = vadd.f32 %v4034_v6, %v10514_v47  ;;  %v11048_v40 = vld [vmem:[#allocation51_spill] sm:$0xff] }
 0xc79   :  { %v5068_v4 = vpop.f32.mrf.mxu0 }
 0xc7a   :  { %v5118_v31 = vadd.f32 %v5117_v35, %v5068_v4  ;;  %v11046_v4 = vld [vmem:[#allocation44_spill] sm:$0xff] }
 0xc7c   :  { %v5156_v14 = vadd.f32 %v5118_v31, %v4057_v46  ;;  %v4065_v31 = vadd.f32 %v10233_v49, %v10514_v47 }
 0xc7e   :  { %v5172_v27 = vadd.f32 %v5156_v14, %v8672_v43  ;;  %v11041_v43 = vld [vmem:[#allocation28_spill] sm:$0xff]  ;;  %v5132_v3 = vpop.f32.mrf.mxu1 }
 0xc80   :  { %5188 = vst [vmem:[#allocation10 + $0x8] sm:$0xff] %v5172_v27  ;;  %v11047_v27 = vld [vmem:[#allocation43_spill] sm:$0xff] }
 0xc81   :  { %v5071_v10 = vpop.f32.mrf.mxu0 }
 0xc82   :  { %v5121_v37 = vadd.f32 %v5120_v42, %v5071_v10 }
 0xc84   :  { %v5157_v23 = vadd.f32 %v5121_v37, %v4058_v44 }
 0xc86   :  { %v5173_v36 = vadd.f32 %v5157_v23, %v8685_v56  ;;  %v11042_v56 = vld [vmem:[#allocation34_spill] sm:$0xff]  ;;  %v5135_v58 = vpop.f32.mrf.mxu1 }
 0xc88   :  { %5189 = vst [vmem:[#allocation10 + $0x10] sm:$0xff] %v5173_v36 }
 0xc89   :  { %v5073_v32 = vpop.f32.mrf.mxu0 }
 0xc8a   :  { %v5123_v50 = vadd.f32 %v5122_v48, %v5073_v32 }
 0xc8c   :  { %v5158_v5 = vadd.f32 %v5123_v50, %v4059_v29  ;;  %v4067_v29 = vadd.f32 %v10336_v61, %v10514_v47  ;;  %v4069_v61 = vadd.f32 %v10349_v12, %v10514_v47  ;;  %v4071_v12 = vadd.f32 %v10354_v34, %v10514_v47 }
 0xc8e   :  { %v5174_v16 = vadd.f32 %v5158_v5, %v11041_v43  ;;  %v5137_v60 = vpop.f32.mrf.mxu1  ;;  %v11049_v43 = vld [vmem:[#allocation50_spill] sm:$0xff] }
 0xc90   :  { %5190 = vst [vmem:[#allocation10 + $0x18] sm:$0xff] %v5174_v16 }
 0xc91   :  { %v5076_v57 = vpop.f32.mrf.mxu0 }
 0xc92   :  { %v5126_v54 = vadd.f32 %v5125_v33, %v5076_v57  ;;  %v4068_v57 = vadd.f32 %v10345_v8, %v10514_v47  ;;  %v4070_v8 = vadd.f32 %v10352_v9, %v10514_v47 }
 0xc94   :  { %v5159_v18 = vadd.f32 %v5126_v54, %v4060_v11 }
 0xc96   :  { %v5175_v41 = vadd.f32 %v5159_v18, %v11042_v56  ;;  %v5140_v7 = vpop.f32.mrf.mxu1  ;;  %v11050_v18 = vld [vmem:[#allocation58_spill] sm:$0xff] }
 0xc98   :  { %5191 = vst [vmem:[#allocation10 + $0x20] sm:$0xff] %v5175_v41 }
 0xc99   :  { %v5078_v52 = vpop.f32.mrf.mxu0 }
 0xc9a   :  { %v5128_v19 = vadd.f32 %v5127_v21, %v5078_v52  ;;  %v11051_v52 = vld [vmem:[#allocation57_spill] sm:$0xff] }
 0xc9c   :  { %v5160_v2 = vadd.f32 %v5128_v19, %v4061_v17 }
 0xc9e   :  { %v5176_v35 = vadd.f32 %v5160_v2, %v11043_v55  ;;  %v5142_v44 = vpop.f32.mrf.mxu1 }
 0xca0   :  { %5192 = vst [vmem:[#allocation10 + $0x28] sm:$0xff] %v5176_v35 }
 0xca1   :  { %v5081_v26 = vpop.f32.mrf.mxu0 }
 0xca2   :  { %v5131_v28 = vadd.f32 %v5130_v53, %v5081_v26  ;;  %v11052_v26 = vld [vmem:[#allocation15_spill] sm:$0xff] }
 0xca4   :  { %v5161_v39 = vadd.f32 %v5131_v28, %v4062_v0 }
 0xca6   :  { %v5177_v59 = vadd.f32 %v5161_v39, %v11044_v51  ;;  %v5145_v50 = vpop.f32.mrf.mxu1  ;;  %v11053_v51 = vld [vmem:[#allocation20_spill] sm:$0xff] }
 0xca8   :  { %5193 = vst [vmem:[#allocation10 + $0x30] sm:$0xff] %v5177_v59 }
 0xca9   :  { %v5083_v24 = vpop.f32.mrf.mxu0 }
 0xcaa   :  { %v5133_v42 = vadd.f32 %v5132_v3, %v5083_v24 }
 0xcac   :  { %v5162_v48 = vadd.f32 %v5133_v42, %v4063_v45 }
 0xcae   :  { %v5178_v63 = vadd.f32 %v5162_v48, %v11045_v62  ;;  %v5147_v54 = vpop.f32.mrf.mxu1 }
 0xcb0   :  { %5194 = vst [vmem:[#allocation10 + $0x38] sm:$0xff] %v5178_v63 }
 0xcb1   :  { %v5086_v22 = vpop.f32.mrf.mxu0 }
 0xcb2   :  { %v5136_v38 = vadd.f32 %v5135_v58, %v5086_v22 }
 0xcb4   :  { %v5163_v15 = vadd.f32 %v5136_v38, %v4064_v13 }
 0xcb6   :  { %v5179_v30 = vadd.f32 %v5163_v15, %v11046_v4  ;;  %v5150_v19 = vpop.f32.mrf.mxu1 }
 0xcb8   :  { %5195 = vst [vmem:[#allocation10 + $0x40] sm:$0xff] %v5179_v30 }
 0xcb9   :  { %v5088_v46 = vpop.f32.mrf.mxu0 }
 0xcba   :  { %v5138_v33 = vadd.f32 %v5137_v60, %v5088_v46 }
 0xcbc   :  { %v5164_v14 = vadd.f32 %v5138_v33, %v4065_v31 }
 0xcbe   :  { %v5180_v10 = vadd.f32 %v5164_v14, %v11047_v27  ;;  %v5152_v28 = vpop.f32.mrf.mxu1 }
 0xcc0   :  { %5196 = vst [vmem:[#allocation10 + $0x48] sm:$0xff] %v5180_v10 }
 0xcc1   :  { %v5091_v37 = vpop.f32.mrf.mxu0 }
 0xcc2   :  { %v5141_v23 = vadd.f32 %v5140_v7, %v5091_v37 }
 0xcc4   :  { %v5165_v21 = vadd.f32 %v5141_v23, %v4066_v1 }
 0xcc6   :  { %v5181_v36 = vadd.f32 %v5165_v21, %v11048_v40 }
 0xcc8   :  { %5197 = vst [vmem:[#allocation10 + $0x50] sm:$0xff] %v5181_v36 }
 0xcc9   :  { %v5093_v32 = vpop.f32.mrf.mxu0 }
 0xcca   :  { %v5143_v49 = vadd.f32 %v5142_v44, %v5093_v32 }
 0xccc   :  { %v5166_v5 = vadd.f32 %v5143_v49, %v4067_v29 }
 0xcce   :  { %v5182_v16 = vadd.f32 %v5166_v5, %v11049_v43 }
 0xcd0   :  { %5198 = vst [vmem:[#allocation10 + $0x58] sm:$0xff] %v5182_v16 }
 0xcd1   :  { %v5096_v53 = vpop.f32.mrf.mxu0 }
 0xcd2   :  { %v5146_v20 = vadd.f32 %v5145_v50, %v5096_v53 }
 0xcd4   :  { %v5167_v11 = vadd.f32 %v5146_v20, %v4068_v57 }
 0xcd6   :  { %v5183_v25 = vadd.f32 %v5167_v11, %v11050_v18 }
 0xcd8   :  { %5199 = vst [vmem:[#allocation10 + $0x60] sm:$0xff] %v5183_v25 }
 0xcd9   :  { %v5098_v56 = vpop.f32.mrf.mxu0 }
 0xcda   :  { %v5148_v41 = vadd.f32 %v5147_v54, %v5098_v56 }
 0xcdc   :  { %v5168_v3 = vadd.f32 %v5148_v41, %v4069_v61 }
 0xcde   :  { %v5184_v17 = vadd.f32 %v5168_v3, %v11051_v52 }
 0xce0   :  { %5200 = vst [vmem:[#allocation10 + $0x68] sm:$0xff] %v5184_v17 }
 0xce1   :  { %v5101_v2 = vpop.f32.mrf.mxu0 }
 0xce2   :  { %v5151_v55 = vadd.f32 %v5150_v19, %v5101_v2 }
 0xce4   :  { %v5169_v35 = vadd.f32 %v5151_v55, %v4070_v8 }
 0xce6   :  { %v5185_v0 = vadd.f32 %v5169_v35, %v11052_v26 }
 0xce8   :  { %5201 = vst [vmem:[#allocation10 + $0x70] sm:$0xff] %v5185_v0 }
 0xce9   :  { %v5103_v58 = vpop.f32.mrf.mxu0 }
 0xcea   :  { %v5153_v39 = vadd.f32 %v5152_v28, %v5103_v58 }
 0xcec   :  { %v5170_v6 = vadd.f32 %v5153_v39, %v4071_v12 }
 0xcee   :  { %v5186_v9 = vadd.f32 %v5170_v6, %v11053_v51 }
 0xcf0   :  { %5202 = vst [vmem:[#allocation10 + $0x78] sm:$0xff] %v5186_v9 }
 0xcf1   :  { %5215 = dma.vmem_to_hbm [thread:$0]  %s5208_s29, 2048, %s5210_s10, [#allocation4], %s6639_s17, %s6639_s17, %s6640_s18  }
 0xcf2   :  { %6636 = dma.done.wait [#allocation4], 2048  }
 0xcf3   :  { %6637 = vsyncadd [#allocation4], 4294965248 }
 0xcf4   :  { %5220 = vsyncpa [#allocation3], 1 }
 0xcf5   :  { %5221 = vsyncpa [#allocation6], 1 }
 0xcf6   :  { %5222 = vsyncpa [#allocation9], 1 }
 0xcf7   :  { %5223 = vsyncpa [#allocation4], 1 }

</bundles_post_ra>
